<compile_context>
chip_gen: v7x
topology: tpu7x:2x2x1
jax: 0.10.0
libtpu: 0.0.40
codegen_flags: <defaults>
</compile_context>

<pallas_src>
import functools

import jax
import jax.numpy as jnp
import numpy as np
from jax import lax
from jax.experimental import pallas as pl
from jax.experimental.pallas import tpu as pltpu

# ----------------------------- architecture -------------------------------
STEM_CH = 16
STAGE_CH = [16, 24, 32, 48, 64, 96]     # scaled-down EffNetV2-S stage widths
STAGE_STRIDE = [1, 2, 2, 2, 1, 2]       # EffNetV2-S per-stage strides
HEAD_CH = 128                           # conv_head out channels (scaled down)
SUP_INDS = [2, 3, 4]
ENC_EPS = 1e-5                          # encoder BatchNorm eps
NORM_EPS = 1e-3                         # sv-head BatchNorm eps (as in module)

CP = 128                                # output channel dims padded to 128 lanes
VMEM_LIMIT = 32 * 1024 * 1024


def _round_up(x, m):
    return ((x + m - 1) // m) * m


# ------------------------------ Pallas kernels ----------------------------
def conv_block_kernel(x_ref, w3_ref, s3_ref, *rest,
                      stride, wo, m, kpad, has_pw, pw_act):
    """conv3x3 (BN folded, taps packed into K) + SiLU, optional 1x1 conv_pwl+BN.

    x_ref:  (B, R, stride*kpad) bf16  tap-packed (+H-phase-split) input
    w3_ref: (3, kpad, CP)       bf16  3x3 weights, taps packed along K
    s3_ref: (1, CP)             f32   folded BN shift
    wpw_ref:(CP, CP) bf16, spw_ref:(1, CP) f32   [only if has_pw]
    o_ref:  (B, m, CP)          bf16
    """
    if has_pw:
        wpw_ref, spw_ref, o_ref = rest
    else:
        (o_ref,) = rest
    B = o_ref.shape[0]

    acc = None
    for i in range(3):                              # 3 kernel rows
        roff = (i // stride) * wo                   # static row offset
        coff = (i % stride) * kpad                  # static lane offset (phase)
        if B == 1:
            patch = x_ref[0, roff:roff + m, coff:coff + kpad]
        else:                                       # batch folded into M
            patch = jnp.concatenate(
                [x_ref[b, roff:roff + m, coff:coff + kpad] for b in range(B)],
                axis=0)
        d = jnp.dot(patch, w3_ref[i], preferred_element_type=jnp.float32)
        acc = d if acc is None else acc + d

    h = acc + s3_ref[...]                           # folded BatchNorm shift
    h = h * jax.nn.sigmoid(h)                       # SiLU
    if has_pw:                                      # conv_pwl + BN (no act)
        h = jnp.dot(h.astype(jnp.bfloat16), wpw_ref[...],
                    preferred_element_type=jnp.float32) + spw_ref[...]
        if pw_act:
            h = h * jax.nn.sigmoid(h)
    hb = h.astype(o_ref.dtype)
    if B == 1:
        o_ref[0] = hb
    else:
        for b in range(B):
            o_ref[b] = hb[b * m:(b + 1) * m, :]


def final_block_heads_kernel(x_ref, w3_ref, s3_ref, wph_ref, sph_ref,
                             f2_ref, f3_ref, f4_ref,
                             svsc_ref, svsh_ref, hw_ref, hb_ref, o_ref,
                             *, stride, wo, m, kpad):
    """Last block + conv_head + all four heads, fused, one grid step per batch.

    Block 5: conv3x3+BN+SiLU, then folded (conv_pwl o conv_head)+BN+SiLU.
    Heads: main = avgpool + Linear on the conv_head output;
           sv1/2/3 = BN + SiLU + avgpool + Linear on the tapped features.
    """
    acc = None
    for i in range(3):
        roff = (i // stride) * wo
        coff = (i % stride) * kpad
        patch = x_ref[0, roff:roff + m, coff:coff + kpad]
        d = jnp.dot(patch, w3_ref[i], preferred_element_type=jnp.float32)
        acc = d if acc is None else acc + d
    h = acc + s3_ref[...]
    h = h * jax.nn.sigmoid(h)                                        # SiLU
    h = jnp.dot(h.astype(jnp.bfloat16), wph_ref[...],               # pwl∘head
                preferred_element_type=jnp.float32) + sph_ref[...]
    h = h * jax.nn.sigmoid(h)                                        # bn2+SiLU

    pooled = [jnp.mean(h, axis=0, keepdims=True)]                    # main head
    for s, fref in enumerate((f2_ref, f3_ref, f4_ref)):              # sv heads
        y = fref[0].astype(jnp.float32)                              # (HW, CP)
        y = y * svsc_ref[s:s + 1, :] + svsh_ref[s:s + 1, :]
        y = y * jax.nn.sigmoid(y)
        pooled.append(jnp.mean(y, axis=0, keepdims=True))
    pall = jnp.concatenate(pooled, axis=0)                           # (4, CP)
    vals = jnp.sum(pall * hw_ref[...], axis=-1, keepdims=True)       # (4, 1)
    o_ref[0] = vals + hb_ref[...]                                    # one store


# ------------------------------ Pallas wrappers ----------------------------
def _prep_conv_input(x_nhwc, cin, stride):
    """Cheap XLA prep: slice to the REAL channel count, pad spatially, gather
    the 3 width taps and pack them into the channel dim (K = 3*cin), pad that
    tap group ONCE to a multiple of 128, split H into stride phases, flatten.
    Kernel row i then reads rows [(i//s)*Wo : +Ho*Wo] and lanes
    [(i%s)*kpad : +kpad] — pure static 2D slices on lane-aligned offsets."""
    N, H, W, _ = x_nhwc.shape
    if stride == 2:
        assert H % 2 == 0 and W % 2 == 0
    x = x_nhwc[..., :cin].astype(jnp.bfloat16)
    xpad = jnp.pad(x, ((0, 0), (1, 1), (1, 1), (0, 0)))
    Ho = (H - 1) // stride + 1
    Wo = (W - 1) // stride + 1
    wsl = [xpad[:, :, j:j + stride * (Wo - 1) + 1:stride, :] for j in range(3)]
    xw = jnp.concatenate(wsl, axis=-1)                 # (N, H+2, Wo, 3*cin)
    kpad = _round_up(3 * cin, 128)
    xw = jnp.pad(xw, ((0, 0), (0, 0), (0, 0), (0, kpad - 3 * cin)))
    if stride == 2:
        phases = [xw[:, a::2, :, :] for a in range(2)]
        xw = jnp.concatenate(phases, axis=-1)          # (N, (H+2)//2, Wo, 2*kpad)
    xk = xw.reshape(N, xw.shape[1] * Wo, xw.shape[-1])
    return xk, Ho, Wo, kpad


def fused_conv_block(x_nhwc, cin, bp, stride, has_pw, pw_act=False,
                     batch_fold=False):
    N = x_nhwc.shape[0]
    xk, Ho, Wo, kpad = _prep_conv_input(x_nhwc, cin, stride)
    M = Ho * Wo
    B = N if batch_fold else 1
    grid = (1,) if batch_fold else (N,)
    if batch_fold:
        x_map = lambda n: (0, 0, 0)
        o_map = lambda n: (0, 0, 0)
        sem = ("arbitrary",)
    else:
        x_map = lambda n: (n, 0, 0)
        o_map = lambda n: (n, 0, 0)
        sem = ("parallel",)

    args = [xk, bp["w3"], bp["shift3"]]
    in_specs = [
        pl.BlockSpec((B,) + xk.shape[1:], x_map),
        pl.BlockSpec(bp["w3"].shape, lambda n: (0, 0, 0)),
        pl.BlockSpec(bp["shift3"].shape, lambda n: (0, 0)),
    ]
    if has_pw:
        args += [bp["wpw"], bp["shiftpw"]]
        in_specs += [
            pl.BlockSpec(bp["wpw"].shape, lambda n: (0, 0)),
            pl.BlockSpec(bp["shiftpw"].shape, lambda n: (0, 0)),
        ]

    kern = functools.partial(conv_block_kernel, stride=stride, wo=Wo, m=M,
                             kpad=kpad, has_pw=has_pw, pw_act=pw_act)
    out = pl.pallas_call(
        kern,
        out_shape=jax.ShapeDtypeStruct((N, M, CP), jnp.bfloat16),
        grid=grid,
        in_specs=in_specs,
        out_specs=pl.BlockSpec((B, M, CP), o_map),
        compiler_params=pltpu.CompilerParams(
            dimension_semantics=sem, vmem_limit_bytes=VMEM_LIMIT),
    )(*args)
    return out.reshape(N, Ho, Wo, CP)


def final_block_heads(x_nhwc, cin, fp, feats):
    N = x_nhwc.shape[0]
    xk, Ho, Wo, kpad = _prep_conv_input(x_nhwc, cin, stride=2)
    M = Ho * Wo
    f2 = feats[SUP_INDS[0]].reshape(N, -1, CP)
    f3 = feats[SUP_INDS[1]].reshape(N, -1, CP)
    f4 = feats[SUP_INDS[2]].reshape(N, -1, CP)

    args = [xk, fp["w3"], fp["shift3"], fp["wph"], fp["sph"],
            f2, f3, f4, fp["svsc"], fp["svsh"], fp["hw"], fp["hb"]]
    in_specs = [
        pl.BlockSpec((1,) + xk.shape[1:], lambda n: (n, 0, 0)),
        pl.BlockSpec(fp["w3"].shape, lambda n: (0, 0, 0)),
        pl.BlockSpec(fp["shift3"].shape, lambda n: (0, 0)),
        pl.BlockSpec(fp["wph"].shape, lambda n: (0, 0)),
        pl.BlockSpec(fp["sph"].shape, lambda n: (0, 0)),
        pl.BlockSpec((1,) + f2.shape[1:], lambda n: (n, 0, 0)),
        pl.BlockSpec((1,) + f3.shape[1:], lambda n: (n, 0, 0)),
        pl.BlockSpec((1,) + f4.shape[1:], lambda n: (n, 0, 0)),
        pl.BlockSpec(fp["svsc"].shape, lambda n: (0, 0)),
        pl.BlockSpec(fp["svsh"].shape, lambda n: (0, 0)),
        pl.BlockSpec(fp["hw"].shape, lambda n: (0, 0)),
        pl.BlockSpec(fp["hb"].shape, lambda n: (0, 0)),
    ]
    kern = functools.partial(final_block_heads_kernel, stride=2, wo=Wo, m=M,
                             kpad=kpad)
    out = pl.pallas_call(
        kern,
        out_shape=jax.ShapeDtypeStruct((N, 4, 1), jnp.float32),
        grid=(N,),
        in_specs=in_specs,
        out_specs=pl.BlockSpec((1, 4, 1), lambda n: (n, 0, 0)),
        compiler_params=pltpu.CompilerParams(
            dimension_semantics=("parallel",), vmem_limit_bytes=VMEM_LIMIT),
    )(*args)
    return out.reshape(N, 4)


# ------------------------- parameter folding / padding ---------------------
def bn_fold(gamma, beta, mean, var, eps):
    scale = gamma / jnp.sqrt(var + eps)
    shift = beta - mean * scale
    return scale, shift


def _pad_last(a, n):
    pad = [(0, 0)] * (a.ndim - 1) + [(0, n - a.shape[-1])]
    return jnp.pad(a, pad)


def _fold_conv(p, eps):
    scale, shift = bn_fold(p["gamma"], p["beta"], p["mean"], p["var"], eps)
    return p["w"] * scale, shift       # fold BN scale into output channels


def _prep_3x3(p, eps=ENC_EPS):
    """Fold BN scale, pack the 3 width taps along K: (3, kpad, CP)."""
    w, shift = _fold_conv(p, eps)
    kh, kw, cin, cout = w.shape
    kpad = _round_up(kw * cin, 128)
    w3 = jnp.pad(w.reshape(kh, kw * cin, cout),
                 ((0, 0), (0, kpad - kw * cin), (0, CP - cout))
                 ).astype(jnp.bfloat16)
    sh = _pad_last(shift.reshape(1, -1), CP).astype(jnp.float32)
    return w3, sh


def _prep_1x1(p, eps=ENC_EPS):
    w, shift = _fold_conv(p, eps)
    cin, cout = w.shape[2], w.shape[3]
    w2 = jnp.pad(w.reshape(cin, cout),
                 ((0, CP - cin), (0, CP - cout))).astype(jnp.bfloat16)
    sh = _pad_last(shift.reshape(1, -1), CP).astype(jnp.float32)
    return w2, sh


def prepare_kernel_params(params):
    kparams = {}
    w3, sh = _prep_3x3(params["stem"])
    kparams["stem"] = dict(w3=w3, shift3=sh)

    kblocks = []
    for idx in range(len(STAGE_CH) - 1):            # blocks 0..4
        blk = params["blocks"][idx]
        w3, sh = _prep_3x3(blk["conv"])
        wp, shp = _prep_1x1(blk["pwl"])
        kblocks.append(dict(w3=w3, shift3=sh, wpw=wp, shiftpw=shp))
    kparams["blocks"] = kblocks

    # final block: conv3x3 + folded (conv_pwl o conv_head) — exact 1x1 fold.
    blk5 = params["blocks"][-1]
    w3, sh = _prep_3x3(blk5["conv"])
    wp, sp = _fold_conv(blk5["pwl"], ENC_EPS)
    wh, shh = _fold_conv(params["head_conv"], ENC_EPS)
    wp2 = wp.reshape(wp.shape[2], wp.shape[3])      # (c5, c5)
    wh2 = wh.reshape(wh.shape[2], wh.shape[3])      # (c5, HEAD_CH)
    wf = wp2 @ wh2                                  # folded weight (f32)
    sf = sp @ wh2 + shh                             # folded shift  (f32)
    wph = jnp.pad(wf, ((0, CP - wf.shape[0]),
                       (0, CP - wf.shape[1]))).astype(jnp.bfloat16)
    sph = _pad_last(sf.reshape(1, -1), CP).astype(jnp.float32)

    # heads: row 0 = main classifier, rows 1..3 = sv1/sv2/sv3 linears.
    svsc, svsh, ws, bs = [], [], [], []
    ws.append(_pad_last(params["classifier"]["w"][:, 0].reshape(1, -1), CP)[0])
    bs.append(params["classifier"]["b"].reshape(()))
    for i in range(len(SUP_INDS)):
        hp = params["sv"][i]
        sc, shf = bn_fold(hp["gamma"], hp["beta"], hp["mean"], hp["var"],
                          NORM_EPS)
        svsc.append(_pad_last(sc.reshape(1, -1), CP)[0])
        svsh.append(_pad_last(shf.reshape(1, -1), CP)[0])
        ws.append(_pad_last(hp["w"][:, 0].reshape(1, -1), CP)[0])
        bs.append(hp["b"].reshape(()))
    kparams["final"] = dict(
        w3=w3, shift3=sh, wph=wph, sph=sph,
        svsc=jnp.stack(svsc).astype(jnp.float32),          # (3, CP)
        svsh=jnp.stack(svsh).astype(jnp.float32),          # (3, CP)
        hw=jnp.stack(ws).astype(jnp.float32),              # (4, CP)
        hb=jnp.stack(bs).reshape(4, 1).astype(jnp.float32),
    )
    return kparams


# ------------------------------ forward pass -------------------------------
def effv2s_deepsuper_forward(kparams, img_nchw):
    # layout: NCHW (PyTorch) -> NHWC for all kernels.
    x = jnp.transpose(img_nchw, (0, 2, 3, 1)).astype(jnp.float32)

    # encoder.conv_stem + encoder.bn1 (BN + SiLU)
    x = fused_conv_block(x, x.shape[-1], kparams["stem"], stride=2,
                         has_pw=False)
    cin = STEM_CH

    # encoder.blocks 0..4 (conv3x3+BN+SiLU fused with conv_pwl+BN); tap feats.
    feats = {}
    for idx in range(len(STAGE_CH) - 1):
        blk = kparams["blocks"][idx]
        x = fused_conv_block(x, cin, blk, stride=STAGE_STRIDE[idx],
                             has_pw=True, pw_act=False,
                             batch_fold=(idx >= 3))   # tiny spatial: fold batch
        cin = STAGE_CH[idx]
        if idx in SUP_INDS:
            feats[idx] = x

    # block 5 + conv_head + bn2 + forward_head + sv1/2/3, all in one call.
    # Dropout(p=0.0) is the identity.
    out4 = final_block_heads(x, cin, kparams["final"], feats)
    main = out4[:, 0:1]
    svs = [out4[:, 1:2], out4[:, 2:3], out4[:, 3:4]]
    return main, svs


# --------------------------- pure-JAX reference ----------------------------
def _ref_conv_bn_act(x, p, stride, pad, act, eps=ENC_EPS):
    y = lax.conv_general_dilated(x, p["w"], (stride, stride),
                                 [(pad, pad), (pad, pad)],
                                 dimension_numbers=("NHWC", "HWIO", "NHWC"))
    scale, shift = bn_fold(p["gamma"], p["beta"], p["mean"], p["var"], eps)
    y = y * scale.reshape(1, 1, 1, -1) + shift.reshape(1, 1, 1, -1)
    if act:
        y = y * jax.nn.sigmoid(y)
    return y


def _ref_head(x, scale, shift, w, b, act):
    y = x * scale.reshape(1, 1, 1, -1) + shift.reshape(1, 1, 1, -1)
    if act:
        y = y * jax.nn.sigmoid(y)
    pooled = y.mean(axis=(1, 2))
    return pooled @ w + b


def reference_forward(params, img_nchw):
    x = jnp.transpose(img_nchw, (0, 2, 3, 1)).astype(jnp.float32)
    x = _ref_conv_bn_act(x, params["stem"], 2, 1, True)
    feats = {}
    for idx, blk in enumerate(params["blocks"]):
        x = _ref_conv_bn_act(x, blk["conv"], STAGE_STRIDE[idx], 1, True)
        x = _ref_conv_bn_act(x, blk["pwl"], 1, 0, False)
        if idx in SUP_INDS:
            feats[idx] = x
    x = _ref_conv_bn_act(x, params["head_conv"], 1, 0, True)
    C = x.shape[-1]
    main = _ref_head(x, jnp.ones((C,)), jnp.zeros((C,)),
                     params["classifier"]["w"], params["classifier"]["b"], False)
    svs = []
    for i, idx in enumerate(SUP_INDS):
        hp = params["sv"][i]
        scale, shift = bn_fold(hp["gamma"], hp["beta"], hp["mean"], hp["var"],
                               NORM_EPS)
        svs.append(_ref_head(feats[idx], scale, shift, hp["w"], hp["b"], True))
    return main, svs


# ------------------------- deterministic parameters ------------------------
def _init_conv_bn(key, kh, kw, cin, cout):
    k1, k2, k3, k4, k5 = jax.random.split(key, 5)
    fan_in = kh * kw * cin
    return dict(
        w=jax.random.normal(k1, (kh, kw, cin, cout), jnp.float32) / np.sqrt(fan_in),
        gamma=1.0 + 0.1 * jax.random.normal(k2, (cout,), jnp.float32),
        beta=0.1 * jax.random.normal(k3, (cout,), jnp.float32),
        mean=0.1 * jax.random.normal(k4, (cout,), jnp.float32),
        var=1.0 + 0.1 * jnp.abs(jax.random.normal(k5, (cout,), jnp.float32)),
    )


def _init_sv_head(key, c):
    k1, k2, k3, k4, k5, k6 = jax.random.split(key, 6)
    return dict(
        gamma=1.0 + 0.1 * jax.random.normal(k1, (c,), jnp.float32),
        beta=0.1 * jax.random.normal(k2, (c,), jnp.float32),
        mean=0.1 * jax.random.normal(k3, (c,), jnp.float32),
        var=1.0 + 0.1 * jnp.abs(jax.random.normal(k4, (c,), jnp.float32)),
        w=jax.random.normal(k5, (c, 1), jnp.float32) / np.sqrt(c),
        b=0.01 * jax.random.normal(k6, (1, 1), jnp.float32),
    )


def init_params(key, in_channels=3):
    keys = jax.random.split(key, 32)
    ki = iter(keys)
    params = {"stem": _init_conv_bn(next(ki), 3, 3, in_channels, STEM_CH)}
    blocks = []
    cin = STEM_CH
    for cout in STAGE_CH:
        blocks.append(dict(
            conv=_init_conv_bn(next(ki), 3, 3, cin, cout),
            pwl=_init_conv_bn(next(ki), 1, 1, cout, cout),   # "conv_pwl" + BN
        ))
        cin = cout
    params["blocks"] = blocks
    params["head_conv"] = _init_conv_bn(next(ki), 1, 1, cin, HEAD_CH)
    kcw, kcb = jax.random.split(next(ki))
    params["classifier"] = dict(
        w=jax.random.normal(kcw, (HEAD_CH, 1), jnp.float32) / np.sqrt(HEAD_CH),
        b=0.01 * jax.random.normal(kcb, (1, 1), jnp.float32),
    )
    params["sv"] = [_init_sv_head(next(ki), STAGE_CH[idx]) for idx in SUP_INDS]
    return params


# ----------------------------------- main ----------------------------------
if __name__ == "__main__":
    key = jax.random.PRNGKey(0)
    kparam_key, kx = jax.random.split(key)
    params = init_params(kparam_key, in_channels=3)
    kparams = prepare_kernel_params(params)       # fold BN, pack taps, pad, bf16
    img = jax.random.normal(kx, (2, 3, 64, 64), jnp.float32)   # NCHW like PyTorch

    fwd = jax.jit(effv2s_deepsuper_forward)
    main_out, sv_outs = jax.block_until_ready(fwd(kparams, img))

    assert main_out.shape == (2, 1)
    assert len(sv_outs) == 3 and all(s.shape == (2, 1) for s in sv_outs)

    # correctness vs. full-f32 reference (tolerance covers bf16 operand storage)
    ref_main, ref_svs = reference_forward(params, img)
    np.testing.assert_allclose(np.asarray(main_out), np.asarray(ref_main),
                               rtol=2e-2, atol=2e-2)
    for got, want in zip(sv_outs, ref_svs):
        np.testing.assert_allclose(np.asarray(got), np.asarray(want),
                                   rtol=2e-2, atol=2e-2)

    print("KERNEL_OK")
</pallas_src>

<mosaic_0001>
module attributes {stable_mosaic.version = 11 : i64} {
  func.func @conv_block_kernel(%arg0: i32, %arg1: memref<1x1056x256xbf16, #tpu.memory_space<vmem>>, %arg2: memref<3x128x128xbf16, #tpu.memory_space<vmem>>, %arg3: memref<1x128xf32, #tpu.memory_space<vmem>>, %arg4: memref<1x1024x128xbf16, #tpu.memory_space<vmem>>) attributes {dimension_semantics = [#tpu.dimension_semantics<parallel>], iteration_bounds = array<i64: 2>, scalar_prefetch = 0 : i64, scratch_operands = 0 : i64, tpu.core_type = #tpu.core_type<tc>, window_params = [{transform_indices = @transform_0, window_bounds = array<i64: 1, 1056, 256>}, {pipeline_mode = #tpu.pipeline_mode<synchronous>, transform_indices = @transform_1, window_bounds = array<i64: 3, 128, 128>}, {pipeline_mode = #tpu.pipeline_mode<synchronous>, transform_indices = @transform_2, window_bounds = array<i64: 1, 128>}, {transform_indices = @transform_3, window_bounds = array<i64: 1, 1024, 128>}]} {
    %c0 = arith.constant 0 : index
    %c0_0 = arith.constant 0 : index
    %c0_1 = arith.constant 0 : index
    %0 = vector.load %arg1[%c0, %c0_0, %c0_1] : memref<1x1056x256xbf16, #tpu.memory_space<vmem>>, vector<1x1024x128xbf16>
    %1 = vector.shape_cast %0 : vector<1x1024x128xbf16> to vector<1024x128xbf16>
    %c0_2 = arith.constant 0 : index
    %c0_3 = arith.constant 0 : index
    %c0_4 = arith.constant 0 : index
    %2 = vector.load %arg2[%c0_2, %c0_3, %c0_4] : memref<3x128x128xbf16, #tpu.memory_space<vmem>>, vector<1x128x128xbf16>
    %3 = vector.shape_cast %2 : vector<1x128x128xbf16> to vector<128x128xbf16>
    %cst = arith.constant dense<0.000000e+00> : vector<1024x128xf32>
    %4 = tpu.matmul %1, %3, %cst {dimension_numbers = #tpu.dot_dimension_numbers<[1], [0], [0], [1], [0, 0, 1, 1], [], []>} : vector<1024x128xbf16>, vector<128x128xbf16>, vector<1024x128xf32> -> vector<1024x128xf32>
    %c0_5 = arith.constant 0 : index
    %c0_6 = arith.constant 0 : index
    %c128 = arith.constant 128 : index
    %5 = vector.load %arg1[%c0_5, %c0_6, %c128] : memref<1x1056x256xbf16, #tpu.memory_space<vmem>>, vector<1x1024x128xbf16>
    %6 = vector.shape_cast %5 : vector<1x1024x128xbf16> to vector<1024x128xbf16>
    %c1 = arith.constant 1 : index
    %c0_7 = arith.constant 0 : index
    %c0_8 = arith.constant 0 : index
    %7 = vector.load %arg2[%c1, %c0_7, %c0_8] : memref<3x128x128xbf16, #tpu.memory_space<vmem>>, vector<1x128x128xbf16>
    %8 = vector.shape_cast %7 : vector<1x128x128xbf16> to vector<128x128xbf16>
    %cst_9 = arith.constant dense<0.000000e+00> : vector<1024x128xf32>
    %9 = tpu.matmul %6, %8, %cst_9 {dimension_numbers = #tpu.dot_dimension_numbers<[1], [0], [0], [1], [0, 0, 1, 1], [], []>} : vector<1024x128xbf16>, vector<128x128xbf16>, vector<1024x128xf32> -> vector<1024x128xf32>
    %10 = arith.addf %4, %9 : vector<1024x128xf32>
    %c0_10 = arith.constant 0 : index
    %c32 = arith.constant 32 : index
    %c0_11 = arith.constant 0 : index
    %11 = vector.load %arg1[%c0_10, %c32, %c0_11] : memref<1x1056x256xbf16, #tpu.memory_space<vmem>>, vector<1x1024x128xbf16>
    %12 = vector.shape_cast %11 : vector<1x1024x128xbf16> to vector<1024x128xbf16>
    %c2 = arith.constant 2 : index
    %c0_12 = arith.constant 0 : index
    %c0_13 = arith.constant 0 : index
    %13 = vector.load %arg2[%c2, %c0_12, %c0_13] : memref<3x128x128xbf16, #tpu.memory_space<vmem>>, vector<1x128x128xbf16>
    %14 = vector.shape_cast %13 : vector<1x128x128xbf16> to vector<128x128xbf16>
    %cst_14 = arith.constant dense<0.000000e+00> : vector<1024x128xf32>
    %15 = tpu.matmul %12, %14, %cst_14 {dimension_numbers = #tpu.dot_dimension_numbers<[1], [0], [0], [1], [0, 0, 1, 1], [], []>} : vector<1024x128xbf16>, vector<128x128xbf16>, vector<1024x128xf32> -> vector<1024x128xf32>
    %16 = arith.addf %10, %15 : vector<1024x128xf32>
    %c0_15 = arith.constant 0 : index
    %c0_16 = arith.constant 0 : index
    %17 = vector.load %arg3[%c0_15, %c0_16] : memref<1x128xf32, #tpu.memory_space<vmem>>, vector<1x128xf32>
    %18 = vector.broadcast %17 : vector<1x128xf32> to vector<1024x128xf32>
    %19 = arith.addf %16, %18 : vector<1024x128xf32>
    %20 = arith.negf %19 : vector<1024x128xf32>
    %21 = math.exp %20 : vector<1024x128xf32>
    %cst_17 = arith.constant 1.000000e+00 : f32
    %22 = vector.broadcast %cst_17 : f32 to vector<1024x128xf32>
    %23 = arith.addf %22, %21 : vector<1024x128xf32>
    %24 = arith.divf %22, %23 : vector<1024x128xf32>
    %25 = arith.mulf %19, %24 : vector<1024x128xf32>
    %26 = arith.truncf %25 : vector<1024x128xf32> to vector<1024x128xbf16>
    %c0_18 = arith.constant 0 : index
    %c0_19 = arith.constant 0 : index
    %c0_20 = arith.constant 0 : index
    %27 = vector.load %arg4[%c0_18, %c0_19, %c0_20] : memref<1x1024x128xbf16, #tpu.memory_space<vmem>>, vector<1x1024x128xbf16>
    %28 = vector.shape_cast %27 : vector<1x1024x128xbf16> to vector<1024x128xbf16>
    %29 = vector.shape_cast %26 : vector<1024x128xbf16> to vector<1x1024x128xbf16>
    tpu.vector_store %arg4[%c0_18, %c0_19, %c0_20], %29 {strides = array<i32>} : memref<1x1024x128xbf16, #tpu.memory_space<vmem>>, vector<1x1024x128xbf16>,
    return
  }
  func.func @transform_0(%arg0: i32) -> (i32, i32, i32) {
    %c0_i32 = arith.constant 0 : i32
    %c0_i32_0 = arith.constant 0 : i32
    %c0_i32_1 = arith.constant 0 : i32
    return %arg0, %c0_i32, %c0_i32_0 : i32, i32, i32
  }
  func.func @transform_1(%arg0: i32) -> (i32, i32, i32) {
    %c0_i32 = arith.constant 0 : i32
    %c0_i32_0 = arith.constant 0 : i32
    %c0_i32_1 = arith.constant 0 : i32
    %c0_i32_2 = arith.constant 0 : i32
    return %c0_i32, %c0_i32_0, %c0_i32_1 : i32, i32, i32
  }
  func.func @transform_2(%arg0: i32) -> (i32, i32) {
    %c0_i32 = arith.constant 0 : i32
    %c0_i32_0 = arith.constant 0 : i32
    %c0_i32_1 = arith.constant 0 : i32
    return %c0_i32, %c0_i32_0 : i32, i32
  }
  func.func @transform_3(%arg0: i32) -> (i32, i32, i32) {
    %c0_i32 = arith.constant 0 : i32
    %c0_i32_0 = arith.constant 0 : i32
    %c0_i32_1 = arith.constant 0 : i32
    return %arg0, %c0_i32, %c0_i32_0 : i32, i32, i32
  }
}

module attributes {stable_mosaic.version = 11 : i64} {
  func.func @conv_block_kernel(%arg0: i32, %arg1: memref<1x1088x128xbf16, #tpu.memory_space<vmem>>, %arg2: memref<3x128x128xbf16, #tpu.memory_space<vmem>>, %arg3: memref<1x128xf32, #tpu.memory_space<vmem>>, %arg4: memref<128x128xbf16, #tpu.memory_space<vmem>>, %arg5: memref<1x128xf32, #tpu.memory_space<vmem>>, %arg6: memref<1x1024x128xbf16, #tpu.memory_space<vmem>>) attributes {dimension_semantics = [#tpu.dimension_semantics<parallel>], iteration_bounds = array<i64: 2>, scalar_prefetch = 0 : i64, scratch_operands = 0 : i64, tpu.core_type = #tpu.core_type<tc>, window_params = [{transform_indices = @transform_0, window_bounds = array<i64: 1, 1088, 128>}, {pipeline_mode = #tpu.pipeline_mode<synchronous>, transform_indices = @transform_1, window_bounds = array<i64: 3, 128, 128>}, {pipeline_mode = #tpu.pipeline_mode<synchronous>, transform_indices = @transform_2, window_bounds = array<i64: 1, 128>}, {pipeline_mode = #tpu.pipeline_mode<synchronous>, transform_indices = @transform_3, window_bounds = array<i64: 128, 128>}, {pipeline_mode = #tpu.pipeline_mode<synchronous>, transform_indices = @transform_4, window_bounds = array<i64: 1, 128>}, {transform_indices = @transform_5, window_bounds = array<i64: 1, 1024, 128>}]} {
    %c0 = arith.constant 0 : index
    %c0_0 = arith.constant 0 : index
    %c0_1 = arith.constant 0 : index
    %0 = vector.load %arg1[%c0, %c0_0, %c0_1] : memref<1x1088x128xbf16, #tpu.memory_space<vmem>>, vector<1x1024x128xbf16>
    %1 = vector.shape_cast %0 : vector<1x1024x128xbf16> to vector<1024x128xbf16>
    %c0_2 = arith.constant 0 : index
    %c0_3 = arith.constant 0 : index
    %c0_4 = arith.constant 0 : index
    %2 = vector.load %arg2[%c0_2, %c0_3, %c0_4] : memref<3x128x128xbf16, #tpu.memory_space<vmem>>, vector<1x128x128xbf16>
    %3 = vector.shape_cast %2 : vector<1x128x128xbf16> to vector<128x128xbf16>
    %cst = arith.constant dense<0.000000e+00> : vector<1024x128xf32>
    %4 = tpu.matmul %1, %3, %cst {dimension_numbers = #tpu.dot_dimension_numbers<[1], [0], [0], [1], [0, 0, 1, 1], [], []>} : vector<1024x128xbf16>, vector<128x128xbf16>, vector<1024x128xf32> -> vector<1024x128xf32>
    %c0_5 = arith.constant 0 : index
    %c32 = arith.constant 32 : index
    %c0_6 = arith.constant 0 : index
    %5 = vector.load %arg1[%c0_5, %c32, %c0_6] : memref<1x1088x128xbf16, #tpu.memory_space<vmem>>, vector<1x1024x128xbf16>
    %6 = vector.shape_cast %5 : vector<1x1024x128xbf16> to vector<1024x128xbf16>
    %c1 = arith.constant 1 : index
    %c0_7 = arith.constant 0 : index
    %c0_8 = arith.constant 0 : index
    %7 = vector.load %arg2[%c1, %c0_7, %c0_8] : memref<3x128x128xbf16, #tpu.memory_space<vmem>>, vector<1x128x128xbf16>
    %8 = vector.shape_cast %7 : vector<1x128x128xbf16> to vector<128x128xbf16>
    %cst_9 = arith.constant dense<0.000000e+00> : vector<1024x128xf32>
    %9 = tpu.matmul %6, %8, %cst_9 {dimension_numbers = #tpu.dot_dimension_numbers<[1], [0], [0], [1], [0, 0, 1, 1], [], []>} : vector<1024x128xbf16>, vector<128x128xbf16>, vector<1024x128xf32> -> vector<1024x128xf32>
    %10 = arith.addf %4, %9 : vector<1024x128xf32>
    %c0_10 = arith.constant 0 : index
    %c64 = arith.constant 64 : index
    %c0_11 = arith.constant 0 : index
    %11 = vector.load %arg1[%c0_10, %c64, %c0_11] : memref<1x1088x128xbf16, #tpu.memory_space<vmem>>, vector<1x1024x128xbf16>
    %12 = vector.shape_cast %11 : vector<1x1024x128xbf16> to vector<1024x128xbf16>
    %c2 = arith.constant 2 : index
    %c0_12 = arith.constant 0 : index
    %c0_13 = arith.constant 0 : index
    %13 = vector.load %arg2[%c2, %c0_12, %c0_13] : memref<3x128x128xbf16, #tpu.memory_space<vmem>>, vector<1x128x128xbf16>
    %14 = vector.shape_cast %13 : vector<1x128x128xbf16> to vector<128x128xbf16>
    %cst_14 = arith.constant dense<0.000000e+00> : vector<1024x128xf32>
    %15 = tpu.matmul %12, %14, %cst_14 {dimension_numbers = #tpu.dot_dimension_numbers<[1], [0], [0], [1], [0, 0, 1, 1], [], []>} : vector<1024x128xbf16>, vector<128x128xbf16>, vector<1024x128xf32> -> vector<1024x128xf32>
    %16 = arith.addf %10, %15 : vector<1024x128xf32>
    %c0_15 = arith.constant 0 : index
    %c0_16 = arith.constant 0 : index
    %17 = vector.load %arg3[%c0_15, %c0_16] : memref<1x128xf32, #tpu.memory_space<vmem>>, vector<1x128xf32>
    %18 = vector.broadcast %17 : vector<1x128xf32> to vector<1024x128xf32>
    %19 = arith.addf %16, %18 : vector<1024x128xf32>
    %20 = arith.negf %19 : vector<1024x128xf32>
    %21 = math.exp %20 : vector<1024x128xf32>
    %cst_17 = arith.constant 1.000000e+00 : f32
    %22 = vector.broadcast %cst_17 : f32 to vector<1024x128xf32>
    %23 = arith.addf %22, %21 : vector<1024x128xf32>
    %24 = arith.divf %22, %23 : vector<1024x128xf32>
    %25 = arith.mulf %19, %24 : vector<1024x128xf32>
    %26 = arith.truncf %25 : vector<1024x128xf32> to vector<1024x128xbf16>
    %c0_18 = arith.constant 0 : index
    %c0_19 = arith.constant 0 : index
    %27 = vector.load %arg4[%c0_18, %c0_19] : memref<128x128xbf16, #tpu.memory_space<vmem>>, vector<128x128xbf16>
    %cst_20 = arith.constant dense<0.000000e+00> : vector<1024x128xf32>
    %28 = tpu.matmul %26, %27, %cst_20 {dimension_numbers = #tpu.dot_dimension_numbers<[1], [0], [0], [1], [0, 0, 1, 1], [], []>} : vector<1024x128xbf16>, vector<128x128xbf16>, vector<1024x128xf32> -> vector<1024x128xf32>
    %c0_21 = arith.constant 0 : index
    %c0_22 = arith.constant 0 : index
    %29 = vector.load %arg5[%c0_21, %c0_22] : memref<1x128xf32, #tpu.memory_space<vmem>>, vector<1x128xf32>
    %30 = vector.broadcast %29 : vector<1x128xf32> to vector<1024x128xf32>
    %31 = arith.addf %28, %30 : vector<1024x128xf32>
    %32 = arith.truncf %31 : vector<1024x128xf32> to vector<1024x128xbf16>
    %c0_23 = arith.constant 0 : index
    %c0_24 = arith.constant 0 : index
    %c0_25 = arith.constant 0 : index
    %33 = vector.load %arg6[%c0_23, %c0_24, %c0_25] : memref<1x1024x128xbf16, #tpu.memory_space<vmem>>, vector<1x1024x128xbf16>
    %34 = vector.shape_cast %33 : vector<1x1024x128xbf16> to vector<1024x128xbf16>
    %35 = vector.shape_cast %32 : vector<1024x128xbf16> to vector<1x1024x128xbf16>
    tpu.vector_store %arg6[%c0_23, %c0_24, %c0_25], %35 {strides = array<i32>} : memref<1x1024x128xbf16, #tpu.memory_space<vmem>>, vector<1x1024x128xbf16>,
    return
  }
  func.func @transform_0(%arg0: i32) -> (i32, i32, i32) {
    %c0_i32 = arith.constant 0 : i32
    %c0_i32_0 = arith.constant 0 : i32
    %c0_i32_1 = arith.constant 0 : i32
    return %arg0, %c0_i32, %c0_i32_0 : i32, i32, i32
  }
  func.func @transform_1(%arg0: i32) -> (i32, i32, i32) {
    %c0_i32 = arith.constant 0 : i32
    %c0_i32_0 = arith.constant 0 : i32
    %c0_i32_1 = arith.constant 0 : i32
    %c0_i32_2 = arith.constant 0 : i32
    return %c0_i32, %c0_i32_0, %c0_i32_1 : i32, i32, i32
  }
  func.func @transform_2(%arg0: i32) -> (i32, i32) {
    %c0_i32 = arith.constant 0 : i32
    %c0_i32_0 = arith.constant 0 : i32
    %c0_i32_1 = arith.constant 0 : i32
    return %c0_i32, %c0_i32_0 : i32, i32
  }
  func.func @transform_3(%arg0: i32) -> (i32, i32) {
    %c0_i32 = arith.constant 0 : i32
    %c0_i32_0 = arith.constant 0 : i32
    %c0_i32_1 = arith.constant 0 : i32
    return %c0_i32, %c0_i32_0 : i32, i32
  }
  func.func @transform_4(%arg0: i32) -> (i32, i32) {
    %c0_i32 = arith.constant 0 : i32
    %c0_i32_0 = arith.constant 0 : i32
    %c0_i32_1 = arith.constant 0 : i32
    return %c0_i32, %c0_i32_0 : i32, i32
  }
  func.func @transform_5(%arg0: i32) -> (i32, i32, i32) {
    %c0_i32 = arith.constant 0 : i32
    %c0_i32_0 = arith.constant 0 : i32
    %c0_i32_1 = arith.constant 0 : i32
    return %arg0, %c0_i32, %c0_i32_0 : i32, i32, i32
  }
}

module attributes {stable_mosaic.version = 11 : i64} {
  func.func @conv_block_kernel(%arg0: i32, %arg1: memref<1x272x256xbf16, #tpu.memory_space<vmem>>, %arg2: memref<3x128x128xbf16, #tpu.memory_space<vmem>>, %arg3: memref<1x128xf32, #tpu.memory_space<vmem>>, %arg4: memref<128x128xbf16, #tpu.memory_space<vmem>>, %arg5: memref<1x128xf32, #tpu.memory_space<vmem>>, %arg6: memref<1x256x128xbf16, #tpu.memory_space<vmem>>) attributes {dimension_semantics = [#tpu.dimension_semantics<parallel>], iteration_bounds = array<i64: 2>, scalar_prefetch = 0 : i64, scratch_operands = 0 : i64, tpu.core_type = #tpu.core_type<tc>, window_params = [{transform_indices = @transform_0, window_bounds = array<i64: 1, 272, 256>}, {pipeline_mode = #tpu.pipeline_mode<synchronous>, transform_indices = @transform_1, window_bounds = array<i64: 3, 128, 128>}, {pipeline_mode = #tpu.pipeline_mode<synchronous>, transform_indices = @transform_2, window_bounds = array<i64: 1, 128>}, {pipeline_mode = #tpu.pipeline_mode<synchronous>, transform_indices = @transform_3, window_bounds = array<i64: 128, 128>}, {pipeline_mode = #tpu.pipeline_mode<synchronous>, transform_indices = @transform_4, window_bounds = array<i64: 1, 128>}, {transform_indices = @transform_5, window_bounds = array<i64: 1, 256, 128>}]} {
    %c0 = arith.constant 0 : index
    %c0_0 = arith.constant 0 : index
    %c0_1 = arith.constant 0 : index
    %0 = vector.load %arg1[%c0, %c0_0, %c0_1] : memref<1x272x256xbf16, #tpu.memory_space<vmem>>, vector<1x256x128xbf16>
    %1 = vector.shape_cast %0 : vector<1x256x128xbf16> to vector<256x128xbf16>
    %c0_2 = arith.constant 0 : index
    %c0_3 = arith.constant 0 : index
    %c0_4 = arith.constant 0 : index
    %2 = vector.load %arg2[%c0_2, %c0_3, %c0_4] : memref<3x128x128xbf16, #tpu.memory_space<vmem>>, vector<1x128x128xbf16>
    %3 = vector.shape_cast %2 : vector<1x128x128xbf16> to vector<128x128xbf16>
    %cst = arith.constant dense<0.000000e+00> : vector<256x128xf32>
    %4 = tpu.matmul %1, %3, %cst {dimension_numbers = #tpu.dot_dimension_numbers<[1], [0], [0], [1], [0, 0, 1, 1], [], []>} : vector<256x128xbf16>, vector<128x128xbf16>, vector<256x128xf32> -> vector<256x128xf32>
    %c0_5 = arith.constant 0 : index
    %c0_6 = arith.constant 0 : index
    %c128 = arith.constant 128 : index
    %5 = vector.load %arg1[%c0_5, %c0_6, %c128] : memref<1x272x256xbf16, #tpu.memory_space<vmem>>, vector<1x256x128xbf16>
    %6 = vector.shape_cast %5 : vector<1x256x128xbf16> to vector<256x128xbf16>
    %c1 = arith.constant 1 : index
    %c0_7 = arith.constant 0 : index
    %c0_8 = arith.constant 0 : index
    %7 = vector.load %arg2[%c1, %c0_7, %c0_8] : memref<3x128x128xbf16, #tpu.memory_space<vmem>>, vector<1x128x128xbf16>
    %8 = vector.shape_cast %7 : vector<1x128x128xbf16> to vector<128x128xbf16>
    %cst_9 = arith.constant dense<0.000000e+00> : vector<256x128xf32>
    %9 = tpu.matmul %6, %8, %cst_9 {dimension_numbers = #tpu.dot_dimension_numbers<[1], [0], [0], [1], [0, 0, 1, 1], [], []>} : vector<256x128xbf16>, vector<128x128xbf16>, vector<256x128xf32> -> vector<256x128xf32>
    %10 = arith.addf %4, %9 : vector<256x128xf32>
    %c0_10 = arith.constant 0 : index
    %c16 = arith.constant 16 : index
    %c0_11 = arith.constant 0 : index
    %11 = vector.load %arg1[%c0_10, %c16, %c0_11] : memref<1x272x256xbf16, #tpu.memory_space<vmem>>, vector<1x256x128xbf16>
    %12 = vector.shape_cast %11 : vector<1x256x128xbf16> to vector<256x128xbf16>
    %c2 = arith.constant 2 : index
    %c0_12 = arith.constant 0 : index
    %c0_13 = arith.constant 0 : index
    %13 = vector.load %arg2[%c2, %c0_12, %c0_13] : memref<3x128x128xbf16, #tpu.memory_space<vmem>>, vector<1x128x128xbf16>
    %14 = vector.shape_cast %13 : vector<1x128x128xbf16> to vector<128x128xbf16>
    %cst_14 = arith.constant dense<0.000000e+00> : vector<256x128xf32>
    %15 = tpu.matmul %12, %14, %cst_14 {dimension_numbers = #tpu.dot_dimension_numbers<[1], [0], [0], [1], [0, 0, 1, 1], [], []>} : vector<256x128xbf16>, vector<128x128xbf16>, vector<256x128xf32> -> vector<256x128xf32>
    %16 = arith.addf %10, %15 : vector<256x128xf32>
    %c0_15 = arith.constant 0 : index
    %c0_16 = arith.constant 0 : index
    %17 = vector.load %arg3[%c0_15, %c0_16] : memref<1x128xf32, #tpu.memory_space<vmem>>, vector<1x128xf32>
    %18 = vector.broadcast %17 : vector<1x128xf32> to vector<256x128xf32>
    %19 = arith.addf %16, %18 : vector<256x128xf32>
    %20 = arith.negf %19 : vector<256x128xf32>
    %21 = math.exp %20 : vector<256x128xf32>
    %cst_17 = arith.constant 1.000000e+00 : f32
    %22 = vector.broadcast %cst_17 : f32 to vector<256x128xf32>
    %23 = arith.addf %22, %21 : vector<256x128xf32>
    %24 = arith.divf %22, %23 : vector<256x128xf32>
    %25 = arith.mulf %19, %24 : vector<256x128xf32>
    %26 = arith.truncf %25 : vector<256x128xf32> to vector<256x128xbf16>
    %c0_18 = arith.constant 0 : index
    %c0_19 = arith.constant 0 : index
    %27 = vector.load %arg4[%c0_18, %c0_19] : memref<128x128xbf16, #tpu.memory_space<vmem>>, vector<128x128xbf16>
    %cst_20 = arith.constant dense<0.000000e+00> : vector<256x128xf32>
    %28 = tpu.matmul %26, %27, %cst_20 {dimension_numbers = #tpu.dot_dimension_numbers<[1], [0], [0], [1], [0, 0, 1, 1], [], []>} : vector<256x128xbf16>, vector<128x128xbf16>, vector<256x128xf32> -> vector<256x128xf32>
    %c0_21 = arith.constant 0 : index
    %c0_22 = arith.constant 0 : index
    %29 = vector.load %arg5[%c0_21, %c0_22] : memref<1x128xf32, #tpu.memory_space<vmem>>, vector<1x128xf32>
    %30 = vector.broadcast %29 : vector<1x128xf32> to vector<256x128xf32>
    %31 = arith.addf %28, %30 : vector<256x128xf32>
    %32 = arith.truncf %31 : vector<256x128xf32> to vector<256x128xbf16>
    %c0_23 = arith.constant 0 : index
    %c0_24 = arith.constant 0 : index
    %c0_25 = arith.constant 0 : index
    %33 = vector.load %arg6[%c0_23, %c0_24, %c0_25] : memref<1x256x128xbf16, #tpu.memory_space<vmem>>, vector<1x256x128xbf16>
    %34 = vector.shape_cast %33 : vector<1x256x128xbf16> to vector<256x128xbf16>
    %35 = vector.shape_cast %32 : vector<256x128xbf16> to vector<1x256x128xbf16>
    tpu.vector_store %arg6[%c0_23, %c0_24, %c0_25], %35 {strides = array<i32>} : memref<1x256x128xbf16, #tpu.memory_space<vmem>>, vector<1x256x128xbf16>,
    return
  }
  func.func @transform_0(%arg0: i32) -> (i32, i32, i32) {
    %c0_i32 = arith.constant 0 : i32
    %c0_i32_0 = arith.constant 0 : i32
    %c0_i32_1 = arith.constant 0 : i32
    return %arg0, %c0_i32, %c0_i32_0 : i32, i32, i32
  }
  func.func @transform_1(%arg0: i32) -> (i32, i32, i32) {
    %c0_i32 = arith.constant 0 : i32
    %c0_i32_0 = arith.constant 0 : i32
    %c0_i32_1 = arith.constant 0 : i32
    %c0_i32_2 = arith.constant 0 : i32
    return %c0_i32, %c0_i32_0, %c0_i32_1 : i32, i32, i32
  }
  func.func @transform_2(%arg0: i32) -> (i32, i32) {
    %c0_i32 = arith.constant 0 : i32
    %c0_i32_0 = arith.constant 0 : i32
    %c0_i32_1 = arith.constant 0 : i32
    return %c0_i32, %c0_i32_0 : i32, i32
  }
  func.func @transform_3(%arg0: i32) -> (i32, i32) {
    %c0_i32 = arith.constant 0 : i32
    %c0_i32_0 = arith.constant 0 : i32
    %c0_i32_1 = arith.constant 0 : i32
    return %c0_i32, %c0_i32_0 : i32, i32
  }
  func.func @transform_4(%arg0: i32) -> (i32, i32) {
    %c0_i32 = arith.constant 0 : i32
    %c0_i32_0 = arith.constant 0 : i32
    %c0_i32_1 = arith.constant 0 : i32
    return %c0_i32, %c0_i32_0 : i32, i32
  }
  func.func @transform_5(%arg0: i32) -> (i32, i32, i32) {
    %c0_i32 = arith.constant 0 : i32
    %c0_i32_0 = arith.constant 0 : i32
    %c0_i32_1 = arith.constant 0 : i32
    return %arg0, %c0_i32, %c0_i32_0 : i32, i32, i32
  }
}

module attributes {stable_mosaic.version = 11 : i64} {
  func.func @conv_block_kernel(%arg0: i32, %arg1: memref<1x72x256xbf16, #tpu.memory_space<vmem>>, %arg2: memref<3x128x128xbf16, #tpu.memory_space<vmem>>, %arg3: memref<1x128xf32, #tpu.memory_space<vmem>>, %arg4: memref<128x128xbf16, #tpu.memory_space<vmem>>, %arg5: memref<1x128xf32, #tpu.memory_space<vmem>>, %arg6: memref<1x64x128xbf16, #tpu.memory_space<vmem>>) attributes {dimension_semantics = [#tpu.dimension_semantics<parallel>], iteration_bounds = array<i64: 2>, scalar_prefetch = 0 : i64, scratch_operands = 0 : i64, tpu.core_type = #tpu.core_type<tc>, window_params = [{transform_indices = @transform_0, window_bounds = array<i64: 1, 72, 256>}, {pipeline_mode = #tpu.pipeline_mode<synchronous>, transform_indices = @transform_1, window_bounds = array<i64: 3, 128, 128>}, {pipeline_mode = #tpu.pipeline_mode<synchronous>, transform_indices = @transform_2, window_bounds = array<i64: 1, 128>}, {pipeline_mode = #tpu.pipeline_mode<synchronous>, transform_indices = @transform_3, window_bounds = array<i64: 128, 128>}, {pipeline_mode = #tpu.pipeline_mode<synchronous>, transform_indices = @transform_4, window_bounds = array<i64: 1, 128>}, {transform_indices = @transform_5, window_bounds = array<i64: 1, 64, 128>}]} {
    %c0 = arith.constant 0 : index
    %c0_0 = arith.constant 0 : index
    %c0_1 = arith.constant 0 : index
    %0 = vector.load %arg1[%c0, %c0_0, %c0_1] : memref<1x72x256xbf16, #tpu.memory_space<vmem>>, vector<1x64x128xbf16>
    %1 = vector.shape_cast %0 : vector<1x64x128xbf16> to vector<64x128xbf16>
    %c0_2 = arith.constant 0 : index
    %c0_3 = arith.constant 0 : index
    %c0_4 = arith.constant 0 : index
    %2 = vector.load %arg2[%c0_2, %c0_3, %c0_4] : memref<3x128x128xbf16, #tpu.memory_space<vmem>>, vector<1x128x128xbf16>
    %3 = vector.shape_cast %2 : vector<1x128x128xbf16> to vector<128x128xbf16>
    %cst = arith.constant dense<0.000000e+00> : vector<64x128xf32>
    %4 = tpu.matmul %1, %3, %cst {dimension_numbers = #tpu.dot_dimension_numbers<[1], [0], [0], [1], [0, 0, 1, 1], [], []>} : vector<64x128xbf16>, vector<128x128xbf16>, vector<64x128xf32> -> vector<64x128xf32>
    %c0_5 = arith.constant 0 : index
    %c0_6 = arith.constant 0 : index
    %c128 = arith.constant 128 : index
    %5 = vector.load %arg1[%c0_5, %c0_6, %c128] : memref<1x72x256xbf16, #tpu.memory_space<vmem>>, vector<1x64x128xbf16>
    %6 = vector.shape_cast %5 : vector<1x64x128xbf16> to vector<64x128xbf16>
    %c1 = arith.constant 1 : index
    %c0_7 = arith.constant 0 : index
    %c0_8 = arith.constant 0 : index
    %7 = vector.load %arg2[%c1, %c0_7, %c0_8] : memref<3x128x128xbf16, #tpu.memory_space<vmem>>, vector<1x128x128xbf16>
    %8 = vector.shape_cast %7 : vector<1x128x128xbf16> to vector<128x128xbf16>
    %cst_9 = arith.constant dense<0.000000e+00> : vector<64x128xf32>
    %9 = tpu.matmul %6, %8, %cst_9 {dimension_numbers = #tpu.dot_dimension_numbers<[1], [0], [0], [1], [0, 0, 1, 1], [], []>} : vector<64x128xbf16>, vector<128x128xbf16>, vector<64x128xf32> -> vector<64x128xf32>
    %10 = arith.addf %4, %9 : vector<64x128xf32>
    %c0_10 = arith.constant 0 : index
    %c8 = arith.constant 8 : index
    %c0_11 = arith.constant 0 : index
    %11 = vector.load %arg1[%c0_10, %c8, %c0_11] : memref<1x72x256xbf16, #tpu.memory_space<vmem>>, vector<1x64x128xbf16>
    %12 = vector.shape_cast %11 : vector<1x64x128xbf16> to vector<64x128xbf16>
    %c2 = arith.constant 2 : index
    %c0_12 = arith.constant 0 : index
    %c0_13 = arith.constant 0 : index
    %13 = vector.load %arg2[%c2, %c0_12, %c0_13] : memref<3x128x128xbf16, #tpu.memory_space<vmem>>, vector<1x128x128xbf16>
    %14 = vector.shape_cast %13 : vector<1x128x128xbf16> to vector<128x128xbf16>
    %cst_14 = arith.constant dense<0.000000e+00> : vector<64x128xf32>
    %15 = tpu.matmul %12, %14, %cst_14 {dimension_numbers = #tpu.dot_dimension_numbers<[1], [0], [0], [1], [0, 0, 1, 1], [], []>} : vector<64x128xbf16>, vector<128x128xbf16>, vector<64x128xf32> -> vector<64x128xf32>
    %16 = arith.addf %10, %15 : vector<64x128xf32>
    %c0_15 = arith.constant 0 : index
    %c0_16 = arith.constant 0 : index
    %17 = vector.load %arg3[%c0_15, %c0_16] : memref<1x128xf32, #tpu.memory_space<vmem>>, vector<1x128xf32>
    %18 = vector.broadcast %17 : vector<1x128xf32> to vector<64x128xf32>
    %19 = arith.addf %16, %18 : vector<64x128xf32>
    %20 = arith.negf %19 : vector<64x128xf32>
    %21 = math.exp %20 : vector<64x128xf32>
    %cst_17 = arith.constant 1.000000e+00 : f32
    %22 = vector.broadcast %cst_17 : f32 to vector<64x128xf32>
    %23 = arith.addf %22, %21 : vector<64x128xf32>
    %24 = arith.divf %22, %23 : vector<64x128xf32>
    %25 = arith.mulf %19, %24 : vector<64x128xf32>
    %26 = arith.truncf %25 : vector<64x128xf32> to vector<64x128xbf16>
    %c0_18 = arith.constant 0 : index
    %c0_19 = arith.constant 0 : index
    %27 = vector.load %arg4[%c0_18, %c0_19] : memref<128x128xbf16, #tpu.memory_space<vmem>>, vector<128x128xbf16>
    %cst_20 = arith.constant dense<0.000000e+00> : vector<64x128xf32>
    %28 = tpu.matmul %26, %27, %cst_20 {dimension_numbers = #tpu.dot_dimension_numbers<[1], [0], [0], [1], [0, 0, 1, 1], [], []>} : vector<64x128xbf16>, vector<128x128xbf16>, vector<64x128xf32> -> vector<64x128xf32>
    %c0_21 = arith.constant 0 : index
    %c0_22 = arith.constant 0 : index
    %29 = vector.load %arg5[%c0_21, %c0_22] : memref<1x128xf32, #tpu.memory_space<vmem>>, vector<1x128xf32>
    %30 = vector.broadcast %29 : vector<1x128xf32> to vector<64x128xf32>
    %31 = arith.addf %28, %30 : vector<64x128xf32>
    %32 = arith.truncf %31 : vector<64x128xf32> to vector<64x128xbf16>
    %c0_23 = arith.constant 0 : index
    %c0_24 = arith.constant 0 : index
    %c0_25 = arith.constant 0 : index
    %33 = vector.load %arg6[%c0_23, %c0_24, %c0_25] : memref<1x64x128xbf16, #tpu.memory_space<vmem>>, vector<1x64x128xbf16>
    %34 = vector.shape_cast %33 : vector<1x64x128xbf16> to vector<64x128xbf16>
    %35 = vector.shape_cast %32 : vector<64x128xbf16> to vector<1x64x128xbf16>
    tpu.vector_store %arg6[%c0_23, %c0_24, %c0_25], %35 {strides = array<i32>} : memref<1x64x128xbf16, #tpu.memory_space<vmem>>, vector<1x64x128xbf16>,
    return
  }
  func.func @transform_0(%arg0: i32) -> (i32, i32, i32) {
    %c0_i32 = arith.constant 0 : i32
    %c0_i32_0 = arith.constant 0 : i32
    %c0_i32_1 = arith.constant 0 : i32
    return %arg0, %c0_i32, %c0_i32_0 : i32, i32, i32
  }
  func.func @transform_1(%arg0: i32) -> (i32, i32, i32) {
    %c0_i32 = arith.constant 0 : i32
    %c0_i32_0 = arith.constant 0 : i32
    %c0_i32_1 = arith.constant 0 : i32
    %c0_i32_2 = arith.constant 0 : i32
    return %c0_i32, %c0_i32_0, %c0_i32_1 : i32, i32, i32
  }
  func.func @transform_2(%arg0: i32) -> (i32, i32) {
    %c0_i32 = arith.constant 0 : i32
    %c0_i32_0 = arith.constant 0 : i32
    %c0_i32_1 = arith.constant 0 : i32
    return %c0_i32, %c0_i32_0 : i32, i32
  }
  func.func @transform_3(%arg0: i32) -> (i32, i32) {
    %c0_i32 = arith.constant 0 : i32
    %c0_i32_0 = arith.constant 0 : i32
    %c0_i32_1 = arith.constant 0 : i32
    return %c0_i32, %c0_i32_0 : i32, i32
  }
  func.func @transform_4(%arg0: i32) -> (i32, i32) {
    %c0_i32 = arith.constant 0 : i32
    %c0_i32_0 = arith.constant 0 : i32
    %c0_i32_1 = arith.constant 0 : i32
    return %c0_i32, %c0_i32_0 : i32, i32
  }
  func.func @transform_5(%arg0: i32) -> (i32, i32, i32) {
    %c0_i32 = arith.constant 0 : i32
    %c0_i32_0 = arith.constant 0 : i32
    %c0_i32_1 = arith.constant 0 : i32
    return %arg0, %c0_i32, %c0_i32_0 : i32, i32, i32
  }
}

module attributes {stable_mosaic.version = 11 : i64} {
  func.func @conv_block_kernel(%arg0: i32, %arg1: memref<2x20x256xbf16, #tpu.memory_space<vmem>>, %arg2: memref<3x128x128xbf16, #tpu.memory_space<vmem>>, %arg3: memref<1x128xf32, #tpu.memory_space<vmem>>, %arg4: memref<128x128xbf16, #tpu.memory_space<vmem>>, %arg5: memref<1x128xf32, #tpu.memory_space<vmem>>, %arg6: memref<2x16x128xbf16, #tpu.memory_space<vmem>>) attributes {dimension_semantics = [#tpu.dimension_semantics<arbitrary>], iteration_bounds = array<i64: 1>, scalar_prefetch = 0 : i64, scratch_operands = 0 : i64, tpu.core_type = #tpu.core_type<tc>, window_params = [{pipeline_mode = #tpu.pipeline_mode<synchronous>, transform_indices = @transform_0, window_bounds = array<i64: 2, 20, 256>}, {pipeline_mode = #tpu.pipeline_mode<synchronous>, transform_indices = @transform_1, window_bounds = array<i64: 3, 128, 128>}, {pipeline_mode = #tpu.pipeline_mode<synchronous>, transform_indices = @transform_2, window_bounds = array<i64: 1, 128>}, {pipeline_mode = #tpu.pipeline_mode<synchronous>, transform_indices = @transform_3, window_bounds = array<i64: 128, 128>}, {pipeline_mode = #tpu.pipeline_mode<synchronous>, transform_indices = @transform_4, window_bounds = array<i64: 1, 128>}, {pipeline_mode = #tpu.pipeline_mode<synchronous>, transform_indices = @transform_5, window_bounds = array<i64: 2, 16, 128>}]} {
    %c0 = arith.constant 0 : index
    %c0_0 = arith.constant 0 : index
    %c0_1 = arith.constant 0 : index
    %0 = vector.load %arg1[%c0, %c0_0, %c0_1] : memref<2x20x256xbf16, #tpu.memory_space<vmem>>, vector<1x16x128xbf16>
    %1 = vector.shape_cast %0 : vector<1x16x128xbf16> to vector<16x128xbf16>
    %c1 = arith.constant 1 : index
    %c0_2 = arith.constant 0 : index
    %c0_3 = arith.constant 0 : index
    %2 = vector.load %arg1[%c1, %c0_2, %c0_3] : memref<2x20x256xbf16, #tpu.memory_space<vmem>>, vector<1x16x128xbf16>
    %3 = vector.shape_cast %2 : vector<1x16x128xbf16> to vector<16x128xbf16>
    %4 = tpu.concatenate %1, %3 in 0 : vector<16x128xbf16>, vector<16x128xbf16> -> vector<32x128xbf16>
    %c0_4 = arith.constant 0 : index
    %c0_5 = arith.constant 0 : index
    %c0_6 = arith.constant 0 : index
    %5 = vector.load %arg2[%c0_4, %c0_5, %c0_6] : memref<3x128x128xbf16, #tpu.memory_space<vmem>>, vector<1x128x128xbf16>
    %6 = vector.shape_cast %5 : vector<1x128x128xbf16> to vector<128x128xbf16>
    %cst = arith.constant dense<0.000000e+00> : vector<32x128xf32>
    %7 = tpu.matmul %4, %6, %cst {dimension_numbers = #tpu.dot_dimension_numbers<[1], [0], [0], [1], [0, 0, 1, 1], [], []>} : vector<32x128xbf16>, vector<128x128xbf16>, vector<32x128xf32> -> vector<32x128xf32>
    %c0_7 = arith.constant 0 : index
    %c0_8 = arith.constant 0 : index
    %c128 = arith.constant 128 : index
    %8 = vector.load %arg1[%c0_7, %c0_8, %c128] : memref<2x20x256xbf16, #tpu.memory_space<vmem>>, vector<1x16x128xbf16>
    %9 = vector.shape_cast %8 : vector<1x16x128xbf16> to vector<16x128xbf16>
    %c1_9 = arith.constant 1 : index
    %c0_10 = arith.constant 0 : index
    %c128_11 = arith.constant 128 : index
    %10 = vector.load %arg1[%c1_9, %c0_10, %c128_11] : memref<2x20x256xbf16, #tpu.memory_space<vmem>>, vector<1x16x128xbf16>
    %11 = vector.shape_cast %10 : vector<1x16x128xbf16> to vector<16x128xbf16>
    %12 = tpu.concatenate %9, %11 in 0 : vector<16x128xbf16>, vector<16x128xbf16> -> vector<32x128xbf16>
    %c1_12 = arith.constant 1 : index
    %c0_13 = arith.constant 0 : index
    %c0_14 = arith.constant 0 : index
    %13 = vector.load %arg2[%c1_12, %c0_13, %c0_14] : memref<3x128x128xbf16, #tpu.memory_space<vmem>>, vector<1x128x128xbf16>
    %14 = vector.shape_cast %13 : vector<1x128x128xbf16> to vector<128x128xbf16>
    %cst_15 = arith.constant dense<0.000000e+00> : vector<32x128xf32>
    %15 = tpu.matmul %12, %14, %cst_15 {dimension_numbers = #tpu.dot_dimension_numbers<[1], [0], [0], [1], [0, 0, 1, 1], [], []>} : vector<32x128xbf16>, vector<128x128xbf16>, vector<32x128xf32> -> vector<32x128xf32>
    %16 = arith.addf %7, %15 : vector<32x128xf32>
    %c0_16 = arith.constant 0 : index
    %c4 = arith.constant 4 : index
    %c0_17 = arith.constant 0 : index
    %17 = vector.load %arg1[%c0_16, %c4, %c0_17] : memref<2x20x256xbf16, #tpu.memory_space<vmem>>, vector<1x16x128xbf16>
    %18 = vector.shape_cast %17 : vector<1x16x128xbf16> to vector<16x128xbf16>
    %c1_18 = arith.constant 1 : index
    %c4_19 = arith.constant 4 : index
    %c0_20 = arith.constant 0 : index
    %19 = vector.load %arg1[%c1_18, %c4_19, %c0_20] : memref<2x20x256xbf16, #tpu.memory_space<vmem>>, vector<1x16x128xbf16>
    %20 = vector.shape_cast %19 : vector<1x16x128xbf16> to vector<16x128xbf16>
    %21 = tpu.concatenate %18, %20 in 0 : vector<16x128xbf16>, vector<16x128xbf16> -> vector<32x128xbf16>
    %c2 = arith.constant 2 : index
    %c0_21 = arith.constant 0 : index
    %c0_22 = arith.constant 0 : index
    %22 = vector.load %arg2[%c2, %c0_21, %c0_22] : memref<3x128x128xbf16, #tpu.memory_space<vmem>>, vector<1x128x128xbf16>
    %23 = vector.shape_cast %22 : vector<1x128x128xbf16> to vector<128x128xbf16>
    %cst_23 = arith.constant dense<0.000000e+00> : vector<32x128xf32>
    %24 = tpu.matmul %21, %23, %cst_23 {dimension_numbers = #tpu.dot_dimension_numbers<[1], [0], [0], [1], [0, 0, 1, 1], [], []>} : vector<32x128xbf16>, vector<128x128xbf16>, vector<32x128xf32> -> vector<32x128xf32>
    %25 = arith.addf %16, %24 : vector<32x128xf32>
    %c0_24 = arith.constant 0 : index
    %c0_25 = arith.constant 0 : index
    %26 = vector.load %arg3[%c0_24, %c0_25] : memref<1x128xf32, #tpu.memory_space<vmem>>, vector<1x128xf32>
    %27 = vector.broadcast %26 : vector<1x128xf32> to vector<32x128xf32>
    %28 = arith.addf %25, %27 : vector<32x128xf32>
    %29 = arith.negf %28 : vector<32x128xf32>
    %30 = math.exp %29 : vector<32x128xf32>
    %cst_26 = arith.constant 1.000000e+00 : f32
    %31 = vector.broadcast %cst_26 : f32 to vector<32x128xf32>
    %32 = arith.addf %31, %30 : vector<32x128xf32>
    %33 = arith.divf %31, %32 : vector<32x128xf32>
    %34 = arith.mulf %28, %33 : vector<32x128xf32>
    %35 = arith.truncf %34 : vector<32x128xf32> to vector<32x128xbf16>
    %c0_27 = arith.constant 0 : index
    %c0_28 = arith.constant 0 : index
    %36 = vector.load %arg4[%c0_27, %c0_28] : memref<128x128xbf16, #tpu.memory_space<vmem>>, vector<128x128xbf16>
    %cst_29 = arith.constant dense<0.000000e+00> : vector<32x128xf32>
    %37 = tpu.matmul %35, %36, %cst_29 {dimension_numbers = #tpu.dot_dimension_numbers<[1], [0], [0], [1], [0, 0, 1, 1], [], []>} : vector<32x128xbf16>, vector<128x128xbf16>, vector<32x128xf32> -> vector<32x128xf32>
    %c0_30 = arith.constant 0 : index
    %c0_31 = arith.constant 0 : index
    %38 = vector.load %arg5[%c0_30, %c0_31] : memref<1x128xf32, #tpu.memory_space<vmem>>, vector<1x128xf32>
    %39 = vector.broadcast %38 : vector<1x128xf32> to vector<32x128xf32>
    %40 = arith.addf %37, %39 : vector<32x128xf32>
    %41 = arith.truncf %40 : vector<32x128xf32> to vector<32x128xbf16>
    %42 = vector.extract_strided_slice %41 {offsets = [0, 0], sizes = [16, 128], strides = [1, 1]} : vector<32x128xbf16> to vector<16x128xbf16>
    %c0_32 = arith.constant 0 : index
    %c0_33 = arith.constant 0 : index
    %c0_34 = arith.constant 0 : index
    %43 = vector.load %arg6[%c0_32, %c0_33, %c0_34] : memref<2x16x128xbf16, #tpu.memory_space<vmem>>, vector<1x16x128xbf16>
    %44 = vector.shape_cast %43 : vector<1x16x128xbf16> to vector<16x128xbf16>
    %45 = vector.shape_cast %42 : vector<16x128xbf16> to vector<1x16x128xbf16>
    tpu.vector_store %arg6[%c0_32, %c0_33, %c0_34], %45 {strides = array<i32>} : memref<2x16x128xbf16, #tpu.memory_space<vmem>>, vector<1x16x128xbf16>,
    %46 = vector.extract_strided_slice %41 {offsets = [16, 0], sizes = [16, 128], strides = [1, 1]} : vector<32x128xbf16> to vector<16x128xbf16>
    %c1_35 = arith.constant 1 : index
    %c0_36 = arith.constant 0 : index
    %c0_37 = arith.constant 0 : index
    %47 = vector.load %arg6[%c1_35, %c0_36, %c0_37] : memref<2x16x128xbf16, #tpu.memory_space<vmem>>, vector<1x16x128xbf16>
    %48 = vector.shape_cast %47 : vector<1x16x128xbf16> to vector<16x128xbf16>
    %49 = vector.shape_cast %46 : vector<16x128xbf16> to vector<1x16x128xbf16>
    tpu.vector_store %arg6[%c1_35, %c0_36, %c0_37], %49 {strides = array<i32>} : memref<2x16x128xbf16, #tpu.memory_space<vmem>>, vector<1x16x128xbf16>,
    return
  }
  func.func @transform_0(%arg0: i32) -> (i32, i32, i32) {
    %c0_i32 = arith.constant 0 : i32
    %c0_i32_0 = arith.constant 0 : i32
    %c0_i32_1 = arith.constant 0 : i32
    %c0_i32_2 = arith.constant 0 : i32
    return %c0_i32, %c0_i32_0, %c0_i32_1 : i32, i32, i32
  }
  func.func @transform_1(%arg0: i32) -> (i32, i32, i32) {
    %c0_i32 = arith.constant 0 : i32
    %c0_i32_0 = arith.constant 0 : i32
    %c0_i32_1 = arith.constant 0 : i32
    %c0_i32_2 = arith.constant 0 : i32
    return %c0_i32, %c0_i32_0, %c0_i32_1 : i32, i32, i32
  }
  func.func @transform_2(%arg0: i32) -> (i32, i32) {
    %c0_i32 = arith.constant 0 : i32
    %c0_i32_0 = arith.constant 0 : i32
    %c0_i32_1 = arith.constant 0 : i32
    return %c0_i32, %c0_i32_0 : i32, i32
  }
  func.func @transform_3(%arg0: i32) -> (i32, i32) {
    %c0_i32 = arith.constant 0 : i32
    %c0_i32_0 = arith.constant 0 : i32
    %c0_i32_1 = arith.constant 0 : i32
    return %c0_i32, %c0_i32_0 : i32, i32
  }
  func.func @transform_4(%arg0: i32) -> (i32, i32) {
    %c0_i32 = arith.constant 0 : i32
    %c0_i32_0 = arith.constant 0 : i32
    %c0_i32_1 = arith.constant 0 : i32
    return %c0_i32, %c0_i32_0 : i32, i32
  }
  func.func @transform_5(%arg0: i32) -> (i32, i32, i32) {
    %c0_i32 = arith.constant 0 : i32
    %c0_i32_0 = arith.constant 0 : i32
    %c0_i32_1 = arith.constant 0 : i32
    %c0_i32_2 = arith.constant 0 : i32
    return %c0_i32, %c0_i32_0, %c0_i32_1 : i32, i32, i32
  }
}

module attributes {stable_mosaic.version = 11 : i64} {
  func.func @conv_block_kernel(%arg0: i32, %arg1: memref<2x24x256xbf16, #tpu.memory_space<vmem>>, %arg2: memref<3x256x128xbf16, #tpu.memory_space<vmem>>, %arg3: memref<1x128xf32, #tpu.memory_space<vmem>>, %arg4: memref<128x128xbf16, #tpu.memory_space<vmem>>, %arg5: memref<1x128xf32, #tpu.memory_space<vmem>>, %arg6: memref<2x16x128xbf16, #tpu.memory_space<vmem>>) attributes {dimension_semantics = [#tpu.dimension_semantics<arbitrary>], iteration_bounds = array<i64: 1>, scalar_prefetch = 0 : i64, scratch_operands = 0 : i64, tpu.core_type = #tpu.core_type<tc>, window_params = [{pipeline_mode = #tpu.pipeline_mode<synchronous>, transform_indices = @transform_0, window_bounds = array<i64: 2, 24, 256>}, {pipeline_mode = #tpu.pipeline_mode<synchronous>, transform_indices = @transform_1, window_bounds = array<i64: 3, 256, 128>}, {pipeline_mode = #tpu.pipeline_mode<synchronous>, transform_indices = @transform_2, window_bounds = array<i64: 1, 128>}, {pipeline_mode = #tpu.pipeline_mode<synchronous>, transform_indices = @transform_3, window_bounds = array<i64: 128, 128>}, {pipeline_mode = #tpu.pipeline_mode<synchronous>, transform_indices = @transform_4, window_bounds = array<i64: 1, 128>}, {pipeline_mode = #tpu.pipeline_mode<synchronous>, transform_indices = @transform_5, window_bounds = array<i64: 2, 16, 128>}]} {
    %c0 = arith.constant 0 : index
    %c0_0 = arith.constant 0 : index
    %c0_1 = arith.constant 0 : index
    %0 = vector.load %arg1[%c0, %c0_0, %c0_1] : memref<2x24x256xbf16, #tpu.memory_space<vmem>>, vector<1x16x256xbf16>
    %1 = vector.shape_cast %0 : vector<1x16x256xbf16> to vector<16x256xbf16>
    %c1 = arith.constant 1 : index
    %c0_2 = arith.constant 0 : index
    %c0_3 = arith.constant 0 : index
    %2 = vector.load %arg1[%c1, %c0_2, %c0_3] : memref<2x24x256xbf16, #tpu.memory_space<vmem>>, vector<1x16x256xbf16>
    %3 = vector.shape_cast %2 : vector<1x16x256xbf16> to vector<16x256xbf16>
    %4 = tpu.concatenate %1, %3 in 0 : vector<16x256xbf16>, vector<16x256xbf16> -> vector<32x256xbf16>
    %c0_4 = arith.constant 0 : index
    %c0_5 = arith.constant 0 : index
    %c0_6 = arith.constant 0 : index
    %5 = vector.load %arg2[%c0_4, %c0_5, %c0_6] : memref<3x256x128xbf16, #tpu.memory_space<vmem>>, vector<1x256x128xbf16>
    %6 = vector.shape_cast %5 : vector<1x256x128xbf16> to vector<256x128xbf16>
    %cst = arith.constant dense<0.000000e+00> : vector<32x128xf32>
    %7 = tpu.matmul %4, %6, %cst {dimension_numbers = #tpu.dot_dimension_numbers<[1], [0], [0], [1], [0, 0, 1, 1], [], []>} : vector<32x256xbf16>, vector<256x128xbf16>, vector<32x128xf32> -> vector<32x128xf32>
    %c0_7 = arith.constant 0 : index
    %c4 = arith.constant 4 : index
    %c0_8 = arith.constant 0 : index
    %8 = vector.load %arg1[%c0_7, %c4, %c0_8] : memref<2x24x256xbf16, #tpu.memory_space<vmem>>, vector<1x16x256xbf16>
    %9 = vector.shape_cast %8 : vector<1x16x256xbf16> to vector<16x256xbf16>
    %c1_9 = arith.constant 1 : index
    %c4_10 = arith.constant 4 : index
    %c0_11 = arith.constant 0 : index
    %10 = vector.load %arg1[%c1_9, %c4_10, %c0_11] : memref<2x24x256xbf16, #tpu.memory_space<vmem>>, vector<1x16x256xbf16>
    %11 = vector.shape_cast %10 : vector<1x16x256xbf16> to vector<16x256xbf16>
    %12 = tpu.concatenate %9, %11 in 0 : vector<16x256xbf16>, vector<16x256xbf16> -> vector<32x256xbf16>
    %c1_12 = arith.constant 1 : index
    %c0_13 = arith.constant 0 : index
    %c0_14 = arith.constant 0 : index
    %13 = vector.load %arg2[%c1_12, %c0_13, %c0_14] : memref<3x256x128xbf16, #tpu.memory_space<vmem>>, vector<1x256x128xbf16>
    %14 = vector.shape_cast %13 : vector<1x256x128xbf16> to vector<256x128xbf16>
    %cst_15 = arith.constant dense<0.000000e+00> : vector<32x128xf32>
    %15 = tpu.matmul %12, %14, %cst_15 {dimension_numbers = #tpu.dot_dimension_numbers<[1], [0], [0], [1], [0, 0, 1, 1], [], []>} : vector<32x256xbf16>, vector<256x128xbf16>, vector<32x128xf32> -> vector<32x128xf32>
    %16 = arith.addf %7, %15 : vector<32x128xf32>
    %c0_16 = arith.constant 0 : index
    %c8 = arith.constant 8 : index
    %c0_17 = arith.constant 0 : index
    %17 = vector.load %arg1[%c0_16, %c8, %c0_17] : memref<2x24x256xbf16, #tpu.memory_space<vmem>>, vector<1x16x256xbf16>
    %18 = vector.shape_cast %17 : vector<1x16x256xbf16> to vector<16x256xbf16>
    %c1_18 = arith.constant 1 : index
    %c8_19 = arith.constant 8 : index
    %c0_20 = arith.constant 0 : index
    %19 = vector.load %arg1[%c1_18, %c8_19, %c0_20] : memref<2x24x256xbf16, #tpu.memory_space<vmem>>, vector<1x16x256xbf16>
    %20 = vector.shape_cast %19 : vector<1x16x256xbf16> to vector<16x256xbf16>
    %21 = tpu.concatenate %18, %20 in 0 : vector<16x256xbf16>, vector<16x256xbf16> -> vector<32x256xbf16>
    %c2 = arith.constant 2 : index
    %c0_21 = arith.constant 0 : index
    %c0_22 = arith.constant 0 : index
    %22 = vector.load %arg2[%c2, %c0_21, %c0_22] : memref<3x256x128xbf16, #tpu.memory_space<vmem>>, vector<1x256x128xbf16>
    %23 = vector.shape_cast %22 : vector<1x256x128xbf16> to vector<256x128xbf16>
    %cst_23 = arith.constant dense<0.000000e+00> : vector<32x128xf32>
    %24 = tpu.matmul %21, %23, %cst_23 {dimension_numbers = #tpu.dot_dimension_numbers<[1], [0], [0], [1], [0, 0, 1, 1], [], []>} : vector<32x256xbf16>, vector<256x128xbf16>, vector<32x128xf32> -> vector<32x128xf32>
    %25 = arith.addf %16, %24 : vector<32x128xf32>
    %c0_24 = arith.constant 0 : index
    %c0_25 = arith.constant 0 : index
    %26 = vector.load %arg3[%c0_24, %c0_25] : memref<1x128xf32, #tpu.memory_space<vmem>>, vector<1x128xf32>
    %27 = vector.broadcast %26 : vector<1x128xf32> to vector<32x128xf32>
    %28 = arith.addf %25, %27 : vector<32x128xf32>
    %29 = arith.negf %28 : vector<32x128xf32>
    %30 = math.exp %29 : vector<32x128xf32>
    %cst_26 = arith.constant 1.000000e+00 : f32
    %31 = vector.broadcast %cst_26 : f32 to vector<32x128xf32>
    %32 = arith.addf %31, %30 : vector<32x128xf32>
    %33 = arith.divf %31, %32 : vector<32x128xf32>
    %34 = arith.mulf %28, %33 : vector<32x128xf32>
    %35 = arith.truncf %34 : vector<32x128xf32> to vector<32x128xbf16>
    %c0_27 = arith.constant 0 : index
    %c0_28 = arith.constant 0 : index
    %36 = vector.load %arg4[%c0_27, %c0_28] : memref<128x128xbf16, #tpu.memory_space<vmem>>, vector<128x128xbf16>
    %cst_29 = arith.constant dense<0.000000e+00> : vector<32x128xf32>
    %37 = tpu.matmul %35, %36, %cst_29 {dimension_numbers = #tpu.dot_dimension_numbers<[1], [0], [0], [1], [0, 0, 1, 1], [], []>} : vector<32x128xbf16>, vector<128x128xbf16>, vector<32x128xf32> -> vector<32x128xf32>
    %c0_30 = arith.constant 0 : index
    %c0_31 = arith.constant 0 : index
    %38 = vector.load %arg5[%c0_30, %c0_31] : memref<1x128xf32, #tpu.memory_space<vmem>>, vector<1x128xf32>
    %39 = vector.broadcast %38 : vector<1x128xf32> to vector<32x128xf32>
    %40 = arith.addf %37, %39 : vector<32x128xf32>
    %41 = arith.truncf %40 : vector<32x128xf32> to vector<32x128xbf16>
    %42 = vector.extract_strided_slice %41 {offsets = [0, 0], sizes = [16, 128], strides = [1, 1]} : vector<32x128xbf16> to vector<16x128xbf16>
    %c0_32 = arith.constant 0 : index
    %c0_33 = arith.constant 0 : index
    %c0_34 = arith.constant 0 : index
    %43 = vector.load %arg6[%c0_32, %c0_33, %c0_34] : memref<2x16x128xbf16, #tpu.memory_space<vmem>>, vector<1x16x128xbf16>
    %44 = vector.shape_cast %43 : vector<1x16x128xbf16> to vector<16x128xbf16>
    %45 = vector.shape_cast %42 : vector<16x128xbf16> to vector<1x16x128xbf16>
    tpu.vector_store %arg6[%c0_32, %c0_33, %c0_34], %45 {strides = array<i32>} : memref<2x16x128xbf16, #tpu.memory_space<vmem>>, vector<1x16x128xbf16>,
    %46 = vector.extract_strided_slice %41 {offsets = [16, 0], sizes = [16, 128], strides = [1, 1]} : vector<32x128xbf16> to vector<16x128xbf16>
    %c1_35 = arith.constant 1 : index
    %c0_36 = arith.constant 0 : index
    %c0_37 = arith.constant 0 : index
    %47 = vector.load %arg6[%c1_35, %c0_36, %c0_37] : memref<2x16x128xbf16, #tpu.memory_space<vmem>>, vector<1x16x128xbf16>
    %48 = vector.shape_cast %47 : vector<1x16x128xbf16> to vector<16x128xbf16>
    %49 = vector.shape_cast %46 : vector<16x128xbf16> to vector<1x16x128xbf16>
    tpu.vector_store %arg6[%c1_35, %c0_36, %c0_37], %49 {strides = array<i32>} : memref<2x16x128xbf16, #tpu.memory_space<vmem>>, vector<1x16x128xbf16>,
    return
  }
  func.func @transform_0(%arg0: i32) -> (i32, i32, i32) {
    %c0_i32 = arith.constant 0 : i32
    %c0_i32_0 = arith.constant 0 : i32
    %c0_i32_1 = arith.constant 0 : i32
    %c0_i32_2 = arith.constant 0 : i32
    return %c0_i32, %c0_i32_0, %c0_i32_1 : i32, i32, i32
  }
  func.func @transform_1(%arg0: i32) -> (i32, i32, i32) {
    %c0_i32 = arith.constant 0 : i32
    %c0_i32_0 = arith.constant 0 : i32
    %c0_i32_1 = arith.constant 0 : i32
    %c0_i32_2 = arith.constant 0 : i32
    return %c0_i32, %c0_i32_0, %c0_i32_1 : i32, i32, i32
  }
  func.func @transform_2(%arg0: i32) -> (i32, i32) {
    %c0_i32 = arith.constant 0 : i32
    %c0_i32_0 = arith.constant 0 : i32
    %c0_i32_1 = arith.constant 0 : i32
    return %c0_i32, %c0_i32_0 : i32, i32
  }
  func.func @transform_3(%arg0: i32) -> (i32, i32) {
    %c0_i32 = arith.constant 0 : i32
    %c0_i32_0 = arith.constant 0 : i32
    %c0_i32_1 = arith.constant 0 : i32
    return %c0_i32, %c0_i32_0 : i32, i32
  }
  func.func @transform_4(%arg0: i32) -> (i32, i32) {
    %c0_i32 = arith.constant 0 : i32
    %c0_i32_0 = arith.constant 0 : i32
    %c0_i32_1 = arith.constant 0 : i32
    return %c0_i32, %c0_i32_0 : i32, i32
  }
  func.func @transform_5(%arg0: i32) -> (i32, i32, i32) {
    %c0_i32 = arith.constant 0 : i32
    %c0_i32_0 = arith.constant 0 : i32
    %c0_i32_1 = arith.constant 0 : i32
    %c0_i32_2 = arith.constant 0 : i32
    return %c0_i32, %c0_i32_0, %c0_i32_1 : i32, i32, i32
  }
}

module attributes {stable_mosaic.version = 11 : i64} {
  func.func @final_block_heads_kernel(%arg0: i32, %arg1: memref<1x6x512xbf16, #tpu.memory_space<vmem>>, %arg2: memref<3x256x128xbf16, #tpu.memory_space<vmem>>, %arg3: memref<1x128xf32, #tpu.memory_space<vmem>>, %arg4: memref<128x128xbf16, #tpu.memory_space<vmem>>, %arg5: memref<1x128xf32, #tpu.memory_space<vmem>>, %arg6: memref<1x64x128xbf16, #tpu.memory_space<vmem>>, %arg7: memref<1x16x128xbf16, #tpu.memory_space<vmem>>, %arg8: memref<1x16x128xbf16, #tpu.memory_space<vmem>>, %arg9: memref<3x128xf32, #tpu.memory_space<vmem>>, %arg10: memref<3x128xf32, #tpu.memory_space<vmem>>, %arg11: memref<4x128xf32, #tpu.memory_space<vmem>>, %arg12: memref<4x1xf32, #tpu.memory_space<vmem>>, %arg13: memref<1x4x1xf32, #tpu.memory_space<vmem>>) attributes {dimension_semantics = [#tpu.dimension_semantics<parallel>], iteration_bounds = array<i64: 2>, scalar_prefetch = 0 : i64, scratch_operands = 0 : i64, tpu.core_type = #tpu.core_type<tc>, window_params = [{transform_indices = @transform_0, window_bounds = array<i64: 1, 6, 512>}, {pipeline_mode = #tpu.pipeline_mode<synchronous>, transform_indices = @transform_1, window_bounds = array<i64: 3, 256, 128>}, {pipeline_mode = #tpu.pipeline_mode<synchronous>, transform_indices = @transform_2, window_bounds = array<i64: 1, 128>}, {pipeline_mode = #tpu.pipeline_mode<synchronous>, transform_indices = @transform_3, window_bounds = array<i64: 128, 128>}, {pipeline_mode = #tpu.pipeline_mode<synchronous>, transform_indices = @transform_4, window_bounds = array<i64: 1, 128>}, {transform_indices = @transform_5, window_bounds = array<i64: 1, 64, 128>}, {transform_indices = @transform_6, window_bounds = array<i64: 1, 16, 128>}, {transform_indices = @transform_7, window_bounds = array<i64: 1, 16, 128>}, {pipeline_mode = #tpu.pipeline_mode<synchronous>, transform_indices = @transform_8, window_bounds = array<i64: 3, 128>}, {pipeline_mode = #tpu.pipeline_mode<synchronous>, transform_indices = @transform_9, window_bounds = array<i64: 3, 128>}, {pipeline_mode = #tpu.pipeline_mode<synchronous>, transform_indices = @transform_10, window_bounds = array<i64: 4, 128>}, {pipeline_mode = #tpu.pipeline_mode<synchronous>, transform_indices = @transform_11, window_bounds = array<i64: 4, 1>}, {transform_indices = @transform_12, window_bounds = array<i64: 1, 4, 1>}]} {
    %c0 = arith.constant 0 : index
    %c0_0 = arith.constant 0 : index
    %c0_1 = arith.constant 0 : index
    %0 = vector.load %arg1[%c0, %c0_0, %c0_1] : memref<1x6x512xbf16, #tpu.memory_space<vmem>>, vector<1x4x256xbf16>
    %1 = vector.shape_cast %0 : vector<1x4x256xbf16> to vector<4x256xbf16>
    %c0_2 = arith.constant 0 : index
    %c0_3 = arith.constant 0 : index
    %c0_4 = arith.constant 0 : index
    %2 = vector.load %arg2[%c0_2, %c0_3, %c0_4] : memref<3x256x128xbf16, #tpu.memory_space<vmem>>, vector<1x256x128xbf16>
    %3 = vector.shape_cast %2 : vector<1x256x128xbf16> to vector<256x128xbf16>
    %cst = arith.constant dense<0.000000e+00> : vector<4x128xf32>
    %4 = tpu.matmul %1, %3, %cst {dimension_numbers = #tpu.dot_dimension_numbers<[1], [0], [0], [1], [0, 0, 1, 1], [], []>} : vector<4x256xbf16>, vector<256x128xbf16>, vector<4x128xf32> -> vector<4x128xf32>
    %c0_5 = arith.constant 0 : index
    %c0_6 = arith.constant 0 : index
    %c256 = arith.constant 256 : index
    %5 = vector.load %arg1[%c0_5, %c0_6, %c256] : memref<1x6x512xbf16, #tpu.memory_space<vmem>>, vector<1x4x256xbf16>
    %6 = vector.shape_cast %5 : vector<1x4x256xbf16> to vector<4x256xbf16>
    %c1 = arith.constant 1 : index
    %c0_7 = arith.constant 0 : index
    %c0_8 = arith.constant 0 : index
    %7 = vector.load %arg2[%c1, %c0_7, %c0_8] : memref<3x256x128xbf16, #tpu.memory_space<vmem>>, vector<1x256x128xbf16>
    %8 = vector.shape_cast %7 : vector<1x256x128xbf16> to vector<256x128xbf16>
    %cst_9 = arith.constant dense<0.000000e+00> : vector<4x128xf32>
    %9 = tpu.matmul %6, %8, %cst_9 {dimension_numbers = #tpu.dot_dimension_numbers<[1], [0], [0], [1], [0, 0, 1, 1], [], []>} : vector<4x256xbf16>, vector<256x128xbf16>, vector<4x128xf32> -> vector<4x128xf32>
    %10 = arith.addf %4, %9 : vector<4x128xf32>
    %c0_10 = arith.constant 0 : index
    %c2 = arith.constant 2 : index
    %c0_11 = arith.constant 0 : index
    %11 = vector.load %arg1[%c0_10, %c2, %c0_11] : memref<1x6x512xbf16, #tpu.memory_space<vmem>>, vector<1x4x256xbf16>
    %12 = vector.shape_cast %11 : vector<1x4x256xbf16> to vector<4x256xbf16>
    %c2_12 = arith.constant 2 : index
    %c0_13 = arith.constant 0 : index
    %c0_14 = arith.constant 0 : index
    %13 = vector.load %arg2[%c2_12, %c0_13, %c0_14] : memref<3x256x128xbf16, #tpu.memory_space<vmem>>, vector<1x256x128xbf16>
    %14 = vector.shape_cast %13 : vector<1x256x128xbf16> to vector<256x128xbf16>
    %cst_15 = arith.constant dense<0.000000e+00> : vector<4x128xf32>
    %15 = tpu.matmul %12, %14, %cst_15 {dimension_numbers = #tpu.dot_dimension_numbers<[1], [0], [0], [1], [0, 0, 1, 1], [], []>} : vector<4x256xbf16>, vector<256x128xbf16>, vector<4x128xf32> -> vector<4x128xf32>
    %16 = arith.addf %10, %15 : vector<4x128xf32>
    %c0_16 = arith.constant 0 : index
    %c0_17 = arith.constant 0 : index
    %17 = vector.load %arg3[%c0_16, %c0_17] : memref<1x128xf32, #tpu.memory_space<vmem>>, vector<1x128xf32>
    %18 = vector.broadcast %17 : vector<1x128xf32> to vector<4x128xf32>
    %19 = arith.addf %16, %18 : vector<4x128xf32>
    %20 = arith.negf %19 : vector<4x128xf32>
    %21 = math.exp %20 : vector<4x128xf32>
    %cst_18 = arith.constant 1.000000e+00 : f32
    %22 = vector.broadcast %cst_18 : f32 to vector<4x128xf32>
    %23 = arith.addf %22, %21 : vector<4x128xf32>
    %24 = arith.divf %22, %23 : vector<4x128xf32>
    %25 = arith.mulf %19, %24 : vector<4x128xf32>
    %26 = arith.truncf %25 : vector<4x128xf32> to vector<4x128xbf16>
    %c0_19 = arith.constant 0 : index
    %c0_20 = arith.constant 0 : index
    %27 = vector.load %arg4[%c0_19, %c0_20] : memref<128x128xbf16, #tpu.memory_space<vmem>>, vector<128x128xbf16>
    %cst_21 = arith.constant dense<0.000000e+00> : vector<4x128xf32>
    %28 = tpu.matmul %26, %27, %cst_21 {dimension_numbers = #tpu.dot_dimension_numbers<[1], [0], [0], [1], [0, 0, 1, 1], [], []>} : vector<4x128xbf16>, vector<128x128xbf16>, vector<4x128xf32> -> vector<4x128xf32>
    %c0_22 = arith.constant 0 : index
    %c0_23 = arith.constant 0 : index
    %29 = vector.load %arg5[%c0_22, %c0_23] : memref<1x128xf32, #tpu.memory_space<vmem>>, vector<1x128xf32>
    %30 = vector.broadcast %29 : vector<1x128xf32> to vector<4x128xf32>
    %31 = arith.addf %28, %30 : vector<4x128xf32>
    %32 = arith.negf %31 : vector<4x128xf32>
    %33 = math.exp %32 : vector<4x128xf32>
    %cst_24 = arith.constant 1.000000e+00 : f32
    %34 = vector.broadcast %cst_24 : f32 to vector<4x128xf32>
    %35 = arith.addf %34, %33 : vector<4x128xf32>
    %36 = arith.divf %34, %35 : vector<4x128xf32>
    %37 = arith.mulf %31, %36 : vector<4x128xf32>
    %cst_25 = arith.constant dense<0.000000e+00> : vector<128xf32>
    %38 = vector.multi_reduction <add>, %37, %cst_25 [0] : vector<4x128xf32> to vector<128xf32>
    %39 = vector.shape_cast %38 : vector<128xf32> to vector<1x128xf32>
    %cst_26 = arith.constant 4.000000e+00 : f32
    %40 = vector.broadcast %cst_26 : f32 to vector<1x128xf32>
    %41 = arith.divf %39, %40 : vector<1x128xf32>
    %c0_27 = arith.constant 0 : index
    %c0_28 = arith.constant 0 : index
    %c0_29 = arith.constant 0 : index
    %42 = vector.load %arg6[%c0_27, %c0_28, %c0_29] : memref<1x64x128xbf16, #tpu.memory_space<vmem>>, vector<1x64x128xbf16>
    %43 = vector.shape_cast %42 : vector<1x64x128xbf16> to vector<64x128xbf16>
    %44 = arith.extf %43 : vector<64x128xbf16> to vector<64x128xf32>
    %c0_30 = arith.constant 0 : index
    %c0_31 = arith.constant 0 : index
    %45 = vector.load %arg9[%c0_30, %c0_31] : memref<3x128xf32, #tpu.memory_space<vmem>>, vector<1x128xf32>
    %46 = vector.broadcast %45 : vector<1x128xf32> to vector<64x128xf32>
    %47 = arith.mulf %44, %46 : vector<64x128xf32>
    %c0_32 = arith.constant 0 : index
    %c0_33 = arith.constant 0 : index
    %48 = vector.load %arg10[%c0_32, %c0_33] : memref<3x128xf32, #tpu.memory_space<vmem>>, vector<1x128xf32>
    %49 = vector.broadcast %48 : vector<1x128xf32> to vector<64x128xf32>
    %50 = arith.addf %47, %49 : vector<64x128xf32>
    %51 = arith.negf %50 : vector<64x128xf32>
    %52 = math.exp %51 : vector<64x128xf32>
    %cst_34 = arith.constant 1.000000e+00 : f32
    %53 = vector.broadcast %cst_34 : f32 to vector<64x128xf32>
    %54 = arith.addf %53, %52 : vector<64x128xf32>
    %55 = arith.divf %53, %54 : vector<64x128xf32>
    %56 = arith.mulf %50, %55 : vector<64x128xf32>
    %cst_35 = arith.constant dense<0.000000e+00> : vector<128xf32>
    %57 = vector.multi_reduction <add>, %56, %cst_35 [0] : vector<64x128xf32> to vector<128xf32>
    %58 = vector.shape_cast %57 : vector<128xf32> to vector<1x128xf32>
    %cst_36 = arith.constant 6.400000e+01 : f32
    %59 = vector.broadcast %cst_36 : f32 to vector<1x128xf32>
    %60 = arith.divf %58, %59 : vector<1x128xf32>
    %c0_37 = arith.constant 0 : index
    %c0_38 = arith.constant 0 : index
    %c0_39 = arith.constant 0 : index
    %61 = vector.load %arg7[%c0_37, %c0_38, %c0_39] : memref<1x16x128xbf16, #tpu.memory_space<vmem>>, vector<1x16x128xbf16>
    %62 = vector.shape_cast %61 : vector<1x16x128xbf16> to vector<16x128xbf16>
    %63 = arith.extf %62 : vector<16x128xbf16> to vector<16x128xf32>
    %c1_40 = arith.constant 1 : index
    %c0_41 = arith.constant 0 : index
    %64 = vector.load %arg9[%c1_40, %c0_41] : memref<3x128xf32, #tpu.memory_space<vmem>>, vector<1x128xf32>
    %65 = vector.broadcast %64 : vector<1x128xf32> to vector<16x128xf32>
    %66 = arith.mulf %63, %65 : vector<16x128xf32>
    %c1_42 = arith.constant 1 : index
    %c0_43 = arith.constant 0 : index
    %67 = vector.load %arg10[%c1_42, %c0_43] : memref<3x128xf32, #tpu.memory_space<vmem>>, vector<1x128xf32>
    %68 = vector.broadcast %67 : vector<1x128xf32> to vector<16x128xf32>
    %69 = arith.addf %66, %68 : vector<16x128xf32>
    %70 = arith.negf %69 : vector<16x128xf32>
    %71 = math.exp %70 : vector<16x128xf32>
    %cst_44 = arith.constant 1.000000e+00 : f32
    %72 = vector.broadcast %cst_44 : f32 to vector<16x128xf32>
    %73 = arith.addf %72, %71 : vector<16x128xf32>
    %74 = arith.divf %72, %73 : vector<16x128xf32>
    %75 = arith.mulf %69, %74 : vector<16x128xf32>
    %cst_45 = arith.constant dense<0.000000e+00> : vector<128xf32>
    %76 = vector.multi_reduction <add>, %75, %cst_45 [0] : vector<16x128xf32> to vector<128xf32>
    %77 = vector.shape_cast %76 : vector<128xf32> to vector<1x128xf32>
    %cst_46 = arith.constant 1.600000e+01 : f32
    %78 = vector.broadcast %cst_46 : f32 to vector<1x128xf32>
    %79 = arith.divf %77, %78 : vector<1x128xf32>
    %c0_47 = arith.constant 0 : index
    %c0_48 = arith.constant 0 : index
    %c0_49 = arith.constant 0 : index
    %80 = vector.load %arg8[%c0_47, %c0_48, %c0_49] : memref<1x16x128xbf16, #tpu.memory_space<vmem>>, vector<1x16x128xbf16>
    %81 = vector.shape_cast %80 : vector<1x16x128xbf16> to vector<16x128xbf16>
    %82 = arith.extf %81 : vector<16x128xbf16> to vector<16x128xf32>
    %c2_50 = arith.constant 2 : index
    %c0_51 = arith.constant 0 : index
    %83 = vector.load %arg9[%c2_50, %c0_51] : memref<3x128xf32, #tpu.memory_space<vmem>>, vector<1x128xf32>
    %84 = vector.broadcast %83 : vector<1x128xf32> to vector<16x128xf32>
    %85 = arith.mulf %82, %84 : vector<16x128xf32>
    %c2_52 = arith.constant 2 : index
    %c0_53 = arith.constant 0 : index
    %86 = vector.load %arg10[%c2_52, %c0_53] : memref<3x128xf32, #tpu.memory_space<vmem>>, vector<1x128xf32>
    %87 = vector.broadcast %86 : vector<1x128xf32> to vector<16x128xf32>
    %88 = arith.addf %85, %87 : vector<16x128xf32>
    %89 = arith.negf %88 : vector<16x128xf32>
    %90 = math.exp %89 : vector<16x128xf32>
    %cst_54 = arith.constant 1.000000e+00 : f32
    %91 = vector.broadcast %cst_54 : f32 to vector<16x128xf32>
    %92 = arith.addf %91, %90 : vector<16x128xf32>
    %93 = arith.divf %91, %92 : vector<16x128xf32>
    %94 = arith.mulf %88, %93 : vector<16x128xf32>
    %cst_55 = arith.constant dense<0.000000e+00> : vector<128xf32>
    %95 = vector.multi_reduction <add>, %94, %cst_55 [0] : vector<16x128xf32> to vector<128xf32>
    %96 = vector.shape_cast %95 : vector<128xf32> to vector<1x128xf32>
    %cst_56 = arith.constant 1.600000e+01 : f32
    %97 = vector.broadcast %cst_56 : f32 to vector<1x128xf32>
    %98 = arith.divf %96, %97 : vector<1x128xf32>
    %99 = tpu.concatenate %41, %60, %79, %98 in 0 : vector<1x128xf32>, vector<1x128xf32>, vector<1x128xf32>, vector<1x128xf32> -> vector<4x128xf32>
    %c0_57 = arith.constant 0 : index
    %c0_58 = arith.constant 0 : index
    %100 = vector.load %arg11[%c0_57, %c0_58] : memref<4x128xf32, #tpu.memory_space<vmem>>, vector<4x128xf32>
    %101 = arith.mulf %99, %100 : vector<4x128xf32>
    %cst_59 = arith.constant dense<0.000000e+00> : vector<4xf32>
    %102 = vector.multi_reduction <add>, %101, %cst_59 [1] : vector<4x128xf32> to vector<4xf32>
    %103 = vector.shape_cast %102 : vector<4xf32> to vector<4x1xf32>
    %c0_60 = arith.constant 0 : index
    %c0_61 = arith.constant 0 : index
    %104 = vector.load %arg12[%c0_60, %c0_61] : memref<4x1xf32, #tpu.memory_space<vmem>>, vector<4x1xf32>
    %105 = arith.addf %103, %104 : vector<4x1xf32>
    %c0_62 = arith.constant 0 : index
    %c0_63 = arith.constant 0 : index
    %c0_64 = arith.constant 0 : index
    %106 = vector.load %arg13[%c0_62, %c0_63, %c0_64] : memref<1x4x1xf32, #tpu.memory_space<vmem>>, vector<1x4x1xf32>
    %107 = vector.shape_cast %106 : vector<1x4x1xf32> to vector<4x1xf32>
    %108 = vector.shape_cast %105 : vector<4x1xf32> to vector<1x4x1xf32>
    tpu.vector_store %arg13[%c0_62, %c0_63, %c0_64], %108 {strides = array<i32>} : memref<1x4x1xf32, #tpu.memory_space<vmem>>, vector<1x4x1xf32>,
    return
  }
  func.func @transform_0(%arg0: i32) -> (i32, i32, i32) {
    %c0_i32 = arith.constant 0 : i32
    %c0_i32_0 = arith.constant 0 : i32
    %c0_i32_1 = arith.constant 0 : i32
    return %arg0, %c0_i32, %c0_i32_0 : i32, i32, i32
  }
  func.func @transform_1(%arg0: i32) -> (i32, i32, i32) {
    %c0_i32 = arith.constant 0 : i32
    %c0_i32_0 = arith.constant 0 : i32
    %c0_i32_1 = arith.constant 0 : i32
    %c0_i32_2 = arith.constant 0 : i32
    return %c0_i32, %c0_i32_0, %c0_i32_1 : i32, i32, i32
  }
  func.func @transform_2(%arg0: i32) -> (i32, i32) {
    %c0_i32 = arith.constant 0 : i32
    %c0_i32_0 = arith.constant 0 : i32
    %c0_i32_1 = arith.constant 0 : i32
    return %c0_i32, %c0_i32_0 : i32, i32
  }
  func.func @transform_3(%arg0: i32) -> (i32, i32) {
    %c0_i32 = arith.constant 0 : i32
    %c0_i32_0 = arith.constant 0 : i32
    %c0_i32_1 = arith.constant 0 : i32
    return %c0_i32, %c0_i32_0 : i32, i32
  }
  func.func @transform_4(%arg0: i32) -> (i32, i32) {
    %c0_i32 = arith.constant 0 : i32
    %c0_i32_0 = arith.constant 0 : i32
    %c0_i32_1 = arith.constant 0 : i32
    return %c0_i32, %c0_i32_0 : i32, i32
  }
  func.func @transform_5(%arg0: i32) -> (i32, i32, i32) {
    %c0_i32 = arith.constant 0 : i32
    %c0_i32_0 = arith.constant 0 : i32
    %c0_i32_1 = arith.constant 0 : i32
    return %arg0, %c0_i32, %c0_i32_0 : i32, i32, i32
  }
  func.func @transform_6(%arg0: i32) -> (i32, i32, i32) {
    %c0_i32 = arith.constant 0 : i32
    %c0_i32_0 = arith.constant 0 : i32
    %c0_i32_1 = arith.constant 0 : i32
    return %arg0, %c0_i32, %c0_i32_0 : i32, i32, i32
  }
  func.func @transform_7(%arg0: i32) -> (i32, i32, i32) {
    %c0_i32 = arith.constant 0 : i32
    %c0_i32_0 = arith.constant 0 : i32
    %c0_i32_1 = arith.constant 0 : i32
    return %arg0, %c0_i32, %c0_i32_0 : i32, i32, i32
  }
  func.func @transform_8(%arg0: i32) -> (i32, i32) {
    %c0_i32 = arith.constant 0 : i32
    %c0_i32_0 = arith.constant 0 : i32
    %c0_i32_1 = arith.constant 0 : i32
    return %c0_i32, %c0_i32_0 : i32, i32
  }
  func.func @transform_9(%arg0: i32) -> (i32, i32) {
    %c0_i32 = arith.constant 0 : i32
    %c0_i32_0 = arith.constant 0 : i32
    %c0_i32_1 = arith.constant 0 : i32
    return %c0_i32, %c0_i32_0 : i32, i32
  }
  func.func @transform_10(%arg0: i32) -> (i32, i32) {
    %c0_i32 = arith.constant 0 : i32
    %c0_i32_0 = arith.constant 0 : i32
    %c0_i32_1 = arith.constant 0 : i32
    return %c0_i32, %c0_i32_0 : i32, i32
  }
  func.func @transform_11(%arg0: i32) -> (i32, i32) {
    %c0_i32 = arith.constant 0 : i32
    %c0_i32_0 = arith.constant 0 : i32
    %c0_i32_1 = arith.constant 0 : i32
    return %c0_i32, %c0_i32_0 : i32, i32
  }
  func.func @transform_12(%arg0: i32) -> (i32, i32, i32) {
    %c0_i32 = arith.constant 0 : i32
    %c0_i32_0 = arith.constant 0 : i32
    %c0_i32_1 = arith.constant 0 : i32
    return %arg0, %c0_i32, %c0_i32_0 : i32, i32, i32
  }
}

</mosaic_0001>

<bundles_post_ra>
// kernel: effv2s_deepsuper_forward.7
= control target key start
LH: loop header
LB: loop body
LE: loop exit
PB: predicated region body
PF: predicated region fallthrough
CT: control target
= control target key end

     0   :  { %s8105_s12 = smov 0   ;;  %s9353_s0 = inlined_call_operand.vmem [shape: bf16[2,1056,256], index: 0, kind: input, shape index: {}]   ;;  %s9354_s1 = inlined_call_operand.vmem [shape: bf16[3,128,128], index: 1, kind: input, shape index: {}]   ;;  %s9355_s2 = inlined_call_operand.vmem [shape: f32[1,128], index: 2, kind: input, shape index: {}]   ;;  %s9356_s3 = inlined_call_operand.vmem [shape: bf16[2,1024,128], index: 3, kind: output, shape index: {}]  }
   0x1 LB: > { %s5391_s13 = sadd.s32 4294967295, %s8083_s12   ;;  %p5395_p0 = scmp.ge.s32.totalorder %s8083_s12, 1  ;;  %s8083_s12 = sphi %s8105_s12, %s13_s12  }
   0x2   : > { %p137_p1 = scmp.lt.s32.totalorder %s8083_s12, 3 }
   0x4   : > { %p138_p2 = pnand %p5395_p0, %p137_p1 }
   0x6   : > { %141 = sbr.rel (%p138_p2) target bundleno = 680 (0x2a8), region = 32 }
   0xd   : > { %v7347_v0 = vld [vmem:[%s9354_s1 + $0x40] sm:$0xff]   ;;  %p161_p3 = scmp.lt.s32.totalorder %s5391_s13, 1  ;;  %v7349_v2 = vld [vmem:[%s9354_s1 + $0x48] sm:$0xff]   ;;  %v7351_v4 = vld [vmem:[%s9354_s1 + $0x50] sm:$0xff]  }
   0xe   : > { %v8119_v1 = vld [vmem:[%s9354_s1] sm:$0xff]   ;;  %6634 = vmatprep.subr.bf16.mxu1 %v7347_v0  ;;  %v8128_v3 = vld [vmem:[%s9354_s1 + $0x8] sm:$0xff]   ;;  %v8138_v5 = vld [vmem:[%s9354_s1 + $0x10] sm:$0xff]  }
   0xf   : > { %6778 = vmatprep.subr.bf16.mxu0 %v8119_v1  ;;  %6635 = vmatpush3.bf16.msra.mxu1 %v7347_v0  ;;  %s9398_s13 = smov (!%p161_p3, %s5391_s13), 1  ;;  %v7353_v6 = vld [vmem:[%s9354_s1 + $0x58] sm:$0xff]   ;;  %v7355_v8 = vld [vmem:[%s9354_s1 + $0x60] sm:$0xff]   ;;  %v7357_v10 = vld [vmem:[%s9354_s1 + $0x68] sm:$0xff]  }
  0x10   : > { %6779 = vmatpush3.bf16.msra.mxu0 %v8119_v1  ;;  %6636 = vmatprep.subr.bf16.mxu1 %v7349_v2  ;;  %v8150_v7 = vld [vmem:[%s9354_s1 + $0x18] sm:$0xff]   ;;  %s7338_s30 = smul.u32 1056, %s9398_s13  ;;  %v8161_v9 = vld [vmem:[%s9354_s1 + $0x20] sm:$0xff]   ;;  %v8174_v11 = vld [vmem:[%s9354_s1 + $0x28] sm:$0xff]   ;;  %s5906_s19 = sshll.u32 %s9398_s13, 9 }
  0x11   : > { %6780 = vmatprep.subr.bf16.mxu0 %v8128_v3  ;;  %v7359_v14 = vld [vmem:[%s9354_s1 + $0x70] sm:$0xff]   ;;  %v7361_v16 = vld [vmem:[%s9354_s1 + $0x78] sm:$0xff]   ;;  %v7367_v19 = vld [vmem:[%s9354_s1 + $0x80] sm:$0xff]   ;;  %s8654_s21 = scalar_lea.vmem %s9356_s3, %s5906_s19 }
  0x12   : > { %s8166_s10 = scalar_lea.vmem %s9353_s0, %s7338_s30  ;;  %v8188_v15 = vld [vmem:[%s9354_s1 + $0x30] sm:$0xff]   ;;  %v8198_v17 = vld [vmem:[%s9354_s1 + $0x38] sm:$0xff]   ;;  %v7376_v23 = vld [vmem:[%s9354_s1 + $0x88] sm:$0xff]  }
  0x13   : > { %6637 = vmatpush3.bf16.msra.mxu1 %v7349_v2  ;;  %v7363_v12 = vld [vmem:[%s8166_s10 + $0x4] ss:$8 sps:$4 sm:$0xff]   ;;  %v7364_v13 = vld [vmem:[%s8166_s10] ss:$8 sps:$4 sm:$0xff]   ;;  %v7365_v18 = vld [vmem:[%s8166_s10 + $0x14] ss:$8 sps:$4 sm:$0xff]  }
  0x14   : > { %6781 = vmatpush3.bf16.msra.mxu0 %v8128_v3  ;;  %6638 = vmatprep.subr.bf16.mxu1 %v7351_v4  ;;  %v7366_v20 = vld [vmem:[%s8166_s10 + $0x10] ss:$8 sps:$4 sm:$0xff]   ;;  %v7368_v21 = vld [vmem:[%s8166_s10 + $0x24] ss:$8 sps:$4 sm:$0xff]   ;;  %v7369_v22 = vld [vmem:[%s8166_s10 + $0x20] ss:$8 sps:$4 sm:$0xff]  }
  0x15   : > { %6782 = vmatprep.subr.bf16.mxu0 %v8138_v5  ;;  %6650 = vmatprep.mubr.bf16.mxu1 %v7363_v12  ;;  %v7370_v24 = vld [vmem:[%s8166_s10 + $0x34] ss:$8 sps:$4 sm:$0xff]   ;;  %v7371_v25 = vld [vmem:[%s8166_s10 + $0x30] ss:$8 sps:$4 sm:$0xff]   ;;  %v7372_v27 = vld [vmem:[%s8166_s10 + $0x44] ss:$8 sps:$4 sm:$0xff]  }
  0x16   : > { %6794 = vmatprep.mubr.bf16.mxu0 %v7364_v13  ;;  %v7385_v26 = vld [vmem:[%s9354_s1 + $0x90] sm:$0xff]   ;;  %v7373_v28 = vld [vmem:[%s8166_s10 + $0x40] ss:$8 sps:$4 sm:$0xff]   ;;  %v7377_v31 = vld [vmem:[%s8166_s10 + $0x64] ss:$8 sps:$4 sm:$0xff]  }
  0x17   : > { %6639 = vmatpush3.bf16.msra.mxu1 %v7351_v4  ;;  %v7374_v29 = vld [vmem:[%s8166_s10 + $0x54] ss:$8 sps:$4 sm:$0xff]   ;;  %v7375_v30 = vld [vmem:[%s8166_s10 + $0x50] ss:$8 sps:$4 sm:$0xff]   ;;  %v7378_v33 = vld [vmem:[%s8166_s10 + $0x60] ss:$8 sps:$4 sm:$0xff]  }
  0x18   : > { %6783 = vmatpush3.bf16.msra.mxu0 %v8138_v5  ;;  %6640 = vmatprep.subr.bf16.mxu1 %v7353_v6  ;;  %v7394_v32 = vld [vmem:[%s9354_s1 + $0x98] sm:$0xff]   ;;  %v7381_v36 = vld [vmem:[%s8166_s10 + $0x84] ss:$8 sps:$4 sm:$0xff]   ;;  %v7382_v37 = vld [vmem:[%s8166_s10 + $0x80] ss:$8 sps:$4 sm:$0xff]  }
  0x19   : > { %6784 = vmatprep.subr.bf16.mxu0 %v8150_v7  ;;  %v7379_v34 = vld [vmem:[%s8166_s10 + $0x74] ss:$8 sps:$4 sm:$0xff]   ;;  %v7380_v35 = vld [vmem:[%s8166_s10 + $0x70] ss:$8 sps:$4 sm:$0xff]   ;;  %v7403_v38 = vld [vmem:[%s9354_s1 + $0xa0] sm:$0xff]  }
  0x1a   : > { %v7383_v39 = vld [vmem:[%s8166_s10 + $0x94] ss:$8 sps:$4 sm:$0xff]   ;;  %v7384_v40 = vld [vmem:[%s8166_s10 + $0x90] ss:$8 sps:$4 sm:$0xff]   ;;  %v7386_v41 = vld [vmem:[%s8166_s10 + $0xa4] ss:$8 sps:$4 sm:$0xff]  }
  0x1b   : > { %6641 = vmatpush3.bf16.msra.mxu1 %v7353_v6  ;;  %v7387_v42 = vld [vmem:[%s8166_s10 + $0xa0] ss:$8 sps:$4 sm:$0xff]   ;;  %v7388_v44 = vld [vmem:[%s8166_s10 + $0xb4] ss:$8 sps:$4 sm:$0xff]   ;;  %v7389_v45 = vld [vmem:[%s8166_s10 + $0xb0] ss:$8 sps:$4 sm:$0xff]  }
  0x1c   : > { %6785 = vmatpush3.bf16.msra.mxu0 %v8150_v7  ;;  %6642 = vmatprep.subr.bf16.mxu1 %v7355_v8  ;;  %v7412_v43 = vld [vmem:[%s9354_s1 + $0xa8] sm:$0xff]   ;;  %v7421_v48 = vld [vmem:[%s9354_s1 + $0xb0] sm:$0xff]   ;;  %v7430_v53 = vld [vmem:[%s9354_s1 + $0xb8] sm:$0xff]  }
  0x1d   : > { %6786 = vmatprep.subr.bf16.mxu0 %v8161_v9  ;;  %v7390_v46 = vld [vmem:[%s8166_s10 + $0xc4] ss:$8 sps:$4 sm:$0xff]   ;;  %v7391_v47 = vld [vmem:[%s8166_s10 + $0xc0] ss:$8 sps:$4 sm:$0xff]   ;;  %v7392_v49 = vld [vmem:[%s8166_s10 + $0xd4] ss:$8 sps:$4 sm:$0xff]  }
  0x1e   : > { %v7393_v50 = vld [vmem:[%s8166_s10 + $0xd0] ss:$8 sps:$4 sm:$0xff]   ;;  %v7395_v51 = vld [vmem:[%s8166_s10 + $0xe4] ss:$8 sps:$4 sm:$0xff]   ;;  %v7396_v52 = vld [vmem:[%s8166_s10 + $0xe0] ss:$8 sps:$4 sm:$0xff]  }
  0x1f   : > { %6643 = vmatpush3.bf16.msra.mxu1 %v7355_v8  ;;  %v7397_v54 = vld [vmem:[%s8166_s10 + $0xf4] ss:$8 sps:$4 sm:$0xff]   ;;  %v7398_v55 = vld [vmem:[%s8166_s10 + $0xf0] ss:$8 sps:$4 sm:$0xff]   ;;  %v7399_v56 = vld [vmem:[%s8166_s10 + $0x104] ss:$8 sps:$4 sm:$0xff]  }
  0x20   : > { %6787 = vmatpush3.bf16.msra.mxu0 %v8161_v9  ;;  %6644 = vmatprep.subr.bf16.mxu1 %v7357_v10  ;;  %v7400_v57 = vld [vmem:[%s8166_s10 + $0x100] ss:$8 sps:$4 sm:$0xff]   ;;  %v7401_v58 = vld [vmem:[%s8166_s10 + $0x114] ss:$8 sps:$4 sm:$0xff]   ;;  %v7402_v59 = vld [vmem:[%s8166_s10 + $0x110] ss:$8 sps:$4 sm:$0xff]  }
  0x21   : > { %6788 = vmatprep.subr.bf16.mxu0 %v8174_v11  ;;  %v7404_v60 = vld [vmem:[%s8166_s10 + $0x124] ss:$8 sps:$4 sm:$0xff]   ;;  %v7405_v61 = vld [vmem:[%s8166_s10 + $0x120] ss:$8 sps:$4 sm:$0xff]   ;;  %v7406_v62 = vld [vmem:[%s8166_s10 + $0x134] ss:$8 sps:$4 sm:$0xff]  }
  0x22   : > { %v7407_v63 = vld [vmem:[%s8166_s10 + $0x130] ss:$8 sps:$4 sm:$0xff]   ;;  %v7408_v0 = vld [vmem:[%s8166_s10 + $0x144] ss:$8 sps:$4 sm:$0xff]   ;;  %v7410_v2 = vld [vmem:[%s8166_s10 + $0x154] ss:$8 sps:$4 sm:$0xff]  }
  0x23   : > { %6645 = vmatpush3.bf16.msra.mxu1 %v7357_v10  ;;  %v7413_v4 = vld [vmem:[%s8166_s10 + $0x164] ss:$8 sps:$4 sm:$0xff]   ;;  %v7415_v6 = vld [vmem:[%s8166_s10 + $0x174] ss:$8 sps:$4 sm:$0xff]   ;;  %v7423_v13 = vld [vmem:[%s8166_s10 + $0x1a0] ss:$8 sps:$4 sm:$0xff]  }
  0x24   : > { %6789 = vmatpush3.bf16.msra.mxu0 %v8174_v11  ;;  %6646 = vmatprep.subr.bf16.mxu1 %v7359_v14  ;;  %v7417_v8 = vld [vmem:[%s8166_s10 + $0x184] ss:$8 sps:$4 sm:$0xff]   ;;  %v7419_v10 = vld [vmem:[%s8166_s10 + $0x194] ss:$8 sps:$4 sm:$0xff]  }
  0x25   : > { %6790 = vmatprep.subr.bf16.mxu0 %v8188_v15  ;;  %v7422_v12 = vld [vmem:[%s8166_s10 + $0x1a4] ss:$8 sps:$4 sm:$0xff]  }
  0x27   : > { %6647 = vmatpush3.bf16.msra.mxu1 %v7359_v14  ;;  %v7424_v14 = vld [vmem:[%s8166_s10 + $0x1b4] ss:$8 sps:$4 sm:$0xff]  }
  0x28   : > { %6791 = vmatpush3.bf16.msra.mxu0 %v8188_v15  ;;  %6648 = vmatprep.subr.bf16.mxu1 %v7361_v16 }
  0x29   : > { %6792 = vmatprep.subr.bf16.mxu0 %v8198_v17 }
  0x2b   : > { %6649 = vmatpush3.bf16.msra.mxu1 %v7361_v16  ;;  %v7426_v16 = vld [vmem:[%s8166_s10 + $0x1c4] ss:$8 sps:$4 sm:$0xff]  }
  0x2c   : > { %6793 = vmatpush3.bf16.msra.mxu0 %v8198_v17  ;;  %7066 = vmatprep.subr.bf16.mxu1 %v8119_v1 }
  0x2d   : > { %6922 = vmatprep.subr.bf16.mxu0 %v7367_v19 }
  0x2e   : > { %6651 = vmatmul.mubr.bf16.vlgmr.msra.gmra.mrb[0].mxu1 %v7365_v18  ;;  %v7428_v18 = vld [vmem:[%s8166_s10 + $0x1d4] ss:$8 sps:$4 sm:$0xff]  }
  0x2f   : > { %6795 = vmatmul.mubr.bf16.vlgmr.msra.gmra.mrb[0].mxu0 %v7366_v20  ;;  %7074 = vmatpush3.bf16.msra.mxu1 %v8119_v1  ;;  %v7409_v1 = vld [vmem:[%s8166_s10 + $0x140] ss:$8 sps:$4 sm:$0xff]   ;;  %v7431_v20 = vld [vmem:[%s8166_s10 + $0x1e4] ss:$8 sps:$4 sm:$0xff]  }
  0x30   : > { %6923 = vmatpush3.bf16.msra.mxu0 %v7367_v19  ;;  %6654 = vmatprep.mubr.bf16.mxu1 %v7368_v21  ;;  %v7429_v19 = vld [vmem:[%s8166_s10 + $0x1d0] ss:$8 sps:$4 sm:$0xff]   ;;  %v7432_v21 = vld [vmem:[%s8166_s10 + $0x1e0] ss:$8 sps:$4 sm:$0xff]  }
  0x31   : > { %6798 = vmatprep.mubr.bf16.mxu0 %v7369_v22  ;;  %6924 = vmatprep.subr.bf16.mxu0 %v7376_v23  ;;  %v7433_v22 = vld [vmem:[%s8166_s10 + $0x1f4] ss:$8 sps:$4 sm:$0xff]  }
  0x32   : > { %7067 = vmatprep.subr.bf16.mxu1 %v8128_v3 }
  0x33   : > { %7075 = vmatpush3.bf16.msra.mxu1 %v8128_v3  ;;  %v7411_v3 = vld [vmem:[%s8166_s10 + $0x150] ss:$8 sps:$4 sm:$0xff]  }
  0x34   : > { %6925 = vmatpush3.bf16.msra.mxu0 %v7376_v23  ;;  %7068 = vmatprep.subr.bf16.mxu1 %v8138_v5  ;;  %v7434_v23 = vld [vmem:[%s8166_s10 + $0x1f0] ss:$8 sps:$4 sm:$0xff]  }
  0x35   : > { %6926 = vmatprep.subr.bf16.mxu0 %v7385_v26 }
  0x36   : > { %6655 = vmatmul.mubr.bf16.gmra.mrb[4].mxu1 %v7370_v24  ;;  %v7435_v24 = vld [vmem:[%s8166_s10 + $0x204] ss:$8 sps:$4 sm:$0xff]  }
  0x37   : > { %6799 = vmatmul.mubr.bf16.gmra.mrb[4].mxu0 %v7371_v25  ;;  %6658 = vmatprep.mubr.bf16.mxu1 %v7372_v27  ;;  %v7436_v25 = vld [vmem:[%s8166_s10 + $0x20] ss:$8 sps:$4 sm:$0xff]   ;;  %v7438_v27 = vld [vmem:[%s8166_s10 + $0x30] ss:$8 sps:$4 sm:$0xff]  }
  0x38   : > { %6802 = vmatprep.mubr.bf16.mxu0 %v7373_v28  ;;  %6927 = vmatpush3.bf16.msra.mxu0 %v7385_v26  ;;  %v7437_v26 = vld [vmem:[%s8166_s10 + $0x214] ss:$8 sps:$4 sm:$0xff]   ;;  %v7439_v28 = vld [vmem:[%s8166_s10 + $0x224] ss:$8 sps:$4 sm:$0xff]  }
  0x39   : > { %7076 = vmatpush3.bf16.msra.mxu1 %v8138_v5  ;;  %6928 = vmatprep.subr.bf16.mxu0 %v7394_v32  ;;  %v7414_v5 = vld [vmem:[%s8166_s10 + $0x160] ss:$8 sps:$4 sm:$0xff]  }
  0x3a   : > { %7069 = vmatprep.subr.bf16.mxu1 %v8150_v7 }
  0x3c   : > { %6929 = vmatpush3.bf16.msra.mxu0 %v7394_v32  ;;  %v7443_v32 = vld [vmem:[%s8166_s10 + $0x244] ss:$8 sps:$4 sm:$0xff]  }
  0x3d   : > { %7077 = vmatpush3.bf16.msra.mxu1 %v8150_v7  ;;  %6930 = vmatprep.subr.bf16.mxu0 %v7403_v38  ;;  %v7416_v7 = vld [vmem:[%s8166_s10 + $0x170] ss:$8 sps:$4 sm:$0xff]  }
  0x3e   : > { %6659 = vmatmul.mubr.bf16.gmra.mrb[8].mxu1 %v7374_v29  ;;  %7070 = vmatprep.subr.bf16.mxu1 %v8161_v9  ;;  %v7440_v29 = vld [vmem:[%s8166_s10 + $0x40] ss:$8 sps:$4 sm:$0xff]  }
  0x3f   : > { %6803 = vmatmul.mubr.bf16.gmra.mrb[8].mxu0 %v7375_v30  ;;  %6662 = vmatprep.mubr.bf16.mxu1 %v7377_v31  ;;  %v7441_v30 = vld [vmem:[%s8166_s10 + $0x234] ss:$8 sps:$4 sm:$0xff]   ;;  %v7442_v31 = vld [vmem:[%s8166_s10 + $0x50] ss:$8 sps:$4 sm:$0xff]  }
  0x40   : > { %6806 = vmatprep.mubr.bf16.mxu0 %v7378_v33  ;;  %6931 = vmatpush3.bf16.msra.mxu0 %v7403_v38  ;;  %v7444_v33 = vld [vmem:[%s8166_s10 + $0x60] ss:$8 sps:$4 sm:$0xff]   ;;  %v7449_v38 = vld [vmem:[%s8166_s10 + $0x274] ss:$8 sps:$4 sm:$0xff]  }
  0x41   : > { %7078 = vmatpush3.bf16.msra.mxu1 %v8161_v9  ;;  %6932 = vmatprep.subr.bf16.mxu0 %v7412_v43  ;;  %v7418_v9 = vld [vmem:[%s8166_s10 + $0x180] ss:$8 sps:$4 sm:$0xff]  }
  0x42   : > { %7071 = vmatprep.subr.bf16.mxu1 %v8174_v11 }
  0x44   : > { %6933 = vmatpush3.bf16.msra.mxu0 %v7412_v43  ;;  %v7454_v43 = vld [vmem:[%s8166_s10 + $0xb0] ss:$8 sps:$4 sm:$0xff]  }
  0x45   : > { %7079 = vmatpush3.bf16.msra.mxu1 %v8174_v11  ;;  %6934 = vmatprep.subr.bf16.mxu0 %v7421_v48  ;;  %v7420_v11 = vld [vmem:[%s8166_s10 + $0x190] ss:$8 sps:$4 sm:$0xff]  }
  0x46   : > { %6663 = vmatmul.mubr.bf16.gmra.mrb[12].mxu1 %v7379_v34  ;;  %7072 = vmatprep.subr.bf16.mxu1 %v8188_v15  ;;  %v7445_v34 = vld [vmem:[%s8166_s10 + $0x254] ss:$8 sps:$4 sm:$0xff]  }
  0x47   : > { %6807 = vmatmul.mubr.bf16.gmra.mrb[12].mxu0 %v7380_v35  ;;  %6666 = vmatprep.mubr.bf16.mxu1 %v7381_v36  ;;  %v7446_v35 = vld [vmem:[%s8166_s10 + $0x70] ss:$8 sps:$4 sm:$0xff]   ;;  %v7447_v36 = vld [vmem:[%s8166_s10 + $0x264] ss:$8 sps:$4 sm:$0xff]  }
  0x48   : > { %6810 = vmatprep.mubr.bf16.mxu0 %v7382_v37  ;;  %6935 = vmatpush3.bf16.msra.mxu0 %v7421_v48  ;;  %v7448_v37 = vld [vmem:[%s8166_s10 + $0x80] ss:$8 sps:$4 sm:$0xff]   ;;  %v7459_v48 = vld [vmem:[%s8166_s10 + $0x2c4] ss:$8 sps:$4 sm:$0xff]  }
  0x49   : > { %7080 = vmatpush3.bf16.msra.mxu1 %v8188_v15  ;;  %6936 = vmatprep.subr.bf16.mxu0 %v7430_v53  ;;  %v7425_v15 = vld [vmem:[%s8166_s10 + $0x1b0] ss:$8 sps:$4 sm:$0xff]  }
  0x4a   : > { %7073 = vmatprep.subr.bf16.mxu1 %v8198_v17 }
  0x4c   : > { %6937 = vmatpush3.bf16.msra.mxu0 %v7430_v53  ;;  %v7464_v53 = vld [vmem:[%s8166_s10 + $0x100] ss:$8 sps:$4 sm:$0xff]  }
  0x4d   : > { %7081 = vmatpush3.bf16.msra.mxu1 %v8198_v17  ;;  %v7427_v17 = vld [vmem:[%s8166_s10 + $0x1c0] ss:$8 sps:$4 sm:$0xff]  }
  0x4e   : > { %6667 = vmatmul.mubr.bf16.gmra.mrb[16].mxu1 %v7383_v39  ;;  %v7450_v39 = vld [vmem:[%s8166_s10 + $0x90] ss:$8 sps:$4 sm:$0xff]  }
  0x4f   : > { %6811 = vmatmul.mubr.bf16.gmra.mrb[16].mxu0 %v7384_v40  ;;  %6670 = vmatprep.mubr.bf16.mxu1 %v7386_v41  ;;  %v7451_v40 = vld [vmem:[%s8166_s10 + $0x284] ss:$8 sps:$4 sm:$0xff]   ;;  %v7452_v41 = vld [vmem:[%s8166_s10 + $0xa0] ss:$8 sps:$4 sm:$0xff]  }
  0x50   : > { %6814 = vmatprep.mubr.bf16.mxu0 %v7387_v42  ;;  %v7453_v42 = vld [vmem:[%s8166_s10 + $0x294] ss:$8 sps:$4 sm:$0xff]  }
  0x56   : > { %6671 = vmatmul.mubr.bf16.gmra.mrb[20].mxu1 %v7388_v44  ;;  %v7455_v44 = vld [vmem:[%s8166_s10 + $0x2a4] ss:$8 sps:$4 sm:$0xff]  }
  0x57   : > { %6815 = vmatmul.mubr.bf16.gmra.mrb[20].mxu0 %v7389_v45  ;;  %6674 = vmatprep.mubr.bf16.mxu1 %v7390_v46  ;;  %v7456_v45 = vld [vmem:[%s8166_s10 + $0xc0] ss:$8 sps:$4 sm:$0xff]   ;;  %v7457_v46 = vld [vmem:[%s8166_s10 + $0x2b4] ss:$8 sps:$4 sm:$0xff]  }
  0x58   : > { %6818 = vmatprep.mubr.bf16.mxu0 %v7391_v47  ;;  %v7458_v47 = vld [vmem:[%s8166_s10 + $0xd0] ss:$8 sps:$4 sm:$0xff]  }
  0x5e   : > { %6675 = vmatmul.mubr.bf16.gmra.mrb[24].mxu1 %v7392_v49  ;;  %v7460_v49 = vld [vmem:[%s8166_s10 + $0xe0] ss:$8 sps:$4 sm:$0xff]  }
  0x5f   : > { %6819 = vmatmul.mubr.bf16.gmra.mrb[24].mxu0 %v7393_v50  ;;  %6678 = vmatprep.mubr.bf16.mxu1 %v7395_v51  ;;  %v7461_v50 = vld [vmem:[%s8166_s10 + $0x2d4] ss:$8 sps:$4 sm:$0xff]   ;;  %v7462_v51 = vld [vmem:[%s8166_s10 + $0xf0] ss:$8 sps:$4 sm:$0xff]  }
  0x60   : > { %6822 = vmatprep.mubr.bf16.mxu0 %v7396_v52  ;;  %v7463_v52 = vld [vmem:[%s8166_s10 + $0x2e4] ss:$8 sps:$4 sm:$0xff]  }
  0x66   : > { %6679 = vmatmul.mubr.bf16.gmra.mrb[28].mxu1 %v7397_v54  ;;  %v7465_v54 = vld [vmem:[%s8166_s10 + $0x2f4] ss:$8 sps:$4 sm:$0xff]  }
  0x67   : > { %6823 = vmatmul.mubr.bf16.gmra.mrb[28].mxu0 %v7398_v55  ;;  %6682 = vmatprep.mubr.bf16.mxu1 %v7399_v56  ;;  %v7466_v55 = vld [vmem:[%s8166_s10 + $0x110] ss:$8 sps:$4 sm:$0xff]   ;;  %v7467_v56 = vld [vmem:[%s8166_s10 + $0x304] ss:$8 sps:$4 sm:$0xff]  }
  0x68   : > { %6826 = vmatprep.mubr.bf16.mxu0 %v7400_v57  ;;  %v7468_v57 = vld [vmem:[%s8166_s10 + $0x120] ss:$8 sps:$4 sm:$0xff]  }
  0x6e   : > { %6683 = vmatmul.mubr.bf16.gmra.mrb[32].mxu1 %v7401_v58  ;;  %v7469_v58 = vld [vmem:[%s8166_s10 + $0x314] ss:$8 sps:$4 sm:$0xff]  }
  0x6f   : > { %6827 = vmatmul.mubr.bf16.gmra.mrb[32].mxu0 %v7402_v59  ;;  %6686 = vmatprep.mubr.bf16.mxu1 %v7404_v60  ;;  %v7470_v59 = vld [vmem:[%s8166_s10 + $0x130] ss:$8 sps:$4 sm:$0xff]   ;;  %v7471_v60 = vld [vmem:[%s8166_s10 + $0x324] ss:$8 sps:$4 sm:$0xff]  }
  0x70   : > { %6830 = vmatprep.mubr.bf16.mxu0 %v7405_v61  ;;  %v7472_v61 = vld [vmem:[%s8166_s10 + $0x140] ss:$8 sps:$4 sm:$0xff]  }
  0x76   : > { %6687 = vmatmul.mubr.bf16.gmra.mrb[36].mxu1 %v7406_v62  ;;  %v7473_v62 = vld [vmem:[%s8166_s10 + $0x334] ss:$8 sps:$4 sm:$0xff]  }
  0x77   : > { %6831 = vmatmul.mubr.bf16.gmra.mrb[36].mxu0 %v7407_v63  ;;  %6690 = vmatprep.mubr.bf16.mxu1 %v7408_v0  ;;  %v7474_v63 = vld [vmem:[%s8166_s10 + $0x150] ss:$8 sps:$4 sm:$0xff]   ;;  %v7475_v0 = vld [vmem:[%s8166_s10 + $0x344] ss:$8 sps:$4 sm:$0xff]  }
  0x78   : > { %6834 = vmatprep.mubr.bf16.mxu0 %v7409_v1  ;;  %v7476_v1 = vld [vmem:[%s8166_s10 + $0x160] ss:$8 sps:$4 sm:$0xff]  }
  0x7e   : > { %6691 = vmatmul.mubr.bf16.gmra.mrb[40].mxu1 %v7410_v2  ;;  %v7477_v2 = vld [vmem:[%s8166_s10 + $0x354] ss:$8 sps:$4 sm:$0xff]  }
  0x7f   : > { %6835 = vmatmul.mubr.bf16.gmra.mrb[40].mxu0 %v7411_v3  ;;  %6694 = vmatprep.mubr.bf16.mxu1 %v7413_v4  ;;  %v7478_v3 = vld [vmem:[%s8166_s10 + $0x170] ss:$8 sps:$4 sm:$0xff]   ;;  %v7479_v4 = vld [vmem:[%s8166_s10 + $0x364] ss:$8 sps:$4 sm:$0xff]  }
  0x80   : > { %6838 = vmatprep.mubr.bf16.mxu0 %v7414_v5  ;;  %v7480_v5 = vld [vmem:[%s8166_s10 + $0x180] ss:$8 sps:$4 sm:$0xff]  }
  0x86   : > { %6695 = vmatmul.mubr.bf16.gmra.mrb[44].mxu1 %v7415_v6 }
  0x87   : > { %6839 = vmatmul.mubr.bf16.gmra.mrb[44].mxu0 %v7416_v7  ;;  %6698 = vmatprep.mubr.bf16.mxu1 %v7417_v8  ;;  %v7481_v8 = vld [vmem:[%s8166_s10 + $0x374] ss:$8 sps:$4 sm:$0xff]  }
  0x88   : > { %6842 = vmatprep.mubr.bf16.mxu0 %v7418_v9 }
  0x8e   : > { %6699 = vmatmul.mubr.bf16.gmra.mrb[48].mxu1 %v7419_v10  ;;  %v7482_v10 = vld [vmem:[%s8166_s10 + $0x190] ss:$8 sps:$4 sm:$0xff]  }
  0x8f   : > { %6843 = vmatmul.mubr.bf16.gmra.mrb[48].mxu0 %v7420_v11  ;;  %6702 = vmatprep.mubr.bf16.mxu1 %v7422_v12  ;;  %v7483_v11 = vld [vmem:[%s8166_s10 + $0x384] ss:$8 sps:$4 sm:$0xff]  }
  0x90   : > { %6846 = vmatprep.mubr.bf16.mxu0 %v7423_v13  ;;  %v7484_v13 = vld [vmem:[%s8166_s10 + $0x1a0] ss:$8 sps:$4 sm:$0xff]  }
  0x96   : > { %6703 = vmatmul.mubr.bf16.gmra.mrb[52].mxu1 %v7424_v14 }
  0x97   : > { %6847 = vmatmul.mubr.bf16.gmra.mrb[52].mxu0 %v7425_v15  ;;  %6706 = vmatprep.mubr.bf16.mxu1 %v7426_v16  ;;  %v7485_v16 = vld [vmem:[%s8166_s10 + $0x394] ss:$8 sps:$4 sm:$0xff]  }
  0x98   : > { %6850 = vmatprep.mubr.bf16.mxu0 %v7427_v17 }
  0x9e   : > { %6707 = vmatmul.mubr.bf16.gmra.mrb[56].mxu1 %v7428_v18  ;;  %v7486_v18 = vld [vmem:[%s8166_s10 + $0x1b0] ss:$8 sps:$4 sm:$0xff]  }
  0x9f   : > { %6851 = vmatmul.mubr.bf16.gmra.mrb[56].mxu0 %v7429_v19  ;;  %6710 = vmatprep.mubr.bf16.mxu1 %v7431_v20  ;;  %v7487_v19 = vld [vmem:[%s8166_s10 + $0x3a4] ss:$8 sps:$4 sm:$0xff]  }
  0xa0   : > { %6854 = vmatprep.mubr.bf16.mxu0 %v7432_v21  ;;  %v7488_v21 = vld [vmem:[%s8166_s10 + $0x1c0] ss:$8 sps:$4 sm:$0xff]  }
  0xa6   : > { %6711 = vmatmul.mubr.bf16.gmra.mrb[60].mxu1 %v7433_v22 }
  0xa7   : > { %6855 = vmatmul.mubr.bf16.gmra.mrb[60].mxu0 %v7434_v23  ;;  %6714 = vmatprep.mubr.bf16.mxu1 %v7435_v24  ;;  %v7489_v24 = vld [vmem:[%s8166_s10 + $0x3b4] ss:$8 sps:$4 sm:$0xff]  }
  0xa8   : > { %6938 = vmatprep.mubr.bf16.mxu0 %v7436_v25 }
  0xae   : > { %6715 = vmatmul.mubr.bf16.gmra.mrb[64].mxu1 %v7437_v26  ;;  %v7490_v26 = vld [vmem:[%s8166_s10 + $0x1d0] ss:$8 sps:$4 sm:$0xff]  }
  0xaf   : > { %6939 = vmatmul.mubr.bf16.vlgmr.msra.gmra.mrb[0].mxu0 %v7438_v27  ;;  %6718 = vmatprep.mubr.bf16.mxu1 %v7439_v28  ;;  %v7491_v27 = vld [vmem:[%s8166_s10 + $0x3c4] ss:$8 sps:$4 sm:$0xff]  }
  0xb0   : > { %6942 = vmatprep.mubr.bf16.mxu0 %v7440_v29  ;;  %v7492_v29 = vld [vmem:[%s8166_s10 + $0x1e0] ss:$8 sps:$4 sm:$0xff]  }
  0xb6   : > { %6719 = vmatmul.mubr.bf16.gmra.mrb[68].mxu1 %v7441_v30 }
  0xb7   : > { %6943 = vmatmul.mubr.bf16.gmra.mrb[4].mxu0 %v7442_v31  ;;  %6722 = vmatprep.mubr.bf16.mxu1 %v7443_v32  ;;  %v7493_v32 = vld [vmem:[%s8166_s10 + $0x3d4] ss:$8 sps:$4 sm:$0xff]  }
  0xb8   : > { %6946 = vmatprep.mubr.bf16.mxu0 %v7444_v33 }
  0xbe   : > { %6723 = vmatmul.mubr.bf16.gmra.mrb[72].mxu1 %v7445_v34  ;;  %v7494_v34 = vld [vmem:[%s8166_s10 + $0x1f0] ss:$8 sps:$4 sm:$0xff]  }
  0xbf   : > { %6947 = vmatmul.mubr.bf16.gmra.mrb[8].mxu0 %v7446_v35  ;;  %6726 = vmatprep.mubr.bf16.mxu1 %v7447_v36  ;;  %v7495_v35 = vld [vmem:[%s8166_s10 + $0x3e4] ss:$8 sps:$4 sm:$0xff]  }
  0xc0   : > { %6950 = vmatprep.mubr.bf16.mxu0 %v7448_v37  ;;  %v7496_v37 = vld [vmem:[%s8166_s10 + $0x200] ss:$8 sps:$4 sm:$0xff]  }
  0xc6   : > { %6727 = vmatmul.mubr.bf16.gmra.mrb[76].mxu1 %v7449_v38 }
  0xc7   : > { %6951 = vmatmul.mubr.bf16.gmra.mrb[12].mxu0 %v7450_v39  ;;  %6730 = vmatprep.mubr.bf16.mxu1 %v7451_v40  ;;  %v7497_v40 = vld [vmem:[%s8166_s10 + $0x3f4] ss:$8 sps:$4 sm:$0xff]  }
  0xc8   : > { %6954 = vmatprep.mubr.bf16.mxu0 %v7452_v41 }
  0xce   : > { %6731 = vmatmul.mubr.bf16.gmra.mrb[80].mxu1 %v7453_v42  ;;  %v7498_v42 = vld [vmem:[%s8166_s10 + $0x210] ss:$8 sps:$4 sm:$0xff]  }
  0xcf   : > { %6955 = vmatmul.mubr.bf16.gmra.mrb[16].mxu0 %v7454_v43  ;;  %6734 = vmatprep.mubr.bf16.mxu1 %v7455_v44  ;;  %v7499_v43 = vld [vmem:[%s8166_s10 + $0x200] ss:$8 sps:$4 sm:$0xff]  }
  0xd0   : > { %6958 = vmatprep.mubr.bf16.mxu0 %v7456_v45  ;;  %v7500_v45 = vld [vmem:[%s8166_s10 + $0x220] ss:$8 sps:$4 sm:$0xff]  }
  0xd6   : > { %6735 = vmatmul.mubr.bf16.gmra.mrb[84].mxu1 %v7457_v46 }
  0xd7   : > { %6959 = vmatmul.mubr.bf16.gmra.mrb[20].mxu0 %v7458_v47  ;;  %6738 = vmatprep.mubr.bf16.mxu1 %v7459_v48  ;;  %v7501_v48 = vld [vmem:[%s8166_s10 + $0x210] ss:$8 sps:$4 sm:$0xff]  }
  0xd8   : > { %6962 = vmatprep.mubr.bf16.mxu0 %v7460_v49 }
  0xde   : > { %6739 = vmatmul.mubr.bf16.gmra.mrb[88].mxu1 %v7461_v50  ;;  %v7502_v50 = vld [vmem:[%s8166_s10 + $0x230] ss:$8 sps:$4 sm:$0xff]  }
  0xdf   : > { %6963 = vmatmul.mubr.bf16.gmra.mrb[24].mxu0 %v7462_v51  ;;  %6742 = vmatprep.mubr.bf16.mxu1 %v7463_v52  ;;  %v7503_v51 = vld [vmem:[%s8166_s10 + $0x220] ss:$8 sps:$4 sm:$0xff]  }
  0xe0   : > { %6966 = vmatprep.mubr.bf16.mxu0 %v7464_v53  ;;  %v7504_v53 = vld [vmem:[%s8166_s10 + $0x240] ss:$8 sps:$4 sm:$0xff]  }
  0xe6   : > { %6743 = vmatmul.mubr.bf16.gmra.mrb[92].mxu1 %v7465_v54 }
  0xe7   : > { %6967 = vmatmul.mubr.bf16.gmra.mrb[28].mxu0 %v7466_v55  ;;  %6746 = vmatprep.mubr.bf16.mxu1 %v7467_v56  ;;  %v7505_v56 = vld [vmem:[%s8166_s10 + $0x230] ss:$8 sps:$4 sm:$0xff]  }
  0xe8   : > { %6970 = vmatprep.mubr.bf16.mxu0 %v7468_v57 }
  0xee   : > { %6747 = vmatmul.mubr.bf16.gmra.mrb[96].mxu1 %v7469_v58  ;;  %v7506_v58 = vld [vmem:[%s8166_s10 + $0x250] ss:$8 sps:$4 sm:$0xff]  }
  0xef   : > { %6971 = vmatmul.mubr.bf16.gmra.mrb[32].mxu0 %v7470_v59  ;;  %6750 = vmatprep.mubr.bf16.mxu1 %v7471_v60  ;;  %v7507_v59 = vld [vmem:[%s8166_s10 + $0x240] ss:$8 sps:$4 sm:$0xff]  }
  0xf0   : > { %6974 = vmatprep.mubr.bf16.mxu0 %v7472_v61  ;;  %v7508_v61 = vld [vmem:[%s8166_s10 + $0x260] ss:$8 sps:$4 sm:$0xff]  }
  0xf6   : > { %6751 = vmatmul.mubr.bf16.gmra.mrb[100].mxu1 %v7473_v62 }
  0xf7   : > { %6975 = vmatmul.mubr.bf16.gmra.mrb[36].mxu0 %v7474_v63  ;;  %6754 = vmatprep.mubr.bf16.mxu1 %v7475_v0  ;;  %v7509_v0 = vld [vmem:[%s8166_s10 + $0x250] ss:$8 sps:$4 sm:$0xff]  }
  0xf8   : > { %6978 = vmatprep.mubr.bf16.mxu0 %v7476_v1 }
  0xfe   : > { %6755 = vmatmul.mubr.bf16.gmra.mrb[104].mxu1 %v7477_v2  ;;  %v7510_v2 = vld [vmem:[%s8166_s10 + $0x270] ss:$8 sps:$4 sm:$0xff]  }
  0xff   : > { %6979 = vmatmul.mubr.bf16.gmra.mrb[40].mxu0 %v7478_v3  ;;  %6758 = vmatprep.mubr.bf16.mxu1 %v7479_v4  ;;  %v7511_v3 = vld [vmem:[%s8166_s10 + $0x260] ss:$8 sps:$4 sm:$0xff]  }
 0x100   : > { %6982 = vmatprep.mubr.bf16.mxu0 %v7480_v5  ;;  %v7512_v5 = vld [vmem:[%s8166_s10 + $0x280] ss:$8 sps:$4 sm:$0xff]  }
 0x101   : > { %v8351_v6 = vpop.f32.mrb[0].mxu1 }
 0x102   : > { %v8353_v7 = vpop.f32.mrb[1].mxu1 }
 0x103   : > { %v8356_v9 = vpop.f32.mrb[2].mxu1 }
 0x104   : > { %v8360_v12 = vpop.f32.mrb[3].mxu1 }
 0x106   : > { %6759 = vmatmul.mubr.bf16.gmra.mrb[108].mxu1 %v7481_v8 }
 0x107   : > { %6983 = vmatmul.mubr.bf16.gmra.mrb[44].mxu0 %v7482_v10  ;;  %6762 = vmatprep.mubr.bf16.mxu1 %v7483_v11  ;;  %v7513_v11 = vld [vmem:[%s8166_s10 + $0x270] ss:$8 sps:$4 sm:$0xff]  }
 0x108   : > { %6986 = vmatprep.mubr.bf16.mxu0 %v7484_v13 }
 0x109   : > { %v8363_v14 = vpop.f32.mrb[4].mxu1 }
 0x10a   : > { %v8365_v15 = vpop.f32.mrb[5].mxu1 }
 0x10b   : > { %v8368_v17 = vpop.f32.mrb[6].mxu1 }
 0x10c   : > { %v8372_v20 = vpop.f32.mrb[7].mxu1 }
 0x10e   : > { %6763 = vmatmul.mubr.bf16.gmra.mrb[112].mxu1 %v7485_v16  ;;  %v7514_v16 = vld [vmem:[%s8166_s10 + $0x290] ss:$8 sps:$4 sm:$0xff]  }
 0x10f   : > { %6987 = vmatmul.mubr.bf16.gmra.mrb[48].mxu0 %v7486_v18  ;;  %6766 = vmatprep.mubr.bf16.mxu1 %v7487_v19  ;;  %v7515_v18 = vld [vmem:[%s8166_s10 + $0x280] ss:$8 sps:$4 sm:$0xff]  }
 0x110   : > { %6990 = vmatprep.mubr.bf16.mxu0 %v7488_v21  ;;  %v7516_v21 = vld [vmem:[%s8166_s10 + $0x2a0] ss:$8 sps:$4 sm:$0xff]  }
 0x111   : > { %v8375_v22 = vpop.f32.mrb[8].mxu1 }
 0x112   : > { %v8377_v23 = vpop.f32.mrb[9].mxu1 }
 0x113   : > { %v8380_v25 = vpop.f32.mrb[10].mxu1 }
 0x114   : > { %v8384_v28 = vpop.f32.mrb[11].mxu1 }
 0x116   : > { %6767 = vmatmul.mubr.bf16.gmra.mrb[116].mxu1 %v7489_v24 }
 0x117   : > { %6991 = vmatmul.mubr.bf16.gmra.mrb[52].mxu0 %v7490_v26  ;;  %6770 = vmatprep.mubr.bf16.mxu1 %v7491_v27  ;;  %v7517_v27 = vld [vmem:[%s8166_s10 + $0x290] ss:$8 sps:$4 sm:$0xff]  }
 0x118   : > { %6994 = vmatprep.mubr.bf16.mxu0 %v7492_v29 }
 0x119   : > { %v8387_v30 = vpop.f32.mrb[12].mxu1 }
 0x11a   : > { %v8389_v31 = vpop.f32.mrb[13].mxu1 }
 0x11b   : > { %v8392_v33 = vpop.f32.mrb[14].mxu1 }
 0x11c   : > { %v8396_v36 = vpop.f32.mrb[15].mxu1 }
 0x11e   : > { %6771 = vmatmul.mubr.bf16.gmra.mrb[120].mxu1 %v7493_v32  ;;  %v7518_v32 = vld [vmem:[%s8166_s10 + $0x2b0] ss:$8 sps:$4 sm:$0xff]  }
 0x11f   : > { %6995 = vmatmul.mubr.bf16.gmra.mrb[56].mxu0 %v7494_v34  ;;  %6774 = vmatprep.mubr.bf16.mxu1 %v7495_v35  ;;  %v7519_v34 = vld [vmem:[%s8166_s10 + $0x2a0] ss:$8 sps:$4 sm:$0xff]  }
 0x120   : > { %6998 = vmatprep.mubr.bf16.mxu0 %v7496_v37  ;;  %v7520_v37 = vld [vmem:[%s8166_s10 + $0x2c0] ss:$8 sps:$4 sm:$0xff]  }
 0x121   : > { %v8399_v38 = vpop.f32.mrb[16].mxu1 }
 0x122   : > { %v8401_v39 = vpop.f32.mrb[17].mxu1 }
 0x123   : > { %v8404_v41 = vpop.f32.mrb[18].mxu1 }
 0x124   : > { %v8408_v44 = vpop.f32.mrb[19].mxu1 }
 0x126   : > { %6775 = vmatmul.mubr.bf16.gmra.mrb[124].mxu1 %v7497_v40 }
 0x127   : > { %6999 = vmatmul.mubr.bf16.gmra.mrb[60].mxu0 %v7498_v42  ;;  %6858 = vmatprep.mubr.bf16.mxu1 %v7499_v43  ;;  %v7521_v43 = vld [vmem:[%s8166_s10 + $0x2b0] ss:$8 sps:$4 sm:$0xff]  }
 0x128   : > { %7002 = vmatprep.mubr.bf16.mxu0 %v7500_v45 }
 0x129   : > { %v8411_v46 = vpop.f32.mrb[20].mxu1 }
 0x12a   : > { %v8413_v47 = vpop.f32.mrb[21].mxu1 }
 0x12b   : > { %v8416_v49 = vpop.f32.mrb[22].mxu1 }
 0x12c   : > { %v8420_v52 = vpop.f32.mrb[23].mxu1 }
 0x12e   : > { %6859 = vmatmul.mubr.bf16.vlgmr.msra.gmra.mrb[64].mxu1 %v7501_v48  ;;  %v7522_v48 = vld [vmem:[%s8166_s10 + $0x2d0] ss:$8 sps:$4 sm:$0xff]  }
 0x12f   : > { %7003 = vmatmul.mubr.bf16.gmra.mrb[64].mxu0 %v7502_v50  ;;  %6862 = vmatprep.mubr.bf16.mxu1 %v7503_v51  ;;  %v7523_v50 = vld [vmem:[%s8166_s10 + $0x2c0] ss:$8 sps:$4 sm:$0xff]  }
 0x130   : > { %7006 = vmatprep.mubr.bf16.mxu0 %v7504_v53  ;;  %v7524_v53 = vld [vmem:[%s8166_s10 + $0x2e0] ss:$8 sps:$4 sm:$0xff]  }
 0x131   : > { %v8423_v54 = vpop.f32.mrb[24].mxu1 }
 0x132   : > { %v8425_v55 = vpop.f32.mrb[25].mxu1 }
 0x133   : > { %v8428_v57 = vpop.f32.mrb[26].mxu1 }
 0x134   : > { %v8432_v60 = vpop.f32.mrb[27].mxu1 }
 0x136   : > { %6863 = vmatmul.mubr.bf16.gmra.mrb[68].mxu1 %v7505_v56 }
 0x137   : > { %7007 = vmatmul.mubr.bf16.gmra.mrb[68].mxu0 %v7506_v58  ;;  %6866 = vmatprep.mubr.bf16.mxu1 %v7507_v59  ;;  %v7525_v59 = vld [vmem:[%s8166_s10 + $0x2d0] ss:$8 sps:$4 sm:$0xff]  }
 0x138   : > { %7010 = vmatprep.mubr.bf16.mxu0 %v7508_v61 }
 0x139   : > { %v8435_v62 = vpop.f32.mrb[28].mxu1 }
 0x13a   : > { %v8437_v63 = vpop.f32.mrb[29].mxu1 }
 0x13b   : > { %v8440_v1 = vpop.f32.mrb[30].mxu1 }
 0x13c   : > { %v8444_v4 = vpop.f32.mrb[31].mxu1 }
 0x13e   : > { %6867 = vmatmul.mubr.bf16.gmra.mrb[72].mxu1 %v7509_v0  ;;  %v7526_v0 = vld [vmem:[%s8166_s10 + $0x2f0] ss:$8 sps:$4 sm:$0xff]  }
 0x13f   : > { %7011 = vmatmul.mubr.bf16.gmra.mrb[72].mxu0 %v7510_v2  ;;  %6870 = vmatprep.mubr.bf16.mxu1 %v7511_v3  ;;  %v7527_v2 = vld [vmem:[%s8166_s10 + $0x2e0] ss:$8 sps:$4 sm:$0xff]  }
 0x140   : > { %7014 = vmatprep.mubr.bf16.mxu0 %v7512_v5  ;;  %v7528_v5 = vld [vmem:[%s8166_s10 + $0x300] ss:$8 sps:$4 sm:$0xff]  }
 0x141   : > { %v8447_v8 = vpop.f32.mrb[32].mxu1 }
 0x142   : > { %v8449_v10 = vpop.f32.mrb[33].mxu1 }
 0x143   : > { %v8452_v13 = vpop.f32.mrb[34].mxu1 }
 0x144   : > { %v8456_v19 = vpop.f32.mrb[35].mxu1 }
 0x146   : > { %6871 = vmatmul.mubr.bf16.gmra.mrb[76].mxu1 %v7513_v11 }
 0x147   : > { %7015 = vmatmul.mubr.bf16.gmra.mrb[76].mxu0 %v7514_v16  ;;  %6874 = vmatprep.mubr.bf16.mxu1 %v7515_v18  ;;  %v7529_v18 = vld [vmem:[%s8166_s10 + $0x2f0] ss:$8 sps:$4 sm:$0xff]  }
 0x148   : > { %7018 = vmatprep.mubr.bf16.mxu0 %v7516_v21 }
 0x149   : > { %v8459_v24 = vpop.f32.mrb[36].mxu1 }
 0x14a   : > { %v8461_v26 = vpop.f32.mrb[37].mxu1 }
 0x14b   : > { %v8464_v29 = vpop.f32.mrb[38].mxu1 }
 0x14c   : > { %v8468_v35 = vpop.f32.mrb[39].mxu1 }
 0x14e   : > { %6875 = vmatmul.mubr.bf16.gmra.mrb[80].mxu1 %v7517_v27  ;;  %v7530_v27 = vld [vmem:[%s8166_s10 + $0x310] ss:$8 sps:$4 sm:$0xff]  }
 0x14f   : > { %7019 = vmatmul.mubr.bf16.gmra.mrb[80].mxu0 %v7518_v32  ;;  %6878 = vmatprep.mubr.bf16.mxu1 %v7519_v34  ;;  %v7531_v32 = vld [vmem:[%s8166_s10 + $0x300] ss:$8 sps:$4 sm:$0xff]  }
 0x150   : > { %7022 = vmatprep.mubr.bf16.mxu0 %v7520_v37  ;;  %v7532_v37 = vld [vmem:[%s8166_s10 + $0x320] ss:$8 sps:$4 sm:$0xff]  }
 0x151   : > { %v8471_v40 = vpop.f32.mrb[40].mxu1 }
 0x152   : > { %v8473_v42 = vpop.f32.mrb[41].mxu1 }
 0x153   : > { %v8476_v45 = vpop.f32.mrb[42].mxu1 }
 0x154   : > { %v8480_v51 = vpop.f32.mrb[43].mxu1 }
 0x156   : > { %6879 = vmatmul.mubr.bf16.gmra.mrb[84].mxu1 %v7521_v43 }
 0x157   : > { %7023 = vmatmul.mubr.bf16.gmra.mrb[84].mxu0 %v7522_v48  ;;  %6882 = vmatprep.mubr.bf16.mxu1 %v7523_v50  ;;  %v7533_v50 = vld [vmem:[%s8166_s10 + $0x310] ss:$8 sps:$4 sm:$0xff]  }
 0x158   : > { %7026 = vmatprep.mubr.bf16.mxu0 %v7524_v53 }
 0x159   : > { %v8483_v56 = vpop.f32.mrb[44].mxu1 }
 0x15a   : > { %9357 = vst [vmem:[#allocation2_spill] sm:$0xff] %v8483_v56  ;;  %v8485_v58 = vpop.f32.mrb[45].mxu1 }
 0x15b   : > { %9358 = vst [vmem:[#allocation3_spill] sm:$0xff] %v8485_v58  ;;  %v8488_v61 = vpop.f32.mrb[46].mxu1 }
 0x15c   : > { %9359 = vst [vmem:[#allocation4_spill] sm:$0xff] %v8488_v61  ;;  %v8492_v3 = vpop.f32.mrb[47].mxu1 }
 0x15d   : > { %9360 = vst [vmem:[#allocation5_spill] sm:$0xff] %v8492_v3 }
 0x15e   : > { %6883 = vmatmul.mubr.bf16.gmra.mrb[88].mxu1 %v7525_v59  ;;  %v7534_v59 = vld [vmem:[%s8166_s10 + $0x330] ss:$8 sps:$4 sm:$0xff]  }
 0x15f   : > { %7027 = vmatmul.mubr.bf16.gmra.mrb[88].mxu0 %v7526_v0  ;;  %6886 = vmatprep.mubr.bf16.mxu1 %v7527_v2  ;;  %v7535_v0 = vld [vmem:[%s8166_s10 + $0x320] ss:$8 sps:$4 sm:$0xff]  }
 0x160   : > { %7030 = vmatprep.mubr.bf16.mxu0 %v7528_v5  ;;  %v7536_v5 = vld [vmem:[%s8166_s10 + $0x340] ss:$8 sps:$4 sm:$0xff]  }
 0x161   : > { %v8495_v11 = vpop.f32.mrb[48].mxu1 }
 0x162   : > { %9361 = vst [vmem:[#allocation6_spill] sm:$0xff] %v8495_v11  ;;  %v8497_v16 = vpop.f32.mrb[49].mxu1 }
 0x163   : > { %9362 = vst [vmem:[#allocation7_spill] sm:$0xff] %v8497_v16  ;;  %v8500_v21 = vpop.f32.mrb[50].mxu1 }
 0x164   : > { %9363 = vst [vmem:[#allocation8_spill] sm:$0xff] %v8500_v21  ;;  %v8504_v34 = vpop.f32.mrb[51].mxu1  ;;  %v7548_v21 = vld [vmem:[%s8166_s10 + $0x3a0] ss:$8 sps:$4 sm:$0xff]  }
 0x165   : > { %9364 = vst [vmem:[#allocation9_spill] sm:$0xff] %v8504_v34 }
 0x166   : > { %6887 = vmatmul.mubr.bf16.gmra.mrb[92].mxu1 %v7529_v18 }
 0x167   : > { %7031 = vmatmul.mubr.bf16.gmra.mrb[92].mxu0 %v7530_v27  ;;  %6890 = vmatprep.mubr.bf16.mxu1 %v7531_v32  ;;  %v7537_v32 = vld [vmem:[%s8166_s10 + $0x330] ss:$8 sps:$4 sm:$0xff]  }
 0x168   : > { %7034 = vmatprep.mubr.bf16.mxu0 %v7532_v37 }
 0x169   : > { %v8507_v43 = vpop.f32.mrb[52].mxu1 }
 0x16a   : > { %9365 = vst [vmem:[#allocation10_spill] sm:$0xff] %v8507_v43  ;;  %v8509_v48 = vpop.f32.mrb[53].mxu1 }
 0x16b   : > { %9366 = vst [vmem:[#allocation11_spill] sm:$0xff] %v8509_v48  ;;  %v8512_v53 = vpop.f32.mrb[54].mxu1  ;;  %v7539_v48 = vld [vmem:[%s8166_s10 + $0x340] ss:$8 sps:$4 sm:$0xff]  }
 0x16c   : > { %9367 = vst [vmem:[#allocation12_spill] sm:$0xff] %v8512_v53  ;;  %v8516_v2 = vpop.f32.mrb[55].mxu1  ;;  %v7538_v53 = vld [vmem:[%s8166_s10 + $0x350] ss:$8 sps:$4 sm:$0xff]  }
 0x16d   : > { %9368 = vst [vmem:[#allocation13_spill] sm:$0xff] %v8516_v2  ;;  %v7540_v2 = vld [vmem:[%s8166_s10 + $0x360] ss:$8 sps:$4 sm:$0xff]  }
 0x16e   : > { %6891 = vmatmul.mubr.bf16.gmra.mrb[96].mxu1 %v7533_v50 }
 0x16f   : > { %7035 = vmatmul.mubr.bf16.gmra.mrb[96].mxu0 %v7534_v59  ;;  %6894 = vmatprep.mubr.bf16.mxu1 %v7535_v0  ;;  %v7541_v0 = vld [vmem:[%s8166_s10 + $0x350] ss:$8 sps:$4 sm:$0xff]  }
 0x170   : > { %7038 = vmatprep.mubr.bf16.mxu0 %v7536_v5 }
 0x171   : > { %v8519_v18 = vpop.f32.mrb[56].mxu1 }
 0x172   : > { %9369 = vst [vmem:[#allocation14_spill] sm:$0xff] %v8519_v18  ;;  %v8521_v27 = vpop.f32.mrb[57].mxu1 }
 0x173   : > { %9370 = vst [vmem:[#allocation15_spill] sm:$0xff] %v8521_v27  ;;  %v8524_v37 = vpop.f32.mrb[58].mxu1  ;;  %v7543_v27 = vld [vmem:[%s8166_s10 + $0x360] ss:$8 sps:$4 sm:$0xff]  }
 0x174   : > { %9371 = vst [vmem:[#allocation16_spill] sm:$0xff] %v8524_v37  ;;  %v8528_v43 = vpop.f32.mrb[59].mxu1  ;;  %v7542_v37 = vld [vmem:[%s8166_s10 + $0x370] ss:$8 sps:$4 sm:$0xff]  }
 0x175   : > { %9372 = vst [vmem:[#allocation17_spill] sm:$0xff] %v8528_v43  ;;  %v7544_v43 = vld [vmem:[%s8166_s10 + $0x380] ss:$8 sps:$4 sm:$0xff]  }
 0x176   : > { %6895 = vmatmul.mubr.bf16.gmra.mrb[100].mxu1 %v7537_v32 }
 0x177   : > { %7039 = vmatmul.mubr.bf16.gmra.mrb[100].mxu0 %v7538_v53  ;;  %6898 = vmatprep.mubr.bf16.mxu1 %v7539_v48  ;;  %v8546_v53 = vld [vmem:[%s9355_s2] ss:$0 sm:$0xff] }
 0x178   : > { %7042 = vmatprep.mubr.bf16.mxu0 %v7540_v2  ;;  %v7545_v2 = vld [vmem:[%s8166_s10 + $0x370] ss:$8 sps:$4 sm:$0xff]  }
 0x179   : > { %v8531_v50 = vpop.f32.mrb[60].mxu1 }
 0x17a   : > { %9373 = vst [vmem:[#allocation18_spill] sm:$0xff] %v8531_v50  ;;  %v8533_v59 = vpop.f32.mrb[61].mxu1  ;;  %v7547_v50 = vld [vmem:[%s8166_s10 + $0x380] ss:$8 sps:$4 sm:$0xff]  }
 0x17b   : > { %9374 = vst [vmem:[#allocation19_spill] sm:$0xff] %v8533_v59  ;;  %v8536_v5 = vpop.f32.mrb[62].mxu1  ;;  %v7546_v59 = vld [vmem:[%s8166_s10 + $0x390] ss:$8 sps:$4 sm:$0xff]  }
 0x17c   : > { %9375 = vst [vmem:[#allocation20_spill] sm:$0xff] %v8536_v5  ;;  %v8540_v18 = vpop.f32.mrb[63].mxu1 }
 0x17d   : > { %9376 = vst [vmem:[#allocation21_spill] sm:$0xff] %v8540_v18 }
 0x17e   : > { %6899 = vmatmul.mubr.bf16.gmra.mrb[104].mxu1 %v7541_v0 }
 0x17f   : > { %7043 = vmatmul.mubr.bf16.gmra.mrb[104].mxu0 %v7542_v37  ;;  %6902 = vmatprep.mubr.bf16.mxu1 %v7543_v27 }
 0x180   : > { %7046 = vmatprep.mubr.bf16.mxu0 %v7544_v43 }
 0x182   : > { %v6940_v48 = vpop.f32.mrb[0].mxu0 }
 0x183   : > { %v7082_v32 = vadd.f32 %v6940_v48, %v8351_v6  ;;  %v3026_v5 = vpop.f32.mrb[1].mxu0  ;;  %v7549_v48 = vld [vmem:[%s8166_s10 + $0x390] ss:$8 sps:$4 sm:$0xff]  }
 0x184   : > { %v7083_v34 = vadd.f32 %v3026_v5, %v8353_v7  ;;  %v6941_v18 = vpop.f32.mrb[2].mxu0 }
 0x185   : > { %v8555_v37 = vadd.f32 %v7082_v32, %v8546_v53  ;;  %v7084_v43 = vadd.f32 %v6941_v18, %v8356_v9  ;;  %v3029_v27 = vpop.f32.mrb[3].mxu0  ;;  %v7551_v32 = vld [vmem:[%s8166_s10 + $0x3a0] ss:$8 sps:$4 sm:$0xff]  }
 0x186   : > { %v8559_v0 = vadd.f32 %v7083_v34, %v8546_v53  ;;  %v7085_v16 = vadd.f32 %v3029_v27, %v8360_v12  ;;  %6903 = vmatmul.mubr.bf16.gmra.mrb[108].mxu1 %v7545_v2  ;;  %v7552_v27 = vld [vmem:[%s8166_s10 + $0x3c0] ss:$8 sps:$4 sm:$0xff]  }
 0x187   : > { %v5650_v6 = vmul.f32 -1.442695, %v8555_v37  ;;  %v8564_v7 = vadd.f32 %v7084_v43, %v8546_v53  ;;  %7047 = vmatmul.mubr.bf16.gmra.mrb[108].mxu0 %v7546_v59  ;;  %6906 = vmatprep.mubr.bf16.mxu1 %v7547_v50  ;;  %v7550_v50 = vld [vmem:[%s8166_s10 + $0x3b0] ss:$8 sps:$4 sm:$0xff]  }
 0x188   : > { %v5648_v5 = vmul.f32 -1.442695, %v8559_v0  ;;  %v8568_v9 = vadd.f32 %v7085_v16, %v8546_v53  ;;  %7050 = vmatprep.mubr.bf16.mxu0 %v7548_v21 }
 0x189   : > { %7563 = vpow2.f32 %v5650_v6  ;;  %v5651_v12 = vmul.f32 -1.442695, %v8564_v7 }
 0x18a   : > { %7565 = vpow2.f32 %v5648_v5  ;;  %v5649_v34 = vmul.f32 -1.442695, %v8568_v9  ;;  %v6944_v18 = vpop.f32.mrb[4].mxu0 }
 0x18b   : > { %7567 = vpow2.f32 %v5651_v12  ;;  %v7086_v2 = vadd.f32 %v6944_v18, %v8363_v14  ;;  %v3042_v59 = vpop.f32.mrb[5].mxu0 }
 0x18c   : > { %7569 = vpow2.f32 %v5649_v34  ;;  %v7087_v16 = vadd.f32 %v3042_v59, %v8365_v15  ;;  %v6945_v43 = vpop.f32.mrb[6].mxu0 }
 0x18d   : > { %v8579_v21 = vadd.f32 %v7086_v2, %v8546_v53  ;;  %v7088_v6 = vadd.f32 %v6945_v43, %v8368_v17  ;;  %v3045_v5 = vpop.f32.mrb[7].mxu0  ;;  %v7553_v2 = vld [vmem:[%s8166_s10 + $0x3b0] ss:$8 sps:$4 sm:$0xff]   ;;  %v7555_v43 = vld [vmem:[%s8166_s10 + $0x3c0] ss:$8 sps:$4 sm:$0xff]  }
 0x18e   : > { %v8583_v11 = vadd.f32 %v7087_v16, %v8546_v53  ;;  %v7089_v14 = vadd.f32 %v3045_v5, %v8372_v20  ;;  %6907 = vmatmul.mubr.bf16.gmra.mrb[112].mxu1 %v7549_v48  ;;  %v7554_v16 = vld [vmem:[%s8166_s10 + $0x3d0] ss:$8 sps:$4 sm:$0xff]  }
 0x18f   : > { %v5654_v12 = vmul.f32 -1.442695, %v8579_v21  ;;  %v8588_v34 = vadd.f32 %v7088_v6, %v8546_v53  ;;  %7051 = vmatmul.mubr.bf16.gmra.mrb[112].mxu0 %v7550_v50  ;;  %6910 = vmatprep.mubr.bf16.mxu1 %v7551_v32 }
 0x190   : > { %v5652_v15 = vmul.f32 -1.442695, %v8583_v11  ;;  %v8592_v17 = vadd.f32 %v7089_v14, %v8546_v53  ;;  %7054 = vmatprep.mubr.bf16.mxu0 %v7552_v27 }
 0x191   : > { %7571 = vpow2.f32 %v5654_v12  ;;  %v5655_v18 = vmul.f32 -1.442695, %v8588_v34  ;;  %v7556_v12 = vld [vmem:[%s8166_s10 + $0x3e0] ss:$8 sps:$4 sm:$0xff]  }
 0x192   : > { %7573 = vpow2.f32 %v5652_v15  ;;  %v5653_v20 = vmul.f32 -1.442695, %v8592_v17  ;;  %v6948_v48 = vpop.f32.mrb[8].mxu0 }
 0x193   : > { %v7564_v59 = vpop.eup %7563  ;;  %7575 = vpow2.f32 %v5655_v18  ;;  %v7090_v50 = vadd.f32 %v6948_v48, %v8375_v22  ;;  %v3058_v32 = vpop.f32.mrb[9].mxu0 }
 0x194   : > { %v7566_v6 = vpop.eup %7565  ;;  %v4186_v5 = vadd.f32 1.0, %v7564_v59  ;;  %7577 = vpow2.f32 %v5653_v20  ;;  %v7091_v27 = vadd.f32 %v3058_v32, %v8377_v23  ;;  %v6949_v14 = vpop.f32.mrb[10].mxu0 }
 0x195   : > { %v7568_v3 = vpop.eup %7567  ;;  %v4184_v15 = vadd.f32 1.0, %v7566_v6  ;;  %v8603_v61 = vadd.f32 %v7090_v50, %v8546_v53  ;;  %v7092_v58 = vadd.f32 %v6949_v14, %v8380_v25  ;;  %v3061_v18 = vpop.f32.mrb[11].mxu0  ;;  %v7558_v6 = vld [vmem:[%s8166_s10 + $0x3f0] ss:$8 sps:$4 sm:$0xff]  }
 0x196   : > { %v7570_v56 = vpop.eup %7569  ;;  %7579 = vrcp.f32 %v4186_v5  ;;  %v4187_v22 = vadd.f32 1.0, %v7568_v3  ;;  %v8607_v48 = vadd.f32 %v7091_v27, %v8546_v53  ;;  %v7093_v20 = vadd.f32 %v3061_v18, %v8384_v28  ;;  %6911 = vmatmul.mubr.bf16.gmra.mrb[116].mxu1 %v7553_v2  ;;  %v7557_v2 = vld [vmem:[%s8166_s10 + $0x3d0] ss:$8 sps:$4 sm:$0xff]   ;;  %v7559_v5 = vld [vmem:[%s8166_s10 + $0x3e0] ss:$8 sps:$4 sm:$0xff]  }
 0x197   : > { %7581 = vrcp.f32 %v4184_v15  ;;  %v4185_v23 = vadd.f32 1.0, %v7570_v56  ;;  %v5658_v59 = vmul.f32 -1.442695, %v8603_v61  ;;  %v8612_v50 = vadd.f32 %v7092_v58, %v8546_v53  ;;  %7055 = vmatmul.mubr.bf16.gmra.mrb[116].mxu0 %v7554_v16  ;;  %6914 = vmatprep.mubr.bf16.mxu1 %v7555_v43  ;;  %v7560_v18 = vld [vmem:[%s8166_s10 + $0x400] ss:$8 sps:$4 sm:$0xff]  }
 0x198   : > { %7583 = vrcp.f32 %v4187_v22  ;;  %v5656_v25 = vmul.f32 -1.442695, %v8607_v48  ;;  %v8616_v3 = vadd.f32 %v7093_v20, %v8546_v53  ;;  %7058 = vmatprep.mubr.bf16.mxu0 %v7556_v12 }
 0x199   : > { %7585 = vrcp.f32 %v4185_v23  ;;  %v5659_v28 = vmul.f32 -1.442695, %v8612_v50 }
 0x19a   : > { %7587 = vpow2.f32 %v5658_v59  ;;  %v5657_v56 = vmul.f32 -1.442695, %v8616_v3  ;;  %v6952_v58 = vpop.f32.mrb[12].mxu0 }
 0x19b   : > { %v7572_v32 = vpop.eup %7571  ;;  %7589 = vpow2.f32 %v5656_v25  ;;  %v7094_v16 = vadd.f32 %v6952_v58, %v8387_v30  ;;  %v3074_v43 = vpop.f32.mrb[13].mxu0 }
 0x19c   : > { %v7574_v27 = vpop.eup %7573  ;;  %v4190_v14 = vadd.f32 1.0, %v7572_v32  ;;  %7591 = vpow2.f32 %v5659_v28  ;;  %v7095_v12 = vadd.f32 %v3074_v43, %v8389_v31  ;;  %v6953_v15 = vpop.f32.mrb[14].mxu0 }
 0x19d   : > { %v7576_v22 = vpop.eup %7575  ;;  %v4188_v20 = vadd.f32 1.0, %v7574_v27  ;;  %7593 = vpow2.f32 %v5657_v56  ;;  %v8627_v23 = vadd.f32 %v7094_v16, %v8546_v53  ;;  %v7096_v59 = vadd.f32 %v6953_v15, %v8392_v33  ;;  %v3077_v25 = vpop.f32.mrb[15].mxu0 }
 0x19e   : > { %v7578_v30 = vpop.eup %7577  ;;  %7595 = vrcp.f32 %v4190_v14  ;;  %v4191_v58 = vadd.f32 1.0, %v7576_v22  ;;  %v8631_v32 = vadd.f32 %v7095_v12, %v8546_v53  ;;  %v7097_v31 = vadd.f32 %v3077_v25, %v8396_v36  ;;  %6915 = vmatmul.mubr.bf16.gmra.mrb[120].mxu1 %v7557_v2  ;;  %v7562_v25 = vld [vmem:[%s8166_s10 + $0x410] ss:$8 sps:$4 sm:$0xff]  }
 0x19f   : > { %7597 = vrcp.f32 %v4188_v20  ;;  %v4189_v28 = vadd.f32 1.0, %v7578_v30  ;;  %v5662_v56 = vmul.f32 -1.442695, %v8627_v23  ;;  %v8636_v16 = vadd.f32 %v7096_v59, %v8546_v53  ;;  %7059 = vmatmul.mubr.bf16.gmra.mrb[120].mxu0 %v7558_v6  ;;  %6918 = vmatprep.mubr.bf16.mxu1 %v7559_v5  ;;  %v7561_v5 = vld [vmem:[%s8166_s10 + $0x3f0] ss:$8 sps:$4 sm:$0xff]  }
 0x1a0   : > { %v7580_v33 = vpop.eup %7579  ;;  %7599 = vrcp.f32 %v4191_v58  ;;  %v5660_v43 = vmul.f32 -1.442695, %v8631_v32  ;;  %v8640_v27 = vadd.f32 %v7097_v31, %v8546_v53  ;;  %7062 = vmatprep.mubr.bf16.mxu0 %v7560_v18 }
 0x1a1   : > { %v7582_v36 = vpop.eup %7581  ;;  %7601 = vrcp.f32 %v4189_v28  ;;  %v5663_v2 = vmul.f32 -1.442695, %v8636_v16  ;;  %v4570_v22 = vmul.f32 %v7580_v33, %v8555_v37 }
 0x1a2   : > { %v7584_v14 = vpop.eup %7583  ;;  %7603 = vpow2.f32 %v5662_v56  ;;  %v5661_v12 = vmul.f32 -1.442695, %v8640_v27  ;;  %v6956_v6 = vpop.f32.mrb[16].mxu0  ;;  %v4568_v58 = vmul.f32 %v7582_v36, %v8559_v0 }
 0x1a3   : > { %v7586_v15 = vpop.eup %7585  ;;  %v4571_v20 = vmul.f32 %v7584_v14, %v8564_v7  ;;  %7605 = vpow2.f32 %v5660_v43  ;;  %v7098_v18 = vadd.f32 %v6956_v6, %v8399_v38  ;;  %v3090_v59 = vpop.f32.mrb[17].mxu0 }
 0x1a4   : > { %v7588_v30 = vpop.eup %7587  ;;  %v4569_v31 = vmul.f32 %v7586_v15, %v8568_v9  ;;  %7607 = vpow2.f32 %v5663_v2  ;;  %v7099_v37 = vadd.f32 %v3090_v59, %v8401_v39  ;;  %v6957_v7 = vpop.f32.mrb[18].mxu0 }
 0x1a5   : > { %v7590_v28 = vpop.eup %7589  ;;  %v6043_v56 = vpack.c.bf16 %v4571_v20, %v4570_v22  ;;  %v4194_v38 = vadd.f32 1.0, %v7588_v30  ;;  %7609 = vpow2.f32 %v5661_v12  ;;  %v8659_v33 = vadd.f32 %v7098_v18, %v8546_v53  ;;  %v3093_v0 = vpop.f32.mrb[19].mxu0 }
 0x1a6   : > { %v7592_v43 = vpop.eup %7591  ;;  %v6038_v36 = vpack.c.bf16 %v4569_v31, %v4568_v58  ;;  %v4192_v14 = vadd.f32 1.0, %v7590_v28  ;;  %v8662_v6 = vadd.f32 %v7099_v37, %v8546_v53  ;;  %v7100_v9 = vadd.f32 %v6957_v7, %v8404_v41  ;;  %6919 = vmatmul.mubr.bf16.gmra.mrb[124].mxu1 %v7561_v5 }
 0x1a7   : > { %v7594_v39 = vpop.eup %7593  ;;  %6355 = vst [vmem:[%s8654_s21 + $0x8] sm:$0xff] %v6043_v56   ;;  %7611 = vrcp.f32 %v4194_v38  ;;  %v4195_v2 = vadd.f32 1.0, %v7592_v43  ;;  %v5666_v12 = vmul.f32 -1.442695, %v8659_v33  ;;  %v7101_v15 = vadd.f32 %v3093_v0, %v8408_v44  ;;  %7063 = vmatmul.mubr.bf16.gmra.mrb[124].mxu0 %v7562_v25 }
 0x1a8   : > { %v7596_v22 = vpop.eup %7595  ;;  %6039 = vst [vmem:[%s8654_s21] sm:$0xff] %v6038_v36   ;;  %7613 = vrcp.f32 %v4192_v14  ;;  %v4193_v20 = vadd.f32 1.0, %v7594_v39  ;;  %v5664_v18 = vmul.f32 -1.442695, %v8662_v6  ;;  %v8671_v59 = vadd.f32 %v7100_v9, %v8546_v53 }
 0x1a9   : > { %v7598_v41 = vpop.eup %7597  ;;  %7615 = vrcp.f32 %v4195_v2  ;;  %v8674_v5 = vadd.f32 %v7101_v15, %v8546_v53  ;;  %v4574_v58 = vmul.f32 %v7596_v22, %v8579_v21 }
 0x1aa   : > { %v7600_v30 = vpop.eup %7599  ;;  %7617 = vrcp.f32 %v4193_v20  ;;  %v5667_v44 = vmul.f32 -1.442695, %v8671_v59  ;;  %v6960_v25 = vpop.f32.mrb[20].mxu0  ;;  %v4572_v0 = vmul.f32 %v7598_v41, %v8583_v11 }
 0x1ab   : > { %v7602_v31 = vpop.eup %7601  ;;  %v4575_v37 = vmul.f32 %v7600_v30, %v8588_v34  ;;  %7619 = vpow2.f32 %v5666_v12  ;;  %v5665_v7 = vmul.f32 -1.442695, %v8674_v5  ;;  %v7102_v28 = vadd.f32 %v6960_v25, %v8411_v46  ;;  %v3106_v56 = vpop.f32.mrb[21].mxu0 }
 0x1ac   : > { %v7604_v38 = vpop.eup %7603  ;;  %v4573_v43 = vmul.f32 %v7602_v31, %v8592_v17  ;;  %7621 = vpow2.f32 %v5664_v18  ;;  %v7103_v21 = vadd.f32 %v3106_v56, %v8413_v47  ;;  %v6961_v36 = vpop.f32.mrb[22].mxu0 }
 0x1ad   : > { %v7606_v14 = vpop.eup %7605  ;;  %v6053_v9 = vpack.c.bf16 %v4575_v37, %v4574_v58  ;;  %v4198_v34 = vadd.f32 1.0, %v7604_v38  ;;  %7623 = vpow2.f32 %v5667_v44  ;;  %v8685_v39 = vadd.f32 %v7102_v28, %v8546_v53  ;;  %v3109_v46 = vpop.f32.mrb[23].mxu0 }
 0x1ae   : > { %v7608_v2 = vpop.eup %7607  ;;  %v6048_v12 = vpack.c.bf16 %v4573_v43, %v4572_v0  ;;  %v4196_v15 = vadd.f32 1.0, %v7606_v14  ;;  %7625 = vpow2.f32 %v5665_v7  ;;  %v8688_v11 = vadd.f32 %v7103_v21, %v8546_v53 }
 0x1af   : > { %v7610_v17 = vpop.eup %7609  ;;  %6357 = vst [vmem:[%s8654_s21 + $0x18] sm:$0xff] %v6053_v9   ;;  %7627 = vrcp.f32 %v4198_v34  ;;  %v4199_v47 = vadd.f32 1.0, %v7608_v2  ;;  %v5670_v22 = vmul.f32 -1.442695, %v8685_v39  ;;  %v7104_v20 = vadd.f32 %v6961_v36, %v8416_v49 }
 0x1b0   : > { %6356 = vst [vmem:[%s8654_s21 + $0x10] sm:$0xff] %v6048_v12   ;;  %7629 = vrcp.f32 %v4196_v15  ;;  %v4197_v18 = vadd.f32 1.0, %v7610_v17  ;;  %v5668_v41 = vmul.f32 -1.442695, %v8688_v11  ;;  %v7105_v30 = vadd.f32 %v3109_v46, %v8420_v52 }
 0x1b1   : > { %v7612_v58 = vpop.eup %7611  ;;  %7631 = vrcp.f32 %v4199_v47  ;;  %v8697_v44 = vadd.f32 %v7104_v20, %v8546_v53 }
 0x1b2   : > { %v7614_v25 = vpop.eup %7613  ;;  %v4578_v31 = vmul.f32 %v7612_v58, %v8603_v61  ;;  %7633 = vrcp.f32 %v4197_v18  ;;  %v8701_v37 = vadd.f32 %v7105_v30, %v8546_v53  ;;  %v6964_v49 = vpop.f32.mrb[24].mxu0 }
 0x1b3   : > { %v7616_v7 = vpop.eup %7615  ;;  %v4576_v28 = vmul.f32 %v7614_v25, %v8607_v48  ;;  %7635 = vpow2.f32 %v5670_v22  ;;  %v5671_v56 = vmul.f32 -1.442695, %v8697_v44  ;;  %v7106_v52 = vadd.f32 %v6964_v49, %v8423_v54  ;;  %v3122_v38 = vpop.f32.mrb[25].mxu0 }
 0x1b4   : > { %v7618_v0 = vpop.eup %7617  ;;  %v4579_v43 = vmul.f32 %v7616_v7, %v8612_v50  ;;  %7637 = vpow2.f32 %v5668_v41  ;;  %v5669_v61 = vmul.f32 -1.442695, %v8701_v37  ;;  %v7107_v21 = vadd.f32 %v3122_v38, %v8425_v55  ;;  %v6965_v36 = vpop.f32.mrb[26].mxu0 }
 0x1b5   : > { %v7620_v14 = vpop.eup %7619  ;;  %v4577_v9 = vmul.f32 %v7618_v0, %v8616_v3  ;;  %7639 = vpow2.f32 %v5671_v56  ;;  %v8711_v48 = vadd.f32 %v7106_v52, %v8546_v53  ;;  %v7108_v54 = vadd.f32 %v6965_v36, %v8428_v57  ;;  %v3125_v34 = vpop.f32.mrb[27].mxu0 }
 0x1b6   : > { %v7622_v46 = vpop.eup %7621  ;;  %v6063_v50 = vpack.c.bf16 %v4579_v43, %v4578_v31  ;;  %v4202_v2 = vadd.f32 1.0, %v7620_v14  ;;  %7641 = vpow2.f32 %v5669_v61  ;;  %v8715_v12 = vadd.f32 %v7107_v21, %v8546_v53 }
 0x1b7   : > { %v7624_v55 = vpop.eup %7623  ;;  %v6058_v15 = vpack.c.bf16 %v4577_v9, %v4576_v28  ;;  %v4200_v17 = vadd.f32 1.0, %v7622_v46  ;;  %v8718_v3 = vadd.f32 %v7108_v54, %v8546_v53  ;;  %v5674_v57 = vmul.f32 -1.442695, %v8711_v48 }
 0x1b8   : > { %v7626_v47 = vpop.eup %7625  ;;  %6359 = vst [vmem:[%s8654_s21 + $0x28] sm:$0xff] %v6063_v50   ;;  %7643 = vrcp.f32 %v4202_v2  ;;  %v4203_v22 = vadd.f32 1.0, %v7624_v55  ;;  %v7109_v20 = vadd.f32 %v3125_v34, %v8432_v60  ;;  %v5672_v30 = vmul.f32 -1.442695, %v8715_v12 }
 0x1b9   : > { %v7628_v18 = vpop.eup %7627  ;;  %6358 = vst [vmem:[%s8654_s21 + $0x20] sm:$0xff] %v6058_v15   ;;  %7645 = vrcp.f32 %v4200_v17  ;;  %v4201_v41 = vadd.f32 1.0, %v7626_v47  ;;  %v5675_v25 = vmul.f32 -1.442695, %v8718_v3 }
 0x1ba   : > { %v7630_v58 = vpop.eup %7629  ;;  %7647 = vrcp.f32 %v4203_v22  ;;  %v8727_v31 = vadd.f32 %v7109_v20, %v8546_v53  ;;  %v6968_v49 = vpop.f32.mrb[28].mxu0  ;;  %v4582_v28 = vmul.f32 %v7628_v18, %v8627_v23 }
 0x1bb   : > { %v7632_v7 = vpop.eup %7631  ;;  %v4580_v56 = vmul.f32 %v7630_v58, %v8631_v32  ;;  %7649 = vrcp.f32 %v4201_v41  ;;  %v7110_v60 = vadd.f32 %v6968_v49, %v8435_v62  ;;  %v3138_v52 = vpop.f32.mrb[29].mxu0 }
 0x1bc   : > { %v7634_v38 = vpop.eup %7633  ;;  %v4583_v0 = vmul.f32 %v7632_v7, %v8636_v16  ;;  %7651 = vpow2.f32 %v5674_v57  ;;  %v5673_v43 = vmul.f32 -1.442695, %v8727_v31  ;;  %v7111_v61 = vadd.f32 %v3138_v52, %v8437_v63  ;;  %v6969_v21 = vpop.f32.mrb[30].mxu0 }
 0x1bd   : > { %v7636_v36 = vpop.eup %7635  ;;  %v4581_v14 = vmul.f32 %v7634_v38, %v8640_v27  ;;  %7653 = vpow2.f32 %v5672_v30  ;;  %v8737_v23 = vadd.f32 %v7110_v60, %v8546_v53  ;;  %v7112_v62 = vadd.f32 %v6969_v21, %v8440_v1  ;;  %v3141_v32 = vpop.f32.mrb[31].mxu0 }
 0x1be   : > { %v7638_v9 = vpop.eup %7637  ;;  %v6073_v16 = vpack.c.bf16 %v4583_v0, %v4582_v28  ;;  %v4206_v54 = vadd.f32 1.0, %v7636_v36  ;;  %7655 = vpow2.f32 %v5675_v25  ;;  %v8741_v34 = vadd.f32 %v7111_v61, %v8546_v53 }
 0x1bf   : > { %v7640_v63 = vpop.eup %7639  ;;  %v6068_v46 = vpack.c.bf16 %v4581_v14, %v4580_v56  ;;  %v4204_v50 = vadd.f32 1.0, %v7638_v9  ;;  %7657 = vpow2.f32 %v5673_v43  ;;  %v5678_v55 = vmul.f32 -1.442695, %v8737_v23 }
 0x1c0   : > { %v7642_v27 = vpop.eup %7641  ;;  %6361 = vst [vmem:[%s8654_s21 + $0x38] sm:$0xff] %v6073_v16   ;;  %7659 = vrcp.f32 %v4206_v54  ;;  %v4207_v2 = vadd.f32 1.0, %v7640_v63  ;;  %v8746_v1 = vadd.f32 %v7112_v62, %v8546_v53  ;;  %v5676_v17 = vmul.f32 -1.442695, %v8741_v34 }
 0x1c1   : > { %6360 = vst [vmem:[%s8654_s21 + $0x30] sm:$0xff] %v6068_v46   ;;  %7661 = vrcp.f32 %v4204_v50  ;;  %v4205_v15 = vadd.f32 1.0, %v7642_v27  ;;  %v7113_v47 = vadd.f32 %v3141_v32, %v8444_v4 }
 0x1c2   : > { %v7644_v22 = vpop.eup %7643  ;;  %7663 = vrcp.f32 %v4207_v2  ;;  %v5679_v57 = vmul.f32 -1.442695, %v8746_v1  ;;  %v6972_v20 = vpop.f32.mrb[32].mxu0 }
 0x1c3   : > { %v7646_v18 = vpop.eup %7645  ;;  %7665 = vrcp.f32 %v4205_v15  ;;  %v8753_v41 = vadd.f32 %v7113_v47, %v8546_v53  ;;  %v7114_v30 = vadd.f32 %v6972_v20, %v8447_v8  ;;  %v3154_v58 = vpop.f32.mrb[33].mxu0  ;;  %v4586_v49 = vmul.f32 %v7644_v22, %v8659_v33 }
 0x1c4   : > { %v7648_v25 = vpop.eup %7647  ;;  %v4584_v7 = vmul.f32 %v7646_v18, %v8662_v6  ;;  %7667 = vpow2.f32 %v5678_v55  ;;  %v7115_v4 = vadd.f32 %v3154_v58, %v8449_v10  ;;  %v6973_v28 = vpop.f32.mrb[34].mxu0 }
 0x1c5   : > { %v7650_v56 = vpop.eup %7649  ;;  %v4587_v60 = vmul.f32 %v7648_v25, %v8671_v59  ;;  %7669 = vpow2.f32 %v5676_v17  ;;  %v5677_v52 = vmul.f32 -1.442695, %v8753_v41  ;;  %v8762_v38 = vadd.f32 %v7114_v30, %v8546_v53  ;;  %v3157_v8 = vpop.f32.mrb[35].mxu0 }
 0x1c6   : > { %v7652_v0 = vpop.eup %7651  ;;  %v4585_v33 = vmul.f32 %v7650_v56, %v8674_v5  ;;  %7671 = vpow2.f32 %v5679_v57  ;;  %v8766_v6 = vadd.f32 %v7115_v4, %v8546_v53  ;;  %v7116_v10 = vadd.f32 %v6973_v28, %v8452_v13 }
 0x1c7   : > { %v7654_v43 = vpop.eup %7653  ;;  %v6083_v59 = vpack.c.bf16 %v4587_v60, %v4586_v49  ;;  %v4210_v61 = vadd.f32 1.0, %v7652_v0  ;;  %7673 = vpow2.f32 %v5677_v52  ;;  %v5682_v9 = vmul.f32 -1.442695, %v8762_v38 }
 0x1c8   : > { %v7656_v21 = vpop.eup %7655  ;;  %v6078_v36 = vpack.c.bf16 %v4585_v33, %v4584_v7  ;;  %v4208_v14 = vadd.f32 1.0, %v7654_v43  ;;  %v8770_v62 = vadd.f32 %v7116_v10, %v8546_v53  ;;  %v7117_v16 = vadd.f32 %v3157_v8, %v8456_v19 }
 0x1c9   : > { %v7658_v32 = vpop.eup %7657  ;;  %6363 = vst [vmem:[%s8654_s21 + $0x48] sm:$0xff] %v6083_v59   ;;  %7675 = vrcp.f32 %v4210_v61  ;;  %v4211_v5 = vadd.f32 1.0, %v7656_v21  ;;  %v5680_v63 = vmul.f32 -1.442695, %v8766_v6 }
 0x1ca   : > { %v7660_v13 = vpop.eup %7659  ;;  %6362 = vst [vmem:[%s8654_s21 + $0x40] sm:$0xff] %v6078_v36   ;;  %7677 = vrcp.f32 %v4208_v14  ;;  %v4209_v54 = vadd.f32 1.0, %v7658_v32  ;;  %v6976_v46 = vpop.f32.mrb[36].mxu0  ;;  %v5683_v27 = vmul.f32 -1.442695, %v8770_v62  ;;  %v8779_v2 = vadd.f32 %v7117_v16, %v8546_v53 }
 0x1cb   : > { %v7662_v50 = vpop.eup %7661  ;;  %7679 = vrcp.f32 %v4211_v5  ;;  %v7118_v55 = vadd.f32 %v6976_v46, %v8459_v24  ;;  %v3170_v15 = vpop.f32.mrb[37].mxu0  ;;  %v4590_v19 = vmul.f32 %v7660_v13, %v8685_v39 }
 0x1cc   : > { %v7664_v17 = vpop.eup %7663  ;;  %v4588_v47 = vmul.f32 %v7662_v50, %v8688_v11  ;;  %7681 = vrcp.f32 %v4209_v54  ;;  %v7119_v22 = vadd.f32 %v3170_v15, %v8461_v26  ;;  %v6977_v57 = vpop.f32.mrb[38].mxu0  ;;  %v5681_v30 = vmul.f32 -1.442695, %v8779_v2 }
 0x1cd   : > { %v7666_v20 = vpop.eup %7665  ;;  %v4591_v18 = vmul.f32 %v7664_v17, %v8697_v44  ;;  %7683 = vpow2.f32 %v5682_v9  ;;  %v8788_v58 = vadd.f32 %v7118_v55, %v8546_v53  ;;  %v3173_v24 = vpop.f32.mrb[39].mxu0  ;;  %v7120_v26 = vadd.f32 %v6977_v57, %v8464_v29 }
 0x1ce   : > { %v7668_v25 = vpop.eup %7667  ;;  %v4589_v39 = vmul.f32 %v7666_v20, %v8701_v37  ;;  %7685 = vpow2.f32 %v5680_v63  ;;  %v8792_v11 = vadd.f32 %v7119_v22, %v8546_v53  ;;  %v7121_v29 = vadd.f32 %v3173_v24, %v8468_v35 }
 0x1cf   : > { %v7670_v49 = vpop.eup %7669  ;;  %v6093_v44 = vpack.c.bf16 %v4591_v18, %v4590_v19  ;;  %v4214_v7 = vadd.f32 1.0, %v7668_v25  ;;  %7687 = vpow2.f32 %v5683_v27  ;;  %v5686_v60 = vmul.f32 -1.442695, %v8788_v58 }
 0x1d0   : > { %v7672_v4 = vpop.eup %7671  ;;  %v6088_v28 = vpack.c.bf16 %v4589_v39, %v4588_v47  ;;  %v4212_v56 = vadd.f32 1.0, %v7670_v49  ;;  %7689 = vpow2.f32 %v5681_v30  ;;  %v8798_v8 = vadd.f32 %v7120_v26, %v8546_v53  ;;  %v9377_v39 = vld [vmem:[#allocation2_spill] sm:$0xff] }
 0x1d1   : > { %v7674_v52 = vpop.eup %7673  ;;  %6365 = vst [vmem:[%s8654_s21 + $0x58] sm:$0xff] %v6093_v44   ;;  %7691 = vrcp.f32 %v4214_v7  ;;  %v4215_v37 = vadd.f32 1.0, %v7672_v4  ;;  %v5684_v33 = vmul.f32 -1.442695, %v8792_v11  ;;  %v8805_v61 = vadd.f32 %v7121_v29, %v8546_v53  ;;  %v9378_v4 = vld [vmem:[#allocation3_spill] sm:$0xff]  ;;  %v9379_v29 = vld [vmem:[#allocation4_spill] sm:$0xff] }
 0x1d2   : > { %6364 = vst [vmem:[%s8654_s21 + $0x50] sm:$0xff] %v6088_v28   ;;  %7693 = vrcp.f32 %v4212_v56  ;;  %v4213_v0 = vadd.f32 1.0, %v7674_v52  ;;  %v6980_v10 = vpop.f32.mrb[40].mxu0  ;;  %v5687_v59 = vmul.f32 -1.442695, %v8798_v8 }
 0x1d3   : > { %v7676_v43 = vpop.eup %7675  ;;  %7695 = vrcp.f32 %v4215_v37  ;;  %v7122_v21 = vadd.f32 %v6980_v10, %v8471_v40  ;;  %v3186_v36 = vpop.f32.mrb[41].mxu0  ;;  %v5685_v13 = vmul.f32 -1.442695, %v8805_v61 }
 0x1d4   : > { %v7678_v14 = vpop.eup %7677  ;;  %v4594_v32 = vmul.f32 %v7676_v43, %v8711_v48  ;;  %7697 = vrcp.f32 %v4213_v0  ;;  %v7123_v35 = vadd.f32 %v3186_v36, %v8473_v42  ;;  %v6981_v5 = vpop.f32.mrb[42].mxu0 }
 0x1d5   : > { %v7680_v9 = vpop.eup %7679  ;;  %v4592_v16 = vmul.f32 %v7678_v14, %v8715_v12  ;;  %7699 = vpow2.f32 %v5686_v60  ;;  %v8813_v54 = vadd.f32 %v7122_v21, %v8546_v53  ;;  %v3189_v63 = vpop.f32.mrb[43].mxu0  ;;  %v7124_v42 = vadd.f32 %v6981_v5, %v8476_v45  ;;  %v9380_v21 = vld [vmem:[#allocation5_spill] sm:$0xff] }
 0x1d6   : > { %v7682_v46 = vpop.eup %7681  ;;  %v4595_v40 = vmul.f32 %v7680_v9, %v8718_v3  ;;  %7701 = vpow2.f32 %v5684_v33  ;;  %v8817_v48 = vadd.f32 %v7123_v35, %v8546_v53  ;;  %v7125_v55 = vadd.f32 %v3189_v63, %v8480_v51 }
 0x1d7   : > { %v7684_v50 = vpop.eup %7683  ;;  %v4593_v12 = vmul.f32 %v7682_v46, %v8727_v31  ;;  %7703 = vpow2.f32 %v5687_v59  ;;  %v5690_v27 = vmul.f32 -1.442695, %v8813_v54  ;;  %v8824_v45 = vadd.f32 %v7124_v42, %v8546_v53 }
 0x1d8   : > { %v7686_v15 = vpop.eup %7685  ;;  %v6103_v17 = vpack.c.bf16 %v4595_v40, %v4594_v32  ;;  %v4218_v19 = vadd.f32 1.0, %v7684_v50  ;;  %7705 = vpow2.f32 %v5685_v13  ;;  %v5688_v20 = vmul.f32 -1.442695, %v8817_v48 }
 0x1d9   : > { %v7688_v3 = vpop.eup %7687  ;;  %v6098_v47 = vpack.c.bf16 %v4593_v12, %v4592_v16  ;;  %v4216_v22 = vadd.f32 1.0, %v7686_v15  ;;  %7707 = vpow2.f32 %v5690_v27  ;;  %v8829_v51 = vadd.f32 %v7125_v55, %v8546_v53  ;;  %v9381_v55 = vld [vmem:[#allocation6_spill] sm:$0xff] }
 0x1da   : > { %v7690_v57 = vpop.eup %7689  ;;  %6367 = vst [vmem:[%s8654_s21 + $0x68] sm:$0xff] %v6103_v17   ;;  %7709 = vrcp.f32 %v4218_v19  ;;  %v4219_v31 = vadd.f32 1.0, %v7688_v3  ;;  %v6984_v18 = vpop.f32.mrb[44].mxu0  ;;  %v5691_v25 = vmul.f32 -1.442695, %v8824_v45 }
 0x1db   : > { %v7692_v30 = vpop.eup %7691  ;;  %6366 = vst [vmem:[%s8654_s21 + $0x60] sm:$0xff] %v6098_v47   ;;  %7711 = vrcp.f32 %v4216_v22  ;;  %v4217_v24 = vadd.f32 1.0, %v7690_v57  ;;  %v7126_v26 = vadd.f32 %v6984_v18, %v9377_v39  ;;  %v3202_v49 = vpop.f32.mrb[45].mxu0  ;;  %v5689_v7 = vmul.f32 -1.442695, %v8829_v51  ;;  %v9382_v22 = vld [vmem:[#allocation7_spill] sm:$0xff] }
 0x1dc   : > { %v7694_v44 = vpop.eup %7693  ;;  %7713 = vrcp.f32 %v4219_v31  ;;  %v7127_v28 = vadd.f32 %v3202_v49, %v9378_v4  ;;  %v6985_v56 = vpop.f32.mrb[46].mxu0  ;;  %v4598_v52 = vmul.f32 %v7692_v30, %v8737_v23 }
 0x1dd   : > { %v7696_v60 = vpop.eup %7695  ;;  %7715 = vrcp.f32 %v4217_v24  ;;  %v8838_v37 = vadd.f32 %v7126_v26, %v8546_v53  ;;  %v7128_v0 = vadd.f32 %v6985_v56, %v9379_v29  ;;  %v3205_v33 = vpop.f32.mrb[47].mxu0  ;;  %v4596_v43 = vmul.f32 %v7694_v44, %v8741_v34  ;;  %v9383_v24 = vld [vmem:[#allocation8_spill] sm:$0xff] }
 0x1de   : > { %v7698_v10 = vpop.eup %7697  ;;  %v4599_v59 = vmul.f32 %v7696_v60, %v8746_v1  ;;  %7717 = vpow2.f32 %v5688_v20  ;;  %v7129_v36 = vadd.f32 %v3205_v33, %v9380_v21  ;;  %v8847_v35 = vadd.f32 %v7127_v28, %v8546_v53 }
 0x1df   : > { %v7700_v14 = vpop.eup %7699  ;;  %v4597_v32 = vmul.f32 %v7698_v10, %v8753_v41  ;;  %7719 = vpow2.f32 %v5691_v25  ;;  %v5694_v23 = vmul.f32 -1.442695, %v8838_v37  ;;  %v8850_v34 = vadd.f32 %v7128_v0, %v8546_v53 }
 0x1e0   : > { %v7702_v5 = vpop.eup %7701  ;;  %v6113_v9 = vpack.c.bf16 %v4599_v59, %v4598_v52  ;;  %v4222_v16 = vadd.f32 1.0, %v7700_v14  ;;  %7721 = vpow2.f32 %v5689_v7  ;;  %v8854_v40 = vadd.f32 %v7129_v36, %v8546_v53  ;;  %v9384_v7 = vld [vmem:[#allocation9_spill] sm:$0xff]  ;;  %v8876_v52 = vld [vmem:[%s9355_s2] ss:$0 sm:$0xff] }
 0x1e1   : > { %v7704_v1 = vpop.eup %7703  ;;  %v6108_v13 = vpack.c.bf16 %v4597_v32, %v4596_v43  ;;  %v4220_v63 = vadd.f32 1.0, %v7702_v5  ;;  %7723 = vpow2.f32 %v5694_v23  ;;  %v5692_v27 = vmul.f32 -1.442695, %v8847_v35  ;;  %v9385_v5 = vld [vmem:[#allocation10_spill] sm:$0xff] }
 0x1e2   : > { %v7706_v46 = vpop.eup %7705  ;;  %6369 = vst [vmem:[%s8654_s21 + $0x78] sm:$0xff] %v6113_v9   ;;  %7725 = vrcp.f32 %v4222_v16  ;;  %v4223_v41 = vadd.f32 1.0, %v7704_v1  ;;  %v6988_v42 = vpop.f32.mrb[48].mxu0  ;;  %v5695_v47 = vmul.f32 -1.442695, %v8850_v34 }
 0x1e3   : > { %v7708_v50 = vpop.eup %7707  ;;  %6368 = vst [vmem:[%s8654_s21 + $0x70] sm:$0xff] %v6108_v13   ;;  %7727 = vrcp.f32 %v4220_v63  ;;  %v4221_v12 = vadd.f32 1.0, %v7706_v46  ;;  %v7130_v15 = vadd.f32 %v6988_v42, %v9381_v55  ;;  %v3218_v17 = vpop.f32.mrb[49].mxu0  ;;  %v5693_v18 = vmul.f32 -1.442695, %v8854_v40  ;;  %v9386_v46 = vld [vmem:[#allocation11_spill] sm:$0xff] }
 0x1e4   : > { %v7710_v19 = vpop.eup %7709  ;;  %7729 = vrcp.f32 %v4223_v41  ;;  %v4226_v3 = vadd.f32 1.0, %v7708_v50  ;;  %v7131_v57 = vadd.f32 %v3218_v17, %v9382_v22  ;;  %v6989_v31 = vpop.f32.mrb[50].mxu0  ;;  %v9387_v55 = vld [vmem:[#allocation12_spill] sm:$0xff]  ;;  %v9388_v22 = vld [vmem:[#allocation13_spill] sm:$0xff] }
 0x1e5   : > { %v7712_v20 = vpop.eup %7711  ;;  %7731 = vrcp.f32 %v4221_v12  ;;  %v8863_v30 = vadd.f32 %v7130_v15, %v8546_v53  ;;  %v7132_v25 = vadd.f32 %v6989_v31, %v9383_v24  ;;  %v3221_v39 = vpop.f32.mrb[51].mxu0  ;;  %v4602_v49 = vmul.f32 %v7710_v19, %v8762_v38 }
 0x1e6   : > { %v7714_v26 = vpop.eup %7713  ;;  %7733 = vrcp.f32 %v4226_v3  ;;  %v8868_v44 = vadd.f32 %v7131_v57, %v8546_v53  ;;  %v7133_v4 = vadd.f32 %v3221_v39, %v9384_v7  ;;  %v4600_v53 = vmul.f32 %v7712_v20, %v8766_v6 }
 0x1e7   : > { %v7716_v28 = vpop.eup %7715  ;;  %v4603_v56 = vmul.f32 %v7714_v26, %v8770_v62  ;;  %7735 = vpow2.f32 %v5692_v27  ;;  %v5698_v60 = vmul.f32 -1.442695, %v8863_v30  ;;  %v8879_v29 = vadd.f32 %v8876_v52, %v7132_v25 }
 0x1e8   : > { %v7718_v38 = vpop.eup %7717  ;;  %v4601_v0 = vmul.f32 %v7716_v28, %v8779_v2  ;;  %7737 = vpow2.f32 %v5695_v47  ;;  %v8884_v62 = vadd.f32 %v8876_v52, %v7133_v4  ;;  %v5696_v14 = vmul.f32 -1.442695, %v8868_v44 }
 0x1e9   : > { %v7720_v33 = vpop.eup %7719  ;;  %v6123_v10 = vpack.c.bf16 %v4603_v56, %v4602_v49  ;;  %v4224_v43 = vadd.f32 1.0, %v7718_v38  ;;  %7739 = vpow2.f32 %v5693_v18  ;;  %v5699_v2 = vmul.f32 -1.442695, %v8879_v29 }
 0x1ea   : > { %v7722_v59 = vpop.eup %7721  ;;  %v6118_v21 = vpack.c.bf16 %v4601_v0, %v4600_v53  ;;  %v4227_v36 = vadd.f32 1.0, %v7720_v33  ;;  %7741 = vpow2.f32 %v5698_v60  ;;  %v6992_v32 = vpop.f32.mrb[52].mxu0  ;;  %v5697_v63 = vmul.f32 -1.442695, %v8884_v62  ;;  %v9389_v53 = vld [vmem:[#allocation14_spill] sm:$0xff] }
 0x1eb   : > { %v7724_v23 = vpop.eup %7723  ;;  %6371 = vst [vmem:[%s8654_s21 + $0x88] sm:$0xff] %v6123_v10   ;;  %7743 = vrcp.f32 %v4224_v43  ;;  %v4225_v6 = vadd.f32 1.0, %v7722_v59  ;;  %v7134_v9 = vadd.f32 %v6992_v32, %v9385_v5  ;;  %v3234_v16 = vpop.f32.mrb[53].mxu0 }
 0x1ec   : > { %v7726_v1 = vpop.eup %7725  ;;  %6370 = vst [vmem:[%s8654_s21 + $0x80] sm:$0xff] %v6118_v21   ;;  %7745 = vrcp.f32 %v4227_v36  ;;  %v4230_v13 = vadd.f32 1.0, %v7724_v23  ;;  %v7135_v41 = vadd.f32 %v3234_v16, %v9386_v46  ;;  %v6993_v42 = vpop.f32.mrb[54].mxu0  ;;  %v9390_v21 = vld [vmem:[#allocation15_spill] sm:$0xff] }
 0x1ed   : > { %v7728_v50 = vpop.eup %7727  ;;  %v4606_v12 = vmul.f32 %v7726_v1, %v8788_v58  ;;  %7747 = vrcp.f32 %v4225_v6  ;;  %v8895_v27 = vadd.f32 %v8876_v52, %v7134_v9  ;;  %v7136_v15 = vadd.f32 %v6993_v42, %v9387_v55  ;;  %v3237_v17 = vpop.f32.mrb[55].mxu0  ;;  %v9391_v6 = vld [vmem:[#allocation16_spill] sm:$0xff] }
 0x1ee   : > { %v7730_v19 = vpop.eup %7729  ;;  %v4604_v3 = vmul.f32 %v7728_v50, %v8792_v11  ;;  %7749 = vrcp.f32 %v4230_v13  ;;  %v8900_v47 = vadd.f32 %v8876_v52, %v7135_v41  ;;  %v7137_v57 = vadd.f32 %v3237_v17, %v9388_v22  ;;  %v9392_v13 = vld [vmem:[#allocation17_spill] sm:$0xff] }
 0x1ef   : > { %v7732_v31 = vpop.eup %7731  ;;  %v4607_v20 = vmul.f32 %v7730_v19, %v8798_v8  ;;  %7751 = vpow2.f32 %v5696_v14  ;;  %v5702_v58 = vmul.f32 -1.442695, %v8895_v27  ;;  %v8906_v18 = vadd.f32 %v8876_v52, %v7136_v15 }
 0x1f0   : > { %v7734_v24 = vpop.eup %7733  ;;  %v4605_v25 = vmul.f32 %v7732_v31, %v8805_v61  ;;  %7753 = vpow2.f32 %v5699_v2  ;;  %v5700_v11 = vmul.f32 -1.442695, %v8900_v47  ;;  %v8911_v39 = vadd.f32 %v8876_v52, %v7137_v57 }
 0x1f1   : > { %v7736_v26 = vpop.eup %7735  ;;  %v6133_v49 = vpack.c.bf16 %v4607_v20, %v4606_v12  ;;  %7755 = vpow2.f32 %v5697_v63  ;;  %v4610_v4 = vmul.f32 %v7734_v24, %v8813_v54  ;;  %v5703_v38 = vmul.f32 -1.442695, %v8906_v18 }
 0x1f2   : > { %v7738_v8 = vpop.eup %7737  ;;  %v6128_v7 = vpack.c.bf16 %v4605_v25, %v4604_v3  ;;  %v4228_v28 = vadd.f32 1.0, %v7736_v26  ;;  %7757 = vpow2.f32 %v5702_v58  ;;  %v6996_v56 = vpop.f32.mrb[56].mxu0  ;;  %v5701_v59 = vmul.f32 -1.442695, %v8911_v39  ;;  %v9393_v58 = vld [vmem:[#allocation18_spill] sm:$0xff] }
 0x1f3   : > { %v7740_v60 = vpop.eup %7739  ;;  %6373 = vst [vmem:[%s8654_s21 + $0x98] sm:$0xff] %v6133_v49   ;;  %v4231_v61 = vadd.f32 1.0, %v7738_v8  ;;  %7759 = vpow2.f32 %v5700_v11  ;;  %v7138_v0 = vadd.f32 %v6996_v56, %v9389_v53  ;;  %v3250_v33 = vpop.f32.mrb[57].mxu0  ;;  %v9394_v8 = vld [vmem:[#allocation19_spill] sm:$0xff] }
 0x1f4   : > { %v7742_v10 = vpop.eup %7741  ;;  %6372 = vst [vmem:[%s8654_s21 + $0x90] sm:$0xff] %v6128_v7   ;;  %7761 = vrcp.f32 %v4228_v28  ;;  %v4229_v43 = vadd.f32 1.0, %v7740_v60  ;;  %v7139_v54 = vadd.f32 %v3250_v33, %v9390_v21  ;;  %v6997_v36 = vpop.f32.mrb[58].mxu0 }
 0x1f5   : > { %v7744_v14 = vpop.eup %7743  ;;  %7763 = vrcp.f32 %v4231_v61  ;;  %v4234_v32 = vadd.f32 1.0, %v7742_v10  ;;  %v8921_v23 = vadd.f32 %v8876_v52, %v7138_v0  ;;  %v7140_v2 = vadd.f32 %v6997_v36, %v9391_v6  ;;  %v3253_v5 = vpop.f32.mrb[59].mxu0  ;;  %v9395_v61 = vld [vmem:[#allocation20_spill] sm:$0xff] }
 0x1f6   : > { %v7746_v9 = vpop.eup %7745  ;;  %v4608_v16 = vmul.f32 %v7744_v14, %v8817_v48  ;;  %7765 = vrcp.f32 %v4229_v43  ;;  %v8926_v1 = vadd.f32 %v8876_v52, %v7139_v54  ;;  %v7141_v63 = vadd.f32 %v3253_v5, %v9392_v13  ;;  %v9396_v43 = vld [vmem:[#allocation21_spill] sm:$0xff] }
 0x1f7   : > { %v7748_v46 = vpop.eup %7747  ;;  %v4611_v41 = vmul.f32 %v7746_v9, %v8824_v45  ;;  %7767 = vrcp.f32 %v4234_v32  ;;  %v5706_v42 = vmul.f32 -1.442695, %v8921_v23  ;;  %v8932_v50 = vadd.f32 %v8876_v52, %v7140_v2 }
 0x1f8   : > { %v7750_v12 = vpop.eup %7749  ;;  %v4609_v55 = vmul.f32 %v7748_v46, %v8829_v51  ;;  %7769 = vpow2.f32 %v5703_v38  ;;  %v5704_v48 = vmul.f32 -1.442695, %v8926_v1  ;;  %v8937_v15 = vadd.f32 %v8876_v52, %v7141_v63 }
 0x1f9   : > { %v7752_v17 = vpop.eup %7751  ;;  %v6143_v19 = vpack.c.bf16 %v4611_v41, %v4610_v4  ;;  %7771 = vpow2.f32 %v5701_v59  ;;  %v5707_v51 = vmul.f32 -1.442695, %v8932_v50  ;;  %v4614_v54 = vmul.f32 %v7750_v12, %v8838_v37 }
 0x1fa   : > { %v7754_v45 = vpop.eup %7753  ;;  %v6138_v3 = vpack.c.bf16 %v4609_v55, %v4608_v16  ;;  %v4232_v22 = vadd.f32 1.0, %v7752_v17  ;;  %7773 = vpow2.f32 %v5706_v42  ;;  %v7000_v57 = vpop.f32.mrb[60].mxu0  ;;  %v5705_v49 = vmul.f32 -1.442695, %v8937_v15 }
 0x1fb   : > { %v7756_v31 = vpop.eup %7755  ;;  %6375 = vst [vmem:[%s8654_s21 + $0xa8] sm:$0xff] %v6143_v19   ;;  %v4235_v20 = vadd.f32 1.0, %v7754_v45  ;;  %7775 = vpow2.f32 %v5704_v48  ;;  %v7142_v24 = vadd.f32 %v7000_v57, %v9393_v58  ;;  %v3266_v25 = vpop.f32.mrb[61].mxu0 }
 0x1fc   : > { %v7758_v11 = vpop.eup %7757  ;;  %6374 = vst [vmem:[%s8654_s21 + $0xa0] sm:$0xff] %v6138_v3   ;;  %7777 = vrcp.f32 %v4232_v22  ;;  %v4233_v26 = vadd.f32 1.0, %v7756_v31  ;;  %v7143_v7 = vadd.f32 %v3266_v25, %v9394_v8  ;;  %v7001_v4 = vpop.f32.mrb[62].mxu0 }
 0x1fd   : > { %v7760_v28 = vpop.eup %7759  ;;  %7779 = vrcp.f32 %v4235_v20  ;;  %v4238_v56 = vadd.f32 1.0, %v7758_v11  ;;  %v8946_v60 = vadd.f32 %v8876_v52, %v7142_v24  ;;  %v7144_v38 = vadd.f32 %v7001_v4, %v9395_v61  ;;  %v3269_v53 = vpop.f32.mrb[63].mxu0 }
 0x1fe   : > { %v7762_v0 = vpop.eup %7761  ;;  %7781 = vrcp.f32 %v4233_v26  ;;  %v4236_v33 = vadd.f32 1.0, %v7760_v28  ;;  %v8950_v10 = vadd.f32 %v8876_v52, %v7143_v7  ;;  %v7145_v59 = vadd.f32 %v3269_v53, %v9396_v43 }
 0x1ff   : > { %v7764_v21 = vpop.eup %7763  ;;  %7783 = vrcp.f32 %v4238_v56  ;;  %v5710_v36 = vmul.f32 -1.442695, %v8946_v60  ;;  %v8956_v14 = vadd.f32 %v8876_v52, %v7144_v38  ;;  %v4612_v16 = vmul.f32 %v7762_v0, %v8847_v35 }
 0x200   : > { %v7766_v32 = vpop.eup %7765  ;;  %v4615_v6 = vmul.f32 %v7764_v21, %v8850_v34  ;;  %7785 = vrcp.f32 %v4236_v33  ;;  %v5708_v2 = vmul.f32 -1.442695, %v8950_v10  ;;  %v8961_v5 = vadd.f32 %v8876_v52, %v7145_v59 }
 0x201   : > { %v7768_v9 = vpop.eup %7767  ;;  %v4613_v37 = vmul.f32 %v7766_v32, %v8854_v40  ;;  %7787 = vpow2.f32 %v5707_v51  ;;  %v6860_v13 = vpop.f32.mrb[64].mxu1  ;;  %v5711_v41 = vmul.f32 -1.442695, %v8956_v14 }
 0x202   : > { %v7770_v63 = vpop.eup %7769  ;;  %v6153_v46 = vpack.c.bf16 %v4615_v6, %v4614_v54  ;;  %7789 = vpow2.f32 %v5705_v49  ;;  %v7004_v34 = vpop.f32.mrb[64].mxu0  ;;  %v5709_v3 = vmul.f32 -1.442695, %v8961_v5  ;;  %v4618_v4 = vmul.f32 %v7768_v9, %v8863_v30 }
 0x203   : > { %v2160_v42 = vpop.f32.mrb[65].mxu1  ;;  %v7772_v12 = vpop.eup %7771  ;;  %v6148_v55 = vpack.c.bf16 %v4613_v37, %v4612_v16  ;;  %v4239_v48 = vadd.f32 1.0, %v7770_v63  ;;  %7791 = vpow2.f32 %v5710_v36  ;;  %v7146_v17 = vadd.f32 %v7004_v34, %v6860_v13 }
 0x204   : > { %v3282_v19 = vpop.f32.mrb[65].mxu0  ;;  %v6861_v35 = vpop.f32.mrb[66].mxu1  ;;  %6377 = vst [vmem:[%s8654_s21 + $0xb8] sm:$0xff] %v6153_v46   ;;  %v4237_v40 = vadd.f32 1.0, %v7772_v12  ;;  %7793 = vpow2.f32 %v5708_v2 }
 0x205   : > { %v7774_v45 = vpop.eup %7773  ;;  %v7147_v22 = vadd.f32 %v3282_v19, %v2160_v42  ;;  %v7005_v57 = vpop.f32.mrb[66].mxu0  ;;  %6376 = vst [vmem:[%s8654_s21 + $0xb0] sm:$0xff] %v6148_v55   ;;  %7795 = vrcp.f32 %v4239_v48  ;;  %v8970_v58 = vadd.f32 %v8876_v52, %v7146_v17 }
 0x206   : > { %v2163_v31 = vpop.f32.mrb[67].mxu1  ;;  %v7776_v20 = vpop.eup %7775  ;;  %v4242_v51 = vadd.f32 1.0, %v7774_v45  ;;  %v7148_v24 = vadd.f32 %v7005_v57, %v6861_v35  ;;  %7797 = vrcp.f32 %v4237_v40 }
 0x207   : > { %v3285_v25 = vpop.f32.mrb[67].mxu0  ;;  %v7778_v11 = vpop.eup %7777  ;;  %v4240_v26 = vadd.f32 1.0, %v7776_v20  ;;  %v8973_v49 = vadd.f32 %v8876_v52, %v7147_v22  ;;  %v5714_v28 = vmul.f32 -1.442695, %v8970_v58 }
 0x208   : > { %v7149_v8 = vadd.f32 %v3285_v25, %v2163_v31  ;;  %v7780_v7 = vpop.eup %7779  ;;  %7799 = vrcp.f32 %v4242_v51  ;;  %v8978_v56 = vadd.f32 %v8876_v52, %v7148_v24  ;;  %v4616_v43 = vmul.f32 %v7778_v11, %v8868_v44 }
 0x209   : > { %v7782_v61 = vpop.eup %7781  ;;  %v4619_v38 = vmul.f32 %v7780_v7, %v8879_v29  ;;  %7801 = vrcp.f32 %v4240_v26  ;;  %v5712_v53 = vmul.f32 -1.442695, %v8973_v49  ;;  %v6864_v21 = vpop.f32.mrb[68].mxu1 }
 0x20a   : > { %v8983_v0 = vadd.f32 %v8876_v52, %v7149_v8  ;;  %v7784_v33 = vpop.eup %7783  ;;  %v4617_v30 = vmul.f32 %v7782_v61, %v8884_v62  ;;  %7803 = vpow2.f32 %v5711_v41  ;;  %v5715_v59 = vmul.f32 -1.442695, %v8978_v56  ;;  %v7008_v29 = vpop.f32.mrb[68].mxu0 }
 0x20b   : > { %v7786_v54 = vpop.eup %7785  ;;  %v6163_v36 = vpack.c.bf16 %v4619_v38, %v4618_v4  ;;  %7805 = vpow2.f32 %v5709_v3  ;;  %v2176_v32 = vpop.f32.mrb[69].mxu1  ;;  %v7150_v9 = vadd.f32 %v7008_v29, %v6864_v21  ;;  %v4622_v20 = vmul.f32 %v7784_v33, %v8895_v27 }
 0x20c   : > { %v7788_v6 = vpop.eup %7787  ;;  %v6158_v2 = vpack.c.bf16 %v4617_v30, %v4616_v43  ;;  %7807 = vpow2.f32 %v5714_v28  ;;  %v3298_v16 = vpop.f32.mrb[69].mxu0  ;;  %v5713_v13 = vmul.f32 -1.442695, %v8983_v0  ;;  %v4620_v11 = vmul.f32 %v7786_v54, %v8900_v47 }
 0x20d   : > { %v6865_v37 = vpop.f32.mrb[70].mxu1  ;;  %v7790_v44 = vpop.eup %7789  ;;  %6379 = vst [vmem:[%s8654_s21 + $0xc8] sm:$0xff] %v6163_v36   ;;  %v4243_v62 = vadd.f32 1.0, %v7788_v6  ;;  %7809 = vpow2.f32 %v5712_v53  ;;  %v7151_v63 = vadd.f32 %v3298_v16, %v2176_v32  ;;  %v8992_v12 = vadd.f32 %v8876_v52, %v7150_v9 }
 0x20e   : > { %v7009_v46 = vpop.f32.mrb[70].mxu0  ;;  %v2179_v41 = vpop.f32.mrb[71].mxu1  ;;  %6378 = vst [vmem:[%s8654_s21 + $0xc0] sm:$0xff] %v6158_v2   ;;  %v4241_v42 = vadd.f32 1.0, %v7790_v44  ;;  %7811 = vpow2.f32 %v5715_v59 }
 0x20f   : > { %v7792_v34 = vpop.eup %7791  ;;  %v7152_v55 = vadd.f32 %v7009_v46, %v6865_v37  ;;  %v3301_v48 = vpop.f32.mrb[71].mxu0  ;;  %7813 = vrcp.f32 %v4243_v62  ;;  %v8995_v35 = vadd.f32 %v8876_v52, %v7151_v63  ;;  %v5718_v22 = vmul.f32 -1.442695, %v8992_v12 }
 0x210   : > { %v7794_v17 = vpop.eup %7793  ;;  %v4246_v19 = vadd.f32 1.0, %v7792_v34  ;;  %v7153_v45 = vadd.f32 %v3301_v48, %v2179_v41  ;;  %7815 = vrcp.f32 %v4241_v42 }
 0x211   : > { %v7796_v40 = vpop.eup %7795  ;;  %v4244_v3 = vadd.f32 1.0, %v7794_v17  ;;  %v8999_v57 = vadd.f32 %v8876_v52, %v7152_v55  ;;  %v5716_v24 = vmul.f32 -1.442695, %v8995_v35  ;;  %v6868_v7 = vpop.f32.mrb[72].mxu1 }
 0x212   : > { %v7798_v31 = vpop.eup %7797  ;;  %v4623_v51 = vmul.f32 %v7796_v40, %v8906_v18  ;;  %7817 = vrcp.f32 %v4246_v19  ;;  %v7012_v61 = vpop.f32.mrb[72].mxu0  ;;  %v9008_v53 = vadd.f32 %v8876_v52, %v7153_v45 }
 0x213   : > { %v7800_v25 = vpop.eup %7799  ;;  %v4621_v26 = vmul.f32 %v7798_v31, %v8911_v39  ;;  %7819 = vrcp.f32 %v4244_v3  ;;  %v5719_v8 = vmul.f32 -1.442695, %v8999_v57  ;;  %v2192_v27 = vpop.f32.mrb[73].mxu1  ;;  %v7154_v47 = vadd.f32 %v7012_v61, %v6868_v7 }
 0x214   : > { %v7802_v4 = vpop.eup %7801  ;;  %v6173_v28 = vpack.c.bf16 %v4623_v51, %v4622_v20  ;;  %7821 = vpow2.f32 %v5713_v13  ;;  %v3314_v33 = vpop.f32.mrb[73].mxu0  ;;  %v5717_v63 = vmul.f32 -1.442695, %v9008_v53  ;;  %v4626_v48 = vmul.f32 %v7800_v25, %v8921_v23 }
 0x215   : > { %v7804_v18 = vpop.eup %7803  ;;  %v6168_v38 = vpack.c.bf16 %v4621_v26, %v4620_v11  ;;  %7823 = vpow2.f32 %v5718_v22  ;;  %v6869_v39 = vpop.f32.mrb[74].mxu1  ;;  %v7155_v59 = vadd.f32 %v3314_v33, %v2192_v27  ;;  %v9013_v32 = vadd.f32 %v8876_v52, %v7154_v47 }
 0x216   : > { %v7806_v43 = vpop.eup %7805  ;;  %6381 = vst [vmem:[%s8654_s21 + $0xd8] sm:$0xff] %v6173_v28   ;;  %v4247_v30 = vadd.f32 1.0, %v7804_v18  ;;  %7825 = vpow2.f32 %v5716_v24  ;;  %v7013_v21 = vpop.f32.mrb[74].mxu0  ;;  %v4624_v3 = vmul.f32 %v7802_v4, %v8926_v1 }
 0x217   : > { %v2195_v54 = vpop.f32.mrb[75].mxu1  ;;  %v7808_v36 = vpop.eup %7807  ;;  %6380 = vst [vmem:[%s8654_s21 + $0xd0] sm:$0xff] %v6168_v38   ;;  %v4245_v29 = vadd.f32 1.0, %v7806_v43  ;;  %7827 = vpow2.f32 %v5719_v8  ;;  %v7156_v6 = vadd.f32 %v7013_v21, %v6869_v39  ;;  %v9016_v37 = vadd.f32 %v8876_v52, %v7155_v59 }
 0x218   : > { %v3317_v2 = vpop.f32.mrb[75].mxu0  ;;  %v7810_v9 = vpop.eup %7809  ;;  %7829 = vrcp.f32 %v4247_v30  ;;  %v4250_v16 = vadd.f32 1.0, %v7808_v36  ;;  %v5722_v42 = vmul.f32 -1.442695, %v9013_v32 }
 0x219   : > { %v7157_v44 = vadd.f32 %v3317_v2, %v2195_v54  ;;  %v7812_v62 = vpop.eup %7811  ;;  %7831 = vrcp.f32 %v4245_v29  ;;  %v4248_v13 = vadd.f32 1.0, %v7810_v9  ;;  %v9020_v46 = vadd.f32 %v8876_v52, %v7156_v6  ;;  %v6872_v45 = vpop.f32.mrb[76].mxu1 }
 0x21a   : > { %v7814_v41 = vpop.eup %7813  ;;  %7833 = vrcp.f32 %v4250_v16  ;;  %v4251_v34 = vadd.f32 1.0, %v7812_v62  ;;  %v5720_v19 = vmul.f32 -1.442695, %v9016_v37  ;;  %v7016_v20 = vpop.f32.mrb[76].mxu0 }
 0x21b   : > { %v7816_v55 = vpop.eup %7815  ;;  %v4627_v17 = vmul.f32 %v7814_v41, %v8932_v50  ;;  %7835 = vrcp.f32 %v4248_v13  ;;  %v5723_v31 = vmul.f32 -1.442695, %v9020_v46  ;;  %v2208_v51 = vpop.f32.mrb[77].mxu1  ;;  %v9030_v23 = vadd.f32 %v8876_v52, %v7157_v44 }
 0x21c   : > { %v7818_v40 = vpop.eup %7817  ;;  %v4625_v22 = vmul.f32 %v7816_v55, %v8937_v15  ;;  %7837 = vrcp.f32 %v4251_v34  ;;  %v7158_v50 = vadd.f32 %v7016_v20, %v6872_v45  ;;  %v3330_v25 = vpop.f32.mrb[77].mxu0 }
 0x21d   : > { %v7820_v24 = vpop.eup %7819  ;;  %v6183_v11 = vpack.c.bf16 %v4627_v17, %v4626_v48  ;;  %7839 = vpow2.f32 %v5717_v63  ;;  %v6873_v26 = vpop.f32.mrb[78].mxu1  ;;  %v7159_v15 = vadd.f32 %v3330_v25, %v2208_v51  ;;  %v5721_v21 = vmul.f32 -1.442695, %v9030_v23 }
 0x21e   : > { %v7822_v8 = vpop.eup %7821  ;;  %v6178_v1 = vpack.c.bf16 %v4625_v22, %v4624_v3  ;;  %7841 = vpow2.f32 %v5722_v42  ;;  %v7017_v7 = vpop.f32.mrb[78].mxu0  ;;  %v9034_v27 = vadd.f32 %v8876_v52, %v7158_v50  ;;  %v4630_v16 = vmul.f32 %v7818_v40, %v8946_v60 }
 0x21f   : > { %v2211_v4 = vpop.f32.mrb[79].mxu1  ;;  %v7824_v28 = vpop.eup %7823  ;;  %6383 = vst [vmem:[%s8654_s21 + $0xe8] sm:$0xff] %v6183_v11   ;;  %v4249_v61 = vadd.f32 1.0, %v7822_v8  ;;  %7843 = vpow2.f32 %v5720_v19  ;;  %v7160_v18 = vadd.f32 %v7017_v7, %v6873_v26  ;;  %v9038_v39 = vadd.f32 %v8876_v52, %v7159_v15 }
 0x220   : > { %v3333_v38 = vpop.f32.mrb[79].mxu0  ;;  %v7826_v47 = vpop.eup %7825  ;;  %6382 = vst [vmem:[%s8654_s21 + $0xe0] sm:$0xff] %v6178_v1   ;;  %v4254_v33 = vadd.f32 1.0, %v7824_v28  ;;  %7845 = vpow2.f32 %v5723_v31  ;;  %v5726_v6 = vmul.f32 -1.442695, %v9034_v27  ;;  %v4628_v41 = vmul.f32 %v7820_v24, %v8950_v10 }
 0x221   : > { %v7161_v43 = vadd.f32 %v3333_v38, %v2211_v4  ;;  %v7828_v30 = vpop.eup %7827  ;;  %7847 = vrcp.f32 %v4249_v61  ;;  %v4252_v59 = vadd.f32 1.0, %v7826_v47  ;;  %v9042_v54 = vadd.f32 %v8876_v52, %v7160_v18  ;;  %v6876_v13 = vpop.f32.mrb[80].mxu1 }
 0x222   : > { %v7830_v36 = vpop.eup %7829  ;;  %7849 = vrcp.f32 %v4254_v33  ;;  %v4255_v29 = vadd.f32 1.0, %v7828_v30  ;;  %v5724_v62 = vmul.f32 -1.442695, %v9038_v39  ;;  %v7020_v55 = vpop.f32.mrb[80].mxu0 }
 0x223   : > { %v9046_v2 = vadd.f32 %v8876_v52, %v7161_v43  ;;  %v7832_v9 = vpop.eup %7831  ;;  %v4631_v44 = vmul.f32 %v7830_v36, %v8956_v14  ;;  %7851 = vrcp.f32 %v4252_v59  ;;  %v5727_v42 = vmul.f32 -1.442695, %v9042_v54  ;;  %v2224_v48 = vpop.f32.mrb[81].mxu1 }
 0x224   : > { %v7834_v63 = vpop.eup %7833  ;;  %v4629_v34 = vmul.f32 %v7832_v9, %v8961_v5  ;;  %7853 = vrcp.f32 %v4255_v29  ;;  %v7162_v14 = vadd.f32 %v7020_v55, %v6876_v13  ;;  %v3346_v45 = vpop.f32.mrb[81].mxu0 }
 0x225   : > { %v7836_v17 = vpop.eup %7835  ;;  %v6193_v19 = vpack.c.bf16 %v4631_v44, %v4630_v16  ;;  %7855 = vpow2.f32 %v5721_v21  ;;  %v5725_v60 = vmul.f32 -1.442695, %v9046_v2  ;;  %v6877_v40 = vpop.f32.mrb[82].mxu1  ;;  %v4634_v10 = vmul.f32 %v7834_v63, %v8970_v58 }
 0x226   : > { %v7838_v3 = vpop.eup %7837  ;;  %v6188_v22 = vpack.c.bf16 %v4629_v34, %v4628_v41  ;;  %7857 = vpow2.f32 %v5726_v6  ;;  %v7163_v5 = vadd.f32 %v3346_v45, %v2224_v48  ;;  %v7021_v31 = vpop.f32.mrb[82].mxu0  ;;  %v9059_v11 = vadd.f32 %v8876_v52, %v7162_v14 }
 0x227   : > { %v2227_v20 = vpop.f32.mrb[83].mxu1  ;;  %v7840_v51 = vpop.eup %7839  ;;  %6385 = vst [vmem:[%s8654_s21 + $0xf8] sm:$0xff] %v6193_v19   ;;  %v4635_v24 = vmul.f32 %v7838_v3, %v8978_v56  ;;  %7859 = vpow2.f32 %v5724_v62  ;;  %v7164_v50 = vadd.f32 %v7021_v31, %v6877_v40  ;;  %v4632_v21 = vmul.f32 %v7836_v17, %v8973_v49 }
 0x228   : > { %v3349_v25 = vpop.f32.mrb[83].mxu0  ;;  %v7842_v26 = vpop.eup %7841  ;;  %6384 = vst [vmem:[%s8654_s21 + $0xf0] sm:$0xff] %v6188_v22   ;;  %v4253_v8 = vadd.f32 1.0, %v7840_v51  ;;  %7861 = vpow2.f32 %v5727_v42  ;;  %v9063_v58 = vadd.f32 %v8876_v52, %v7163_v5  ;;  %v5730_v61 = vmul.f32 -1.442695, %v9059_v11 }
 0x229   : > { %v7165_v1 = vadd.f32 %v3349_v25, %v2227_v20  ;;  %v7844_v15 = vpop.eup %7843  ;;  %v6203_v7 = vpack.c.bf16 %v4635_v24, %v4634_v10  ;;  %v4258_v4 = vadd.f32 1.0, %v7842_v26  ;;  %7863 = vpow2.f32 %v5725_v60  ;;  %v6880_v30 = vpop.f32.mrb[84].mxu1 }
 0x22a   : > { %v7846_v56 = vpop.eup %7845  ;;  %7865 = vrcp.f32 %v4253_v8  ;;  %v4256_v28 = vadd.f32 1.0, %v7844_v15  ;;  %v9067_v18 = vadd.f32 %v8876_v52, %v7164_v50  ;;  %v5728_v33 = vmul.f32 -1.442695, %v9063_v58  ;;  %v7024_v6 = vpop.f32.mrb[84].mxu0 }
 0x22b   : > { %v7848_v38 = vpop.eup %7847  ;;  %6387 = vst [vmem:[%s8654_s21 + $0x108] sm:$0xff] %v6203_v7   ;;  %7867 = vrcp.f32 %v4258_v4  ;;  %v4259_v47 = vadd.f32 1.0, %v7846_v56  ;;  %v9072_v43 = vadd.f32 %v8876_v52, %v7165_v1  ;;  %v2240_v9 = vpop.f32.mrb[85].mxu1  ;;  %v7166_v62 = vadd.f32 %v7024_v6, %v6880_v30 }
 0x22c   : > { %v7850_v59 = vpop.eup %7849  ;;  %v4633_v36 = vmul.f32 %v7848_v38, %v8983_v0  ;;  %7869 = vrcp.f32 %v4256_v28  ;;  %v5731_v29 = vmul.f32 -1.442695, %v9067_v18  ;;  %v3362_v13 = vpop.f32.mrb[85].mxu0 }
 0x22d   : > { %v7852_v16 = vpop.eup %7851  ;;  %7871 = vrcp.f32 %v4259_v47  ;;  %v5729_v44 = vmul.f32 -1.442695, %v9072_v43  ;;  %v6881_v63 = vpop.f32.mrb[86].mxu1  ;;  %v4638_v42 = vmul.f32 %v7850_v59, %v8992_v12  ;;  %v7167_v49 = vadd.f32 %v3362_v13, %v2240_v9 }
 0x22e   : > { %v7854_v41 = vpop.eup %7853  ;;  %v6198_v34 = vpack.c.bf16 %v4633_v36, %v4632_v21  ;;  %7873 = vpow2.f32 %v5730_v61  ;;  %v7025_v0 = vpop.f32.mrb[86].mxu0  ;;  %v9081_v19 = vadd.f32 %v8876_v52, %v7166_v62  ;;  %v4636_v1 = vmul.f32 %v7852_v16, %v8995_v35 }
 0x22f   : > { %v2243_v55 = vpop.f32.mrb[87].mxu1  ;;  %v7856_v48 = vpop.eup %7855  ;;  %v4639_v17 = vmul.f32 %v7854_v41, %v8999_v57  ;;  %7875 = vpow2.f32 %v5728_v33  ;;  %v7168_v60 = vadd.f32 %v7025_v0, %v6881_v63  ;;  %v9085_v12 = vadd.f32 %v8876_v52, %v7167_v49 }
 0x230   : > { %v3365_v14 = vpop.f32.mrb[87].mxu0  ;;  %v7858_v45 = vpop.eup %7857  ;;  %6386 = vst [vmem:[%s8654_s21 + $0x100] sm:$0xff] %v6198_v34   ;;  %v4257_v40 = vadd.f32 1.0, %v7856_v48  ;;  %7877 = vpow2.f32 %v5731_v29  ;;  %v5734_v50 = vmul.f32 -1.442695, %v9081_v19 }
 0x231   : > { %v7169_v3 = vadd.f32 %v3365_v14, %v2243_v55  ;;  %v7860_v22 = vpop.eup %7859  ;;  %v6213_v10 = vpack.c.bf16 %v4639_v17, %v4638_v42  ;;  %v4262_v5 = vadd.f32 1.0, %v7858_v45  ;;  %7879 = vpow2.f32 %v5729_v44  ;;  %v6884_v26 = vpop.f32.mrb[88].mxu1 }
 0x232   : > { %v7862_v57 = vpop.eup %7861  ;;  %7881 = vrcp.f32 %v4257_v40  ;;  %v4260_v31 = vadd.f32 1.0, %v7860_v22  ;;  %v9088_v20 = vadd.f32 %v8876_v52, %v7168_v60  ;;  %v5732_v7 = vmul.f32 -1.442695, %v9085_v12  ;;  %v7028_v4 = vpop.f32.mrb[88].mxu0 }
 0x233   : > { %v7864_v51 = vpop.eup %7863  ;;  %6389 = vst [vmem:[%s8654_s21 + $0x118] sm:$0xff] %v6213_v10   ;;  %7883 = vrcp.f32 %v4262_v5  ;;  %v4263_v24 = vadd.f32 1.0, %v7862_v57  ;;  %v9093_v25 = vadd.f32 %v8876_v52, %v7169_v3  ;;  %v2256_v56 = vpop.f32.mrb[89].mxu1  ;;  %v7170_v47 = vadd.f32 %v7028_v4, %v6884_v26 }
 0x234   : > { %v7866_v8 = vpop.eup %7865  ;;  %7885 = vrcp.f32 %v4260_v31  ;;  %v4261_v15 = vadd.f32 1.0, %v7864_v51  ;;  %v5735_v38 = vmul.f32 -1.442695, %v9088_v20  ;;  %v3378_v33 = vpop.f32.mrb[89].mxu0 }
 0x235   : > { %v7868_v28 = vpop.eup %7867  ;;  %v4637_v61 = vmul.f32 %v7866_v8, %v9008_v53  ;;  %7887 = vrcp.f32 %v4263_v24  ;;  %v6885_v30 = vpop.f32.mrb[90].mxu1  ;;  %v5733_v21 = vmul.f32 -1.442695, %v9093_v25  ;;  %v7171_v35 = vadd.f32 %v3378_v33, %v2256_v56 }
 0x236   : > { %v7870_v59 = vpop.eup %7869  ;;  %7889 = vrcp.f32 %v4261_v15  ;;  %v7029_v36 = vpop.f32.mrb[90].mxu0  ;;  %v4642_v16 = vmul.f32 %v7868_v28, %v9013_v32  ;;  %v9102_v53 = vadd.f32 %v8876_v52, %v7170_v47 }
 0x237   : > { %v2259_v29 = vpop.f32.mrb[91].mxu1  ;;  %v7872_v6 = vpop.eup %7871  ;;  %v6208_v9 = vpack.c.bf16 %v4637_v61, %v4636_v1  ;;  %7891 = vpow2.f32 %v5734_v50  ;;  %v9106_v63 = vadd.f32 %v8876_v52, %v7171_v35  ;;  %v7172_v41 = vadd.f32 %v7029_v36, %v6885_v30 }
 0x238   : > { %v3381_v44 = vpop.f32.mrb[91].mxu0  ;;  %v7874_v62 = vpop.eup %7873  ;;  %v4643_v13 = vmul.f32 %v7872_v6, %v9020_v46  ;;  %7893 = vpow2.f32 %v5732_v7  ;;  %v5738_v48 = vmul.f32 -1.442695, %v9102_v53  ;;  %v4640_v31 = vmul.f32 %v7870_v59, %v9016_v37 }
 0x239   : > { %v7876_v34 = vpop.eup %7875  ;;  %6388 = vst [vmem:[%s8654_s21 + $0x110] sm:$0xff] %v6208_v9   ;;  %v4266_v42 = vadd.f32 1.0, %v7874_v62  ;;  %7895 = vpow2.f32 %v5735_v38  ;;  %v7173_v49 = vadd.f32 %v3381_v44, %v2259_v29  ;;  %v9111_v60 = vadd.f32 %v8876_v52, %v7172_v41  ;;  %v6888_v45 = vpop.f32.mrb[92].mxu1 }
 0x23a   : > { %v7878_v32 = vpop.eup %7877  ;;  %v6223_v0 = vpack.c.bf16 %v4643_v13, %v4642_v16  ;;  %v4264_v55 = vadd.f32 1.0, %v7876_v34  ;;  %7897 = vpow2.f32 %v5733_v21  ;;  %v5736_v22 = vmul.f32 -1.442695, %v9106_v63  ;;  %v7032_v10 = vpop.f32.mrb[92].mxu0 }
 0x23b   : > { %v7880_v17 = vpop.eup %7879  ;;  %7899 = vrcp.f32 %v4266_v42  ;;  %v4267_v46 = vadd.f32 1.0, %v7878_v32  ;;  %v9114_v14 = vadd.f32 %v8876_v52, %v7173_v49  ;;  %v2272_v5 = vpop.f32.mrb[93].mxu1  ;;  %v5739_v24 = vmul.f32 -1.442695, %v9111_v60 }
 0x23c   : > { %v7882_v40 = vpop.eup %7881  ;;  %6391 = vst [vmem:[%s8654_s21 + $0x128] sm:$0xff] %v6223_v0   ;;  %7901 = vrcp.f32 %v4264_v55  ;;  %v4265_v3 = vadd.f32 1.0, %v7880_v17  ;;  %v3394_v50 = vpop.f32.mrb[93].mxu0  ;;  %v7174_v15 = vadd.f32 %v7032_v10, %v6888_v45 }
 0x23d   : > { %v7884_v57 = vpop.eup %7883  ;;  %v4641_v51 = vmul.f32 %v7882_v40, %v9030_v23  ;;  %7903 = vrcp.f32 %v4267_v46  ;;  %v6889_v26 = vpop.f32.mrb[94].mxu1  ;;  %v5737_v1 = vmul.f32 -1.442695, %v9114_v14  ;;  %v7175_v7 = vadd.f32 %v3394_v50, %v2272_v5 }
 0x23e   : > { %v7886_v8 = vpop.eup %7885  ;;  %7905 = vrcp.f32 %v4265_v3  ;;  %v7033_v4 = vpop.f32.mrb[94].mxu0  ;;  %v4646_v37 = vmul.f32 %v7884_v57, %v9034_v27  ;;  %v9126_v59 = vadd.f32 %v8876_v52, %v7174_v15  ;;  %v9133_v27 = vld [vmem:[%s9355_s2] ss:$0 sm:$0xff] }
 0x23f   : > { %v2275_v56 = vpop.f32.mrb[95].mxu1  ;;  %v7888_v28 = vpop.eup %7887  ;;  %v6218_v61 = vpack.c.bf16 %v4641_v51, %v4640_v31  ;;  %7907 = vpow2.f32 %v5738_v48  ;;  %v7176_v23 = vadd.f32 %v7033_v4, %v6889_v26  ;;  %v4644_v33 = vmul.f32 %v7886_v8, %v9038_v39 }
 0x240   : > { %v3397_v38 = vpop.f32.mrb[95].mxu0  ;;  %v7890_v47 = vpop.eup %7889  ;;  %v4647_v30 = vmul.f32 %v7888_v28, %v9042_v54  ;;  %7909 = vpow2.f32 %v5736_v22  ;;  %v9136_v36 = vadd.f32 %v9133_v27, %v7175_v7  ;;  %v5742_v41 = vmul.f32 -1.442695, %v9126_v59 }
 0x241   : > { %v7892_v21 = vpop.eup %7891  ;;  %6390 = vst [vmem:[%s8654_s21 + $0x120] sm:$0xff] %v6218_v61   ;;  %v4645_v35 = vmul.f32 %v7890_v47, %v9046_v2  ;;  %7911 = vpow2.f32 %v5739_v24  ;;  %v7177_v39 = vadd.f32 %v3397_v38, %v2275_v56  ;;  %v9139_v52 = vadd.f32 %v9133_v27, %v7176_v23  ;;  %v6892_v44 = vpop.f32.mrb[96].mxu1 }
 0x242   : > { %v7894_v54 = vpop.eup %7893  ;;  %v6233_v29 = vpack.c.bf16 %v4647_v30, %v4646_v37  ;;  %v4270_v6 = vadd.f32 1.0, %v7892_v21  ;;  %7913 = vpow2.f32 %v5737_v1  ;;  %v7036_v42 = vpop.f32.mrb[96].mxu0  ;;  %v5740_v55 = vmul.f32 -1.442695, %v9136_v36 }
 0x243   : > { %v7896_v9 = vpop.eup %7895  ;;  %v6228_v2 = vpack.c.bf16 %v4645_v35, %v4644_v33  ;;  %v4268_v16 = vadd.f32 1.0, %v7894_v54  ;;  %v9144_v34 = vadd.f32 %v9133_v27, %v7177_v39  ;;  %v2288_v49 = vpop.f32.mrb[97].mxu1  ;;  %v7178_v48 = vadd.f32 %v7036_v42, %v6892_v44 }
 0x244   : > { %v7898_v62 = vpop.eup %7897  ;;  %6393 = vst [vmem:[%s8654_s21 + $0x138] sm:$0xff] %v6233_v29   ;;  %7915 = vrcp.f32 %v4270_v6  ;;  %v4271_v13 = vadd.f32 1.0, %v7896_v9  ;;  %v3410_v17 = vpop.f32.mrb[97].mxu0  ;;  %v5743_v40 = vmul.f32 -1.442695, %v9139_v52 }
 0x245   : > { %v7900_v32 = vpop.eup %7899  ;;  %6392 = vst [vmem:[%s8654_s21 + $0x130] sm:$0xff] %v6228_v2   ;;  %7917 = vrcp.f32 %v4268_v16  ;;  %v4269_v0 = vadd.f32 1.0, %v7898_v62  ;;  %v6893_v46 = vpop.f32.mrb[98].mxu1  ;;  %v7179_v3 = vadd.f32 %v3410_v17, %v2288_v49  ;;  %v5741_v31 = vmul.f32 -1.442695, %v9144_v34 }
 0x246   : > { %v7902_v45 = vpop.eup %7901  ;;  %7919 = vrcp.f32 %v4271_v13  ;;  %v7037_v22 = vpop.f32.mrb[98].mxu0  ;;  %v4650_v57 = vmul.f32 %v7900_v32, %v9059_v11  ;;  %v9153_v8 = vadd.f32 %v9133_v27, %v7178_v48 }
 0x247   : > { %v2291_v10 = vpop.f32.mrb[99].mxu1  ;;  %v7904_v5 = vpop.eup %7903  ;;  %7921 = vrcp.f32 %v4269_v0  ;;  %v7180_v51 = vadd.f32 %v7037_v22, %v6893_v46  ;;  %v4648_v7 = vmul.f32 %v7902_v45, %v9063_v58  ;;  %v9158_v11 = vadd.f32 %v9133_v27, %v7179_v3 }
 0x248   : > { %v3413_v24 = vpop.f32.mrb[99].mxu0  ;;  %v7906_v50 = vpop.eup %7905  ;;  %v4651_v26 = vmul.f32 %v7904_v5, %v9067_v18  ;;  %7923 = vpow2.f32 %v5742_v41  ;;  %v5746_v33 = vmul.f32 -1.442695, %v9153_v8 }
 0x249   : > { %v7181_v1 = vadd.f32 %v3413_v24, %v2291_v10  ;;  %v7908_v15 = vpop.eup %7907  ;;  %v4649_v4 = vmul.f32 %v7906_v50, %v9072_v43  ;;  %7925 = vpow2.f32 %v5740_v55  ;;  %v9161_v18 = vadd.f32 %v9133_v27, %v7180_v51  ;;  %v6896_v47 = vpop.f32.mrb[100].mxu1 }
 0x24a   : > { %v7910_v56 = vpop.eup %7909  ;;  %v6243_v28 = vpack.c.bf16 %v4651_v26, %v4650_v57  ;;  %v4274_v61 = vadd.f32 1.0, %v7908_v15  ;;  %7927 = vpow2.f32 %v5743_v40  ;;  %v7040_v21 = vpop.f32.mrb[100].mxu0  ;;  %v5744_v54 = vmul.f32 -1.442695, %v9158_v11 }
 0x24b   : > { %v7912_v37 = vpop.eup %7911  ;;  %v6238_v23 = vpack.c.bf16 %v4649_v4, %v4648_v7  ;;  %v4272_v38 = vadd.f32 1.0, %v7910_v56  ;;  %7929 = vpow2.f32 %v5741_v31  ;;  %v9166_v30 = vadd.f32 %v9133_v27, %v7181_v1  ;;  %v2304_v35 = vpop.f32.mrb[101].mxu1 }
 0x24c   : > { %v7914_v58 = vpop.eup %7913  ;;  %6395 = vst [vmem:[%s8654_s21 + $0x148] sm:$0xff] %v6243_v28   ;;  %7931 = vrcp.f32 %v4274_v61  ;;  %v4275_v43 = vadd.f32 1.0, %v7912_v37  ;;  %v7182_v29 = vadd.f32 %v7040_v21, %v6896_v47  ;;  %v3426_v6 = vpop.f32.mrb[101].mxu0  ;;  %v5747_v16 = vmul.f32 -1.442695, %v9161_v18 }
 0x24d   : > { %6394 = vst [vmem:[%s8654_s21 + $0x140] sm:$0xff] %v6238_v23   ;;  %7933 = vrcp.f32 %v4272_v38  ;;  %v4273_v39 = vadd.f32 1.0, %v7914_v58  ;;  %v6897_v9 = vpop.f32.mrb[102].mxu1  ;;  %v7183_v44 = vadd.f32 %v3426_v6, %v2304_v35  ;;  %v7041_v62 = vpop.f32.mrb[102].mxu0  ;;  %v5745_v42 = vmul.f32 -1.442695, %v9166_v30 }
 0x24e   : > { %v7916_v2 = vpop.eup %7915  ;;  %7935 = vrcp.f32 %v4275_v43  ;;  %v2307_v13 = vpop.f32.mrb[103].mxu1  ;;  %v9173_v49 = vadd.f32 %v9133_v27, %v7182_v29  ;;  %v7184_v32 = vadd.f32 %v7041_v62, %v6897_v9 }
 0x24f   : > { %v7918_v41 = vpop.eup %7917  ;;  %7937 = vrcp.f32 %v4273_v39  ;;  %v3429_v0 = vpop.f32.mrb[103].mxu0  ;;  %v4654_v48 = vmul.f32 %v7916_v2, %v9081_v19  ;;  %v9179_v3 = vadd.f32 %v9133_v27, %v7183_v44 }
 0x250   : > { %v7920_v55 = vpop.eup %7919  ;;  %7939 = vpow2.f32 %v5746_v33  ;;  %v7185_v17 = vadd.f32 %v3429_v0, %v2307_v13  ;;  %v5750_v40 = vmul.f32 -1.442695, %v9173_v49  ;;  %v4652_v10 = vmul.f32 %v7918_v41, %v9085_v12 }
 0x251   : > { %v7922_v46 = vpop.eup %7921  ;;  %v4655_v45 = vmul.f32 %v7920_v55, %v9088_v20  ;;  %7941 = vpow2.f32 %v5744_v54  ;;  %v9184_v19 = vadd.f32 %v9133_v27, %v7184_v32  ;;  %v6900_v24 = vpop.f32.mrb[104].mxu1  ;;  %v5748_v4 = vmul.f32 -1.442695, %v9179_v3 }
 0x252   : > { %v7924_v22 = vpop.eup %7923  ;;  %v4653_v5 = vmul.f32 %v7922_v46, %v9093_v25  ;;  %7943 = vpow2.f32 %v5747_v16  ;;  %v9187_v20 = vadd.f32 %v9133_v27, %v7185_v17  ;;  %v7044_v12 = vpop.f32.mrb[104].mxu0 }
 0x253   : > { %v7926_v57 = vpop.eup %7925  ;;  %v6253_v31 = vpack.c.bf16 %v4655_v45, %v4654_v48  ;;  %v4278_v51 = vadd.f32 1.0, %v7924_v22  ;;  %7945 = vpow2.f32 %v5745_v42  ;;  %v2320_v25 = vpop.f32.mrb[105].mxu1  ;;  %v7186_v56 = vadd.f32 %v7044_v12, %v6900_v24 }
 0x254   : > { %v7928_v50 = vpop.eup %7927  ;;  %v6248_v26 = vpack.c.bf16 %v4653_v5, %v4652_v10  ;;  %v4276_v1 = vadd.f32 1.0, %v7926_v57  ;;  %7947 = vpow2.f32 %v5750_v40  ;;  %v3442_v28 = vpop.f32.mrb[105].mxu0  ;;  %v5751_v38 = vmul.f32 -1.442695, %v9184_v19 }
 0x255   : > { %v7930_v15 = vpop.eup %7929  ;;  %6397 = vst [vmem:[%s8654_s21 + $0x158] sm:$0xff] %v6253_v31   ;;  %7949 = vrcp.f32 %v4278_v51  ;;  %v4279_v7 = vadd.f32 1.0, %v7928_v50  ;;  %v6901_v61 = vpop.f32.mrb[106].mxu1  ;;  %v7187_v47 = vadd.f32 %v3442_v28, %v2320_v25  ;;  %v5749_v21 = vmul.f32 -1.442695, %v9187_v20 }
 0x256   : > { %v7932_v37 = vpop.eup %7931  ;;  %6396 = vst [vmem:[%s8654_s21 + $0x150] sm:$0xff] %v6248_v26   ;;  %7951 = vrcp.f32 %v4276_v1  ;;  %v4277_v23 = vadd.f32 1.0, %v7930_v15  ;;  %v7045_v58 = vpop.f32.mrb[106].mxu0  ;;  %v9195_v35 = vadd.f32 %v9133_v27, %v7186_v56 }
 0x257   : > { %v2323_v43 = vpop.f32.mrb[107].mxu1  ;;  %v7934_v33 = vpop.eup %7933  ;;  %7953 = vrcp.f32 %v4279_v7  ;;  %v7188_v39 = vadd.f32 %v7045_v58, %v6901_v61  ;;  %v4658_v6 = vmul.f32 %v7932_v37, %v9102_v53  ;;  %v9201_v62 = vadd.f32 %v9133_v27, %v7187_v47 }
 0x258   : > { %v3445_v54 = vpop.f32.mrb[107].mxu0  ;;  %v7936_v29 = vpop.eup %7935  ;;  %7955 = vrcp.f32 %v4277_v23  ;;  %v5754_v44 = vmul.f32 -1.442695, %v9195_v35  ;;  %v4656_v41 = vmul.f32 %v7934_v33, %v9106_v63 }
 0x259   : > { %v7189_v9 = vadd.f32 %v3445_v54, %v2323_v43  ;;  %v7938_v2 = vpop.eup %7937  ;;  %v4659_v16 = vmul.f32 %v7936_v29, %v9111_v60  ;;  %7957 = vpow2.f32 %v5748_v4  ;;  %v9206_v53 = vadd.f32 %v9133_v27, %v7188_v39  ;;  %v6904_v60 = vpop.f32.mrb[108].mxu1 }
 0x25a   : > { %v7940_v13 = vpop.eup %7939  ;;  %v4657_v42 = vmul.f32 %v7938_v2, %v9114_v14  ;;  %7959 = vpow2.f32 %v5751_v38  ;;  %v7048_v63 = vpop.f32.mrb[108].mxu0  ;;  %v5752_v10 = vmul.f32 -1.442695, %v9201_v62 }
 0x25b   : > { %v7942_v32 = vpop.eup %7941  ;;  %v6263_v0 = vpack.c.bf16 %v4659_v16, %v4658_v6  ;;  %v4282_v55 = vadd.f32 1.0, %v7940_v13  ;;  %7961 = vpow2.f32 %v5749_v21  ;;  %v9209_v45 = vadd.f32 %v9133_v27, %v7189_v9  ;;  %v2336_v14 = vpop.f32.mrb[109].mxu1 }
 0x25c   : > { %v7944_v48 = vpop.eup %7943  ;;  %v6258_v17 = vpack.c.bf16 %v4657_v42, %v4656_v41  ;;  %v4280_v46 = vadd.f32 1.0, %v7942_v32  ;;  %7963 = vpow2.f32 %v5754_v44  ;;  %v7190_v5 = vadd.f32 %v7048_v63, %v6904_v60  ;;  %v3458_v57 = vpop.f32.mrb[109].mxu0 }
 0x25d   : > { %v7946_v40 = vpop.eup %7945  ;;  %6399 = vst [vmem:[%s8654_s21 + $0x168] sm:$0xff] %v6263_v0   ;;  %7965 = vrcp.f32 %v4282_v55  ;;  %v4283_v22 = vadd.f32 1.0, %v7944_v48  ;;  %v6905_v31 = vpop.f32.mrb[110].mxu1  ;;  %v5755_v50 = vmul.f32 -1.442695, %v9206_v53  ;;  %v7191_v26 = vadd.f32 %v3458_v57, %v2336_v14 }
 0x25e   : > { %v7948_v51 = vpop.eup %7947  ;;  %6398 = vst [vmem:[%s8654_s21 + $0x160] sm:$0xff] %v6258_v17   ;;  %7967 = vrcp.f32 %v4280_v46  ;;  %v4281_v24 = vadd.f32 1.0, %v7946_v40  ;;  %v7049_v1 = vpop.f32.mrb[110].mxu0  ;;  %v9216_v7 = vadd.f32 %v9133_v27, %v7190_v5  ;;  %v5753_v61 = vmul.f32 -1.442695, %v9209_v45 }
 0x25f   : > { %v2339_v12 = vpop.f32.mrb[111].mxu1  ;;  %v7950_v25 = vpop.eup %7949  ;;  %7969 = vrcp.f32 %v4283_v22  ;;  %v4286_v15 = vadd.f32 1.0, %v7948_v51  ;;  %v7192_v4 = vadd.f32 %v7049_v1, %v6905_v31  ;;  %v9220_v37 = vadd.f32 %v9133_v27, %v7191_v26 }
 0x260   : > { %v3461_v56 = vpop.f32.mrb[111].mxu0  ;;  %v7952_v28 = vpop.eup %7951  ;;  %7971 = vrcp.f32 %v4281_v24  ;;  %v5758_v47 = vmul.f32 -1.442695, %v9216_v7  ;;  %v4662_v43 = vmul.f32 %v7950_v25, %v9126_v59 }
 0x261   : > { %v7193_v23 = vadd.f32 %v3461_v56, %v2339_v12  ;;  %v7954_v38 = vpop.eup %7953  ;;  %7973 = vrcp.f32 %v4286_v15  ;;  %v9226_v21 = vadd.f32 %v9133_v27, %v7192_v4  ;;  %v4660_v54 = vmul.f32 %v7952_v28, %v9136_v36  ;;  %v6908_v9 = vpop.f32.mrb[112].mxu1 }
 0x262   : > { %v7956_v58 = vpop.eup %7955  ;;  %v4663_v33 = vmul.f32 %v7954_v38, %v9139_v52  ;;  %7975 = vpow2.f32 %v5752_v10  ;;  %v5756_v6 = vmul.f32 -1.442695, %v9220_v37  ;;  %v7052_v52 = vpop.f32.mrb[112].mxu0 }
 0x263   : > { %v7958_v39 = vpop.eup %7957  ;;  %v4661_v29 = vmul.f32 %v7956_v58, %v9144_v34  ;;  %7977 = vpow2.f32 %v5755_v50  ;;  %v9232_v59 = vadd.f32 %v9133_v27, %v7193_v23  ;;  %v2352_v13 = vpop.f32.mrb[113].mxu1  ;;  %v7194_v34 = vadd.f32 %v7052_v52, %v6908_v9 }
 0x264   : > { %v7960_v2 = vpop.eup %7959  ;;  %v6273_v16 = vpack.c.bf16 %v4663_v33, %v4662_v43  ;;  %v4284_v44 = vadd.f32 1.0, %v7958_v39  ;;  %7979 = vpow2.f32 %v5753_v61  ;;  %v3474_v32 = vpop.f32.mrb[113].mxu0  ;;  %v5759_v48 = vmul.f32 -1.442695, %v9226_v21 }
 0x265   : > { %v7962_v41 = vpop.eup %7961  ;;  %v6268_v42 = vpack.c.bf16 %v4661_v29, %v4660_v54  ;;  %v4287_v36 = vadd.f32 1.0, %v7960_v2  ;;  %7981 = vpow2.f32 %v5758_v47  ;;  %v6909_v0 = vpop.f32.mrb[114].mxu1  ;;  %v7195_v17 = vadd.f32 %v3474_v32, %v2352_v13 }
 0x266   : > { %v7964_v55 = vpop.eup %7963  ;;  %6401 = vst [vmem:[%s8654_s21 + $0x178] sm:$0xff] %v6273_v16   ;;  %7983 = vrcp.f32 %v4284_v44  ;;  %v4285_v60 = vadd.f32 1.0, %v7962_v41  ;;  %v7053_v46 = vpop.f32.mrb[114].mxu0  ;;  %v9238_v22 = vadd.f32 %v9133_v27, %v7194_v34  ;;  %v5757_v31 = vmul.f32 -1.442695, %v9232_v59 }
 0x267   : > { %v2355_v63 = vpop.f32.mrb[115].mxu1  ;;  %v7966_v14 = vpop.eup %7965  ;;  %6400 = vst [vmem:[%s8654_s21 + $0x170] sm:$0xff] %v6268_v42   ;;  %7985 = vrcp.f32 %v4287_v36  ;;  %v4290_v40 = vadd.f32 1.0, %v7964_v55  ;;  %v7196_v10 = vadd.f32 %v7053_v46, %v6909_v0  ;;  %v9242_v51 = vadd.f32 %v9133_v27, %v7195_v17 }
 0x268   : > { %v3477_v5 = vpop.f32.mrb[115].mxu0  ;;  %v7968_v57 = vpop.eup %7967  ;;  %7987 = vrcp.f32 %v4285_v60  ;;  %v4666_v26 = vmul.f32 %v7966_v14, %v9153_v8  ;;  %v5762_v1 = vmul.f32 -1.442695, %v9238_v22 }
 0x269   : > { %v7197_v24 = vadd.f32 %v3477_v5, %v2355_v63  ;;  %v7970_v50 = vpop.eup %7969  ;;  %7989 = vrcp.f32 %v4290_v40  ;;  %v9247_v12 = vadd.f32 %v9133_v27, %v7196_v10  ;;  %v5760_v4 = vmul.f32 -1.442695, %v9242_v51  ;;  %v6912_v23 = vpop.f32.mrb[116].mxu1 }
 0x26a   : > { %v7972_v25 = vpop.eup %7971  ;;  %v4667_v15 = vmul.f32 %v7970_v50, %v9161_v18  ;;  %7991 = vpow2.f32 %v5756_v6  ;;  %v4664_v61 = vmul.f32 %v7968_v57, %v9158_v11  ;;  %v7056_v18 = vpop.f32.mrb[116].mxu0 }
 0x26b   : > { %v9252_v56 = vadd.f32 %v9133_v27, %v7197_v24  ;;  %v7974_v28 = vpop.eup %7973  ;;  %v4665_v8 = vmul.f32 %v7972_v25, %v9166_v30  ;;  %7993 = vpow2.f32 %v5759_v48  ;;  %v5763_v58 = vmul.f32 -1.442695, %v9247_v12  ;;  %v2368_v43 = vpop.f32.mrb[117].mxu1 }
 0x26c   : > { %v7976_v38 = vpop.eup %7975  ;;  %v6283_v47 = vpack.c.bf16 %v4667_v15, %v4666_v26  ;;  %7995 = vpow2.f32 %v5757_v31  ;;  %v7198_v29 = vadd.f32 %v7056_v18, %v6912_v23  ;;  %v3490_v6 = vpop.f32.mrb[117].mxu0  ;;  %v4670_v17 = vmul.f32 %v7974_v28, %v9173_v49 }
 0x26d   : > { %v7978_v33 = vpop.eup %7977  ;;  %v6278_v39 = vpack.c.bf16 %v4665_v8, %v4664_v61  ;;  %v4288_v54 = vadd.f32 1.0, %v7976_v38  ;;  %7997 = vpow2.f32 %v5762_v1  ;;  %v6913_v11 = vpop.f32.mrb[118].mxu1  ;;  %v5761_v2 = vmul.f32 -1.442695, %v9252_v56 }
 0x26e   : > { %v7980_v9 = vpop.eup %7979  ;;  %6403 = vst [vmem:[%s8654_s21 + $0x188] sm:$0xff] %v6283_v47   ;;  %v4291_v30 = vadd.f32 1.0, %v7978_v33  ;;  %7999 = vpow2.f32 %v5760_v4  ;;  %v7199_v16 = vadd.f32 %v3490_v6, %v2368_v43  ;;  %v7057_v44 = vpop.f32.mrb[118].mxu0  ;;  %v9261_v42 = vadd.f32 %v9133_v27, %v7198_v29 }
 0x26f   : > { %v2371_v52 = vpop.f32.mrb[119].mxu1  ;;  %v7982_v13 = vpop.eup %7981  ;;  %6402 = vst [vmem:[%s8654_s21 + $0x180] sm:$0xff] %v6278_v39   ;;  %8001 = vrcp.f32 %v4288_v54  ;;  %v4289_v41 = vadd.f32 1.0, %v7980_v9  ;;  %v7200_v36 = vadd.f32 %v7057_v44, %v6913_v11 }
 0x270   : > { %v3493_v34 = vpop.f32.mrb[119].mxu0  ;;  %v7984_v32 = vpop.eup %7983  ;;  %8003 = vrcp.f32 %v4291_v30  ;;  %v4294_v0 = vadd.f32 1.0, %v7982_v13  ;;  %v9264_v55 = vadd.f32 %v9133_v27, %v7199_v16  ;;  %v5766_v46 = vmul.f32 -1.442695, %v9261_v42 }
 0x271   : > { %v7201_v60 = vadd.f32 %v3493_v34, %v2371_v52  ;;  %v7986_v48 = vpop.eup %7985  ;;  %8005 = vrcp.f32 %v4289_v41  ;;  %v9271_v10 = vadd.f32 %v9133_v27, %v7200_v36  ;;  %v4668_v57 = vmul.f32 %v7984_v32, %v9179_v3  ;;  %v6916_v49 = vpop.f32.mrb[120].mxu1 }
 0x272   : > { %v7988_v63 = vpop.eup %7987  ;;  %v4671_v14 = vmul.f32 %v7986_v48, %v9184_v19  ;;  %8007 = vrcp.f32 %v4294_v0  ;;  %v5764_v40 = vmul.f32 -1.442695, %v9264_v55  ;;  %v7060_v19 = vpop.f32.mrb[120].mxu0 }
 0x273   : > { %v7990_v5 = vpop.eup %7989  ;;  %v4669_v31 = vmul.f32 %v7988_v63, %v9187_v20  ;;  %8009 = vpow2.f32 %v5763_v58  ;;  %v9276_v26 = vadd.f32 %v9133_v27, %v7201_v60  ;;  %v2384_v1 = vpop.f32.mrb[121].mxu1  ;;  %v7202_v28 = vadd.f32 %v7060_v19, %v6916_v49 }
 0x274   : > { %v7992_v24 = vpop.eup %7991  ;;  %v6293_v50 = vpack.c.bf16 %v4671_v14, %v4670_v17  ;;  %8011 = vpow2.f32 %v5761_v2  ;;  %v3506_v3 = vpop.f32.mrb[121].mxu0  ;;  %v5767_v23 = vmul.f32 -1.442695, %v9271_v10  ;;  %v4674_v36 = vmul.f32 %v7990_v5, %v9195_v35 }
 0x275   : > { %v7994_v25 = vpop.eup %7993  ;;  %v6288_v15 = vpack.c.bf16 %v4669_v31, %v4668_v57  ;;  %v4292_v4 = vadd.f32 1.0, %v7992_v24  ;;  %8013 = vpow2.f32 %v5766_v46  ;;  %v6917_v61 = vpop.f32.mrb[122].mxu1  ;;  %v7203_v38 = vadd.f32 %v3506_v3, %v2384_v1 }
 0x276   : > { %v7996_v20 = vpop.eup %7995  ;;  %6405 = vst [vmem:[%s8654_s21 + $0x198] sm:$0xff] %v6293_v50   ;;  %v4295_v8 = vadd.f32 1.0, %v7994_v25  ;;  %8015 = vpow2.f32 %v5764_v40  ;;  %v7061_v47 = vpop.f32.mrb[122].mxu0  ;;  %v9282_v33 = vadd.f32 %v9133_v27, %v7202_v28  ;;  %v5765_v16 = vmul.f32 -1.442695, %v9276_v26 }
 0x277   : > { %v2387_v58 = vpop.f32.mrb[123].mxu1  ;;  %v7998_v18 = vpop.eup %7997  ;;  %6404 = vst [vmem:[%s8654_s21 + $0x190] sm:$0xff] %v6288_v15   ;;  %8017 = vrcp.f32 %v4292_v4  ;;  %v4293_v43 = vadd.f32 1.0, %v7996_v20  ;;  %v7204_v39 = vadd.f32 %v7061_v47, %v6917_v61  ;;  %v9285_v11 = vadd.f32 %v9133_v27, %v7203_v38 }
 0x278   : > { %v3509_v54 = vpop.f32.mrb[123].mxu0  ;;  %v8000_v29 = vpop.eup %7999  ;;  %8019 = vrcp.f32 %v4295_v8  ;;  %v4298_v6 = vadd.f32 1.0, %v7998_v18  ;;  %v5770_v13 = vmul.f32 -1.442695, %v9282_v33 }
 0x279   : > { %v7205_v9 = vadd.f32 %v3509_v54, %v2387_v58  ;;  %v8002_v30 = vpop.eup %8001  ;;  %8021 = vrcp.f32 %v4293_v43  ;;  %v4296_v2 = vadd.f32 1.0, %v8000_v29  ;;  %v9289_v44 = vadd.f32 %v9133_v27, %v7204_v39  ;;  %v6920_v0 = vpop.f32.mrb[124].mxu1 }
 0x27a   : > { %v8004_v52 = vpop.eup %8003  ;;  %8023 = vrcp.f32 %v4298_v6  ;;  %v5768_v32 = vmul.f32 -1.442695, %v9285_v11  ;;  %v4672_v48 = vmul.f32 %v8002_v30, %v9201_v62  ;;  %v7064_v63 = vpop.f32.mrb[124].mxu0 }
 0x27b   : > { %v8006_v41 = vpop.eup %8005  ;;  %v4675_v34 = vmul.f32 %v8004_v52, %v9206_v53  ;;  %8025 = vrcp.f32 %v4296_v2  ;;  %v9298_v46 = vadd.f32 %v9133_v27, %v7205_v9  ;;  %v2400_v14 = vpop.f32.mrb[125].mxu1  ;;  %v5771_v53 = vmul.f32 -1.442695, %v9289_v44 }
 0x27c   : > { %v8008_v60 = vpop.eup %8007  ;;  %v4673_v17 = vmul.f32 %v8006_v41, %v9209_v45  ;;  %8027 = vpow2.f32 %v5767_v23  ;;  %v7206_v5 = vadd.f32 %v7064_v63, %v6920_v0  ;;  %v3522_v57 = vpop.f32.mrb[125].mxu0 }
 0x27d   : > { %v8010_v40 = vpop.eup %8009  ;;  %v6303_v35 = vpack.c.bf16 %v4675_v34, %v4674_v36  ;;  %8029 = vpow2.f32 %v5765_v16  ;;  %v6921_v31 = vpop.f32.mrb[126].mxu1  ;;  %v7207_v45 = vadd.f32 %v3522_v57, %v2400_v14  ;;  %v5769_v47 = vmul.f32 -1.442695, %v9298_v46 }
 0x27e   : > { %v8012_v49 = vpop.eup %8011  ;;  %v6298_v62 = vpack.c.bf16 %v4673_v17, %v4672_v48  ;;  %v4299_v24 = vadd.f32 1.0, %v8010_v40  ;;  %8031 = vpow2.f32 %v5770_v13  ;;  %v7065_v50 = vpop.f32.mrb[126].mxu0  ;;  %v9303_v15 = vadd.f32 %v9133_v27, %v7206_v5 }
 0x27f   : > { %v2403_v19 = vpop.f32.mrb[127].mxu1  ;;  %v8014_v1 = vpop.eup %8013  ;;  %6407 = vst [vmem:[%s8654_s21 + $0x1a8] sm:$0xff] %v6303_v35   ;;  %v4297_v25 = vadd.f32 1.0, %v8012_v49  ;;  %8033 = vpow2.f32 %v5768_v32  ;;  %v7208_v4 = vadd.f32 %v7065_v50, %v6921_v31  ;;  %v9307_v20 = vadd.f32 %v9133_v27, %v7207_v45 }
 0x280   : > { %v3525_v28 = vpop.f32.mrb[127].mxu0  ;;  %v8016_v3 = vpop.eup %8015  ;;  %6406 = vst [vmem:[%s8654_s21 + $0x1a0] sm:$0xff] %v6298_v62   ;;  %8035 = vrcp.f32 %v4299_v24  ;;  %v4302_v61 = vadd.f32 1.0, %v8014_v1  ;;  %v5774_v43 = vmul.f32 -1.442695, %v9303_v15  ;;  %v4678_v54 = vmul.f32 %v8008_v60, %v9216_v7 }
 0x281   : > { %v7209_v8 = vadd.f32 %v3525_v28, %v2403_v19  ;;  %v8018_v23 = vpop.eup %8017  ;;  %8037 = vrcp.f32 %v4297_v25  ;;  %v4300_v38 = vadd.f32 1.0, %v8016_v3  ;;  %v9311_v58 = vadd.f32 %v9133_v27, %v7208_v4 }
 0x282   : > { %v8020_v18 = vpop.eup %8019  ;;  %8039 = vrcp.f32 %v4302_v61  ;;  %v5772_v6 = vmul.f32 -1.442695, %v9307_v20  ;;  %v4676_v30 = vmul.f32 %v8018_v23, %v9220_v37 }
 0x283   : > { %v8022_v39 = vpop.eup %8021  ;;  %v4679_v29 = vmul.f32 %v8020_v18, %v9226_v21  ;;  %8041 = vrcp.f32 %v4300_v38  ;;  %v5775_v16 = vmul.f32 -1.442695, %v9311_v58  ;;  %v9321_v7 = vadd.f32 %v9133_v27, %v7209_v8 }
 0x284   : > { %v8024_v9 = vpop.eup %8023  ;;  %v4677_v2 = vmul.f32 %v8022_v39, %v9232_v59  ;;  %8043 = vpow2.f32 %v5771_v53 }
 0x285   : > { %v8026_v52 = vpop.eup %8025  ;;  %v6313_v13 = vpack.c.bf16 %v4679_v29, %v4678_v54  ;;  %8045 = vpow2.f32 %v5769_v47  ;;  %v5773_v0 = vmul.f32 -1.442695, %v9321_v7  ;;  %v4682_v48 = vmul.f32 %v8024_v9, %v9238_v22 }
 0x286   : > { %v8028_v21 = vpop.eup %8027  ;;  %v6308_v41 = vpack.c.bf16 %v4677_v2, %v4676_v30  ;;  %8047 = vpow2.f32 %v5774_v43  ;;  %v4680_v40 = vmul.f32 %v8026_v52, %v9242_v51 }
 0x287   : > { %v8030_v36 = vpop.eup %8029  ;;  %6409 = vst [vmem:[%s8654_s21 + $0x1b8] sm:$0xff] %v6313_v13   ;;  %v4303_v34 = vadd.f32 1.0, %v8028_v21  ;;  %8049 = vpow2.f32 %v5772_v6 }
 0x288   : > { %v8032_v37 = vpop.eup %8031  ;;  %6408 = vst [vmem:[%s8654_s21 + $0x1b0] sm:$0xff] %v6308_v41   ;;  %v4301_v32 = vadd.f32 1.0, %v8030_v36  ;;  %8051 = vpow2.f32 %v5775_v16 }
 0x289   : > { %v8034_v59 = vpop.eup %8033  ;;  %8053 = vrcp.f32 %v4303_v34  ;;  %v4306_v63 = vadd.f32 1.0, %v8032_v37 }
 0x28a   : > { %v8036_v60 = vpop.eup %8035  ;;  %8055 = vrcp.f32 %v4301_v32  ;;  %v4304_v53 = vadd.f32 1.0, %v8034_v59 }
 0x28b   : > { %v8038_v27 = vpop.eup %8037  ;;  %v4683_v17 = vmul.f32 %v8036_v60, %v9247_v12  ;;  %8057 = vpow2.f32 %v5773_v0 }
 0x28c   : > { %v8040_v14 = vpop.eup %8039  ;;  %v4681_v35 = vmul.f32 %v8038_v27, %v9252_v56  ;;  %8059 = vrcp.f32 %v4306_v63 }
 0x28d   : > { %v8042_v5 = vpop.eup %8041  ;;  %v6323_v57 = vpack.c.bf16 %v4683_v17, %v4682_v48  ;;  %8061 = vrcp.f32 %v4304_v53  ;;  %v4686_v25 = vmul.f32 %v8040_v14, %v9261_v42 }
 0x28e   : > { %v8044_v31 = vpop.eup %8043  ;;  %v6318_v49 = vpack.c.bf16 %v4681_v35, %v4680_v40  ;;  %v4684_v3 = vmul.f32 %v8042_v5, %v9264_v55 }
 0x28f   : > { %v8046_v62 = vpop.eup %8045  ;;  %6411 = vst [vmem:[%s8654_s21 + $0x1c8] sm:$0xff] %v6323_v57   ;;  %v4307_v24 = vadd.f32 1.0, %v8044_v31 }
 0x290   : > { %v8048_v22 = vpop.eup %8047  ;;  %6410 = vst [vmem:[%s8654_s21 + $0x1c0] sm:$0xff] %v6318_v49   ;;  %v4305_v12 = vadd.f32 1.0, %v8046_v62 }
 0x291   : > { %v8050_v45 = vpop.eup %8049  ;;  %8063 = vrcp.f32 %v4307_v24  ;;  %v4310_v50 = vadd.f32 1.0, %v8048_v22 }
 0x292   : > { %v8052_v51 = vpop.eup %8051  ;;  %8065 = vrcp.f32 %v4305_v12  ;;  %v4308_v28 = vadd.f32 1.0, %v8050_v45 }
 0x293   : > { %v8054_v56 = vpop.eup %8053  ;;  %8067 = vrcp.f32 %v4310_v50  ;;  %v4311_v19 = vadd.f32 1.0, %v8052_v51 }
 0x294   : > { %v8056_v1 = vpop.eup %8055  ;;  %v4687_v4 = vmul.f32 %v8054_v56, %v9271_v10 }
 0x295   : > { %v4685_v61 = vmul.f32 %v8056_v1, %v9276_v26  ;;  %8069 = vrcp.f32 %v4311_v19  ;;  %v8058_v23 = vpop.eup %8057 }
 0x296   : > { %v6333_v8 = vpack.c.bf16 %v4687_v4, %v4686_v25  ;;  %8071 = vrcp.f32 %v4308_v28  ;;  %v4309_v47 = vadd.f32 1.0, %v8058_v23  ;;  %v8060_v18 = vpop.eup %8059 }
 0x297   : > { %v6328_v38 = vpack.c.bf16 %v4685_v61, %v4684_v3  ;;  %v8062_v43 = vpop.eup %8061  ;;  %v4690_v55 = vmul.f32 %v8060_v18, %v9282_v33 }
 0x298   : > { %6413 = vst [vmem:[%s8654_s21 + $0x1d8] sm:$0xff] %v6333_v8   ;;  %8073 = vrcp.f32 %v4309_v47  ;;  %v4688_v54 = vmul.f32 %v8062_v43, %v9285_v11 }
 0x299   : > { %6412 = vst [vmem:[%s8654_s21 + $0x1d0] sm:$0xff] %v6328_v38  }
 0x29b   : > { %v8064_v42 = vpop.eup %8063 }
 0x29c   : > { %v8066_v10 = vpop.eup %8065  ;;  %v4691_v26 = vmul.f32 %v8064_v42, %v9289_v44 }
 0x29d   : > { %v8068_v39 = vpop.eup %8067  ;;  %v4689_v29 = vmul.f32 %v8066_v10, %v9298_v46 }
 0x29e   : > { %v6343_v6 = vpack.c.bf16 %v4691_v26, %v4690_v55  ;;  %v4694_v2 = vmul.f32 %v8068_v39, %v9303_v15 }
 0x29f   : > { %v8070_v9 = vpop.eup %8069  ;;  %v6338_v30 = vpack.c.bf16 %v4689_v29, %v4688_v54 }
 0x2a0   : > { %6415 = vst [vmem:[%s8654_s21 + $0x1e8] sm:$0xff] %v6343_v6   ;;  %v4695_v16 = vmul.f32 %v8070_v9, %v9311_v58  ;;  %v8072_v52 = vpop.eup %8071 }
 0x2a1   : > { %6414 = vst [vmem:[%s8654_s21 + $0x1e0] sm:$0xff] %v6338_v30   ;;  %v4692_v44 = vmul.f32 %v8072_v52, %v9307_v20 }
 0x2a2   : > { %v6353_v13 = vpack.c.bf16 %v4695_v16, %v4694_v2  ;;  %v8074_v33 = vpop.eup %8073 }
 0x2a3   : > { %v4693_v11 = vmul.f32 %v8074_v33, %v9321_v7 }
 0x2a4   : > { %6417 = vst [vmem:[%s8654_s21 + $0x1f8] sm:$0xff] %v6353_v13  }
 0x2a5   : > { %v6348_v21 = vpack.c.bf16 %v4693_v11, %v4692_v44 }
 0x2a7   : > { %6416 = vst [vmem:[%s8654_s21 + $0x1f0] sm:$0xff] %v6348_v21  }
 0x2a8 PF: > { %s13_s12 = sadd.s32 1, %s8083_s12  }
 0x2a9   : > { %p10_p4 = scmp.ge.s32.totalorder %s13_s12, 4  }
 0x2ab   :  { %12 = sbr.rel (!%p10_p4) target bundleno = 1 (0x1), region = 64 }

// kernel: effv2s_deepsuper_forward.8
= control target key start
LH: loop header
LB: loop body
LE: loop exit
PB: predicated region body
PF: predicated region fallthrough
CT: control target
= control target key end

     0   :  { %s8446_s18 = smov 0   ;;  %s10189_s0 = inlined_call_operand.vmem [shape: bf16[2,1088,128], index: 0, kind: input, shape index: {}]   ;;  %s10190_s1 = inlined_call_operand.vmem [shape: bf16[3,128,128], index: 1, kind: input, shape index: {}]   ;;  %s10191_s2 = inlined_call_operand.vmem [shape: f32[1,128], index: 2, kind: input, shape index: {}]   ;;  %s10192_s3 = inlined_call_operand.vmem [shape: bf16[128,128], index: 3, kind: input, shape index: {}]   ;;  %s10193_s4 = inlined_call_operand.vmem [shape: f32[1,128], index: 4, kind: input, shape index: {}]   ;;  %s10194_s5 = inlined_call_operand.vmem [shape: bf16[2,1024,128], index: 5, kind: output, shape index: {}]  }
   0x1 LB: > { %s5629_s19 = sadd.s32 4294967295, %s8414_s18   ;;  %p5633_p0 = scmp.ge.s32.totalorder %s8414_s18, 1  ;;  %s8414_s18 = sphi %s8446_s18, %s15_s18  }
   0x2   : > { %p187_p1 = scmp.lt.s32.totalorder %s8414_s18, 3 }
   0x4   : > { %p188_p2 = pnand %p5633_p0, %p187_p1 }
   0x6   : > { %191 = sbr.rel (%p188_p2) target bundleno = 1027 (0x403), region = 40 }
   0xd   : > { %v7732_v0 = vld [vmem:[%s10190_s1] sm:$0xff]   ;;  %p215_p3 = scmp.lt.s32.totalorder %s5629_s19, 1  ;;  %v7733_v1 = vld [vmem:[%s10190_s1 + $0x8] sm:$0xff]   ;;  %v7734_v2 = vld [vmem:[%s10190_s1 + $0x10] sm:$0xff]  }
   0xe   : > { %7035 = vmatprep.subr.bf16.mxu0 %v7732_v0  ;;  %v7735_v3 = vld [vmem:[%s10190_s1 + $0x18] sm:$0xff]   ;;  %v7736_v6 = vld [vmem:[%s10190_s1 + $0x20] sm:$0xff]   ;;  %v7737_v7 = vld [vmem:[%s10190_s1 + $0x28] sm:$0xff]  }
   0xf   : > { %s10324_s19 = smov (!%p215_p3, %s5629_s19), 1  ;;  %7036 = vmatpush3.bf16.msra.mxu0 %v7732_v0  ;;  %v7738_v8 = vld [vmem:[%s10190_s1 + $0x30] sm:$0xff]   ;;  %v7739_v9 = vld [vmem:[%s10190_s1 + $0x38] sm:$0xff]   ;;  %v7742_v10 = vld [vmem:[%s10190_s1 + $0x80] sm:$0xff]  }
  0x10   : > { %7037 = vmatprep.subr.bf16.mxu0 %v7733_v1  ;;  %s7723_s26 = smul.u32 544, %s10324_s19  ;;  %v7751_v12 = vld [vmem:[%s10190_s1 + $0x88] sm:$0xff]   ;;  %v7760_v13 = vld [vmem:[%s10190_s1 + $0x90] sm:$0xff]   ;;  %v7769_v16 = vld [vmem:[%s10190_s1 + $0x98] sm:$0xff]   ;;  %s6091_s28 = sshll.u32 %s10324_s19, 9 }
  0x11   : > { %v7778_v18 = vld [vmem:[%s10190_s1 + $0xa0] sm:$0xff]   ;;  %v7787_v24 = vld [vmem:[%s10190_s1 + $0xa8] sm:$0xff]   ;;  %v7796_v33 = vld [vmem:[%s10190_s1 + $0xb0] sm:$0xff]   ;;  %s9977_s6 = scalar_lea.vmem %s10194_s5, %s6091_s28 }
  0x12   : > { %s8469_s29 = scalar_lea.vmem %s10189_s0, %s7723_s26  ;;  %v7802_v38 = vld [vmem:[%s10190_s1 + $0x40] sm:$0xff]   ;;  %v7804_v41 = vld [vmem:[%s10190_s1 + $0x48] sm:$0xff]   ;;  %v7806_v42 = vld [vmem:[%s10190_s1 + $0x50] sm:$0xff]  }
  0x13   : > { %7038 = vmatpush3.bf16.msra.mxu0 %v7733_v1  ;;  %v7740_v4 = vld [vmem:[%s8469_s29] sm:$0xff]   ;;  %v7743_v5 = vld [vmem:[%s8469_s29 + $0x10] sm:$0xff]   ;;  %v7741_v11 = vld [vmem:[%s8469_s29 + $0x8] sm:$0xff]   ;;  %6891 = vmatprep.subr.bf16.mxu1 %v7802_v38 }
  0x14   : > { %7039 = vmatprep.subr.bf16.mxu0 %v7734_v2  ;;  %7051 = vmatprep.mubr.bf16.mxu0 %v7740_v4  ;;  %v8499_v14 = vld [vmem:[%s8469_s29 + $0x18] sm:$0xff]   ;;  %v8502_v15 = vld [vmem:[%s8469_s29 + $0x20] sm:$0xff]   ;;  %v8510_v17 = vld [vmem:[%s8469_s29 + $0x28] sm:$0xff]  }
  0x15   : > { %6907 = vmatprep.mubr.bf16.mxu1 %v7743_v5  ;;  %v8516_v19 = vld [vmem:[%s8469_s29 + $0x30] sm:$0xff]   ;;  %v8521_v20 = vld [vmem:[%s8469_s29 + $0x38] sm:$0xff]   ;;  %v8524_v21 = vld [vmem:[%s8469_s29 + $0x40] sm:$0xff]   ;;  %6892 = vmatpush3.bf16.msra.mxu1 %v7802_v38 }
  0x16   : > { %v8529_v22 = vld [vmem:[%s8469_s29 + $0x48] sm:$0xff]   ;;  %v8532_v23 = vld [vmem:[%s8469_s29 + $0x50] sm:$0xff]   ;;  %v8540_v25 = vld [vmem:[%s8469_s29 + $0x58] sm:$0xff]   ;;  %6893 = vmatprep.subr.bf16.mxu1 %v7804_v41 }
  0x17   : > { %7040 = vmatpush3.bf16.msra.mxu0 %v7734_v2  ;;  %v8543_v26 = vld [vmem:[%s8469_s29 + $0x60] sm:$0xff]   ;;  %v8548_v27 = vld [vmem:[%s8469_s29 + $0x68] sm:$0xff]   ;;  %v8551_v28 = vld [vmem:[%s8469_s29 + $0x70] sm:$0xff]  }
  0x18   : > { %7041 = vmatprep.subr.bf16.mxu0 %v7735_v3  ;;  %v8556_v29 = vld [vmem:[%s8469_s29 + $0x78] sm:$0xff]   ;;  %v8559_v30 = vld [vmem:[%s8469_s29 + $0x80] sm:$0xff]   ;;  %v8564_v31 = vld [vmem:[%s8469_s29 + $0x88] sm:$0xff]  }
  0x19   : > { %v8567_v32 = vld [vmem:[%s8469_s29 + $0x90] sm:$0xff]   ;;  %v8575_v34 = vld [vmem:[%s8469_s29 + $0x98] sm:$0xff]   ;;  %v8578_v35 = vld [vmem:[%s8469_s29 + $0xa0] sm:$0xff]   ;;  %6894 = vmatpush3.bf16.msra.mxu1 %v7804_v41 }
  0x1a   : > { %v8583_v36 = vld [vmem:[%s8469_s29 + $0xa8] sm:$0xff]   ;;  %v8586_v37 = vld [vmem:[%s8469_s29 + $0xb0] sm:$0xff]   ;;  %v8594_v39 = vld [vmem:[%s8469_s29 + $0xb8] sm:$0xff]   ;;  %6895 = vmatprep.subr.bf16.mxu1 %v7806_v42 }
  0x1b   : > { %7042 = vmatpush3.bf16.msra.mxu0 %v7735_v3  ;;  %v8597_v40 = vld [vmem:[%s8469_s29 + $0xc0] sm:$0xff]   ;;  %v8608_v43 = vld [vmem:[%s8469_s29 + $0xc8] sm:$0xff]   ;;  %v8611_v44 = vld [vmem:[%s8469_s29 + $0xd0] sm:$0xff]  }
  0x1c   : > { %7043 = vmatprep.subr.bf16.mxu0 %v7736_v6  ;;  %v7808_v45 = vld [vmem:[%s10190_s1 + $0xb8] sm:$0xff]   ;;  %v7811_v47 = vld [vmem:[%s10190_s1 + $0x60] sm:$0xff]   ;;  %v7813_v50 = vld [vmem:[%s10190_s1 + $0x68] sm:$0xff]  }
  0x1d   : > { %6896 = vmatpush3.bf16.msra.mxu1 %v7806_v42  ;;  %v7809_v46 = vld [vmem:[%s10190_s1 + $0x58] sm:$0xff]   ;;  %v8628_v49 = vld [vmem:[%s8469_s29 + $0xe0] sm:$0xff]   ;;  %v7815_v51 = vld [vmem:[%s10190_s1 + $0x70] sm:$0xff]  }
  0x1e   : > { %v8625_v48 = vld [vmem:[%s8469_s29 + $0xd8] sm:$0xff]   ;;  %6897 = vmatprep.subr.bf16.mxu1 %v7809_v46  ;;  %v8639_v52 = vld [vmem:[%s8469_s29 + $0xe8] sm:$0xff]   ;;  %v8642_v53 = vld [vmem:[%s8469_s29 + $0xf0] sm:$0xff]  }
  0x1f   : > { %7044 = vmatpush3.bf16.msra.mxu0 %v7736_v6  ;;  %v7817_v54 = vld [vmem:[%s10190_s1 + $0x78] sm:$0xff]   ;;  %v8653_v56 = vld [vmem:[%s8469_s29 + $0x100] sm:$0xff]   ;;  %v8663_v58 = vld [vmem:[%s8469_s29 + $0x108] sm:$0xff]  }
  0x20   : > { %7045 = vmatprep.subr.bf16.mxu0 %v7737_v7  ;;  %v8650_v55 = vld [vmem:[%s8469_s29 + $0xf8] sm:$0xff]   ;;  %v7820_v57 = vld [vmem:[%s10192_s3] sm:$0xff]   ;;  %v8666_v59 = vld [vmem:[%s8469_s29 + $0x110] sm:$0xff]  }
  0x21   : > { %6898 = vmatpush3.bf16.msra.mxu1 %v7809_v46  ;;  %v8673_v60 = vld [vmem:[%s8469_s29 + $0x118] sm:$0xff]   ;;  %v8676_v61 = vld [vmem:[%s8469_s29 + $0x120] sm:$0xff]   ;;  %v8683_v62 = vld [vmem:[%s8469_s29 + $0x128] sm:$0xff]  }
  0x22   : > { %6899 = vmatprep.subr.bf16.mxu1 %v7811_v47  ;;  %v8686_v63 = vld [vmem:[%s8469_s29 + $0x130] sm:$0xff]   ;;  %v8693_v0 = vld [vmem:[%s8469_s29 + $0x138] sm:$0xff]   ;;  %v8696_v1 = vld [vmem:[%s8469_s29 + $0x140] sm:$0xff]  }
  0x23   : > { %7046 = vmatpush3.bf16.msra.mxu0 %v7737_v7  ;;  %v7829_v2 = vld [vmem:[%s10192_s3 + $0x8] sm:$0xff]   ;;  %v8709_v4 = vld [vmem:[%s8469_s29 + $0x150] sm:$0xff]   ;;  %v8719_v6 = vld [vmem:[%s8469_s29 + $0x160] sm:$0xff]  }
  0x24   : > { %7047 = vmatprep.subr.bf16.mxu0 %v7738_v8  ;;  %v8706_v3 = vld [vmem:[%s8469_s29 + $0x148] sm:$0xff]   ;;  %v7833_v41 = vld [vmem:[%s8469_s29 + $0x78] sm:$0xff]   ;;  %v7834_v42 = vld [vmem:[%s8469_s29 + $0x80] sm:$0xff]  }
  0x25   : > { %6900 = vmatpush3.bf16.msra.mxu1 %v7811_v47  ;;  %v8726_v7 = vld [vmem:[%s8469_s29 + $0x168] sm:$0xff]   ;;  %v7839_v46 = vld [vmem:[%s8469_s29 + $0xa0] sm:$0xff]   ;;  %v7874_v47 = vld [vmem:[%s10192_s3 + $0x30] sm:$0xff]  }
  0x26   : > { %6901 = vmatprep.subr.bf16.mxu1 %v7813_v50  ;;  %v7865_v38 = vld [vmem:[%s10192_s3 + $0x28] sm:$0xff]  }
  0x27   : > { %7048 = vmatpush3.bf16.msra.mxu0 %v7738_v8  ;;  %v8729_v8 = vld [vmem:[%s8469_s29 + $0x170] sm:$0xff]  }
  0x28   : > { %7049 = vmatprep.subr.bf16.mxu0 %v7739_v9 }
  0x29   : > { %6902 = vmatpush3.bf16.msra.mxu1 %v7813_v50  ;;  %v7842_v50 = vld [vmem:[%s8469_s29 + $0xb8] sm:$0xff]  }
  0x2a   : > { %6903 = vmatprep.subr.bf16.mxu1 %v7815_v51 }
  0x2b   : > { %7050 = vmatpush3.bf16.msra.mxu0 %v7739_v9  ;;  %v8736_v9 = vld [vmem:[%s8469_s29 + $0x178] sm:$0xff]  }
  0x2c   : > { %7179 = vmatprep.subr.bf16.mxu0 %v7742_v10 }
  0x2d   : > { %6904 = vmatpush3.bf16.msra.mxu1 %v7815_v51  ;;  %v7843_v51 = vld [vmem:[%s8469_s29 + $0xc0] sm:$0xff]  }
  0x2e   : > { %7052 = vmatmul.mubr.bf16.vlgmr.msra.gmra.mrb[0].mxu0 %v7741_v11  ;;  %6905 = vmatprep.subr.bf16.mxu1 %v7817_v54  ;;  %v7838_v11 = vld [vmem:[%s10192_s3 + $0x10] sm:$0xff]  }
  0x2f   : > { %7180 = vmatpush3.bf16.msra.mxu0 %v7742_v10  ;;  %7055 = vmatprep.mubr.bf16.mxu0 %v7743_v5  ;;  %v8716_v5 = vld [vmem:[%s8469_s29 + $0x158] sm:$0xff]   ;;  %v8739_v10 = vld [vmem:[%s8469_s29 + $0x180] sm:$0xff]  }
  0x30   : > { %7181 = vmatprep.subr.bf16.mxu0 %v7751_v12 }
  0x31   : > { %6906 = vmatpush3.bf16.msra.mxu1 %v7817_v54 }
  0x32   : > { %7323 = vmatprep.subr.bf16.mxu1 %v7820_v57 }
  0x33   : > { %7182 = vmatpush3.bf16.msra.mxu0 %v7751_v12  ;;  %v8749_v12 = vld [vmem:[%s8469_s29 + $0x188] sm:$0xff]  }
  0x34   : > { %7183 = vmatprep.subr.bf16.mxu0 %v7760_v13  ;;  %6908 = vmatmul.mubr.bf16.vlgmr.msra.gmra.mrb[0].mxu1 %v8499_v14 }
  0x35   : > { %6911 = vmatprep.mubr.bf16.mxu1 %v8502_v15  ;;  %7324 = vmatpush3.bf16.msra.mxu1 %v7820_v57  ;;  %v7845_v57 = vld [vmem:[%s8469_s29 + $0xd0] sm:$0xff]  }
  0x36   : > { %7056 = vmatmul.mubr.bf16.gmra.mrb[4].mxu0 %v8499_v14  ;;  %7325 = vmatprep.subr.bf16.mxu1 %v7829_v2  ;;  %v8759_v14 = vld [vmem:[%s8469_s29 + $0x198] sm:$0xff]  }
  0x37   : > { %7059 = vmatprep.mubr.bf16.mxu0 %v8502_v15  ;;  %7184 = vmatpush3.bf16.msra.mxu0 %v7760_v13  ;;  %v8752_v13 = vld [vmem:[%s8469_s29 + $0x190] sm:$0xff]   ;;  %v8762_v15 = vld [vmem:[%s8469_s29 + $0x1a0] sm:$0xff]  }
  0x38   : > { %7185 = vmatprep.subr.bf16.mxu0 %v7769_v16 }
  0x39   : > { %7326 = vmatpush3.bf16.msra.mxu1 %v7829_v2  ;;  %v7849_v2 = vld [vmem:[%s8469_s29 + $0xe8] sm:$0xff]  }
  0x3a   : > { %7327 = vmatprep.subr.bf16.mxu1 %v7838_v11 }
  0x3b   : > { %7186 = vmatpush3.bf16.msra.mxu0 %v7769_v16  ;;  %v8769_v16 = vld [vmem:[%s8469_s29 + $0x1a8] sm:$0xff]  }
  0x3c   : > { %7187 = vmatprep.subr.bf16.mxu0 %v7778_v18  ;;  %6912 = vmatmul.mubr.bf16.gmra.mrb[4].mxu1 %v8510_v17 }
  0x3d   : > { %6915 = vmatprep.mubr.bf16.mxu1 %v8516_v19  ;;  %7328 = vmatpush3.bf16.msra.mxu1 %v7838_v11 }
  0x3e   : > { %7060 = vmatmul.mubr.bf16.gmra.mrb[8].mxu0 %v8510_v17  ;;  %v8772_v17 = vld [vmem:[%s8469_s29 + $0x1b0] sm:$0xff]  }
  0x3f   : > { %7063 = vmatprep.mubr.bf16.mxu0 %v8516_v19  ;;  %7188 = vmatpush3.bf16.msra.mxu0 %v7778_v18  ;;  %v8779_v18 = vld [vmem:[%s8469_s29 + $0x1b8] sm:$0xff]   ;;  %v8782_v19 = vld [vmem:[%s8469_s29 + $0x1c0] sm:$0xff]  }
  0x40   : > { %7189 = vmatprep.subr.bf16.mxu0 %v7787_v24 }
  0x43   : > { %7190 = vmatpush3.bf16.msra.mxu0 %v7787_v24  ;;  %v8805_v24 = vld [vmem:[%s8469_s29 + $0x1e0] sm:$0xff]  }
  0x44   : > { %7191 = vmatprep.subr.bf16.mxu0 %v7796_v33  ;;  %6916 = vmatmul.mubr.bf16.gmra.mrb[8].mxu1 %v8521_v20 }
  0x45   : > { %6919 = vmatprep.mubr.bf16.mxu1 %v8524_v21 }
  0x46   : > { %7064 = vmatmul.mubr.bf16.gmra.mrb[12].mxu0 %v8521_v20  ;;  %v7847_v20 = vld [vmem:[%s10192_s3 + $0x18] sm:$0xff]  }
  0x47   : > { %7067 = vmatprep.mubr.bf16.mxu0 %v8524_v21  ;;  %7192 = vmatpush3.bf16.msra.mxu0 %v7796_v33  ;;  %v8792_v21 = vld [vmem:[%s8469_s29 + $0x1c8] sm:$0xff]   ;;  %v7825_v33 = vld [vmem:[%s8469_s29 + $0x40] sm:$0xff]  }
  0x48   : > { %7193 = vmatprep.subr.bf16.mxu0 %v7808_v45  ;;  %7329 = vmatprep.subr.bf16.mxu1 %v7847_v20 }
  0x49   : > { %7330 = vmatpush3.bf16.msra.mxu1 %v7847_v20 }
  0x4b   : > { %7194 = vmatpush3.bf16.msra.mxu0 %v7808_v45  ;;  %v7837_v45 = vld [vmem:[%s8469_s29 + $0x98] sm:$0xff]  }
  0x4c   : > { %6920 = vmatmul.mubr.bf16.gmra.mrb[12].mxu1 %v8529_v22 }
  0x4d   : > { %6923 = vmatprep.mubr.bf16.mxu1 %v8532_v23 }
  0x4e   : > { %7068 = vmatmul.mubr.bf16.gmra.mrb[16].mxu0 %v8529_v22  ;;  %v8795_v22 = vld [vmem:[%s8469_s29 + $0x1d0] sm:$0xff]  }
  0x4f   : > { %7071 = vmatprep.mubr.bf16.mxu0 %v8532_v23  ;;  %v8802_v23 = vld [vmem:[%s8469_s29 + $0x1d8] sm:$0xff]  }
  0x54   : > { %6924 = vmatmul.mubr.bf16.gmra.mrb[16].mxu1 %v8540_v25 }
  0x55   : > { %6927 = vmatprep.mubr.bf16.mxu1 %v8543_v26 }
  0x56   : > { %7072 = vmatmul.mubr.bf16.gmra.mrb[20].mxu0 %v8540_v25  ;;  %v8812_v25 = vld [vmem:[%s8469_s29 + $0x1e8] sm:$0xff]  }
  0x57   : > { %7075 = vmatprep.mubr.bf16.mxu0 %v8543_v26  ;;  %v8815_v26 = vld [vmem:[%s8469_s29 + $0x1f0] sm:$0xff]  }
  0x5c   : > { %6928 = vmatmul.mubr.bf16.gmra.mrb[20].mxu1 %v8548_v27 }
  0x5d   : > { %6931 = vmatprep.mubr.bf16.mxu1 %v8551_v28 }
  0x5e   : > { %7076 = vmatmul.mubr.bf16.gmra.mrb[24].mxu0 %v8548_v27  ;;  %v8822_v27 = vld [vmem:[%s8469_s29 + $0x1f8] sm:$0xff]  }
  0x5f   : > { %7079 = vmatprep.mubr.bf16.mxu0 %v8551_v28  ;;  %v7821_v28 = vld [vmem:[%s8469_s29 + $0x20] sm:$0xff]  }
  0x64   : > { %6932 = vmatmul.mubr.bf16.gmra.mrb[24].mxu1 %v8556_v29 }
  0x65   : > { %6935 = vmatprep.mubr.bf16.mxu1 %v8559_v30 }
  0x66   : > { %7080 = vmatmul.mubr.bf16.gmra.mrb[28].mxu0 %v8556_v29  ;;  %v7856_v29 = vld [vmem:[%s10192_s3 + $0x20] sm:$0xff]  }
  0x67   : > { %7083 = vmatprep.mubr.bf16.mxu0 %v8559_v30  ;;  %7331 = vmatprep.subr.bf16.mxu1 %v7856_v29  ;;  %v7822_v30 = vld [vmem:[%s8469_s29 + $0x28] sm:$0xff]  }
  0x68   : > { %7332 = vmatpush3.bf16.msra.mxu1 %v7856_v29  ;;  %v7859_v29 = vld [vmem:[%s8469_s29 + $0x130] sm:$0xff]  }
  0x69   : > { %7333 = vmatprep.subr.bf16.mxu1 %v7865_v38 }
  0x6c   : > { %6936 = vmatmul.mubr.bf16.gmra.mrb[28].mxu1 %v8564_v31 }
  0x6d   : > { %6939 = vmatprep.mubr.bf16.mxu1 %v8567_v32  ;;  %7334 = vmatpush3.bf16.msra.mxu1 %v7865_v38 }
  0x6e   : > { %7084 = vmatmul.mubr.bf16.gmra.mrb[32].mxu0 %v8564_v31  ;;  %v7823_v31 = vld [vmem:[%s8469_s29 + $0x30] sm:$0xff]   ;;  %7335 = vmatprep.subr.bf16.mxu1 %v7874_v47 }
  0x6f   : > { %7087 = vmatprep.mubr.bf16.mxu0 %v8567_v32  ;;  %v7824_v32 = vld [vmem:[%s8469_s29 + $0x38] sm:$0xff]  }
  0x71   : > { %7336 = vmatpush3.bf16.msra.mxu1 %v7874_v47 }
  0x74   : > { %6940 = vmatmul.mubr.bf16.gmra.mrb[32].mxu1 %v8575_v34 }
  0x75   : > { %6943 = vmatprep.mubr.bf16.mxu1 %v8578_v35 }
  0x76   : > { %7088 = vmatmul.mubr.bf16.gmra.mrb[36].mxu0 %v8575_v34  ;;  %v7826_v34 = vld [vmem:[%s8469_s29 + $0x48] sm:$0xff]  }
  0x77   : > { %7091 = vmatprep.mubr.bf16.mxu0 %v8578_v35  ;;  %v7827_v35 = vld [vmem:[%s8469_s29 + $0x50] sm:$0xff]  }
  0x7c   : > { %6944 = vmatmul.mubr.bf16.gmra.mrb[36].mxu1 %v8583_v36 }
  0x7d   : > { %6947 = vmatprep.mubr.bf16.mxu1 %v8586_v37 }
  0x7e   : > { %7092 = vmatmul.mubr.bf16.gmra.mrb[40].mxu0 %v8583_v36  ;;  %v7828_v36 = vld [vmem:[%s8469_s29 + $0x58] sm:$0xff]  }
  0x7f   : > { %7095 = vmatprep.mubr.bf16.mxu0 %v8586_v37  ;;  %v7830_v37 = vld [vmem:[%s8469_s29 + $0x60] sm:$0xff]  }
  0x84   : > { %6948 = vmatmul.mubr.bf16.gmra.mrb[40].mxu1 %v8594_v39 }
  0x85   : > { %6951 = vmatprep.mubr.bf16.mxu1 %v8597_v40 }
  0x86   : > { %7096 = vmatmul.mubr.bf16.gmra.mrb[44].mxu0 %v8594_v39  ;;  %v7831_v39 = vld [vmem:[%s8469_s29 + $0x68] sm:$0xff]  }
  0x87   : > { %7099 = vmatprep.mubr.bf16.mxu0 %v8597_v40  ;;  %v7832_v40 = vld [vmem:[%s8469_s29 + $0x70] sm:$0xff]  }
  0x8c   : > { %6952 = vmatmul.mubr.bf16.gmra.mrb[44].mxu1 %v8608_v43 }
  0x8d   : > { %6955 = vmatprep.mubr.bf16.mxu1 %v8611_v44 }
  0x8e   : > { %7100 = vmatmul.mubr.bf16.gmra.mrb[48].mxu0 %v8608_v43  ;;  %v7835_v43 = vld [vmem:[%s8469_s29 + $0x88] sm:$0xff]  }
  0x8f   : > { %7103 = vmatprep.mubr.bf16.mxu0 %v8611_v44  ;;  %v7836_v44 = vld [vmem:[%s8469_s29 + $0x90] sm:$0xff]  }
  0x94   : > { %6956 = vmatmul.mubr.bf16.gmra.mrb[48].mxu1 %v8625_v48 }
  0x95   : > { %6959 = vmatprep.mubr.bf16.mxu1 %v8628_v49 }
  0x96   : > { %7104 = vmatmul.mubr.bf16.gmra.mrb[52].mxu0 %v8625_v48  ;;  %v7840_v48 = vld [vmem:[%s8469_s29 + $0xa8] sm:$0xff]  }
  0x97   : > { %7107 = vmatprep.mubr.bf16.mxu0 %v8628_v49  ;;  %v7841_v49 = vld [vmem:[%s8469_s29 + $0xb0] sm:$0xff]  }
  0x9c   : > { %6960 = vmatmul.mubr.bf16.gmra.mrb[52].mxu1 %v8639_v52 }
  0x9d   : > { %6963 = vmatprep.mubr.bf16.mxu1 %v8642_v53 }
  0x9e   : > { %7108 = vmatmul.mubr.bf16.gmra.mrb[56].mxu0 %v8639_v52 }
  0x9f   : > { %7111 = vmatprep.mubr.bf16.mxu0 %v8642_v53 }
  0xa4   : > { %6964 = vmatmul.mubr.bf16.gmra.mrb[56].mxu1 %v8650_v55 }
  0xa5   : > { %6967 = vmatprep.mubr.bf16.mxu1 %v8653_v56 }
  0xa6   : > { %7112 = vmatmul.mubr.bf16.gmra.mrb[60].mxu0 %v8650_v55  ;;  %v7844_v55 = vld [vmem:[%s8469_s29 + $0xc8] sm:$0xff]  }
  0xa7   : > { %7115 = vmatprep.mubr.bf16.mxu0 %v8653_v56 }
  0xac   : > { %6968 = vmatmul.mubr.bf16.gmra.mrb[60].mxu1 %v8663_v58 }
  0xad   : > { %6971 = vmatprep.mubr.bf16.mxu1 %v8666_v59 }
  0xae   : > { %7116 = vmatmul.mubr.bf16.gmra.mrb[64].mxu0 %v8663_v58 }
  0xaf   : > { %7119 = vmatprep.mubr.bf16.mxu0 %v8666_v59 }
  0xb4   : > { %6972 = vmatmul.mubr.bf16.gmra.mrb[64].mxu1 %v8673_v60 }
  0xb5   : > { %6975 = vmatprep.mubr.bf16.mxu1 %v8676_v61 }
  0xb6   : > { %7120 = vmatmul.mubr.bf16.gmra.mrb[68].mxu0 %v8673_v60  ;;  %v7846_v60 = vld [vmem:[%s8469_s29 + $0xd8] sm:$0xff]  }
  0xb7   : > { %7123 = vmatprep.mubr.bf16.mxu0 %v8676_v61 }
  0xbc   : > { %6976 = vmatmul.mubr.bf16.gmra.mrb[68].mxu1 %v8683_v62 }
  0xbd   : > { %6979 = vmatprep.mubr.bf16.mxu1 %v8686_v63 }
  0xbe   : > { %7124 = vmatmul.mubr.bf16.gmra.mrb[72].mxu0 %v8683_v62  ;;  %v7848_v62 = vld [vmem:[%s8469_s29 + $0xe0] sm:$0xff]  }
  0xbf   : > { %7127 = vmatprep.mubr.bf16.mxu0 %v8686_v63 }
  0xc4   : > { %6980 = vmatmul.mubr.bf16.gmra.mrb[72].mxu1 %v8693_v0 }
  0xc5   : > { %6983 = vmatprep.mubr.bf16.mxu1 %v8696_v1 }
  0xc6   : > { %7128 = vmatmul.mubr.bf16.gmra.mrb[76].mxu0 %v8693_v0 }
  0xc7   : > { %7131 = vmatprep.mubr.bf16.mxu0 %v8696_v1 }
  0xcc   : > { %6984 = vmatmul.mubr.bf16.gmra.mrb[76].mxu1 %v8706_v3 }
  0xcd   : > { %6987 = vmatprep.mubr.bf16.mxu1 %v8709_v4 }
  0xce   : > { %7132 = vmatmul.mubr.bf16.gmra.mrb[80].mxu0 %v8706_v3 }
  0xcf   : > { %7135 = vmatprep.mubr.bf16.mxu0 %v8709_v4  ;;  %v7850_v4 = vld [vmem:[%s8469_s29 + $0xf0] sm:$0xff]  }
  0xd4   : > { %6988 = vmatmul.mubr.bf16.gmra.mrb[80].mxu1 %v8716_v5 }
  0xd5   : > { %6991 = vmatprep.mubr.bf16.mxu1 %v8719_v6 }
  0xd6   : > { %7136 = vmatmul.mubr.bf16.gmra.mrb[84].mxu0 %v8716_v5 }
  0xd7   : > { %7139 = vmatprep.mubr.bf16.mxu0 %v8719_v6 }
  0xdc   : > { %6992 = vmatmul.mubr.bf16.gmra.mrb[84].mxu1 %v8726_v7 }
  0xdd   : > { %6995 = vmatprep.mubr.bf16.mxu1 %v8729_v8 }
  0xde   : > { %7140 = vmatmul.mubr.bf16.gmra.mrb[88].mxu0 %v8726_v7  ;;  %v7851_v7 = vld [vmem:[%s8469_s29 + $0xf8] sm:$0xff]  }
  0xdf   : > { %7143 = vmatprep.mubr.bf16.mxu0 %v8729_v8 }
  0xe4   : > { %6996 = vmatmul.mubr.bf16.gmra.mrb[88].mxu1 %v8736_v9 }
  0xe5   : > { %6999 = vmatprep.mubr.bf16.mxu1 %v8739_v10 }
  0xe6   : > { %7144 = vmatmul.mubr.bf16.gmra.mrb[92].mxu0 %v8736_v9  ;;  %v7852_v9 = vld [vmem:[%s8469_s29 + $0x100] sm:$0xff]  }
  0xe7   : > { %7147 = vmatprep.mubr.bf16.mxu0 %v8739_v10 }
  0xec   : > { %7000 = vmatmul.mubr.bf16.gmra.mrb[92].mxu1 %v8749_v12 }
  0xed   : > { %7003 = vmatprep.mubr.bf16.mxu1 %v8752_v13 }
  0xee   : > { %7148 = vmatmul.mubr.bf16.gmra.mrb[96].mxu0 %v8749_v12 }
  0xef   : > { %7151 = vmatprep.mubr.bf16.mxu0 %v8752_v13  ;;  %v7853_v13 = vld [vmem:[%s8469_s29 + $0x108] sm:$0xff]  }
  0xf4   : > { %7004 = vmatmul.mubr.bf16.gmra.mrb[96].mxu1 %v8759_v14 }
  0xf5   : > { %7007 = vmatprep.mubr.bf16.mxu1 %v8762_v15 }
  0xf6   : > { %7152 = vmatmul.mubr.bf16.gmra.mrb[100].mxu0 %v8759_v14 }
  0xf7   : > { %7155 = vmatprep.mubr.bf16.mxu0 %v8762_v15  ;;  %v7854_v15 = vld [vmem:[%s8469_s29 + $0x110] sm:$0xff]  }
  0xfc   : > { %7008 = vmatmul.mubr.bf16.gmra.mrb[100].mxu1 %v8769_v16 }
  0xfd   : > { %7011 = vmatprep.mubr.bf16.mxu1 %v8772_v17 }
  0xfe   : > { %7156 = vmatmul.mubr.bf16.gmra.mrb[104].mxu0 %v8769_v16 }
  0xff   : > { %7159 = vmatprep.mubr.bf16.mxu0 %v8772_v17  ;;  %v7888_v17 = vld [vmem:[%s8469_s29 + $0x200] sm:$0xff]  }
 0x104   : > { %7012 = vmatmul.mubr.bf16.gmra.mrb[104].mxu1 %v8779_v18 }
 0x105   : > { %7015 = vmatprep.mubr.bf16.mxu1 %v8782_v19 }
 0x106   : > { %7160 = vmatmul.mubr.bf16.gmra.mrb[108].mxu0 %v8779_v18 }
 0x107   : > { %7163 = vmatprep.mubr.bf16.mxu0 %v8782_v19  ;;  %v8877_v52 = vpop.f32.mrb[0].mxu1  ;;  %v7890_v19 = vld [vmem:[%s8469_s29 + $0x208] sm:$0xff]  }
 0x108   : > { %v8879_v53 = vpop.f32.mrb[1].mxu1 }
 0x109   : > { %v8881_v54 = vpop.f32.mrb[2].mxu1 }
 0x10a   : > { %v8884_v56 = vpop.f32.mrb[3].mxu1 }
 0x10c   : > { %7016 = vmatmul.mubr.bf16.gmra.mrb[108].mxu1 %v8792_v21 }
 0x10d   : > { %7019 = vmatprep.mubr.bf16.mxu1 %v8795_v22 }
 0x10e   : > { %7164 = vmatmul.mubr.bf16.gmra.mrb[112].mxu0 %v8792_v21  ;;  %v7855_v21 = vld [vmem:[%s8469_s29 + $0x118] sm:$0xff]  }
 0x10f   : > { %7167 = vmatprep.mubr.bf16.mxu0 %v8795_v22  ;;  %v8889_v58 = vpop.f32.mrb[4].mxu1  ;;  %v7883_v22 = vld [vmem:[%s10192_s3 + $0x38] sm:$0xff]  }
 0x110   : > { %v8891_v59 = vpop.f32.mrb[5].mxu1  ;;  %7337 = vmatprep.subr.bf16.mxu1 %v7883_v22 }
 0x111   : > { %v8894_v61 = vpop.f32.mrb[6].mxu1  ;;  %7338 = vmatpush3.bf16.msra.mxu1 %v7883_v22 }
 0x112   : > { %v8897_v63 = vpop.f32.mrb[7].mxu1 }
 0x114   : > { %7020 = vmatmul.mubr.bf16.gmra.mrb[112].mxu1 %v8802_v23 }
 0x115   : > { %7023 = vmatprep.mubr.bf16.mxu1 %v8805_v24 }
 0x116   : > { %7168 = vmatmul.mubr.bf16.gmra.mrb[116].mxu0 %v8802_v23  ;;  %v7857_v23 = vld [vmem:[%s8469_s29 + $0x120] sm:$0xff]  }
 0x117   : > { %7171 = vmatprep.mubr.bf16.mxu0 %v8805_v24  ;;  %v8901_v0 = vpop.f32.mrb[8].mxu1 }
 0x118   : > { %v8903_v1 = vpop.f32.mrb[9].mxu1 }
 0x119   : > { %v8906_v3 = vpop.f32.mrb[10].mxu1 }
 0x11a   : > { %v8909_v5 = vpop.f32.mrb[11].mxu1 }
 0x11c   : > { %7024 = vmatmul.mubr.bf16.gmra.mrb[116].mxu1 %v8812_v25 }
 0x11d   : > { %7027 = vmatprep.mubr.bf16.mxu1 %v8815_v26 }
 0x11e   : > { %7172 = vmatmul.mubr.bf16.gmra.mrb[120].mxu0 %v8812_v25 }
 0x11f   : > { %7175 = vmatprep.mubr.bf16.mxu0 %v8815_v26  ;;  %v8913_v6 = vpop.f32.mrb[12].mxu1 }
 0x120   : > { %v8916_v8 = vpop.f32.mrb[13].mxu1 }
 0x121   : > { %v8919_v10 = vpop.f32.mrb[14].mxu1 }
 0x122   : > { %v8921_v11 = vpop.f32.mrb[15].mxu1 }
 0x124   : > { %7028 = vmatmul.mubr.bf16.gmra.mrb[120].mxu1 %v8822_v27 }
 0x125   : > { %7031 = vmatprep.mubr.bf16.mxu1 %v7888_v17 }
 0x126   : > { %7176 = vmatmul.mubr.bf16.gmra.mrb[124].mxu0 %v8822_v27  ;;  %v7858_v27 = vld [vmem:[%s8469_s29 + $0x128] sm:$0xff]  }
 0x127   : > { %7195 = vmatprep.mubr.bf16.mxu0 %v7821_v28  ;;  %v8924_v12 = vpop.f32.mrb[16].mxu1 }
 0x128   : > { %v8927_v14 = vpop.f32.mrb[17].mxu1 }
 0x129   : > { %v8930_v16 = vpop.f32.mrb[18].mxu1 }
 0x12a   : > { %v8933_v18 = vpop.f32.mrb[19].mxu1 }
 0x12c   : > { %7032 = vmatmul.mubr.bf16.gmra.mrb[124].mxu1 %v7890_v19  ;;  %v7871_v19 = vld [vmem:[%s8469_s29 + $0x188] sm:$0xff]  }
 0x12e   : > { %7196 = vmatmul.mubr.bf16.vlgmr.msra.gmra.mrb[0].mxu0 %v7822_v30 }
 0x12f   : > { %7199 = vmatprep.mubr.bf16.mxu0 %v7823_v31  ;;  %v8936_v20 = vpop.f32.mrb[20].mxu1 }
 0x130   : > { %v8943_v24 = vpop.f32.mrb[21].mxu1 }
 0x131   : > { %v8945_v25 = vpop.f32.mrb[22].mxu1 }
 0x132   : > { %v8947_v26 = vpop.f32.mrb[23].mxu1 }
 0x136   : > { %7200 = vmatmul.mubr.bf16.gmra.mrb[4].mxu0 %v7824_v32 }
 0x137   : > { %7203 = vmatprep.mubr.bf16.mxu0 %v7825_v33  ;;  %v8950_v28 = vpop.f32.mrb[24].mxu1  ;;  %v7860_v33 = vld [vmem:[%s8469_s29 + $0x138] sm:$0xff]  }
 0x138   : > { %v8953_v30 = vpop.f32.mrb[25].mxu1 }
 0x139   : > { %v8955_v31 = vpop.f32.mrb[26].mxu1 }
 0x13a   : > { %v8957_v32 = vpop.f32.mrb[27].mxu1 }
 0x13e   : > { %7204 = vmatmul.mubr.bf16.gmra.mrb[8].mxu0 %v7826_v34  ;;  %v7861_v34 = vld [vmem:[%s8469_s29 + $0x140] sm:$0xff]  }
 0x13f   : > { %7207 = vmatprep.mubr.bf16.mxu0 %v7827_v35  ;;  %v8961_v35 = vpop.f32.mrb[28].mxu1 }
 0x146   : > { %7208 = vmatmul.mubr.bf16.gmra.mrb[12].mxu0 %v7828_v36  ;;  %v8963_v36 = vpop.f32.mrb[29].mxu1 }
 0x147   : > { %7211 = vmatprep.mubr.bf16.mxu0 %v7830_v37  ;;  %v8965_v37 = vpop.f32.mrb[30].mxu1 }
 0x148   : > { %v8967_v38 = vpop.f32.mrb[31].mxu1 }
 0x14e   : > { %7212 = vmatmul.mubr.bf16.gmra.mrb[16].mxu0 %v7831_v39  ;;  %v7862_v39 = vld [vmem:[%s8469_s29 + $0x148] sm:$0xff]  }
 0x14f   : > { %7215 = vmatprep.mubr.bf16.mxu0 %v7832_v40  ;;  %v7863_v40 = vld [vmem:[%s8469_s29 + $0x150] sm:$0xff]  }
 0x156   : > { %7216 = vmatmul.mubr.bf16.gmra.mrb[20].mxu0 %v7833_v41  ;;  %v8971_v41 = vpop.f32.mrb[32].mxu1 }
 0x157   : > { %7219 = vmatprep.mubr.bf16.mxu0 %v7834_v42  ;;  %v8973_v42 = vpop.f32.mrb[33].mxu1 }
 0x15e   : > { %7220 = vmatmul.mubr.bf16.gmra.mrb[24].mxu0 %v7835_v43  ;;  %v8975_v43 = vpop.f32.mrb[34].mxu1 }
 0x15f   : > { %7223 = vmatprep.mubr.bf16.mxu0 %v7836_v44  ;;  %v8977_v44 = vpop.f32.mrb[35].mxu1 }
 0x160   : > { %v8981_v47 = vpop.f32.mrb[36].mxu1 }
 0x166   : > { %7224 = vmatmul.mubr.bf16.gmra.mrb[28].mxu0 %v7837_v45  ;;  %v7864_v45 = vld [vmem:[%s8469_s29 + $0x158] sm:$0xff]  }
 0x167   : > { %7227 = vmatprep.mubr.bf16.mxu0 %v7839_v46  ;;  %v7866_v46 = vld [vmem:[%s8469_s29 + $0x160] sm:$0xff]  }
 0x16e   : > { %7228 = vmatmul.mubr.bf16.gmra.mrb[32].mxu0 %v7840_v48  ;;  %v8983_v48 = vpop.f32.mrb[37].mxu1 }
 0x16f   : > { %7231 = vmatprep.mubr.bf16.mxu0 %v7841_v49  ;;  %v8985_v49 = vpop.f32.mrb[38].mxu1 }
 0x176   : > { %7232 = vmatmul.mubr.bf16.gmra.mrb[36].mxu0 %v7842_v50  ;;  %v8987_v50 = vpop.f32.mrb[39].mxu1 }
 0x177   : > { %7235 = vmatprep.mubr.bf16.mxu0 %v7843_v51  ;;  %v7867_v51 = vld [vmem:[%s8469_s29 + $0x168] sm:$0xff]  }
 0x17e   : > { %7236 = vmatmul.mubr.bf16.gmra.mrb[40].mxu0 %v7844_v55  ;;  %v7868_v55 = vld [vmem:[%s8469_s29 + $0x170] sm:$0xff]  }
 0x17f   : > { %7239 = vmatprep.mubr.bf16.mxu0 %v7845_v57  ;;  %v8991_v57 = vpop.f32.mrb[40].mxu1 }
 0x186   : > { %7240 = vmatmul.mubr.bf16.gmra.mrb[44].mxu0 %v7846_v60  ;;  %v8993_v60 = vpop.f32.mrb[41].mxu1 }
 0x187   : > { %7243 = vmatprep.mubr.bf16.mxu0 %v7848_v62  ;;  %v8995_v62 = vpop.f32.mrb[42].mxu1 }
 0x18e   : > { %7244 = vmatmul.mubr.bf16.gmra.mrb[48].mxu0 %v7849_v2  ;;  %v8997_v2 = vpop.f32.mrb[43].mxu1 }
 0x18f   : > { %7247 = vmatprep.mubr.bf16.mxu0 %v7850_v4  ;;  %10195 = vst [vmem:[#allocation2_spill] sm:$0xff] %v8997_v2  ;;  %v7869_v4 = vld [vmem:[%s8469_s29 + $0x178] sm:$0xff]  }
 0x196   : > { %7248 = vmatmul.mubr.bf16.gmra.mrb[52].mxu0 %v7851_v7  ;;  %v7870_v7 = vld [vmem:[%s8469_s29 + $0x180] sm:$0xff]  }
 0x197   : > { %7251 = vmatprep.mubr.bf16.mxu0 %v7852_v9  ;;  %v9001_v9 = vpop.f32.mrb[44].mxu1 }
 0x198   : > { %10196 = vst [vmem:[#allocation3_spill] sm:$0xff] %v9001_v9 }
 0x19e   : > { %7252 = vmatmul.mubr.bf16.gmra.mrb[56].mxu0 %v7853_v13  ;;  %v9003_v13 = vpop.f32.mrb[45].mxu1 }
 0x19f   : > { %7255 = vmatprep.mubr.bf16.mxu0 %v7854_v15  ;;  %10197 = vst [vmem:[#allocation4_spill] sm:$0xff] %v9003_v13  ;;  %v9005_v15 = vpop.f32.mrb[46].mxu1 }
 0x1a0   : > { %10198 = vst [vmem:[#allocation5_spill] sm:$0xff] %v9005_v15  ;;  %v9007_v17 = vpop.f32.mrb[47].mxu1 }
 0x1a1   : > { %10199 = vst [vmem:[#allocation6_spill] sm:$0xff] %v9007_v17  ;;  %v9011_v22 = vpop.f32.mrb[48].mxu1 }
 0x1a2   : > { %10200 = vst [vmem:[#allocation7_spill] sm:$0xff] %v9011_v22  ;;  %v7889_v22 = vld [vmem:[%s8469_s29 + $0x200] sm:$0xff]  }
 0x1a6   : > { %7256 = vmatmul.mubr.bf16.gmra.mrb[60].mxu0 %v7855_v21  ;;  %v7872_v21 = vld [vmem:[%s8469_s29 + $0x190] sm:$0xff]  }
 0x1a7   : > { %7259 = vmatprep.mubr.bf16.mxu0 %v7857_v23  ;;  %v9013_v23 = vpop.f32.mrb[49].mxu1 }
 0x1a8   : > { %10201 = vst [vmem:[#allocation8_spill] sm:$0xff] %v9013_v23 }
 0x1ae   : > { %7260 = vmatmul.mubr.bf16.gmra.mrb[64].mxu0 %v7858_v27  ;;  %v9015_v27 = vpop.f32.mrb[50].mxu1 }
 0x1af   : > { %7263 = vmatprep.mubr.bf16.mxu0 %v7859_v29  ;;  %10202 = vst [vmem:[#allocation9_spill] sm:$0xff] %v9015_v27  ;;  %v9017_v29 = vpop.f32.mrb[51].mxu1 }
 0x1b0   : > { %10203 = vst [vmem:[#allocation10_spill] sm:$0xff] %v9017_v29 }
 0x1b6   : > { %7264 = vmatmul.mubr.bf16.gmra.mrb[68].mxu0 %v7860_v33  ;;  %v7873_v33 = vld [vmem:[%s8469_s29 + $0x198] sm:$0xff]  }
 0x1b7   : > { %7267 = vmatprep.mubr.bf16.mxu0 %v7861_v34  ;;  %v7875_v34 = vld [vmem:[%s8469_s29 + $0x1a0] sm:$0xff]  }
 0x1be   : > { %7268 = vmatmul.mubr.bf16.gmra.mrb[72].mxu0 %v7862_v39  ;;  %v9021_v39 = vpop.f32.mrb[52].mxu1 }
 0x1bf   : > { %7271 = vmatprep.mubr.bf16.mxu0 %v7863_v40  ;;  %10204 = vst [vmem:[#allocation11_spill] sm:$0xff] %v9021_v39  ;;  %v9023_v40 = vpop.f32.mrb[53].mxu1 }
 0x1c0   : > { %10205 = vst [vmem:[#allocation12_spill] sm:$0xff] %v9023_v40 }
 0x1c6   : > { %7272 = vmatmul.mubr.bf16.gmra.mrb[76].mxu0 %v7864_v45  ;;  %v9025_v45 = vpop.f32.mrb[54].mxu1 }
 0x1c7   : > { %7275 = vmatprep.mubr.bf16.mxu0 %v7866_v46  ;;  %10206 = vst [vmem:[#allocation13_spill] sm:$0xff] %v9025_v45  ;;  %v9027_v46 = vpop.f32.mrb[55].mxu1 }
 0x1c8   : > { %10207 = vst [vmem:[#allocation14_spill] sm:$0xff] %v9027_v46 }
 0x1ce   : > { %7276 = vmatmul.mubr.bf16.gmra.mrb[80].mxu0 %v7867_v51  ;;  %v7876_v51 = vld [vmem:[%s8469_s29 + $0x1a8] sm:$0xff]  }
 0x1cf   : > { %7279 = vmatprep.mubr.bf16.mxu0 %v7868_v55  ;;  %v7877_v55 = vld [vmem:[%s8469_s29 + $0x1b0] sm:$0xff]  }
 0x1d6   : > { %7280 = vmatmul.mubr.bf16.gmra.mrb[84].mxu0 %v7869_v4  ;;  %v9031_v4 = vpop.f32.mrb[56].mxu1 }
 0x1d7   : > { %7283 = vmatprep.mubr.bf16.mxu0 %v7870_v7  ;;  %10208 = vst [vmem:[#allocation15_spill] sm:$0xff] %v9031_v4  ;;  %v9033_v7 = vpop.f32.mrb[57].mxu1 }
 0x1d8   : > { %10209 = vst [vmem:[#allocation16_spill] sm:$0xff] %v9033_v7 }
 0x1de   : > { %7284 = vmatmul.mubr.bf16.gmra.mrb[88].mxu0 %v7871_v19  ;;  %v9035_v19 = vpop.f32.mrb[58].mxu1 }
 0x1df   : > { %7287 = vmatprep.mubr.bf16.mxu0 %v7872_v21  ;;  %10210 = vst [vmem:[#allocation17_spill] sm:$0xff] %v9035_v19  ;;  %v9037_v21 = vpop.f32.mrb[59].mxu1 }
 0x1e0   : > { %10211 = vst [vmem:[#allocation18_spill] sm:$0xff] %v9037_v21  ;;  %v9041_v40 = vpop.f32.mrb[60].mxu1 }
 0x1e1   : > { %10212 = vst [vmem:[#allocation19_spill] sm:$0xff] %v9041_v40  ;;  %v9043_v46 = vpop.f32.mrb[61].mxu1  ;;  %v7882_v40 = vld [vmem:[%s8469_s29 + $0x1d8] sm:$0xff]  }
 0x1e2   : > { %10213 = vst [vmem:[#allocation20_spill] sm:$0xff] %v9043_v46  ;;  %v9045_v45 = vpop.f32.mrb[62].mxu1 }
 0x1e3   : > { %10214 = vst [vmem:[#allocation21_spill] sm:$0xff] %v9045_v45  ;;  %v9047_v4 = vpop.f32.mrb[63].mxu1 }
 0x1e4   : > { %10215 = vst [vmem:[#allocation22_spill] sm:$0xff] %v9047_v4  ;;  %v9051_v19 = vpop.f32.mrb[64].mxu1 }
 0x1e5   : > { %10216 = vst [vmem:[#allocation23_spill] sm:$0xff] %v9051_v19  ;;  %v9053_v21 = vpop.f32.mrb[65].mxu1 }
 0x1e6   : > { %7288 = vmatmul.mubr.bf16.gmra.mrb[92].mxu0 %v7873_v33  ;;  %v7878_v33 = vld [vmem:[%s8469_s29 + $0x1b8] sm:$0xff]   ;;  %10217 = vst [vmem:[#allocation24_spill] sm:$0xff] %v9053_v21  ;;  %v9055_v7 = vpop.f32.mrb[66].mxu1 }
 0x1e7   : > { %7291 = vmatprep.mubr.bf16.mxu0 %v7875_v34  ;;  %v7879_v34 = vld [vmem:[%s8469_s29 + $0x1c0] sm:$0xff]   ;;  %10218 = vst [vmem:[#allocation25_spill] sm:$0xff] %v9055_v7  ;;  %v9062_v45 = vpop.f32.mrb[67].mxu1 }
 0x1e8   : > { %10219 = vst [vmem:[#allocation26_spill] sm:$0xff] %v9062_v45 }
 0x1ee   : > { %7292 = vmatmul.mubr.bf16.gmra.mrb[96].mxu0 %v7876_v51  ;;  %v7880_v51 = vld [vmem:[%s8469_s29 + $0x1c8] sm:$0xff]  }
 0x1ef   : > { %7295 = vmatprep.mubr.bf16.mxu0 %v7877_v55  ;;  %v7881_v55 = vld [vmem:[%s8469_s29 + $0x1d0] sm:$0xff]  }
 0x1f6   : > { %7296 = vmatmul.mubr.bf16.gmra.mrb[100].mxu0 %v7878_v33 }
 0x1f7   : > { %7299 = vmatprep.mubr.bf16.mxu0 %v7879_v34  ;;  %v9060_v34 = vld [vmem:[%s10191_s2] ss:$0 sm:$0xff] }
 0x1fe   : > { %7300 = vmatmul.mubr.bf16.gmra.mrb[104].mxu0 %v7880_v51 }
 0x1ff   : > { %7303 = vmatprep.mubr.bf16.mxu0 %v7881_v55  ;;  %v7884_v55 = vld [vmem:[%s8469_s29 + $0x1e0] sm:$0xff]  }
 0x201   : > { %v7197_v33 = vpop.f32.mrb[0].mxu0 }
 0x202   : > { %v7467_v4 = vadd.f32 %v7197_v33, %v8877_v52  ;;  %v2584_v46 = vpop.f32.mrb[1].mxu0 }
 0x203   : > { %v7468_v51 = vadd.f32 %v2584_v46, %v8879_v53  ;;  %v7198_v19 = vpop.f32.mrb[2].mxu0  ;;  %v9080_v53 = vpop.f32.mrb[68].mxu1 }
 0x204   : > { %v9069_v21 = vadd.f32 %v7467_v4, %v9060_v34  ;;  %v7469_v7 = vadd.f32 %v7198_v19, %v8881_v54  ;;  %v2587_v39 = vpop.f32.mrb[3].mxu0  ;;  %10220 = vst [vmem:[#allocation27_spill] sm:$0xff] %v9080_v53  ;;  %v9086_v54 = vpop.f32.mrb[69].mxu1 }
 0x205   : > { %v9073_v29 = vadd.f32 %v7468_v51, %v9060_v34  ;;  %v7470_v27 = vadd.f32 %v2587_v39, %v8884_v56  ;;  %10221 = vst [vmem:[#allocation28_spill] sm:$0xff] %v9086_v54  ;;  %v9089_v39 = vpop.f32.mrb[70].mxu1  ;;  %v7885_v51 = vld [vmem:[%s8469_s29 + $0x1e8] sm:$0xff]  }
 0x206   : > { %v5826_v45 = vmul.f32 -1.442695, %v9069_v21  ;;  %v9078_v52 = vadd.f32 %v7469_v7, %v9060_v34  ;;  %7304 = vmatmul.mubr.bf16.gmra.mrb[108].mxu0 %v7882_v40  ;;  %10222 = vst [vmem:[#allocation29_spill] sm:$0xff] %v9089_v39  ;;  %v9092_v19 = vpop.f32.mrb[71].mxu1 }
 0x207   : > { %v5824_v46 = vmul.f32 -1.442695, %v9073_v29  ;;  %v9084_v4 = vadd.f32 %v7470_v27, %v9060_v34  ;;  %7307 = vmatprep.mubr.bf16.mxu0 %v7884_v55  ;;  %10223 = vst [vmem:[#allocation30_spill] sm:$0xff] %v9092_v19 }
 0x208   : > { %7894 = vpow2.f32 %v5826_v45  ;;  %v5827_v56 = vmul.f32 -1.442695, %v9078_v52  ;;  %v7886_v45 = vld [vmem:[%s8469_s29 + $0x1f0] sm:$0xff]  }
 0x209   : > { %7896 = vpow2.f32 %v5824_v46  ;;  %v5825_v40 = vmul.f32 -1.442695, %v9084_v4  ;;  %v7201_v7 = vpop.f32.mrb[4].mxu0 }
 0x20a   : > { %7898 = vpow2.f32 %v5827_v56  ;;  %v7471_v33 = vadd.f32 %v7201_v7, %v8889_v58  ;;  %v2600_v27 = vpop.f32.mrb[5].mxu0 }
 0x20b   : > { %7900 = vpow2.f32 %v5825_v40  ;;  %v7472_v55 = vadd.f32 %v2600_v27, %v8891_v59  ;;  %v7202_v54 = vpop.f32.mrb[6].mxu0  ;;  %v9110_v59 = vpop.f32.mrb[72].mxu1 }
 0x20c   : > { %v9099_v53 = vadd.f32 %v7471_v33, %v9060_v34  ;;  %v7473_v46 = vadd.f32 %v7202_v54, %v8894_v61  ;;  %v2603_v39 = vpop.f32.mrb[7].mxu0  ;;  %10224 = vst [vmem:[#allocation31_spill] sm:$0xff] %v9110_v59  ;;  %v9116_v61 = vpop.f32.mrb[73].mxu1 }
 0x20d   : > { %v9103_v23 = vadd.f32 %v7472_v55, %v9060_v34  ;;  %v7474_v56 = vadd.f32 %v2603_v39, %v8897_v63  ;;  %10225 = vst [vmem:[#allocation32_spill] sm:$0xff] %v9116_v61  ;;  %v9119_v54 = vpop.f32.mrb[74].mxu1 }
 0x20e   : > { %v5830_v58 = vmul.f32 -1.442695, %v9099_v53  ;;  %v9108_v7 = vadd.f32 %v7473_v46, %v9060_v34  ;;  %7308 = vmatmul.mubr.bf16.gmra.mrb[112].mxu0 %v7885_v51  ;;  %10226 = vst [vmem:[#allocation33_spill] sm:$0xff] %v9119_v54  ;;  %v9122_v51 = vpop.f32.mrb[75].mxu1 }
 0x20f   : > { %v5828_v40 = vmul.f32 -1.442695, %v9103_v23  ;;  %v9114_v33 = vadd.f32 %v7474_v56, %v9060_v34  ;;  %7311 = vmatprep.mubr.bf16.mxu0 %v7886_v45  ;;  %10227 = vst [vmem:[#allocation34_spill] sm:$0xff] %v9122_v51  ;;  %v7887_v45 = vld [vmem:[%s8469_s29 + $0x1f8] sm:$0xff]  }
 0x210   : > { %7902 = vpow2.f32 %v5830_v58  ;;  %v5831_v63 = vmul.f32 -1.442695, %v9108_v7 }
 0x211   : > { %7904 = vpow2.f32 %v5828_v40  ;;  %v5829_v39 = vmul.f32 -1.442695, %v9114_v33  ;;  %v7205_v27 = vpop.f32.mrb[8].mxu0 }
 0x212   : > { %v7895_v55 = vpop.eup %7894  ;;  %7906 = vpow2.f32 %v5831_v63  ;;  %v7475_v46 = vadd.f32 %v7205_v27, %v8901_v0  ;;  %v2616_v56 = vpop.f32.mrb[9].mxu0 }
 0x213   : > { %v7897_v59 = vpop.eup %7896  ;;  %v3744_v61 = vadd.f32 1.0, %v7895_v55  ;;  %7908 = vpow2.f32 %v5829_v39  ;;  %v7476_v58 = vadd.f32 %v2616_v56, %v8903_v1  ;;  %v7206_v19 = vpop.f32.mrb[10].mxu0 }
 0x214   : > { %v7899_v54 = vpop.eup %7898  ;;  %v3742_v40 = vadd.f32 1.0, %v7897_v59  ;;  %v9129_v17 = vadd.f32 %v7475_v46, %v9060_v34  ;;  %v7477_v51 = vadd.f32 %v7206_v19, %v8906_v3  ;;  %v2619_v15 = vpop.f32.mrb[11].mxu0 }
 0x215   : > { %v7901_v63 = vpop.eup %7900  ;;  %7910 = vrcp.f32 %v3744_v61  ;;  %v3745_v0 = vadd.f32 1.0, %v7899_v54  ;;  %v9133_v27 = vadd.f32 %v7476_v58, %v9060_v34  ;;  %v7478_v39 = vadd.f32 %v2619_v15, %v8909_v5  ;;  %v9144_v61 = vpop.f32.mrb[76].mxu1 }
 0x216   : > { %7912 = vrcp.f32 %v3742_v40  ;;  %v3743_v1 = vadd.f32 1.0, %v7901_v63  ;;  %v5834_v55 = vmul.f32 -1.442695, %v9129_v17  ;;  %v9138_v59 = vadd.f32 %v7477_v51, %v9060_v34  ;;  %7312 = vmatmul.mubr.bf16.gmra.mrb[116].mxu0 %v7887_v45  ;;  %10228 = vst [vmem:[#allocation35_spill] sm:$0xff] %v9144_v61  ;;  %v9147_v15 = vpop.f32.mrb[77].mxu1 }
 0x217   : > { %7914 = vrcp.f32 %v3745_v0  ;;  %v5832_v3 = vmul.f32 -1.442695, %v9133_v27  ;;  %v9142_v19 = vadd.f32 %v7478_v39, %v9060_v34  ;;  %7315 = vmatprep.mubr.bf16.mxu0 %v7889_v22  ;;  %10229 = vst [vmem:[#allocation36_spill] sm:$0xff] %v9147_v15  ;;  %v9150_v46 = vpop.f32.mrb[78].mxu1  ;;  %v7891_v22 = vld [vmem:[%s8469_s29 + $0x208] sm:$0xff]  }
 0x218   : > { %7916 = vrcp.f32 %v3743_v1  ;;  %v5835_v5 = vmul.f32 -1.442695, %v9138_v59  ;;  %10230 = vst [vmem:[#allocation37_spill] sm:$0xff] %v9150_v46  ;;  %v9154_v40 = vpop.f32.mrb[79].mxu1 }
 0x219   : > { %7918 = vpow2.f32 %v5834_v55  ;;  %v5833_v54 = vmul.f32 -1.442695, %v9142_v19  ;;  %v7209_v51 = vpop.f32.mrb[12].mxu0  ;;  %10231 = vst [vmem:[#allocation38_spill] sm:$0xff] %v9154_v40  ;;  %v7892_v55 = vld [vmem:[%s8469_s29 + $0x210] sm:$0xff]  }
 0x21a   : > { %v7903_v56 = vpop.eup %7902  ;;  %7920 = vpow2.f32 %v5832_v3  ;;  %v7479_v45 = vadd.f32 %v7209_v51, %v8913_v6  ;;  %v2632_v58 = vpop.f32.mrb[13].mxu0 }
 0x21b   : > { %v7905_v63 = vpop.eup %7904  ;;  %v3748_v0 = vadd.f32 1.0, %v7903_v56  ;;  %7922 = vpow2.f32 %v5835_v5  ;;  %v7480_v39 = vadd.f32 %v2632_v58, %v8916_v8  ;;  %v7210_v1 = vpop.f32.mrb[14].mxu0 }
 0x21c   : > { %v7907_v15 = vpop.eup %7906  ;;  %v3746_v61 = vadd.f32 1.0, %v7905_v63  ;;  %7924 = vpow2.f32 %v5833_v54  ;;  %v9159_v46 = vadd.f32 %v7479_v45, %v9060_v34  ;;  %v7481_v3 = vadd.f32 %v7210_v1, %v8919_v10  ;;  %v2635_v6 = vpop.f32.mrb[15].mxu0 }
 0x21d   : > { %v7909_v51 = vpop.eup %7908  ;;  %7926 = vrcp.f32 %v3748_v0  ;;  %v3749_v13 = vadd.f32 1.0, %v7907_v15  ;;  %v9163_v40 = vadd.f32 %v7480_v39, %v9060_v34  ;;  %v7482_v5 = vadd.f32 %v2635_v6, %v8921_v11  ;;  %v9174_v15 = vpop.f32.mrb[80].mxu1 }
 0x21e   : > { %7928 = vrcp.f32 %v3746_v61  ;;  %v3747_v8 = vadd.f32 1.0, %v7909_v51  ;;  %v5838_v56 = vmul.f32 -1.442695, %v9159_v46  ;;  %v9168_v54 = vadd.f32 %v7481_v3, %v9060_v34  ;;  %7316 = vmatmul.mubr.bf16.gmra.mrb[120].mxu0 %v7891_v22  ;;  %10232 = vst [vmem:[#allocation39_spill] sm:$0xff] %v9174_v15  ;;  %v9177_v63 = vpop.f32.mrb[81].mxu1 }
 0x21f   : > { %v7911_v45 = vpop.eup %7910  ;;  %7930 = vrcp.f32 %v3749_v13  ;;  %v5836_v10 = vmul.f32 -1.442695, %v9163_v40  ;;  %v9172_v58 = vadd.f32 %v7482_v5, %v9060_v34  ;;  %7319 = vmatprep.mubr.bf16.mxu0 %v7892_v55  ;;  %10233 = vst [vmem:[#allocation40_spill] sm:$0xff] %v9177_v63  ;;  %v9180_v39 = vpop.f32.mrb[82].mxu1  ;;  %v7893_v5 = vld [vmem:[%s8469_s29 + $0x218] sm:$0xff]  }
 0x220   : > { %v7913_v11 = vpop.eup %7912  ;;  %7932 = vrcp.f32 %v3747_v8  ;;  %v5839_v61 = vmul.f32 -1.442695, %v9168_v54  ;;  %10234 = vst [vmem:[#allocation41_spill] sm:$0xff] %v9180_v39  ;;  %v4128_v3 = vmul.f32 %v7911_v45, %v9069_v21  ;;  %v9186_v8 = vpop.f32.mrb[83].mxu1 }
 0x221   : > { %v7915_v0 = vpop.eup %7914  ;;  %7934 = vpow2.f32 %v5838_v56  ;;  %v5837_v22 = vmul.f32 -1.442695, %v9172_v58  ;;  %v7213_v13 = vpop.f32.mrb[16].mxu0  ;;  %v4126_v56 = vmul.f32 %v7913_v11, %v9073_v29 }
 0x222   : > { %v7917_v1 = vpop.eup %7916  ;;  %v4129_v55 = vmul.f32 %v7915_v0, %v9078_v52  ;;  %7936 = vpow2.f32 %v5836_v10  ;;  %v7483_v6 = vadd.f32 %v7213_v13, %v8924_v12  ;;  %v2648_v51 = vpop.f32.mrb[17].mxu0 }
 0x223   : > { %v7919_v63 = vpop.eup %7918  ;;  %v4127_v15 = vmul.f32 %v7917_v1, %v9084_v4  ;;  %7938 = vpow2.f32 %v5839_v61  ;;  %v7484_v39 = vadd.f32 %v2648_v51, %v8927_v14  ;;  %v7214_v9 = vpop.f32.mrb[18].mxu0 }
 0x224   : > { %v7921_v2 = vpop.eup %7920  ;;  %v4255_v21 = vpack.c.bf16 %v4129_v55, %v4128_v3  ;;  %v3752_v45 = vadd.f32 1.0, %v7919_v63  ;;  %7940 = vpow2.f32 %v5837_v22  ;;  %v9192_v52 = vadd.f32 %v7483_v6, %v9060_v34  ;;  %v2651_v12 = vpop.f32.mrb[19].mxu0 }
 0x225   : > { %v7923_v10 = vpop.eup %7922  ;;  %v3750_v0 = vadd.f32 1.0, %v7921_v2  ;;  %v9195_v13 = vadd.f32 %v7484_v39, %v9060_v34  ;;  %v7485_v29 = vadd.f32 %v7214_v9, %v8930_v16  ;;  %v7486_v4 = vadd.f32 %v2651_v12, %v8933_v18  ;;  %v9204_v39 = vpop.f32.mrb[84].mxu1 }
 0x226   : > { %v7925_v11 = vpop.eup %7924  ;;  %7942 = vrcp.f32 %v3752_v45  ;;  %v3753_v14 = vadd.f32 1.0, %v7923_v10  ;;  %v5842_v61 = vmul.f32 -1.442695, %v9192_v52  ;;  %7320 = vmatmul.mubr.bf16.gmra.mrb[124].mxu0 %v7893_v5  ;;  %v4254_v63 = vpack.c.bf16 %v4127_v15, %v4126_v56  ;;  %v9209_v9 = vpop.f32.mrb[85].mxu1 }
 0x227   : > { %v7927_v22 = vpop.eup %7926  ;;  %7944 = vrcp.f32 %v3750_v0  ;;  %v3751_v1 = vadd.f32 1.0, %v7925_v11  ;;  %v5840_v3 = vmul.f32 -1.442695, %v9195_v13  ;;  %v9202_v2 = vadd.f32 %v7485_v29, %v9060_v34  ;;  %v9213_v5 = vpop.f32.mrb[86].mxu1 }
 0x228   : > { %v7929_v16 = vpop.eup %7928  ;;  %7946 = vrcp.f32 %v3753_v14  ;;  %v9207_v18 = vadd.f32 %v7486_v4, %v9060_v34  ;;  %7339 = vmatprep.mubr.bf16.mxu1 %v4254_v63  ;;  %v4132_v15 = vmul.f32 %v7927_v22, %v9099_v53  ;;  %v9218_v29 = vpop.f32.mrb[87].mxu1 }
 0x229   : > { %v7931_v55 = vpop.eup %7930  ;;  %7948 = vrcp.f32 %v3751_v1  ;;  %v5843_v6 = vmul.f32 -1.442695, %v9202_v2  ;;  %7340 = vmatmul.mubr.bf16.vlgmr.msra.gmra.mrb[128].mxu1 %v4255_v21  ;;  %v7217_v51 = vpop.f32.mrb[20].mxu0  ;;  %v4130_v45 = vmul.f32 %v7929_v16, %v9103_v23 }
 0x22a   : > { %v7933_v56 = vpop.eup %7932  ;;  %7950 = vpow2.f32 %v5842_v61  ;;  %v5841_v12 = vmul.f32 -1.442695, %v9207_v18  ;;  %v7487_v10 = vadd.f32 %v7217_v51, %v8936_v20  ;;  %v2664_v0 = vpop.f32.mrb[21].mxu0  ;;  %v4133_v53 = vmul.f32 %v7931_v55, %v9108_v7 }
 0x22b   : > { %v7935_v4 = vpop.eup %7934  ;;  %v4131_v11 = vmul.f32 %v7933_v56, %v9114_v33  ;;  %7952 = vpow2.f32 %v5840_v3  ;;  %v7488_v21 = vadd.f32 %v2664_v0, %v8943_v24  ;;  %v7218_v14 = vpop.f32.mrb[22].mxu0 }
 0x22c   : > { %v7937_v63 = vpop.eup %7936  ;;  %v3756_v22 = vadd.f32 1.0, %v7935_v4  ;;  %7954 = vpow2.f32 %v5843_v6  ;;  %v9224_v23 = vadd.f32 %v7487_v10, %v9060_v34  ;;  %v7489_v20 = vadd.f32 %v7218_v14, %v8945_v25  ;;  %v2667_v61 = vpop.f32.mrb[23].mxu0 }
 0x22d   : > { %v7939_v1 = vpop.eup %7938  ;;  %v3754_v16 = vadd.f32 1.0, %v7937_v63  ;;  %7956 = vpow2.f32 %v5841_v12  ;;  %v9228_v7 = vadd.f32 %v7488_v21, %v9060_v34  ;;  %v7490_v33 = vadd.f32 %v2667_v61, %v8947_v26  ;;  %v9239_v12 = vpop.f32.mrb[88].mxu1 }
 0x22e   : > { %v7941_v3 = vpop.eup %7940  ;;  %7958 = vrcp.f32 %v3756_v22  ;;  %v3757_v24 = vadd.f32 1.0, %v7939_v1  ;;  %v5846_v55 = vmul.f32 -1.442695, %v9224_v23  ;;  %v9233_v6 = vadd.f32 %v7489_v20, %v9060_v34  ;;  %v9242_v21 = vpop.f32.mrb[89].mxu1 }
 0x22f   : > { %7960 = vrcp.f32 %v3754_v16  ;;  %v3755_v51 = vadd.f32 1.0, %v7941_v3  ;;  %v5844_v25 = vmul.f32 -1.442695, %v9228_v7  ;;  %v9237_v56 = vadd.f32 %v7490_v33, %v9060_v34  ;;  %v9245_v20 = vpop.f32.mrb[90].mxu1 }
 0x230   : > { %v7943_v10 = vpop.eup %7942  ;;  %7962 = vrcp.f32 %v3757_v24  ;;  %v5847_v26 = vmul.f32 -1.442695, %v9233_v6  ;;  %v4256_v0 = vpack.c.bf16 %v4131_v11, %v4130_v45  ;;  %v4257_v4 = vpack.c.bf16 %v4133_v53, %v4132_v15  ;;  %v9248_v33 = vpop.f32.mrb[91].mxu1 }
 0x231   : > { %v7945_v14 = vpop.eup %7944  ;;  %7964 = vrcp.f32 %v3755_v51  ;;  %v5845_v63 = vmul.f32 -1.442695, %v9237_v56  ;;  %v7221_v22 = vpop.f32.mrb[24].mxu0  ;;  %10235 = vst [vmem:[#allocation42_spill] sm:$0xff] %v9248_v33 }
 0x232   : > { %v7947_v61 = vpop.eup %7946  ;;  %7966 = vpow2.f32 %v5846_v55  ;;  %7343 = vmatprep.mubr.bf16.mxu1 %v4256_v0  ;;  %v7491_v1 = vadd.f32 %v7221_v22, %v8950_v28  ;;  %v2680_v16 = vpop.f32.mrb[25].mxu0  ;;  %v4134_v15 = vmul.f32 %v7945_v14, %v9133_v27 }
 0x233   : > { %v7949_v3 = vpop.eup %7948  ;;  %v4137_v45 = vmul.f32 %v7947_v61, %v9138_v59  ;;  %7968 = vpow2.f32 %v5844_v25  ;;  %7344 = vmatmul.mubr.bf16.gmra.mrb[132].mxu1 %v4257_v4  ;;  %v7492_v53 = vadd.f32 %v2680_v16, %v8953_v30  ;;  %v7222_v11 = vpop.f32.mrb[26].mxu0  ;;  %v4136_v25 = vmul.f32 %v7943_v10, %v9129_v17 }
 0x234   : > { %v7951_v24 = vpop.eup %7950  ;;  %v4135_v51 = vmul.f32 %v7949_v3, %v9142_v19  ;;  %7970 = vpow2.f32 %v5847_v26  ;;  %v9255_v55 = vadd.f32 %v7491_v1, %v9060_v34  ;;  %v7493_v28 = vadd.f32 %v7222_v11, %v8955_v31  ;;  %v2683_v0 = vpop.f32.mrb[27].mxu0 }
 0x235   : > { %v7953_v22 = vpop.eup %7952  ;;  %v3760_v33 = vadd.f32 1.0, %v7951_v24  ;;  %7972 = vpow2.f32 %v5845_v63  ;;  %v9259_v27 = vadd.f32 %v7492_v53, %v9060_v34  ;;  %v7494_v59 = vadd.f32 %v2683_v0, %v8957_v32  ;;  %v9270_v1 = vpop.f32.mrb[92].mxu1 }
 0x236   : > { %v7955_v30 = vpop.eup %7954  ;;  %v3758_v4 = vadd.f32 1.0, %v7953_v22  ;;  %v9264_v19 = vadd.f32 %v7493_v28, %v9060_v34  ;;  %v4258_v26 = vpack.c.bf16 %v4135_v51, %v4134_v15  ;;  %v5850_v61 = vmul.f32 -1.442695, %v9255_v55  ;;  %v9273_v3 = vpop.f32.mrb[93].mxu1 }
 0x237   : > { %v7957_v14 = vpop.eup %7956  ;;  %7974 = vrcp.f32 %v3760_v33  ;;  %v3761_v31 = vadd.f32 1.0, %v7955_v30  ;;  %v9268_v63 = vadd.f32 %v7494_v59, %v9060_v34  ;;  %v5848_v17 = vmul.f32 -1.442695, %v9259_v27  ;;  %v9276_v11 = vpop.f32.mrb[94].mxu1 }
 0x238   : > { %v7959_v16 = vpop.eup %7958  ;;  %7976 = vrcp.f32 %v3758_v4  ;;  %v3759_v32 = vadd.f32 1.0, %v7957_v14  ;;  %7347 = vmatprep.mubr.bf16.mxu1 %v4258_v26  ;;  %v4259_v10 = vpack.c.bf16 %v4137_v45, %v4136_v25  ;;  %v5851_v33 = vmul.f32 -1.442695, %v9264_v19  ;;  %v9280_v22 = vpop.f32.mrb[95].mxu1 }
 0x239   : > { %v7961_v15 = vpop.eup %7960  ;;  %7978 = vrcp.f32 %v3761_v31  ;;  %v7225_v53 = vpop.f32.mrb[28].mxu0  ;;  %v5849_v51 = vmul.f32 -1.442695, %v9268_v63  ;;  %10236 = vst [vmem:[#allocation43_spill] sm:$0xff] %v9280_v22  ;;  %v4140_v45 = vmul.f32 %v7959_v16, %v9159_v46 }
 0x23a   : > { %v7963_v24 = vpop.eup %7962  ;;  %7980 = vrcp.f32 %v3759_v32  ;;  %v7495_v28 = vadd.f32 %v7225_v53, %v8961_v35  ;;  %v2696_v0 = vpop.f32.mrb[29].mxu0 }
 0x23b   : > { %v7965_v59 = vpop.eup %7964  ;;  %v4141_v30 = vmul.f32 %v7963_v24, %v9168_v54  ;;  %7982 = vpow2.f32 %v5850_v61  ;;  %7348 = vmatmul.mubr.bf16.gmra.mrb[136].mxu1 %v4259_v10  ;;  %v7496_v25 = vadd.f32 %v2696_v0, %v8963_v36  ;;  %v7226_v4 = vpop.f32.mrb[30].mxu0  ;;  %v4138_v61 = vmul.f32 %v7961_v15, %v9163_v40 }
 0x23c   : > { %v7967_v26 = vpop.eup %7966  ;;  %v4139_v14 = vmul.f32 %v7965_v59, %v9172_v58  ;;  %7984 = vpow2.f32 %v5848_v17  ;;  %v9287_v31 = vadd.f32 %v7495_v28, %v9060_v34  ;;  %v7497_v35 = vadd.f32 %v7226_v4, %v8965_v37  ;;  %v2699_v32 = vpop.f32.mrb[31].mxu0 }
 0x23d   : > { %v7969_v53 = vpop.eup %7968  ;;  %v3764_v22 = vadd.f32 1.0, %v7967_v26  ;;  %7986 = vpow2.f32 %v5851_v33  ;;  %v9291_v46 = vadd.f32 %v7496_v25, %v9060_v34  ;;  %v7498_v54 = vadd.f32 %v2699_v32, %v8967_v38  ;;  %v9302_v24 = vpop.f32.mrb[96].mxu1 }
 0x23e   : > { %v7971_v36 = vpop.eup %7970  ;;  %v3762_v16 = vadd.f32 1.0, %v7969_v53  ;;  %7988 = vpow2.f32 %v5849_v51  ;;  %v9296_v58 = vadd.f32 %v7497_v35, %v9060_v34  ;;  %v5854_v10 = vmul.f32 -1.442695, %v9287_v31  ;;  %v9305_v15 = vpop.f32.mrb[97].mxu1 }
 0x23f   : > { %v7973_v17 = vpop.eup %7972  ;;  %7990 = vrcp.f32 %v3764_v22  ;;  %v3765_v37 = vadd.f32 1.0, %v7971_v36  ;;  %v9300_v33 = vadd.f32 %v7498_v54, %v9060_v34  ;;  %v5852_v28 = vmul.f32 -1.442695, %v9291_v46  ;;  %v9308_v25 = vpop.f32.mrb[98].mxu1 }
 0x240   : > { %7992 = vrcp.f32 %v3762_v16  ;;  %v3763_v38 = vadd.f32 1.0, %v7973_v17  ;;  %v4260_v40 = vpack.c.bf16 %v4139_v14, %v4138_v61  ;;  %v5855_v0 = vmul.f32 -1.442695, %v9296_v58  ;;  %v9312_v53 = vpop.f32.mrb[99].mxu1 }
 0x241   : > { %v7975_v51 = vpop.eup %7974  ;;  %7994 = vrcp.f32 %v3765_v37  ;;  %v4261_v22 = vpack.c.bf16 %v4141_v30, %v4140_v45  ;;  %v7229_v59 = vpop.f32.mrb[32].mxu0  ;;  %v5853_v26 = vmul.f32 -1.442695, %v9300_v33 }
 0x242   : > { %v7977_v4 = vpop.eup %7976  ;;  %7996 = vrcp.f32 %v3763_v38  ;;  %7351 = vmatprep.mubr.bf16.mxu1 %v4260_v40  ;;  %v7499_v35 = vadd.f32 %v7229_v59, %v8971_v41  ;;  %v2712_v32 = vpop.f32.mrb[33].mxu0  ;;  %v4144_v40 = vmul.f32 %v7975_v51, %v9192_v52 }
 0x243   : > { %v7979_v14 = vpop.eup %7978  ;;  %v4142_v54 = vmul.f32 %v7977_v4, %v9195_v13  ;;  %7998 = vpow2.f32 %v5854_v10  ;;  %7352 = vmatmul.mubr.bf16.gmra.mrb[140].mxu1 %v4261_v22  ;;  %v7500_v45 = vadd.f32 %v2712_v32, %v8973_v42  ;;  %v7230_v30 = vpop.f32.mrb[34].mxu0 }
 0x244   : > { %v7981_v36 = vpop.eup %7980  ;;  %v4145_v61 = vmul.f32 %v7979_v14, %v9202_v2  ;;  %8000 = vpow2.f32 %v5852_v28  ;;  %v9318_v16 = vadd.f32 %v7499_v35, %v9060_v34  ;;  %v7501_v41 = vadd.f32 %v7230_v30, %v8975_v43  ;;  %v2715_v17 = vpop.f32.mrb[35].mxu0 }
 0x245   : > { %v7983_v37 = vpop.eup %7982  ;;  %v4143_v38 = vmul.f32 %v7981_v36, %v9207_v18  ;;  %8002 = vpow2.f32 %v5855_v0  ;;  %v9323_v13 = vadd.f32 %v7500_v45, %v9060_v34  ;;  %v7502_v42 = vadd.f32 %v2715_v17, %v8977_v44  ;;  %v9333_v0 = vpop.f32.mrb[100].mxu1 }
 0x246   : > { %v7985_v10 = vpop.eup %7984  ;;  %v3768_v2 = vadd.f32 1.0, %v7983_v37  ;;  %8004 = vpow2.f32 %v5853_v26  ;;  %v9328_v28 = vadd.f32 %v7501_v41, %v9060_v34  ;;  %v5858_v44 = vmul.f32 -1.442695, %v9318_v16  ;;  %v9336_v52 = vpop.f32.mrb[101].mxu1 }
 0x247   : > { %v7987_v22 = vpop.eup %7986  ;;  %v3766_v43 = vadd.f32 1.0, %v7985_v10  ;;  %v9331_v59 = vadd.f32 %v7502_v42, %v9060_v34  ;;  %v4262_v18 = vpack.c.bf16 %v4143_v38, %v4142_v54  ;;  %v4263_v32 = vpack.c.bf16 %v4145_v61, %v4144_v40  ;;  %v9339_v30 = vpop.f32.mrb[102].mxu1 }
 0x248   : > { %v7989_v4 = vpop.eup %7988  ;;  %8006 = vrcp.f32 %v3768_v2  ;;  %v3769_v35 = vadd.f32 1.0, %v7987_v22  ;;  %v5856_v14 = vmul.f32 -1.442695, %v9323_v13  ;;  %v5859_v36 = vmul.f32 -1.442695, %v9328_v28  ;;  %v9343_v37 = vpop.f32.mrb[103].mxu1 }
 0x249   : > { %v7991_v51 = vpop.eup %7990  ;;  %8008 = vrcp.f32 %v3766_v43  ;;  %v3767_v26 = vadd.f32 1.0, %v7989_v4  ;;  %7355 = vmatprep.mubr.bf16.mxu1 %v4262_v18  ;;  %v7233_v45 = vpop.f32.mrb[36].mxu0  ;;  %v5857_v38 = vmul.f32 -1.442695, %v9331_v59 }
 0x24a   : > { %v7993_v54 = vpop.eup %7992  ;;  %8010 = vrcp.f32 %v3769_v35  ;;  %v7503_v41 = vadd.f32 %v7233_v45, %v8981_v47  ;;  %v2728_v17 = vpop.f32.mrb[37].mxu0 }
 0x24b   : > { %v7995_v61 = vpop.eup %7994  ;;  %8012 = vrcp.f32 %v3767_v26  ;;  %7356 = vmatmul.mubr.bf16.gmra.mrb[144].mxu1 %v4263_v32  ;;  %v7504_v42 = vadd.f32 %v2728_v17, %v8983_v48  ;;  %v7234_v10 = vpop.f32.mrb[38].mxu0  ;;  %v4146_v26 = vmul.f32 %v7993_v54, %v9228_v7 }
 0x24c   : > { %v7997_v40 = vpop.eup %7996  ;;  %v4149_v2 = vmul.f32 %v7995_v61, %v9233_v6  ;;  %8014 = vpow2.f32 %v5858_v44  ;;  %v9349_v22 = vadd.f32 %v7503_v41, %v9060_v34  ;;  %v7505_v47 = vadd.f32 %v7234_v10, %v8985_v49  ;;  %v2731_v43 = vpop.f32.mrb[39].mxu0 }
 0x24d   : > { %v7999_v18 = vpop.eup %7998  ;;  %v4147_v4 = vmul.f32 %v7997_v40, %v9237_v56  ;;  %8016 = vpow2.f32 %v5856_v14  ;;  %v9354_v35 = vadd.f32 %v7504_v42, %v9060_v34  ;;  %v7506_v48 = vadd.f32 %v2731_v43, %v8987_v50  ;;  %v9365_v14 = vpop.f32.mrb[104].mxu1 }
 0x24e   : > { %v8001_v32 = vpop.eup %8000  ;;  %v3772_v6 = vadd.f32 1.0, %v7999_v18  ;;  %8018 = vpow2.f32 %v5859_v36  ;;  %v9359_v44 = vadd.f32 %v7505_v47, %v9060_v34  ;;  %v4148_v49 = vmul.f32 %v7991_v51, %v9224_v23  ;;  %v9368_v36 = vpop.f32.mrb[105].mxu1 }
 0x24f   : > { %v8003_v45 = vpop.eup %8002  ;;  %v3770_v41 = vadd.f32 1.0, %v8001_v32  ;;  %8020 = vpow2.f32 %v5857_v38  ;;  %v9363_v56 = vadd.f32 %v7506_v48, %v9060_v34  ;;  %v5862_v7 = vmul.f32 -1.442695, %v9349_v22  ;;  %v9371_v38 = vpop.f32.mrb[106].mxu1 }
 0x250   : > { %v8005_v17 = vpop.eup %8004  ;;  %8022 = vrcp.f32 %v3772_v6  ;;  %v3773_v50 = vadd.f32 1.0, %v8003_v45  ;;  %v4264_v54 = vpack.c.bf16 %v4147_v4, %v4146_v26  ;;  %v5860_v42 = vmul.f32 -1.442695, %v9354_v35  ;;  %10237 = vst [vmem:[#allocation44_spill] sm:$0xff] %v9371_v38  ;;  %v9375_v18 = vpop.f32.mrb[107].mxu1 }
 0x251   : > { %8024 = vrcp.f32 %v3770_v41  ;;  %v3771_v61 = vadd.f32 1.0, %v8005_v17  ;;  %v4265_v23 = vpack.c.bf16 %v4149_v2, %v4148_v49  ;;  %v7237_v51 = vpop.f32.mrb[40].mxu0  ;;  %v5863_v40 = vmul.f32 -1.442695, %v9359_v44  ;;  %10238 = vst [vmem:[#allocation45_spill] sm:$0xff] %v9375_v18 }
 0x252   : > { %v8007_v10 = vpop.eup %8006  ;;  %8026 = vrcp.f32 %v3773_v50  ;;  %7359 = vmatprep.mubr.bf16.mxu1 %v4264_v54  ;;  %v7507_v47 = vadd.f32 %v7237_v51, %v8991_v57  ;;  %v2744_v43 = vpop.f32.mrb[41].mxu0  ;;  %v5861_v48 = vmul.f32 -1.442695, %v9363_v56  ;;  %v10239_v54 = vld [vmem:[#allocation2_spill] sm:$0xff] }
 0x253   : > { %v8009_v4 = vpop.eup %8008  ;;  %8028 = vrcp.f32 %v3771_v61  ;;  %7360 = vmatmul.mubr.bf16.gmra.mrb[148].mxu1 %v4265_v23  ;;  %v7508_v2 = vadd.f32 %v2744_v43, %v8993_v60  ;;  %v7238_v32 = vpop.f32.mrb[42].mxu0  ;;  %v4152_v51 = vmul.f32 %v8007_v10, %v9255_v55 }
 0x254   : > { %v8011_v26 = vpop.eup %8010  ;;  %v4150_v6 = vmul.f32 %v8009_v4, %v9259_v27  ;;  %8030 = vpow2.f32 %v5862_v7  ;;  %v9381_v45 = vadd.f32 %v7507_v47, %v9060_v34  ;;  %v7509_v57 = vadd.f32 %v7238_v32, %v8995_v62  ;;  %v2747_v49 = vpop.f32.mrb[43].mxu0 }
 0x255   : > { %v8013_v41 = vpop.eup %8012  ;;  %v4153_v17 = vmul.f32 %v8011_v26, %v9264_v19  ;;  %8032 = vpow2.f32 %v5860_v42  ;;  %v9386_v50 = vadd.f32 %v7508_v2, %v9060_v34  ;;  %v7510_v60 = vadd.f32 %v2747_v49, %v10239_v54  ;;  %v9398_v42 = vpop.f32.mrb[108].mxu1  ;;  %v10243_v54 = vld [vmem:[#allocation3_spill] sm:$0xff] }
 0x256   : > { %v8015_v61 = vpop.eup %8014  ;;  %v4151_v23 = vmul.f32 %v8013_v41, %v9268_v63  ;;  %8034 = vpow2.f32 %v5863_v40  ;;  %v5866_v27 = vmul.f32 -1.442695, %v9381_v45  ;;  %v9392_v7 = vadd.f32 %v7509_v57, %v9060_v34  ;;  %10240 = vst [vmem:[#allocation2_spill] sm:$0xff] %v9398_v42  ;;  %v9400_v40 = vpop.f32.mrb[109].mxu1 }
 0x257   : > { %v8017_v62 = vpop.eup %8016  ;;  %v3776_v47 = vadd.f32 1.0, %v8015_v61  ;;  %8036 = vpow2.f32 %v5861_v48  ;;  %v9396_v19 = vadd.f32 %v7510_v60, %v9060_v34  ;;  %10241 = vst [vmem:[#allocation46_spill] sm:$0xff] %v9400_v40  ;;  %v5864_v26 = vmul.f32 -1.442695, %v9386_v50  ;;  %v9403_v10 = vpop.f32.mrb[110].mxu1 }
 0x258   : > { %v8019_v43 = vpop.eup %8018  ;;  %v3774_v4 = vadd.f32 1.0, %v8017_v62  ;;  %8038 = vpow2.f32 %v5866_v27  ;;  %v4266_v63 = vpack.c.bf16 %v4151_v23, %v4150_v6  ;;  %v4267_v57 = vpack.c.bf16 %v4153_v17, %v4152_v51  ;;  %10242 = vst [vmem:[#allocation47_spill] sm:$0xff] %v9403_v10  ;;  %v9407_v61 = vpop.f32.mrb[111].mxu1  ;;  %v10245_v17 = vld [vmem:[#allocation4_spill] sm:$0xff] }
 0x259   : > { %v8021_v2 = vpop.eup %8020  ;;  %8040 = vrcp.f32 %v3776_v47  ;;  %v3777_v32 = vadd.f32 1.0, %v8019_v43  ;;  %v7241_v55 = vpop.f32.mrb[44].mxu0  ;;  %v5867_v41 = vmul.f32 -1.442695, %v9392_v7  ;;  %10244 = vst [vmem:[#allocation3_spill] sm:$0xff] %v9407_v61 }
 0x25a   : > { %v8023_v48 = vpop.eup %8022  ;;  %8042 = vrcp.f32 %v3774_v4  ;;  %v3775_v49 = vadd.f32 1.0, %v8021_v2  ;;  %7363 = vmatprep.mubr.bf16.mxu1 %v4266_v63  ;;  %v7511_v60 = vadd.f32 %v7241_v55, %v10243_v54  ;;  %v2760_v6 = vpop.f32.mrb[45].mxu0  ;;  %v5865_v27 = vmul.f32 -1.442695, %v9396_v19  ;;  %v10246_v4 = vld [vmem:[#allocation5_spill] sm:$0xff] }
 0x25b   : > { %v8025_v23 = vpop.eup %8024  ;;  %8044 = vrcp.f32 %v3777_v32  ;;  %7364 = vmatmul.mubr.bf16.gmra.mrb[152].mxu1 %v4267_v57  ;;  %v7512_v62 = vadd.f32 %v2760_v6, %v10245_v17  ;;  %v7242_v51 = vpop.f32.mrb[46].mxu0  ;;  %v10247_v32 = vld [vmem:[#allocation6_spill] sm:$0xff] }
 0x25c   : > { %v8027_v47 = vpop.eup %8026  ;;  %8046 = vrcp.f32 %v3775_v49  ;;  %v9412_v43 = vadd.f32 %v7511_v60, %v9060_v34  ;;  %v7513_v63 = vadd.f32 %v7242_v51, %v10246_v4  ;;  %v2763_v2 = vpop.f32.mrb[47].mxu0  ;;  %v4154_v54 = vmul.f32 %v8025_v23, %v9291_v46 }
 0x25d   : > { %v8029_v55 = vpop.eup %8028  ;;  %v4157_v61 = vmul.f32 %v8027_v47, %v9296_v58  ;;  %8048 = vpow2.f32 %v5864_v26  ;;  %v7514_v10 = vadd.f32 %v2763_v2, %v10247_v32  ;;  %v9421_v60 = vadd.f32 %v7512_v62, %v9060_v34  ;;  %v9427_v58 = vpop.f32.mrb[112].mxu1 }
 0x25e   : > { %v8031_v57 = vpop.eup %8030  ;;  %v4155_v6 = vmul.f32 %v8029_v55, %v9300_v33  ;;  %8050 = vpow2.f32 %v5867_v41  ;;  %v5870_v49 = vmul.f32 -1.442695, %v9412_v43  ;;  %v4156_v51 = vmul.f32 %v8023_v48, %v9287_v31  ;;  %10248 = vst [vmem:[#allocation4_spill] sm:$0xff] %v9427_v58  ;;  %v9432_v47 = vpop.f32.mrb[113].mxu1 }
 0x25f   : > { %v8033_v17 = vpop.eup %8032  ;;  %v3780_v4 = vadd.f32 1.0, %v8031_v57  ;;  %8052 = vpow2.f32 %v5865_v27  ;;  %v9425_v46 = vadd.f32 %v7513_v63, %v9060_v34  ;;  %v9430_v33 = vadd.f32 %v7514_v10, %v9060_v34  ;;  %10249 = vst [vmem:[#allocation5_spill] sm:$0xff] %v9432_v47  ;;  %v9434_v27 = vpop.f32.mrb[114].mxu1  ;;  %v10251_v57 = vld [vmem:[#allocation7_spill] sm:$0xff] }
 0x260   : > { %v8035_v26 = vpop.eup %8034  ;;  %v3778_v23 = vadd.f32 1.0, %v8033_v17  ;;  %8054 = vpow2.f32 %v5870_v49  ;;  %v4268_v41 = vpack.c.bf16 %v4155_v6, %v4154_v54  ;;  %v4269_v31 = vpack.c.bf16 %v4157_v61, %v4156_v51  ;;  %10250 = vst [vmem:[#allocation6_spill] sm:$0xff] %v9434_v27  ;;  %v9438_v10 = vpop.f32.mrb[115].mxu1  ;;  %v10253_v61 = vld [vmem:[#allocation8_spill] sm:$0xff] }
 0x261   : > { %v8037_v62 = vpop.eup %8036  ;;  %8056 = vrcp.f32 %v3780_v4  ;;  %v3781_v2 = vadd.f32 1.0, %v8035_v26  ;;  %v7245_v48 = vpop.f32.mrb[48].mxu0  ;;  %v5868_v32 = vmul.f32 -1.442695, %v9421_v60  ;;  %10252 = vst [vmem:[#allocation7_spill] sm:$0xff] %v9438_v10 }
 0x262   : > { %v8039_v63 = vpop.eup %8038  ;;  %8058 = vrcp.f32 %v3778_v23  ;;  %v3779_v55 = vadd.f32 1.0, %v8037_v62  ;;  %7367 = vmatprep.mubr.bf16.mxu1 %v4268_v41  ;;  %v7515_v49 = vadd.f32 %v7245_v48, %v10251_v57  ;;  %v2776_v34 = vpop.f32.mrb[49].mxu0  ;;  %v5871_v17 = vmul.f32 -1.442695, %v9425_v46  ;;  %v9446_v41 = vld [vmem:[%s10191_s2] ss:$0 sm:$0xff] }
 0x263   : > { %v8041_v54 = vpop.eup %8040  ;;  %8060 = vrcp.f32 %v3781_v2  ;;  %v3784_v6 = vadd.f32 1.0, %v8039_v63  ;;  %7368 = vmatmul.mubr.bf16.gmra.mrb[156].mxu1 %v4269_v31  ;;  %v7516_v51 = vadd.f32 %v2776_v34, %v10253_v61  ;;  %v7246_v4 = vpop.f32.mrb[50].mxu0  ;;  %v5869_v23 = vmul.f32 -1.442695, %v9430_v33  ;;  %v10254_v2 = vld [vmem:[#allocation9_spill] sm:$0xff] }
 0x264   : > { %v8043_v26 = vpop.eup %8042  ;;  %8062 = vrcp.f32 %v3779_v55  ;;  %v9449_v62 = vadd.f32 %v9446_v41, %v7515_v49  ;;  %v7517_v48 = vadd.f32 %v7246_v4, %v10254_v2  ;;  %v2779_v63 = vpop.f32.mrb[51].mxu0  ;;  %v4160_v31 = vmul.f32 %v8041_v54, %v9318_v16  ;;  %v10255_v55 = vld [vmem:[#allocation10_spill] sm:$0xff] }
 0x265   : > { %v8045_v57 = vpop.eup %8044  ;;  %8064 = vrcp.f32 %v3784_v6  ;;  %v9454_v34 = vadd.f32 %v9446_v41, %v7516_v51  ;;  %v7518_v61 = vadd.f32 %v2779_v63, %v10255_v55  ;;  %v4158_v2 = vmul.f32 %v8043_v26, %v9323_v13  ;;  %v9467_v6 = vpop.f32.mrb[116].mxu1 }
 0x266   : > { %v8047_v10 = vpop.eup %8046  ;;  %v4161_v27 = vmul.f32 %v8045_v57, %v9328_v28  ;;  %8066 = vpow2.f32 %v5868_v32  ;;  %v5874_v47 = vmul.f32 -1.442695, %v9449_v62  ;;  %v9460_v49 = vadd.f32 %v9446_v41, %v7517_v48  ;;  %10256 = vst [vmem:[#allocation8_spill] sm:$0xff] %v9467_v6  ;;  %v9469_v32 = vpop.f32.mrb[117].mxu1  ;;  %v10259_v6 = vld [vmem:[#allocation11_spill] sm:$0xff] }
 0x267   : > { %v8049_v4 = vpop.eup %8048  ;;  %v4159_v16 = vmul.f32 %v8047_v10, %v9331_v59  ;;  %8068 = vpow2.f32 %v5871_v17  ;;  %v9465_v54 = vadd.f32 %v9446_v41, %v7518_v61  ;;  %10257 = vst [vmem:[#allocation9_spill] sm:$0xff] %v9469_v32  ;;  %v5872_v55 = vmul.f32 -1.442695, %v9454_v34  ;;  %v9472_v59 = vpop.f32.mrb[118].mxu1 }
 0x268   : > { %v8051_v51 = vpop.eup %8050  ;;  %v3782_v63 = vadd.f32 1.0, %v8049_v4  ;;  %8070 = vpow2.f32 %v5869_v23  ;;  %v4271_v28 = vpack.c.bf16 %v4161_v27, %v4160_v31  ;;  %10258 = vst [vmem:[#allocation10_spill] sm:$0xff] %v9472_v59  ;;  %v5875_v61 = vmul.f32 -1.442695, %v9460_v49  ;;  %v9476_v27 = vpop.f32.mrb[119].mxu1 }
 0x269   : > { %v8053_v57 = vpop.eup %8052  ;;  %v3785_v48 = vadd.f32 1.0, %v8051_v51  ;;  %8072 = vpow2.f32 %v5874_v47  ;;  %v4270_v13 = vpack.c.bf16 %v4159_v16, %v4158_v2  ;;  %v7249_v26 = vpop.f32.mrb[52].mxu0  ;;  %10260 = vst [vmem:[#allocation11_spill] sm:$0xff] %v9476_v27  ;;  %v5873_v47 = vmul.f32 -1.442695, %v9465_v54  ;;  %v10261_v2 = vld [vmem:[#allocation12_spill] sm:$0xff] }
 0x26a   : > { %v8055_v10 = vpop.eup %8054  ;;  %8074 = vrcp.f32 %v3782_v63  ;;  %v3783_v17 = vadd.f32 1.0, %v8053_v57  ;;  %v7519_v4 = vadd.f32 %v7249_v26, %v10259_v6  ;;  %v2792_v23 = vpop.f32.mrb[53].mxu0  ;;  %v10262_v6 = vld [vmem:[#allocation13_spill] sm:$0xff] }
 0x26b   : > { %v8057_v31 = vpop.eup %8056  ;;  %8076 = vrcp.f32 %v3785_v48  ;;  %v3788_v51 = vadd.f32 1.0, %v8055_v10  ;;  %7371 = vmatprep.mubr.bf16.mxu1 %v4270_v13  ;;  %v7520_v16 = vadd.f32 %v2792_v23, %v10261_v2  ;;  %v7250_v32 = vpop.f32.mrb[54].mxu0  ;;  %v10263_v10 = vld [vmem:[#allocation14_spill] sm:$0xff] }
 0x26c   : > { %v8059_v59 = vpop.eup %8058  ;;  %v4164_v63 = vmul.f32 %v8057_v31, %v9349_v22  ;;  %8078 = vrcp.f32 %v3783_v17  ;;  %7372 = vmatmul.mubr.bf16.gmra.mrb[160].mxu1 %v4271_v28  ;;  %v9482_v57 = vadd.f32 %v9446_v41, %v7519_v4  ;;  %v7521_v26 = vadd.f32 %v7250_v32, %v10262_v6  ;;  %v2795_v27 = vpop.f32.mrb[55].mxu0 }
 0x26d   : > { %v8061_v58 = vpop.eup %8060  ;;  %v4162_v48 = vmul.f32 %v8059_v59, %v9354_v35  ;;  %8080 = vrcp.f32 %v3788_v51  ;;  %v9487_v13 = vadd.f32 %v9446_v41, %v7520_v16  ;;  %v7522_v23 = vadd.f32 %v2795_v27, %v10263_v10  ;;  %v9500_v31 = vpop.f32.mrb[120].mxu1 }
 0x26e   : > { %v8063_v2 = vpop.eup %8062  ;;  %v4165_v22 = vmul.f32 %v8061_v58, %v9359_v44  ;;  %8082 = vpow2.f32 %v5872_v55  ;;  %v5878_v28 = vmul.f32 -1.442695, %v9482_v57  ;;  %v9493_v17 = vadd.f32 %v9446_v41, %v7521_v26  ;;  %10264 = vst [vmem:[#allocation12_spill] sm:$0xff] %v9500_v31  ;;  %v9502_v58 = vpop.f32.mrb[121].mxu1 }
 0x26f   : > { %v8065_v32 = vpop.eup %8064  ;;  %v4163_v4 = vmul.f32 %v8063_v2, %v9363_v56  ;;  %8084 = vpow2.f32 %v5875_v61  ;;  %v5876_v35 = vmul.f32 -1.442695, %v9487_v13  ;;  %v9498_v59 = vadd.f32 %v9446_v41, %v7522_v23  ;;  %10265 = vst [vmem:[#allocation13_spill] sm:$0xff] %v9502_v58  ;;  %v9507_v6 = vpop.f32.mrb[122].mxu1  ;;  %v10267_v2 = vld [vmem:[#allocation15_spill] sm:$0xff] }
 0x270   : > { %v8067_v27 = vpop.eup %8066  ;;  %8086 = vpow2.f32 %v5873_v47  ;;  %v4273_v44 = vpack.c.bf16 %v4165_v22, %v4164_v63  ;;  %v9505_v51 = vmul.f32 %v8065_v32, %v9381_v45  ;;  %10266 = vst [vmem:[#allocation14_spill] sm:$0xff] %v9507_v6  ;;  %v5879_v23 = vmul.f32 -1.442695, %v9493_v17  ;;  %v9511_v22 = vpop.f32.mrb[123].mxu1 }
 0x271   : > { %v8069_v55 = vpop.eup %8068  ;;  %v3786_v16 = vadd.f32 1.0, %v8067_v27  ;;  %8088 = vpow2.f32 %v5878_v28  ;;  %v4272_v56 = vpack.c.bf16 %v4163_v4, %v4162_v48  ;;  %v7253_v61 = vpop.f32.mrb[56].mxu0  ;;  %10268 = vst [vmem:[#allocation15_spill] sm:$0xff] %v9511_v22  ;;  %v5877_v32 = vmul.f32 -1.442695, %v9498_v59  ;;  %v10269_v48 = vld [vmem:[#allocation16_spill] sm:$0xff] }
 0x272   : > { %v8071_v26 = vpop.eup %8070  ;;  %v3789_v10 = vadd.f32 1.0, %v8069_v55  ;;  %8090 = vpow2.f32 %v5876_v35  ;;  %v7523_v47 = vadd.f32 %v7253_v61, %v10267_v2  ;;  %v2808_v63 = vpop.f32.mrb[57].mxu0  ;;  %v10270_v61 = vld [vmem:[#allocation17_spill] sm:$0xff] }
 0x273   : > { %v8073_v58 = vpop.eup %8072  ;;  %8092 = vrcp.f32 %v3786_v16  ;;  %v3787_v45 = vadd.f32 1.0, %v8071_v26  ;;  %7375 = vmatprep.mubr.bf16.mxu1 %v4272_v56  ;;  %v7524_v28 = vadd.f32 %v2808_v63, %v10269_v48  ;;  %v7254_v4 = vpop.f32.mrb[58].mxu0  ;;  %v10271_v56 = vld [vmem:[#allocation18_spill] sm:$0xff] }
 0x274   : > { %v8075_v27 = vpop.eup %8074  ;;  %8094 = vrcp.f32 %v3789_v10  ;;  %v3792_v55 = vadd.f32 1.0, %v8073_v58  ;;  %7376 = vmatmul.mubr.bf16.gmra.mrb[164].mxu1 %v4273_v44  ;;  %v9516_v35 = vadd.f32 %v9446_v41, %v7523_v47  ;;  %v7525_v2 = vadd.f32 %v7254_v4, %v10270_v61  ;;  %v2811_v6 = vpop.f32.mrb[59].mxu0 }
 0x275   : > { %v8077_v22 = vpop.eup %8076  ;;  %v4166_v16 = vmul.f32 %v8075_v27, %v9386_v50  ;;  %8096 = vrcp.f32 %v3787_v45  ;;  %v9521_v26 = vadd.f32 %v9446_v41, %v7524_v28  ;;  %v7526_v63 = vadd.f32 %v2811_v6, %v10271_v56  ;;  %v9534_v28 = vpop.f32.mrb[124].mxu1 }
 0x276   : > { %v8079_v48 = vpop.eup %8078  ;;  %v4169_v10 = vmul.f32 %v8077_v22, %v9392_v7  ;;  %8098 = vrcp.f32 %v3792_v55  ;;  %v5882_v44 = vmul.f32 -1.442695, %v9516_v35  ;;  %v9527_v58 = vadd.f32 %v9446_v41, %v7525_v2  ;;  %10272 = vst [vmem:[#allocation16_spill] sm:$0xff] %v9534_v28  ;;  %v9537_v22 = vpop.f32.mrb[125].mxu1 }
 0x277   : > { %v8081_v47 = vpop.eup %8080  ;;  %v4167_v4 = vmul.f32 %v8079_v48, %v9396_v19  ;;  %8100 = vpow2.f32 %v5879_v23  ;;  %v5880_v50 = vmul.f32 -1.442695, %v9521_v26  ;;  %v9532_v45 = vadd.f32 %v9446_v41, %v7526_v63  ;;  %10273 = vst [vmem:[#allocation17_spill] sm:$0xff] %v9537_v22  ;;  %v9539_v19 = vpop.f32.mrb[126].mxu1  ;;  %v10275_v48 = vld [vmem:[#allocation19_spill] sm:$0xff] }
 0x278   : > { %v8083_v6 = vpop.eup %8082  ;;  %8102 = vpow2.f32 %v5877_v32  ;;  %v4275_v7 = vpack.c.bf16 %v4169_v10, %v9505_v51  ;;  %10274 = vst [vmem:[#allocation18_spill] sm:$0xff] %v9539_v19  ;;  %v5883_v63 = vmul.f32 -1.442695, %v9527_v58  ;;  %v9543_v32 = vpop.f32.mrb[127].mxu1 }
 0x279   : > { %v8085_v27 = vpop.eup %8084  ;;  %v3790_v55 = vadd.f32 1.0, %v8083_v6  ;;  %8104 = vpow2.f32 %v5882_v44  ;;  %v4274_v61 = vpack.c.bf16 %v4167_v4, %v4166_v16  ;;  %v7257_v2 = vpop.f32.mrb[60].mxu0  ;;  %10276 = vst [vmem:[#allocation19_spill] sm:$0xff] %v9543_v32  ;;  %v5881_v6 = vmul.f32 -1.442695, %v9532_v45  ;;  %v10277_v16 = vld [vmem:[#allocation20_spill] sm:$0xff] }
 0x27a   : > { %v8087_v23 = vpop.eup %8086  ;;  %v3793_v56 = vadd.f32 1.0, %v8085_v27  ;;  %8106 = vpow2.f32 %v5880_v50  ;;  %v7527_v28 = vadd.f32 %v7257_v2, %v10275_v48  ;;  %v2824_v31 = vpop.f32.mrb[61].mxu0  ;;  %v10278_v2 = vld [vmem:[#allocation21_spill] sm:$0xff] }
 0x27b   : > { %v8089_v51 = vpop.eup %8088  ;;  %8108 = vrcp.f32 %v3790_v55  ;;  %v3791_v10 = vadd.f32 1.0, %v8087_v23  ;;  %7379 = vmatprep.mubr.bf16.mxu1 %v4274_v61  ;;  %v7528_v44 = vadd.f32 %v2824_v31, %v10277_v16  ;;  %v7258_v4 = vpop.f32.mrb[62].mxu0  ;;  %v10279_v61 = vld [vmem:[#allocation22_spill] sm:$0xff]  ;;  %v4172_v16 = vmul.f32 %v8081_v47, %v9412_v43 }
 0x27c   : > { %v8091_v19 = vpop.eup %8090  ;;  %8110 = vrcp.f32 %v3793_v56  ;;  %v3796_v27 = vadd.f32 1.0, %v8089_v51  ;;  %7380 = vmatmul.mubr.bf16.gmra.mrb[168].mxu1 %v4275_v7  ;;  %v9548_v50 = vadd.f32 %v9446_v41, %v7527_v28  ;;  %v7529_v48 = vadd.f32 %v7258_v4, %v10278_v2  ;;  %v2827_v22 = vpop.f32.mrb[63].mxu0 }
 0x27d   : > { %v8093_v32 = vpop.eup %8092  ;;  %8112 = vrcp.f32 %v3791_v10  ;;  %v3794_v55 = vadd.f32 1.0, %v8091_v19  ;;  %v9552_v23 = vadd.f32 %v9446_v41, %v7528_v44  ;;  %v7530_v40 = vadd.f32 %v2827_v22, %v10279_v61  ;;  %v10280_v61 = vld [vmem:[#allocation23_spill] sm:$0xff] }
 0x27e   : > { %v8095_v31 = vpop.eup %8094  ;;  %8114 = vrcp.f32 %v3796_v27  ;;  %v5886_v7 = vmul.f32 -1.442695, %v9548_v50  ;;  %v9558_v28 = vadd.f32 %v9446_v41, %v7529_v48  ;;  %v4170_v22 = vmul.f32 %v8093_v32, %v9421_v60 }
 0x27f   : > { %v8097_v56 = vpop.eup %8096  ;;  %v4173_v51 = vmul.f32 %v8095_v31, %v9425_v46  ;;  %8116 = vrcp.f32 %v3794_v55  ;;  %v5884_v19 = vmul.f32 -1.442695, %v9552_v23  ;;  %v9563_v10 = vadd.f32 %v9446_v41, %v7530_v40 }
 0x280   : > { %v8099_v44 = vpop.eup %8098  ;;  %v4171_v43 = vmul.f32 %v8097_v56, %v9430_v33  ;;  %8118 = vpow2.f32 %v5883_v63  ;;  %v5887_v4 = vmul.f32 -1.442695, %v9558_v28  ;;  %v10281_v33 = vld [vmem:[#allocation24_spill] sm:$0xff] }
 0x281   : > { %v8101_v47 = vpop.eup %8100  ;;  %8120 = vpow2.f32 %v5881_v6  ;;  %v4277_v27 = vpack.c.bf16 %v4173_v51, %v4172_v16  ;;  %v7261_v2 = vpop.f32.mrb[64].mxu0  ;;  %v5885_v60 = vmul.f32 -1.442695, %v9563_v10 }
 0x282   : > { %v8103_v48 = vpop.eup %8102  ;;  %v3797_v46 = vadd.f32 1.0, %v8101_v47  ;;  %8122 = vpow2.f32 %v5886_v7  ;;  %v4276_v55 = vpack.c.bf16 %v4171_v43, %v4170_v22  ;;  %v7531_v31 = vadd.f32 %v7261_v2, %v10280_v61  ;;  %v2840_v40 = vpop.f32.mrb[65].mxu0  ;;  %v10282_v7 = vld [vmem:[#allocation25_spill] sm:$0xff]  ;;  %v10283_v2 = vld [vmem:[#allocation26_spill] sm:$0xff] }
 0x283   : > { %v8105_v42 = vpop.eup %8104  ;;  %v3795_v18 = vadd.f32 1.0, %v8103_v48  ;;  %8124 = vpow2.f32 %v5884_v19  ;;  %v7532_v63 = vadd.f32 %v2840_v40, %v10281_v33  ;;  %v7262_v32 = vpop.f32.mrb[66].mxu0 }
 0x284   : > { %v8107_v6 = vpop.eup %8106  ;;  %8126 = vrcp.f32 %v3797_v46  ;;  %v3800_v56 = vadd.f32 1.0, %v8105_v42  ;;  %7383 = vmatprep.mubr.bf16.mxu1 %v4276_v55  ;;  %v9572_v16 = vadd.f32 %v9446_v41, %v7531_v31  ;;  %v7533_v51 = vadd.f32 %v7262_v32, %v10282_v7  ;;  %v2843_v22 = vpop.f32.mrb[67].mxu0 }
 0x285   : > { %v8109_v43 = vpop.eup %8108  ;;  %8128 = vrcp.f32 %v3795_v18  ;;  %v3798_v47 = vadd.f32 1.0, %v8107_v6  ;;  %7384 = vmatmul.mubr.bf16.gmra.mrb[172].mxu1 %v4277_v27  ;;  %v9576_v19 = vadd.f32 %v9446_v41, %v7532_v63  ;;  %v7534_v48 = vadd.f32 %v2843_v22, %v10283_v2 }
 0x286   : > { %v8111_v61 = vpop.eup %8110  ;;  %v4176_v46 = vmul.f32 %v8099_v44, %v9449_v62  ;;  %8130 = vrcp.f32 %v3800_v56  ;;  %v5890_v42 = vmul.f32 -1.442695, %v9572_v16  ;;  %v9582_v55 = vadd.f32 %v9446_v41, %v7533_v51  ;;  %v10284_v51 = vld [vmem:[#allocation27_spill] sm:$0xff] }
 0x287   : > { %v8113_v31 = vpop.eup %8112  ;;  %v4177_v40 = vmul.f32 %v8111_v61, %v9460_v49  ;;  %8132 = vrcp.f32 %v3798_v47  ;;  %v5888_v18 = vmul.f32 -1.442695, %v9576_v19  ;;  %v9587_v27 = vadd.f32 %v9446_v41, %v7534_v48 }
 0x288   : > { %v8115_v33 = vpop.eup %8114  ;;  %v4174_v63 = vmul.f32 %v8109_v43, %v9454_v34  ;;  %v4175_v62 = vmul.f32 %v8113_v31, %v9465_v54  ;;  %8134 = vpow2.f32 %v5887_v4  ;;  %v5891_v44 = vmul.f32 -1.442695, %v9582_v55  ;;  %v10285_v43 = vld [vmem:[#allocation28_spill] sm:$0xff] }
 0x289   : > { %v8117_v32 = vpop.eup %8116  ;;  %8136 = vpow2.f32 %v5885_v60  ;;  %v4279_v6 = vpack.c.bf16 %v4177_v40, %v4176_v46  ;;  %v7265_v56 = vpop.f32.mrb[68].mxu0  ;;  %v5889_v34 = vmul.f32 -1.442695, %v9587_v27  ;;  %v10286_v46 = vld [vmem:[#allocation29_spill] sm:$0xff] }
 0x28a   : > { %v8119_v7 = vpop.eup %8118  ;;  %8138 = vpow2.f32 %v5890_v42  ;;  %v4278_v49 = vpack.c.bf16 %v4175_v62, %v4174_v63  ;;  %v7535_v22 = vadd.f32 %v7265_v56, %v10284_v51  ;;  %v2856_v47 = vpop.f32.mrb[69].mxu0  ;;  %v10287_v56 = vld [vmem:[#allocation30_spill] sm:$0xff] }
 0x28b   : > { %v8121_v2 = vpop.eup %8120  ;;  %v3801_v48 = vadd.f32 1.0, %v8119_v7  ;;  %8140 = vpow2.f32 %v5888_v18  ;;  %v7536_v54 = vadd.f32 %v2856_v47, %v10285_v43  ;;  %v7266_v4 = vpop.f32.mrb[70].mxu0 }
 0x28c   : > { %v8123_v61 = vpop.eup %8122  ;;  %v3799_v31 = vadd.f32 1.0, %v8121_v2  ;;  %8142 = vpow2.f32 %v5891_v44  ;;  %7387 = vmatprep.mubr.bf16.mxu1 %v4278_v49  ;;  %v9596_v60 = vadd.f32 %v9446_v41, %v7535_v22  ;;  %v7537_v42 = vadd.f32 %v7266_v4, %v10286_v46  ;;  %v2859_v40 = vpop.f32.mrb[71].mxu0 }
 0x28d   : > { %v8125_v63 = vpop.eup %8124  ;;  %8144 = vrcp.f32 %v3801_v48  ;;  %v3804_v62 = vadd.f32 1.0, %v8123_v61  ;;  %7388 = vmatmul.mubr.bf16.gmra.mrb[176].mxu1 %v4279_v6  ;;  %v9600_v18 = vadd.f32 %v9446_v41, %v7536_v54  ;;  %v7538_v7 = vadd.f32 %v2859_v40, %v10287_v56 }
 0x28e   : > { %v8127_v51 = vpop.eup %8126  ;;  %8146 = vrcp.f32 %v3799_v31  ;;  %v3802_v47 = vadd.f32 1.0, %v8125_v63  ;;  %v5894_v44 = vmul.f32 -1.442695, %v9596_v60  ;;  %v9605_v49 = vadd.f32 %v9446_v41, %v7537_v42 }
 0x28f   : > { %v8129_v22 = vpop.eup %8128  ;;  %v4180_v2 = vmul.f32 %v8115_v33, %v9482_v57  ;;  %v4181_v48 = vmul.f32 %v8127_v51, %v9493_v17  ;;  %8148 = vrcp.f32 %v3804_v62  ;;  %v5892_v6 = vmul.f32 -1.442695, %v9600_v18  ;;  %v10288_v33 = vld [vmem:[#allocation31_spill] sm:$0xff] }
 0x290   : > { %v8131_v43 = vpop.eup %8130  ;;  %v4178_v54 = vmul.f32 %v8117_v32, %v9487_v13  ;;  %v4179_v4 = vmul.f32 %v8129_v22, %v9498_v59  ;;  %8150 = vrcp.f32 %v3802_v47  ;;  %v5895_v61 = vmul.f32 -1.442695, %v9605_v49  ;;  %v10289_v59 = vld [vmem:[#allocation32_spill] sm:$0xff] }
 0x291   : > { %v8133_v31 = vpop.eup %8132  ;;  %8152 = vpow2.f32 %v5889_v34  ;;  %v4281_v46 = vpack.c.bf16 %v4181_v48, %v4180_v2  ;;  %v7269_v42 = vpop.f32.mrb[72].mxu0  ;;  %v9614_v57 = vadd.f32 %v9446_v41, %v7538_v7 }
 0x292   : > { %v8135_v40 = vpop.eup %8134  ;;  %8154 = vpow2.f32 %v5894_v44  ;;  %v4280_v17 = vpack.c.bf16 %v4179_v4, %v4178_v54  ;;  %v7539_v63 = vadd.f32 %v7269_v42, %v10288_v33  ;;  %v2872_v62 = vpop.f32.mrb[73].mxu0  ;;  %v10290_v44 = vld [vmem:[#allocation33_spill] sm:$0xff] }
 0x293   : > { %v8137_v56 = vpop.eup %8136  ;;  %v3805_v13 = vadd.f32 1.0, %v8135_v40  ;;  %8156 = vpow2.f32 %v5892_v6  ;;  %v7540_v32 = vadd.f32 %v2872_v62, %v10289_v59  ;;  %v7270_v51 = vpop.f32.mrb[74].mxu0  ;;  %v10291_v6 = vld [vmem:[#allocation34_spill] sm:$0xff] }
 0x294   : > { %v8139_v47 = vpop.eup %8138  ;;  %v3803_v22 = vadd.f32 1.0, %v8137_v56  ;;  %8158 = vpow2.f32 %v5895_v61  ;;  %7391 = vmatprep.mubr.bf16.mxu1 %v4280_v17  ;;  %v9619_v34 = vadd.f32 %v9446_v41, %v7539_v63  ;;  %v7541_v7 = vadd.f32 %v7270_v51, %v10290_v44  ;;  %v2875_v2 = vpop.f32.mrb[75].mxu0 }
 0x295   : > { %v8141_v48 = vpop.eup %8140  ;;  %8160 = vrcp.f32 %v3805_v13  ;;  %v3808_v54 = vadd.f32 1.0, %v8139_v47  ;;  %7392 = vmatmul.mubr.bf16.gmra.mrb[180].mxu1 %v4281_v46  ;;  %v9623_v4 = vadd.f32 %v9446_v41, %v7540_v32  ;;  %v7542_v42 = vadd.f32 %v2875_v2, %v10291_v6 }
 0x296   : > { %v8143_v40 = vpop.eup %8142  ;;  %8162 = vrcp.f32 %v3803_v22  ;;  %v3806_v33 = vadd.f32 1.0, %v8141_v48  ;;  %v5893_v61 = vmul.f32 -1.442695, %v9614_v57  ;;  %v9628_v17 = vadd.f32 %v9446_v41, %v7541_v7 }
 0x297   : > { %v8145_v63 = vpop.eup %8144  ;;  %8164 = vrcp.f32 %v3808_v54  ;;  %v3809_v62 = vadd.f32 1.0, %v8143_v40  ;;  %v5898_v56 = vmul.f32 -1.442695, %v9619_v34  ;;  %v4184_v46 = vmul.f32 %v8131_v43, %v9516_v35  ;;  %v10292_v43 = vld [vmem:[#allocation35_spill] sm:$0xff] }
 0x298   : > { %v8147_v13 = vpop.eup %8146  ;;  %v4185_v59 = vmul.f32 %v8145_v63, %v9527_v58  ;;  %8166 = vrcp.f32 %v3806_v33  ;;  %v5896_v32 = vmul.f32 -1.442695, %v9623_v4  ;;  %v4182_v47 = vmul.f32 %v8133_v31, %v9521_v26  ;;  %v10293_v33 = vld [vmem:[#allocation36_spill] sm:$0xff] }
 0x299   : > { %v8149_v51 = vpop.eup %8148  ;;  %v4183_v22 = vmul.f32 %v8147_v13, %v9532_v45  ;;  %8168 = vrcp.f32 %v3809_v62  ;;  %v5899_v44 = vmul.f32 -1.442695, %v9628_v17  ;;  %v7273_v7 = vpop.f32.mrb[76].mxu0  ;;  %v9638_v48 = vadd.f32 %v9446_v41, %v7542_v42 }
 0x29a   : > { %v8151_v2 = vpop.eup %8150  ;;  %8170 = vpow2.f32 %v5893_v61  ;;  %v4283_v35 = vpack.c.bf16 %v4185_v59, %v4184_v46  ;;  %v7543_v58 = vadd.f32 %v7273_v7, %v10292_v43  ;;  %v2888_v54 = vpop.f32.mrb[77].mxu0  ;;  %v10294_v61 = vld [vmem:[#allocation37_spill] sm:$0xff] }
 0x29b   : > { %v8153_v6 = vpop.eup %8152  ;;  %8172 = vpow2.f32 %v5898_v56  ;;  %v4282_v40 = vpack.c.bf16 %v4183_v22, %v4182_v47  ;;  %v7544_v26 = vadd.f32 %v2888_v54, %v10293_v33  ;;  %v7274_v31 = vpop.f32.mrb[78].mxu0  ;;  %v10295_v56 = vld [vmem:[#allocation38_spill] sm:$0xff]  ;;  %v4188_v33 = vmul.f32 %v8149_v51, %v9548_v50  ;;  %v10296_v50 = vld [vmem:[#allocation39_spill] sm:$0xff] }
 0x29c   : > { %v8155_v45 = vpop.eup %8154  ;;  %v3807_v63 = vadd.f32 1.0, %v8153_v6  ;;  %8174 = vpow2.f32 %v5896_v32  ;;  %v9643_v62 = vadd.f32 %v9446_v41, %v7543_v58  ;;  %v7545_v13 = vadd.f32 %v7274_v31, %v10294_v61  ;;  %v2891_v42 = vpop.f32.mrb[79].mxu0 }
 0x29d   : > { %v8157_v38 = vpop.eup %8156  ;;  %v3812_v46 = vadd.f32 1.0, %v8155_v45  ;;  %8176 = vpow2.f32 %v5899_v44  ;;  %7395 = vmatprep.mubr.bf16.mxu1 %v4282_v40  ;;  %v9647_v59 = vadd.f32 %v9446_v41, %v7544_v26  ;;  %v7546_v47 = vadd.f32 %v2891_v42, %v10295_v56 }
 0x29e   : > { %v8159_v22 = vpop.eup %8158  ;;  %8178 = vrcp.f32 %v3807_v63  ;;  %v3810_v7 = vadd.f32 1.0, %v8157_v38  ;;  %v5897_v32 = vmul.f32 -1.442695, %v9638_v48  ;;  %7396 = vmatmul.mubr.bf16.gmra.mrb[184].mxu1 %v4283_v35  ;;  %v9652_v43 = vadd.f32 %v9446_v41, %v7545_v13 }
 0x29f   : > { %v8161_v58 = vpop.eup %8160  ;;  %8180 = vrcp.f32 %v3812_v46  ;;  %v3813_v54 = vadd.f32 1.0, %v8159_v22  ;;  %v5902_v44 = vmul.f32 -1.442695, %v9643_v62  ;;  %v9656_v6 = vadd.f32 %v9446_v41, %v7546_v47  ;;  %v10297_v22 = vld [vmem:[#allocation40_spill] sm:$0xff] }
 0x2a0   : > { %v8163_v40 = vpop.eup %8162  ;;  %v4189_v26 = vmul.f32 %v8161_v58, %v9558_v28  ;;  %8182 = vrcp.f32 %v3810_v7  ;;  %v5900_v38 = vmul.f32 -1.442695, %v9647_v59  ;;  %v4186_v31 = vmul.f32 %v8151_v2, %v9552_v23 }
 0x2a1   : > { %v8165_v35 = vpop.eup %8164  ;;  %v4187_v45 = vmul.f32 %v8163_v40, %v9563_v10  ;;  %8184 = vrcp.f32 %v3813_v54  ;;  %v5903_v63 = vmul.f32 -1.442695, %v9652_v43  ;;  %v7277_v61 = vpop.f32.mrb[80].mxu0  ;;  %v5901_v42 = vmul.f32 -1.442695, %v9656_v6 }
 0x2a2   : > { %v8167_v13 = vpop.eup %8166  ;;  %8186 = vpow2.f32 %v5897_v32  ;;  %v4285_v46 = vpack.c.bf16 %v4189_v26, %v4188_v33  ;;  %v7547_v51 = vadd.f32 %v7277_v61, %v10296_v50  ;;  %v2904_v28 = vpop.f32.mrb[81].mxu0  ;;  %v10298_v32 = vld [vmem:[#allocation41_spill] sm:$0xff]  ;;  %v4192_v61 = vmul.f32 %v8165_v35, %v9572_v16 }
 0x2a3   : > { %v8169_v56 = vpop.eup %8168  ;;  %8188 = vpow2.f32 %v5902_v44  ;;  %v4284_v47 = vpack.c.bf16 %v4187_v45, %v4186_v31  ;;  %v7548_v7 = vadd.f32 %v2904_v28, %v10297_v22  ;;  %v7278_v23 = vpop.f32.mrb[82].mxu0 }
 0x2a4   : > { %v8171_v2 = vpop.eup %8170  ;;  %v4193_v10 = vmul.f32 %v8169_v56, %v9582_v55  ;;  %8190 = vpow2.f32 %v5900_v38  ;;  %v9669_v58 = vadd.f32 %v9446_v41, %v7547_v51  ;;  %v7549_v54 = vadd.f32 %v7278_v23, %v10298_v32  ;;  %v2907_v40 = vpop.f32.mrb[83].mxu0 }
 0x2a5   : > { %v8173_v33 = vpop.eup %8172  ;;  %v3811_v26 = vadd.f32 1.0, %v8171_v2  ;;  %8192 = vpow2.f32 %v5903_v63  ;;  %7399 = vmatprep.mubr.bf16.mxu1 %v4284_v47  ;;  %v9673_v44 = vadd.f32 %v9446_v41, %v7548_v7  ;;  %v7550_v31 = vadd.f32 %v2907_v40, %v9186_v8 }
 0x2a6   : > { %v8175_v45 = vpop.eup %8174  ;;  %v3816_v55 = vadd.f32 1.0, %v8173_v33  ;;  %8194 = vpow2.f32 %v5901_v42  ;;  %7400 = vmatmul.mubr.bf16.gmra.mrb[188].mxu1 %v4285_v46  ;;  %v9678_v38 = vadd.f32 %v9446_v41, %v7549_v54  ;;  %v5906_v63 = vmul.f32 -1.442695, %v9669_v58 }
 0x2a7   : > { %v8177_v50 = vpop.eup %8176  ;;  %8196 = vrcp.f32 %v3811_v26  ;;  %v3814_v51 = vadd.f32 1.0, %v8175_v45  ;;  %v9682_v28 = vadd.f32 %v9446_v41, %v7550_v31  ;;  %v5904_v47 = vmul.f32 -1.442695, %v9673_v44 }
 0x2a8   : > { %v8179_v56 = vpop.eup %8178  ;;  %8198 = vrcp.f32 %v3816_v55  ;;  %v3817_v8 = vadd.f32 1.0, %v8177_v50  ;;  %v4287_v16 = vpack.c.bf16 %v4193_v10, %v4192_v61  ;;  %v4190_v42 = vmul.f32 %v8167_v13, %v9576_v19 }
 0x2a9   : > { %v8181_v35 = vpop.eup %8180  ;;  %v4191_v46 = vmul.f32 %v8179_v56, %v9587_v27  ;;  %8200 = vrcp.f32 %v3814_v51  ;;  %v5907_v22 = vmul.f32 -1.442695, %v9678_v38  ;;  %v7281_v7 = vpop.f32.mrb[84].mxu0  ;;  %v5905_v2 = vmul.f32 -1.442695, %v9682_v28 }
 0x2aa   : > { %v8183_v23 = vpop.eup %8182  ;;  %8202 = vrcp.f32 %v3817_v8  ;;  %v7551_v32 = vadd.f32 %v7281_v7, %v9204_v39  ;;  %v2920_v54 = vpop.f32.mrb[85].mxu0  ;;  %v4196_v51 = vmul.f32 %v8181_v35, %v9596_v60 }
 0x2ab   : > { %v8185_v40 = vpop.eup %8184  ;;  %8204 = vpow2.f32 %v5906_v63  ;;  %v4286_v33 = vpack.c.bf16 %v4191_v46, %v4190_v42  ;;  %v7552_v10 = vadd.f32 %v2920_v54, %v9209_v9  ;;  %v7282_v26 = vpop.f32.mrb[86].mxu0  ;;  %v4194_v60 = vmul.f32 %v8183_v23, %v9600_v18 }
 0x2ac   : > { %v8187_v19 = vpop.eup %8186  ;;  %v4197_v27 = vmul.f32 %v8185_v40, %v9605_v49  ;;  %8206 = vpow2.f32 %v5904_v47  ;;  %v9693_v13 = vadd.f32 %v9446_v41, %v7551_v32  ;;  %v7553_v31 = vadd.f32 %v7282_v26, %v9213_v5  ;;  %v2923_v45 = vpop.f32.mrb[87].mxu0 }
 0x2ad   : > { %v8189_v61 = vpop.eup %8188  ;;  %v3815_v55 = vadd.f32 1.0, %v8187_v19  ;;  %8208 = vpow2.f32 %v5907_v22  ;;  %7403 = vmatprep.mubr.bf16.mxu1 %v4286_v33  ;;  %v9697_v39 = vadd.f32 %v9446_v41, %v7552_v10  ;;  %v7554_v9 = vadd.f32 %v2923_v45, %v9218_v29 }
 0x2ae   : > { %v8191_v50 = vpop.eup %8190  ;;  %v3820_v49 = vadd.f32 1.0, %v8189_v61  ;;  %8210 = vpow2.f32 %v5905_v2  ;;  %7404 = vmatmul.mubr.bf16.gmra.mrb[192].mxu1 %v4287_v16  ;;  %v9702_v63 = vadd.f32 %v9446_v41, %v7553_v31  ;;  %v5910_v29 = vmul.f32 -1.442695, %v9693_v13 }
 0x2af   : > { %v8193_v5 = vpop.eup %8192  ;;  %8212 = vrcp.f32 %v3815_v55  ;;  %v3818_v56 = vadd.f32 1.0, %v8191_v50  ;;  %v9705_v8 = vadd.f32 %v9446_v41, %v7554_v9  ;;  %v4289_v46 = vpack.c.bf16 %v4197_v27, %v4196_v51  ;;  %v10299_v51 = vld [vmem:[#allocation42_spill] sm:$0xff] }
 0x2b0   : > { %v8195_v47 = vpop.eup %8194  ;;  %8214 = vrcp.f32 %v3820_v49  ;;  %v3821_v42 = vadd.f32 1.0, %v8193_v5  ;;  %v5908_v35 = vmul.f32 -1.442695, %v9697_v39  ;;  %v5911_v54 = vmul.f32 -1.442695, %v9702_v63 }
 0x2b1   : > { %v8197_v22 = vpop.eup %8196  ;;  %8216 = vrcp.f32 %v3818_v56  ;;  %v3819_v16 = vadd.f32 1.0, %v8195_v47  ;;  %v7285_v7 = vpop.f32.mrb[88].mxu0  ;;  %v5909_v26 = vmul.f32 -1.442695, %v9705_v8 }
 0x2b2   : > { %v8199_v2 = vpop.eup %8198  ;;  %v4195_v32 = vmul.f32 %v8197_v22, %v9614_v57  ;;  %8218 = vrcp.f32 %v3821_v42  ;;  %v7555_v40 = vadd.f32 %v7285_v7, %v9239_v12  ;;  %v2936_v33 = vpop.f32.mrb[89].mxu0 }
 0x2b3   : > { %v8201_v10 = vpop.eup %8200  ;;  %8220 = vrcp.f32 %v3819_v16  ;;  %v7556_v18 = vadd.f32 %v2936_v33, %v9242_v21  ;;  %v7286_v23 = vpop.f32.mrb[90].mxu0  ;;  %v4200_v21 = vmul.f32 %v8199_v2, %v9619_v34 }
 0x2b4   : > { %v8203_v19 = vpop.eup %8202  ;;  %8222 = vpow2.f32 %v5910_v29  ;;  %v4288_v27 = vpack.c.bf16 %v4195_v32, %v4194_v60  ;;  %v9716_v31 = vadd.f32 %v9446_v41, %v7555_v40  ;;  %v2939_v57 = vpop.f32.mrb[91].mxu0  ;;  %v7557_v55 = vadd.f32 %v7286_v23, %v9245_v20 }
 0x2b5   : > { %v8205_v45 = vpop.eup %8204  ;;  %v4201_v61 = vmul.f32 %v8203_v19, %v9628_v17  ;;  %8224 = vpow2.f32 %v5908_v35  ;;  %v9720_v12 = vadd.f32 %v9446_v41, %v7556_v18  ;;  %v7558_v49 = vadd.f32 %v2939_v57, %v10299_v51 }
 0x2b6   : > { %v8207_v9 = vpop.eup %8206  ;;  %v3824_v50 = vadd.f32 1.0, %v8205_v45  ;;  %8226 = vpow2.f32 %v5911_v54  ;;  %7407 = vmatprep.mubr.bf16.mxu1 %v4288_v27  ;;  %v5914_v17 = vmul.f32 -1.442695, %v9716_v31  ;;  %v9727_v47 = vadd.f32 %v9446_v41, %v7557_v55 }
 0x2b7   : > { %v8209_v5 = vpop.eup %8208  ;;  %v3822_v56 = vadd.f32 1.0, %v8207_v9  ;;  %8228 = vpow2.f32 %v5909_v26  ;;  %7408 = vmatmul.mubr.bf16.gmra.mrb[196].mxu1 %v4289_v46  ;;  %v9730_v29 = vadd.f32 %v9446_v41, %v7558_v49  ;;  %v4291_v34 = vpack.c.bf16 %v4201_v61, %v4200_v21  ;;  %v10300_v9 = vld [vmem:[#allocation43_spill] sm:$0xff] }
 0x2b8   : > { %v8211_v42 = vpop.eup %8210  ;;  %8230 = vrcp.f32 %v3824_v50  ;;  %v3825_v20 = vadd.f32 1.0, %v8209_v5  ;;  %v4198_v60 = vmul.f32 %v8201_v10, %v9623_v4  ;;  %v5912_v35 = vmul.f32 -1.442695, %v9720_v12 }
 0x2b9   : > { %v8213_v22 = vpop.eup %8212  ;;  %8232 = vrcp.f32 %v3822_v56  ;;  %v3823_v16 = vadd.f32 1.0, %v8211_v42  ;;  %v7289_v46 = vpop.f32.mrb[92].mxu0  ;;  %v5915_v32 = vmul.f32 -1.442695, %v9727_v47  ;;  %v5913_v26 = vmul.f32 -1.442695, %v9730_v29 }
 0x2ba   : > { %v8215_v7 = vpop.eup %8214  ;;  %v4199_v2 = vmul.f32 %v8213_v22, %v9638_v48  ;;  %8234 = vrcp.f32 %v3825_v20  ;;  %v7559_v54 = vadd.f32 %v7289_v46, %v9270_v1  ;;  %v2952_v40 = vpop.f32.mrb[93].mxu0 }
 0x2bb   : > { %v8217_v33 = vpop.eup %8216  ;;  %8236 = vrcp.f32 %v3823_v16  ;;  %v7560_v4 = vadd.f32 %v2952_v40, %v9273_v3  ;;  %v7290_v10 = vpop.f32.mrb[94].mxu0  ;;  %v4204_v51 = vmul.f32 %v8215_v7, %v9643_v62 }
 0x2bc   : > { %v8219_v18 = vpop.eup %8218  ;;  %v4202_v23 = vmul.f32 %v8217_v33, %v9647_v59  ;;  %8238 = vpow2.f32 %v5914_v17  ;;  %v4290_v19 = vpack.c.bf16 %v4199_v2, %v4198_v60  ;;  %v9741_v48 = vadd.f32 %v9446_v41, %v7559_v54  ;;  %v2955_v27 = vpop.f32.mrb[95].mxu0 }
 0x2bd   : > { %v8221_v57 = vpop.eup %8220  ;;  %v4205_v1 = vmul.f32 %v8219_v18, %v9652_v43  ;;  %8240 = vpow2.f32 %v5912_v35  ;;  %v9745_v45 = vadd.f32 %v9446_v41, %v7560_v4  ;;  %v7561_v61 = vadd.f32 %v7290_v10, %v9276_v11  ;;  %v9755_v41 = vld [vmem:[%s10191_s2] ss:$0 sm:$0xff] }
 0x2be   : > { %v8223_v3 = vpop.eup %8222  ;;  %v4203_v55 = vmul.f32 %v8221_v57, %v9656_v6  ;;  %8242 = vpow2.f32 %v5915_v32  ;;  %7411 = vmatprep.mubr.bf16.mxu1 %v4290_v19  ;;  %v5918_v59 = vmul.f32 -1.442695, %v9741_v48  ;;  %v7562_v21 = vadd.f32 %v2955_v27, %v10300_v9 }
 0x2bf   : > { %v8225_v50 = vpop.eup %8224  ;;  %v3828_v49 = vadd.f32 1.0, %v8223_v3  ;;  %8244 = vpow2.f32 %v5913_v26  ;;  %7412 = vmatmul.mubr.bf16.gmra.mrb[200].mxu1 %v4291_v34  ;;  %v9758_v11 = vadd.f32 %v9755_v41, %v7561_v61  ;;  %v5916_v42 = vmul.f32 -1.442695, %v9745_v45 }
 0x2c0   : > { %v8227_v43 = vpop.eup %8226  ;;  %v3826_v6 = vadd.f32 1.0, %v8225_v50  ;;  %8246 = vpow2.f32 %v5918_v59  ;;  %v9761_v5 = vadd.f32 %v9755_v41, %v7562_v21  ;;  %v4292_v56 = vpack.c.bf16 %v4203_v55, %v4202_v23 }
 0x2c1   : > { %v8229_v17 = vpop.eup %8228  ;;  %8248 = vrcp.f32 %v3828_v49  ;;  %v3829_v62 = vadd.f32 1.0, %v8227_v43  ;;  %v4293_v20 = vpack.c.bf16 %v4205_v1, %v4204_v51  ;;  %v7293_v34 = vpop.f32.mrb[96].mxu0  ;;  %v5919_v16 = vmul.f32 -1.442695, %v9758_v11 }
 0x2c2   : > { %v8231_v22 = vpop.eup %8230  ;;  %8250 = vrcp.f32 %v3826_v6  ;;  %v3827_v60 = vadd.f32 1.0, %v8229_v17  ;;  %7415 = vmatprep.mubr.bf16.mxu1 %v4292_v56  ;;  %v7563_v35 = vadd.f32 %v7293_v34, %v9302_v24  ;;  %v2968_v46 = vpop.f32.mrb[97].mxu0  ;;  %v5917_v2 = vmul.f32 -1.442695, %v9761_v5 }
 0x2c3   : > { %v8233_v7 = vpop.eup %8232  ;;  %8252 = vrcp.f32 %v3829_v62  ;;  %v7564_v32 = vadd.f32 %v2968_v46, %v9305_v15  ;;  %v7294_v54 = vpop.f32.mrb[98].mxu0 }
 0x2c4   : > { %v8235_v40 = vpop.eup %8234  ;;  %8254 = vrcp.f32 %v3827_v60  ;;  %v9769_v33 = vadd.f32 %v9755_v41, %v7563_v35  ;;  %v7565_v26 = vadd.f32 %v7294_v54, %v9308_v25  ;;  %v2971_v4 = vpop.f32.mrb[99].mxu0  ;;  %v4206_v18 = vmul.f32 %v8233_v7, %v9673_v44 }
 0x2c5   : > { %v8237_v10 = vpop.eup %8236  ;;  %v4209_v24 = vmul.f32 %v8235_v40, %v9678_v38  ;;  %8256 = vpow2.f32 %v5916_v42  ;;  %v7566_v23 = vadd.f32 %v2971_v4, %v9312_v53  ;;  %v9778_v57 = vadd.f32 %v9755_v41, %v7564_v32 }
 0x2c6   : > { %v8239_v19 = vpop.eup %8238  ;;  %v4207_v15 = vmul.f32 %v8237_v10, %v9682_v28  ;;  %8258 = vpow2.f32 %v5919_v16  ;;  %v5922_v27 = vmul.f32 -1.442695, %v9769_v33  ;;  %v4208_v25 = vmul.f32 %v8231_v22, %v9669_v58 }
 0x2c7   : > { %v8241_v1 = vpop.eup %8240  ;;  %v3832_v61 = vadd.f32 1.0, %v8239_v19  ;;  %8260 = vpow2.f32 %v5917_v2  ;;  %7416 = vmatmul.mubr.bf16.gmra.mrb[204].mxu1 %v4293_v20  ;;  %v9782_v44 = vadd.f32 %v9755_v41, %v7565_v26  ;;  %v9785_v28 = vadd.f32 %v9755_v41, %v7566_v23 }
 0x2c8   : > { %v8243_v38 = vpop.eup %8242  ;;  %v3830_v53 = vadd.f32 1.0, %v8241_v1  ;;  %8262 = vpow2.f32 %v5922_v27  ;;  %v4294_v3 = vpack.c.bf16 %v4207_v15, %v4206_v18  ;;  %v4295_v9 = vpack.c.bf16 %v4209_v24, %v4208_v25 }
 0x2c9   : > { %v8245_v55 = vpop.eup %8244  ;;  %8264 = vrcp.f32 %v3832_v61  ;;  %v3833_v59 = vadd.f32 1.0, %v8243_v38  ;;  %v7297_v21 = vpop.f32.mrb[100].mxu0  ;;  %v5920_v51 = vmul.f32 -1.442695, %v9778_v57  ;;  %v5923_v17 = vmul.f32 -1.442695, %v9782_v44 }
 0x2ca   : > { %v8247_v50 = vpop.eup %8246  ;;  %8266 = vrcp.f32 %v3830_v53  ;;  %v3831_v58 = vadd.f32 1.0, %v8245_v55  ;;  %7419 = vmatprep.mubr.bf16.mxu1 %v4294_v3  ;;  %v7567_v49 = vadd.f32 %v7297_v21, %v9333_v0  ;;  %v2984_v43 = vpop.f32.mrb[101].mxu0  ;;  %v5921_v34 = vmul.f32 -1.442695, %v9785_v28  ;;  %v10301_v21 = vld [vmem:[#allocation44_spill] sm:$0xff] }
 0x2cb   : > { %v8249_v6 = vpop.eup %8248  ;;  %8268 = vrcp.f32 %v3833_v59  ;;  %v3836_v56 = vadd.f32 1.0, %v8247_v50  ;;  %v7568_v62 = vadd.f32 %v2984_v43, %v9336_v52  ;;  %v7298_v42 = vpop.f32.mrb[102].mxu0  ;;  %v10302_v43 = vld [vmem:[#allocation45_spill] sm:$0xff] }
 0x2cc   : > { %v8251_v20 = vpop.eup %8250  ;;  %8270 = vrcp.f32 %v3831_v58  ;;  %v9793_v22 = vadd.f32 %v9755_v41, %v7567_v49  ;;  %v7569_v60 = vadd.f32 %v7298_v42, %v9339_v30  ;;  %v2987_v16 = vpop.f32.mrb[103].mxu0  ;;  %v4212_v35 = vmul.f32 %v8249_v6, %v9693_v13 }
 0x2cd   : > { %v8253_v0 = vpop.eup %8252  ;;  %8272 = vrcp.f32 %v3836_v56  ;;  %v9798_v46 = vadd.f32 %v9755_v41, %v7568_v62  ;;  %v7570_v52 = vadd.f32 %v2987_v16, %v9343_v37  ;;  %v4210_v40 = vmul.f32 %v8251_v20, %v9697_v39 }
 0x2ce   : > { %v8255_v7 = vpop.eup %8254  ;;  %v4213_v2 = vmul.f32 %v8253_v0, %v9702_v63  ;;  %8274 = vpow2.f32 %v5920_v51  ;;  %v5926_v32 = vmul.f32 -1.442695, %v9793_v22  ;;  %v9804_v54 = vadd.f32 %v9755_v41, %v7569_v60 }
 0x2cf   : > { %v8257_v30 = vpop.eup %8256  ;;  %v4211_v13 = vmul.f32 %v8255_v7, %v9705_v8  ;;  %8276 = vpow2.f32 %v5923_v17  ;;  %7420 = vmatmul.mubr.bf16.gmra.mrb[208].mxu1 %v4295_v9  ;;  %v9809_v26 = vadd.f32 %v9755_v41, %v7570_v52  ;;  %v5924_v24 = vmul.f32 -1.442695, %v9798_v46 }
 0x2d0   : > { %v8259_v37 = vpop.eup %8258  ;;  %v3834_v4 = vadd.f32 1.0, %v8257_v30  ;;  %8278 = vpow2.f32 %v5921_v34  ;;  %v4297_v63 = vpack.c.bf16 %v4213_v2, %v4212_v35  ;;  %v5927_v8 = vmul.f32 -1.442695, %v9804_v54 }
 0x2d1   : > { %v8261_v10 = vpop.eup %8260  ;;  %v3837_v18 = vadd.f32 1.0, %v8259_v37  ;;  %8280 = vpow2.f32 %v5926_v32  ;;  %v4296_v23 = vpack.c.bf16 %v4211_v13, %v4210_v40  ;;  %v7301_v19 = vpop.f32.mrb[104].mxu0  ;;  %v5925_v38 = vmul.f32 -1.442695, %v9809_v26  ;;  %v10303_v32 = vld [vmem:[#allocation2_spill] sm:$0xff] }
 0x2d2   : > { %v8263_v15 = vpop.eup %8262  ;;  %8282 = vrcp.f32 %v3834_v4  ;;  %v3835_v39 = vadd.f32 1.0, %v8261_v10  ;;  %v7571_v27 = vadd.f32 %v7301_v19, %v9365_v14  ;;  %v3000_v1 = vpop.f32.mrb[105].mxu0  ;;  %v10305_v19 = vld [vmem:[#allocation47_spill] sm:$0xff] }
 0x2d3   : > { %v8265_v25 = vpop.eup %8264  ;;  %8284 = vrcp.f32 %v3837_v18  ;;  %v3840_v61 = vadd.f32 1.0, %v8263_v15  ;;  %7423 = vmatprep.mubr.bf16.mxu1 %v4296_v23  ;;  %v7572_v53 = vadd.f32 %v3000_v1, %v9368_v36  ;;  %v7302_v3 = vpop.f32.mrb[106].mxu0 }
 0x2d4   : > { %v8267_v55 = vpop.eup %8266  ;;  %v4216_v59 = vmul.f32 %v8265_v25, %v9716_v31  ;;  %8286 = vrcp.f32 %v3835_v39  ;;  %v9818_v9 = vadd.f32 %v9755_v41, %v7571_v27  ;;  %v7573_v50 = vadd.f32 %v7302_v3, %v10301_v21  ;;  %v3003_v14 = vpop.f32.mrb[107].mxu0  ;;  %v10306_v25 = vld [vmem:[#allocation3_spill] sm:$0xff] }
 0x2d5   : > { %v8269_v58 = vpop.eup %8268  ;;  %v4214_v51 = vmul.f32 %v8267_v55, %v9720_v12  ;;  %8288 = vrcp.f32 %v3840_v61  ;;  %v9823_v49 = vadd.f32 %v9755_v41, %v7572_v53  ;;  %v7574_v36 = vadd.f32 %v3003_v14, %v10302_v43 }
 0x2d6   : > { %v8271_v6 = vpop.eup %8270  ;;  %v4217_v56 = vmul.f32 %v8269_v58, %v9727_v47  ;;  %8290 = vpow2.f32 %v5924_v24  ;;  %v5930_v31 = vmul.f32 -1.442695, %v9818_v9  ;;  %v9829_v17 = vadd.f32 %v9755_v41, %v7573_v50 }
 0x2d7   : > { %v8273_v62 = vpop.eup %8272  ;;  %v4215_v42 = vmul.f32 %v8271_v6, %v9730_v29  ;;  %8292 = vpow2.f32 %v5927_v8  ;;  %7424 = vmatmul.mubr.bf16.gmra.mrb[212].mxu1 %v4297_v63  ;;  %v5928_v12 = vmul.f32 -1.442695, %v9823_v49  ;;  %v9834_v20 = vadd.f32 %v9755_v41, %v7574_v36 }
 0x2d8   : > { %v8275_v34 = vpop.eup %8274  ;;  %8294 = vpow2.f32 %v5925_v38  ;;  %v4299_v60 = vpack.c.bf16 %v4217_v56, %v4216_v59  ;;  %v9837_v16 = vmul.f32 %v8273_v62, %v9741_v48  ;;  %v5931_v2 = vmul.f32 -1.442695, %v9829_v17  ;;  %v10304_v48 = vld [vmem:[#allocation46_spill] sm:$0xff] }
 0x2d9   : > { %v8277_v47 = vpop.eup %8276  ;;  %v3838_v0 = vadd.f32 1.0, %v8275_v34  ;;  %8296 = vpow2.f32 %v5930_v31  ;;  %v4298_v35 = vpack.c.bf16 %v4215_v42, %v4214_v51  ;;  %v7305_v52 = vpop.f32.mrb[108].mxu0  ;;  %v5929_v4 = vmul.f32 -1.442695, %v9834_v20  ;;  %v10307_v31 = vld [vmem:[#allocation4_spill] sm:$0xff] }
 0x2da   : > { %v8279_v7 = vpop.eup %8278  ;;  %v3841_v29 = vadd.f32 1.0, %v8277_v47  ;;  %8298 = vpow2.f32 %v5928_v12  ;;  %v7575_v30 = vadd.f32 %v7305_v52, %v10303_v32  ;;  %v3016_v40 = vpop.f32.mrb[109].mxu0  ;;  %v10308_v47 = vld [vmem:[#allocation5_spill] sm:$0xff] }
 0x2db   : > { %v8281_v13 = vpop.eup %8280  ;;  %8300 = vrcp.f32 %v3838_v0  ;;  %v3839_v37 = vadd.f32 1.0, %v8279_v7  ;;  %7427 = vmatprep.mubr.bf16.mxu1 %v4298_v35  ;;  %v7576_v63 = vadd.f32 %v3016_v40, %v10304_v48  ;;  %v7306_v10 = vpop.f32.mrb[110].mxu0 }
 0x2dc   : > { %v8283_v18 = vpop.eup %8282  ;;  %8302 = vrcp.f32 %v3841_v29  ;;  %v3844_v24 = vadd.f32 1.0, %v8281_v13  ;;  %v9844_v23 = vadd.f32 %v9755_v41, %v7575_v30  ;;  %v7577_v15 = vadd.f32 %v7306_v10, %v10305_v19  ;;  %v3019_v39 = vpop.f32.mrb[111].mxu0  ;;  %v10309_v29 = vld [vmem:[#allocation6_spill] sm:$0xff] }
 0x2dd   : > { %v8285_v8 = vpop.eup %8284  ;;  %v4218_v27 = vmul.f32 %v8283_v18, %v9745_v45  ;;  %8304 = vrcp.f32 %v3839_v37  ;;  %v9849_v1 = vadd.f32 %v9755_v41, %v7576_v63  ;;  %v7578_v61 = vadd.f32 %v3019_v39, %v10306_v25  ;;  %v10310_v37 = vld [vmem:[#allocation7_spill] sm:$0xff] }
 0x2de   : > { %v8287_v38 = vpop.eup %8286  ;;  %v4221_v53 = vmul.f32 %v8285_v8, %v9758_v11  ;;  %8306 = vrcp.f32 %v3844_v24  ;;  %v5934_v3 = vmul.f32 -1.442695, %v9844_v23  ;;  %v9855_v55 = vadd.f32 %v9755_v41, %v7577_v15 }
 0x2df   : > { %v8289_v59 = vpop.eup %8288  ;;  %v4219_v21 = vmul.f32 %v8287_v38, %v9761_v5  ;;  %8308 = vpow2.f32 %v5931_v2  ;;  %7428 = vmatmul.mubr.bf16.gmra.mrb[216].mxu1 %v4299_v60  ;;  %v5932_v45 = vmul.f32 -1.442695, %v9849_v1  ;;  %v9860_v50 = vadd.f32 %v9755_v41, %v7578_v61 }
 0x2e0   : > { %v8291_v14 = vpop.eup %8290  ;;  %8310 = vpow2.f32 %v5929_v4  ;;  %v4301_v11 = vpack.c.bf16 %v4221_v53, %v9837_v16  ;;  %v5935_v5 = vmul.f32 -1.442695, %v9855_v55  ;;  %v4224_v63 = vmul.f32 %v8289_v59, %v9769_v33 }
 0x2e1   : > { %v8293_v58 = vpop.eup %8292  ;;  %v3842_v51 = vadd.f32 1.0, %v8291_v14  ;;  %8312 = vpow2.f32 %v5934_v3  ;;  %v4300_v43 = vpack.c.bf16 %v4219_v21, %v4218_v27  ;;  %v7309_v36 = vpop.f32.mrb[112].mxu0  ;;  %v5933_v60 = vmul.f32 -1.442695, %v9860_v50  ;;  %v10311_v21 = vld [vmem:[#allocation8_spill] sm:$0xff] }
 0x2e2   : > { %v8295_v6 = vpop.eup %8294  ;;  %v3845_v56 = vadd.f32 1.0, %v8293_v58  ;;  %8314 = vpow2.f32 %v5932_v45  ;;  %v7579_v62 = vadd.f32 %v7309_v36, %v10307_v31  ;;  %v3032_v42 = vpop.f32.mrb[113].mxu0 }
 0x2e3   : > { %v8297_v12 = vpop.eup %8296  ;;  %8316 = vrcp.f32 %v3842_v51  ;;  %v3843_v34 = vadd.f32 1.0, %v8295_v6  ;;  %7431 = vmatprep.mubr.bf16.mxu1 %v4300_v43  ;;  %v7580_v16 = vadd.f32 %v3032_v42, %v10308_v47  ;;  %v7310_v0 = vpop.f32.mrb[114].mxu0 }
 0x2e4   : > { %v8299_v35 = vpop.eup %8298  ;;  %8318 = vrcp.f32 %v3845_v56  ;;  %v3848_v52 = vadd.f32 1.0, %v8297_v12  ;;  %v9868_v7 = vadd.f32 %v9755_v41, %v7579_v62  ;;  %v7581_v2 = vadd.f32 %v7310_v0, %v10309_v29  ;;  %v3035_v32 = vpop.f32.mrb[115].mxu0 }
 0x2e5   : > { %v8301_v30 = vpop.eup %8300  ;;  %8320 = vrcp.f32 %v3843_v34  ;;  %v3846_v40 = vadd.f32 1.0, %v8299_v35  ;;  %v9872_v13 = vadd.f32 %v9755_v41, %v7580_v16  ;;  %v7582_v4 = vadd.f32 %v3035_v32, %v10310_v37 }
 0x2e6   : > { %v8303_v48 = vpop.eup %8302  ;;  %8322 = vrcp.f32 %v3848_v52  ;;  %v5938_v10 = vmul.f32 -1.442695, %v9868_v7  ;;  %v9878_v18 = vadd.f32 %v9755_v41, %v7581_v2  ;;  %v4222_v27 = vmul.f32 %v8301_v30, %v9778_v57 }
 0x2e7   : > { %v8305_v24 = vpop.eup %8304  ;;  %v4225_v19 = vmul.f32 %v8303_v48, %v9782_v44  ;;  %8324 = vrcp.f32 %v3846_v40  ;;  %7432 = vmatmul.mubr.bf16.gmra.mrb[220].mxu1 %v4301_v11  ;;  %v5936_v15 = vmul.f32 -1.442695, %v9872_v13  ;;  %v9883_v39 = vadd.f32 %v9755_v41, %v7582_v4 }
 0x2e8   : > { %v8307_v8 = vpop.eup %8306  ;;  %v4223_v33 = vmul.f32 %v8305_v24, %v9785_v28  ;;  %8326 = vpow2.f32 %v5935_v5  ;;  %v5939_v61 = vmul.f32 -1.442695, %v9878_v18  ;;  %v10312_v28 = vld [vmem:[#allocation9_spill] sm:$0xff]  ;;  %v10313_v5 = vld [vmem:[#allocation10_spill] sm:$0xff] }
 0x2e9   : > { %v8309_v25 = vpop.eup %8308  ;;  %8328 = vpow2.f32 %v5933_v60  ;;  %v4303_v38 = vpack.c.bf16 %v4225_v19, %v4224_v63  ;;  %v7313_v53 = vpop.f32.mrb[116].mxu0  ;;  %v5937_v57 = vmul.f32 -1.442695, %v9883_v39  ;;  %v10314_v60 = vld [vmem:[#allocation11_spill] sm:$0xff]  ;;  %v4228_v0 = vmul.f32 %v8307_v8, %v9793_v22 }
 0x2ea   : > { %v8311_v44 = vpop.eup %8310  ;;  %v3849_v3 = vadd.f32 1.0, %v8309_v25  ;;  %8330 = vpow2.f32 %v5938_v10  ;;  %v4302_v59 = vpack.c.bf16 %v4223_v33, %v4222_v27  ;;  %v7583_v45 = vadd.f32 %v7313_v53, %v10311_v21  ;;  %v3048_v14 = vpop.f32.mrb[117].mxu0  ;;  %v10316_v25 = vld [vmem:[#allocation13_spill] sm:$0xff] }
 0x2eb   : > { %v8313_v11 = vpop.eup %8312  ;;  %v3847_v58 = vadd.f32 1.0, %v8311_v44  ;;  %8332 = vpow2.f32 %v5936_v15  ;;  %v7584_v51 = vadd.f32 %v3048_v14, %v10312_v28  ;;  %v7314_v43 = vpop.f32.mrb[118].mxu0  ;;  %v10315_v15 = vld [vmem:[#allocation12_spill] sm:$0xff] }
 0x2ec   : > { %v8315_v36 = vpop.eup %8314  ;;  %8334 = vrcp.f32 %v3849_v3  ;;  %v3852_v6 = vadd.f32 1.0, %v8313_v11  ;;  %7435 = vmatprep.mubr.bf16.mxu1 %v4302_v59  ;;  %v9892_v56 = vadd.f32 %v9755_v41, %v7583_v45  ;;  %v7585_v31 = vadd.f32 %v7314_v43, %v10313_v5  ;;  %v3051_v62 = vpop.f32.mrb[119].mxu0  ;;  %v10317_v3 = vld [vmem:[#allocation14_spill] sm:$0xff] }
 0x2ed   : > { %v8317_v42 = vpop.eup %8316  ;;  %8336 = vrcp.f32 %v3847_v58  ;;  %v3850_v12 = vadd.f32 1.0, %v8315_v36  ;;  %v9896_v34 = vadd.f32 %v9755_v41, %v7584_v51  ;;  %v7586_v47 = vadd.f32 %v3051_v62, %v10314_v60  ;;  %v10318_v58 = vld [vmem:[#allocation15_spill] sm:$0xff] }
 0x2ee   : > { %v8319_v16 = vpop.eup %8318  ;;  %8338 = vrcp.f32 %v3852_v6  ;;  %v5942_v35 = vmul.f32 -1.442695, %v9892_v56  ;;  %v9902_v52 = vadd.f32 %v9755_v41, %v7585_v31  ;;  %v4226_v37 = vmul.f32 %v8317_v42, %v9798_v46 }
 0x2ef   : > { %v8321_v29 = vpop.eup %8320  ;;  %v4229_v2 = vmul.f32 %v8319_v16, %v9804_v54  ;;  %8340 = vrcp.f32 %v3850_v12  ;;  %7436 = vmatmul.mubr.bf16.gmra.mrb[224].mxu1 %v4303_v38  ;;  %v5940_v32 = vmul.f32 -1.442695, %v9896_v34  ;;  %v9907_v30 = vadd.f32 %v9755_v41, %v7586_v47 }
 0x2f0   : > { %v8323_v40 = vpop.eup %8322  ;;  %v4227_v22 = vmul.f32 %v8321_v29, %v9809_v26  ;;  %8342 = vpow2.f32 %v5939_v61  ;;  %v5943_v4 = vmul.f32 -1.442695, %v9902_v52 }
 0x2f1   : > { %v8325_v48 = vpop.eup %8324  ;;  %8344 = vpow2.f32 %v5937_v57  ;;  %v4305_v63 = vpack.c.bf16 %v4229_v2, %v4228_v0  ;;  %v7317_v10 = vpop.f32.mrb[120].mxu0  ;;  %v9913_v24 = vmul.f32 %v8323_v40, %v9818_v9  ;;  %v5941_v26 = vmul.f32 -1.442695, %v9907_v30 }
 0x2f2   : > { %v8327_v54 = vpop.eup %8326  ;;  %8346 = vpow2.f32 %v5942_v35  ;;  %v4304_v19 = vpack.c.bf16 %v4227_v22, %v4226_v37  ;;  %v7587_v8 = vadd.f32 %v7317_v10, %v10315_v15  ;;  %v3064_v27 = vpop.f32.mrb[121].mxu0  ;;  %v4230_v12 = vmul.f32 %v8325_v48, %v9823_v49  ;;  %v9948_v10 = vld [vmem:[%s10193_s4] ss:$0 sm:$0xff] }
 0x2f3   : > { %v8329_v33 = vpop.eup %8328  ;;  %v3853_v46 = vadd.f32 1.0, %v8327_v54  ;;  %8348 = vpow2.f32 %v5940_v32  ;;  %v7588_v61 = vadd.f32 %v3064_v27, %v10316_v25  ;;  %v7318_v38 = vpop.f32.mrb[122].mxu0  ;;  %v10319_v32 = vld [vmem:[#allocation16_spill] sm:$0xff] }
 0x2f4   : > { %v8331_v53 = vpop.eup %8330  ;;  %v3851_v44 = vadd.f32 1.0, %v8329_v33  ;;  %8350 = vpow2.f32 %v5943_v4  ;;  %7439 = vmatprep.mubr.bf16.mxu1 %v4304_v19  ;;  %v9919_v9 = vadd.f32 %v9755_v41, %v7587_v8  ;;  %v7589_v59 = vadd.f32 %v7318_v38, %v10317_v3  ;;  %v3067_v21 = vpop.f32.mrb[123].mxu0  ;;  %v10320_v4 = vld [vmem:[#allocation17_spill] sm:$0xff]  ;;  %v10321_v19 = vld [vmem:[#allocation18_spill] sm:$0xff] }
 0x2f5   : > { %v8333_v45 = vpop.eup %8332  ;;  %8352 = vrcp.f32 %v3853_v46  ;;  %v3856_v14 = vadd.f32 1.0, %v8331_v53  ;;  %v9923_v11 = vadd.f32 %v9755_v41, %v7588_v61  ;;  %v7590_v57 = vadd.f32 %v3067_v21, %v10318_v58 }
 0x2f6   : > { %v8335_v28 = vpop.eup %8334  ;;  %8354 = vrcp.f32 %v3851_v44  ;;  %v3854_v51 = vadd.f32 1.0, %v8333_v45  ;;  %v5946_v43 = vmul.f32 -1.442695, %v9919_v9  ;;  %v9928_v36 = vadd.f32 %v9755_v41, %v7589_v59 }
 0x2f7   : > { %v8337_v6 = vpop.eup %8336  ;;  %v4233_v5 = vmul.f32 %v8335_v28, %v9829_v17  ;;  %8356 = vrcp.f32 %v3856_v14  ;;  %7440 = vmatmul.mubr.bf16.gmra.mrb[228].mxu1 %v4305_v63  ;;  %v5944_v31 = vmul.f32 -1.442695, %v9923_v11  ;;  %v9933_v62 = vadd.f32 %v9755_v41, %v7590_v57  ;;  %v10322_v14 = vld [vmem:[#allocation19_spill] sm:$0xff] }
 0x2f8   : > { %v8339_v42 = vpop.eup %8338  ;;  %v4231_v60 = vmul.f32 %v8337_v6, %v9834_v20  ;;  %8358 = vrcp.f32 %v3854_v51  ;;  %v5947_v47 = vmul.f32 -1.442695, %v9928_v36 }
 0x2f9   : > { %v8341_v16 = vpop.eup %8340  ;;  %8360 = vpow2.f32 %v5941_v26  ;;  %v4307_v0 = vpack.c.bf16 %v4233_v5, %v9913_v24  ;;  %v7321_v17 = vpop.f32.mrb[124].mxu0  ;;  %v9940_v29 = vmul.f32 %v8339_v42, %v9844_v23  ;;  %v5945_v20 = vmul.f32 -1.442695, %v9933_v62 }
 0x2fa   : > { %v8343_v35 = vpop.eup %8342  ;;  %8362 = vpow2.f32 %v5946_v43  ;;  %v4306_v2 = vpack.c.bf16 %v4231_v60, %v4230_v12  ;;  %v7591_v40 = vadd.f32 %v7321_v17, %v10319_v32  ;;  %v3080_v37 = vpop.f32.mrb[125].mxu0  ;;  %v4234_v46 = vmul.f32 %v8341_v16, %v9849_v1 }
 0x2fb   : > { %v8345_v49 = vpop.eup %8344  ;;  %v3857_v22 = vadd.f32 1.0, %v8343_v35  ;;  %8364 = vpow2.f32 %v5944_v31  ;;  %v7592_v48 = vadd.f32 %v3080_v37, %v10320_v4  ;;  %v7322_v63 = vpop.f32.mrb[126].mxu0 }
 0x2fc   : > { %v8347_v23 = vpop.eup %8346  ;;  %v3855_v54 = vadd.f32 1.0, %v8345_v49  ;;  %8366 = vpow2.f32 %v5947_v47  ;;  %7443 = vmatprep.mubr.bf16.mxu1 %v4306_v2  ;;  %v9951_v24 = vadd.f32 %v9755_v41, %v7591_v40  ;;  %v7593_v15 = vadd.f32 %v7322_v63, %v10321_v19  ;;  %v7341_v8 = vpop.f32.mrb[128].mxu1 }
 0x2fd   : > { %v3083_v27 = vpop.f32.mrb[127].mxu0  ;;  %v8349_v33 = vpop.eup %8348  ;;  %8368 = vrcp.f32 %v3857_v22  ;;  %v3860_v26 = vadd.f32 1.0, %v8347_v23  ;;  %v9956_v25 = vadd.f32 %v9755_v41, %v7592_v48  ;;  %v4432_v3 = vadd.f32 %v7341_v8, %v9948_v10 }
 0x2fe   : > { %v4423_v61 = vpop.f32.mrb[129].mxu1  ;;  %v8351_v38 = vpop.eup %8350  ;;  %8370 = vrcp.f32 %v3855_v54  ;;  %v3858_v53 = vadd.f32 1.0, %v8349_v33  ;;  %v9959_v44 = vadd.f32 %v9755_v41, %v7593_v15  ;;  %v5950_v1 = vmul.f32 -1.442695, %v9951_v24 }
 0x2ff   : > { %v7342_v59 = vpop.f32.mrb[130].mxu1  ;;  %v8353_v21 = vpop.eup %8352  ;;  %8372 = vrcp.f32 %v3860_v26  ;;  %v3861_v45 = vadd.f32 1.0, %v8351_v38  ;;  %7444 = vmatmul.mubr.bf16.gmra.mrb[232].mxu1 %v4307_v0  ;;  %v7594_v58 = vadd.f32 %v3083_v27, %v10322_v14  ;;  %v5948_v43 = vmul.f32 -1.442695, %v9956_v25 }
 0x300   : > { %v4426_v57 = vpop.f32.mrb[131].mxu1  ;;  %v8355_v28 = vpop.eup %8354  ;;  %v4237_v51 = vmul.f32 %v8353_v21, %v9855_v55  ;;  %8374 = vrcp.f32 %v3858_v53  ;;  %v5951_v6 = vmul.f32 -1.442695, %v9959_v44  ;;  %v4424_v42 = vadd.f32 %v9948_v10, %v4423_v61 }
 0x301   : > { %v8357_v5 = vpop.eup %8356  ;;  %v4235_v31 = vmul.f32 %v8355_v28, %v9860_v50  ;;  %8376 = vrcp.f32 %v3861_v45  ;;  %v4435_v12 = vadd.f32 %v7342_v59, %v9948_v10  ;;  %v9972_v47 = vadd.f32 %v9755_v41, %v7594_v58 }
 0x302   : > { %v8359_v60 = vpop.eup %8358  ;;  %8378 = vpow2.f32 %v5945_v20  ;;  %v4427_v55 = vadd.f32 %v9948_v10, %v4426_v57  ;;  %v4309_v50 = vpack.c.bf16 %v4237_v51, %v9940_v29  ;;  %v4240_v63 = vmul.f32 %v8357_v5, %v9868_v7 }
 0x303   : > { %v8361_v16 = vpop.eup %8360  ;;  %8380 = vpow2.f32 %v5950_v1  ;;  %v6228_v0 = vpack.c.bf16 %v4435_v12, %v4432_v3  ;;  %v4308_v41 = vpack.c.bf16 %v4235_v31, %v4234_v46  ;;  %v5949_v49 = vmul.f32 -1.442695, %v9972_v47 }
 0x304   : > { %v8363_v17 = vpop.eup %8362  ;;  %v3859_v35 = vadd.f32 1.0, %v8361_v16  ;;  %8382 = vpow2.f32 %v5948_v43  ;;  %v6223_v2 = vpack.c.bf16 %v4427_v55, %v4424_v42  ;;  %v4238_v23 = vmul.f32 %v8359_v60, %v9872_v13 }
 0x305   : > { %v8365_v32 = vpop.eup %8364  ;;  %v3864_v40 = vadd.f32 1.0, %v8363_v17  ;;  %8384 = vpow2.f32 %v5951_v6  ;;  %6540 = vst [vmem:[%s9977_s6 + $0x8] sm:$0xff] %v6228_v0   ;;  %7447 = vmatprep.mubr.bf16.mxu1 %v4308_v41 }
 0x306   : > { %v8367_v37 = vpop.eup %8366  ;;  %8386 = vrcp.f32 %v3859_v35  ;;  %6224 = vst [vmem:[%s9977_s6] sm:$0xff] %v6223_v2   ;;  %v7345_v29 = vpop.f32.mrb[132].mxu1  ;;  %v3862_v19 = vadd.f32 1.0, %v8365_v32 }
 0x307   : > { %v8369_v22 = vpop.eup %8368  ;;  %8388 = vrcp.f32 %v3864_v40  ;;  %v3865_v20 = vadd.f32 1.0, %v8367_v37  ;;  %7448 = vmatmul.mubr.bf16.gmra.mrb[236].mxu1 %v4309_v50  ;;  %v4439_v4 = vpop.f32.mrb[133].mxu1  ;;  %v4448_v33 = vadd.f32 %v7345_v29, %v9948_v10 }
 0x308   : > { %v8371_v48 = vpop.eup %8370  ;;  %v4241_v54 = vmul.f32 %v8369_v22, %v9878_v18  ;;  %v7346_v15 = vpop.f32.mrb[134].mxu1  ;;  %v4440_v7 = vadd.f32 %v9948_v10, %v4439_v4 }
 0x309   : > { %v8373_v8 = vpop.eup %8372  ;;  %v4239_v27 = vmul.f32 %v8371_v48, %v9883_v39  ;;  %8390 = vrcp.f32 %v3865_v20  ;;  %v4451_v46 = vadd.f32 %v7346_v15, %v9948_v10  ;;  %v4442_v26 = vpop.f32.mrb[135].mxu1 }
 0x30a   : > { %v8375_v61 = vpop.eup %8374  ;;  %8392 = vpow2.f32 %v5949_v49  ;;  %v4443_v13 = vadd.f32 %v9948_v10, %v4442_v26  ;;  %v4311_v18 = vpack.c.bf16 %v4241_v54, %v4240_v63  ;;  %v4244_v39 = vmul.f32 %v8373_v8, %v9892_v56 }
 0x30b   : > { %v8377_v38 = vpop.eup %8376  ;;  %v6238_v53 = vpack.c.bf16 %v4451_v46, %v4448_v33  ;;  %v4310_v3 = vpack.c.bf16 %v4239_v27, %v4238_v23  ;;  %8394 = vrcp.f32 %v3862_v19  ;;  %v4242_v56 = vmul.f32 %v8375_v61, %v9896_v34 }
 0x30c   : > { %v8379_v59 = vpop.eup %8378  ;;  %v4245_v21 = vmul.f32 %v8377_v38, %v9902_v52  ;;  %v6233_v45 = vpack.c.bf16 %v4443_v13, %v4440_v7 }
 0x30d   : > { %v8381_v1 = vpop.eup %8380  ;;  %v3863_v14 = vadd.f32 1.0, %v8379_v59  ;;  %6542 = vst [vmem:[%s9977_s6 + $0x18] sm:$0xff] %v6238_v53   ;;  %7451 = vmatprep.mubr.bf16.mxu1 %v4310_v3 }
 0x30e   : > { %v8383_v58 = vpop.eup %8382  ;;  %v3868_v57 = vadd.f32 1.0, %v8381_v1  ;;  %6541 = vst [vmem:[%s9977_s6 + $0x10] sm:$0xff] %v6233_v45   ;;  %v7349_v28 = vpop.f32.mrb[136].mxu1  ;;  %v4313_v51 = vpack.c.bf16 %v4245_v21, %v4244_v39 }
 0x30f   : > { %v8385_v43 = vpop.eup %8384  ;;  %8396 = vrcp.f32 %v3863_v14  ;;  %7452 = vmatmul.mubr.bf16.gmra.mrb[240].mxu1 %v4311_v18  ;;  %v4455_v6 = vpop.f32.mrb[137].mxu1  ;;  %v3866_v60 = vadd.f32 1.0, %v8383_v58  ;;  %v4464_v55 = vadd.f32 %v7349_v28, %v9948_v10 }
 0x310   : > { %v8387_v5 = vpop.eup %8386  ;;  %8398 = vrcp.f32 %v3868_v57  ;;  %v3869_v52 = vadd.f32 1.0, %v8385_v43  ;;  %v7350_v31 = vpop.f32.mrb[138].mxu1  ;;  %v4456_v0 = vadd.f32 %v9948_v10, %v4455_v6 }
 0x311   : > { %v8389_v42 = vpop.eup %8388  ;;  %v4243_v12 = vmul.f32 %v8387_v5, %v9907_v30  ;;  %v4467_v50 = vadd.f32 %v7350_v31, %v9948_v10  ;;  %v4458_v16 = vpop.f32.mrb[139].mxu1 }
 0x312   : > { %8400 = vrcp.f32 %v3869_v52  ;;  %v4459_v17 = vadd.f32 %v9948_v10, %v4458_v16  ;;  %v4248_v32 = vmul.f32 %v8389_v42, %v9919_v9 }
 0x313   : > { %v8391_v34 = vpop.eup %8390  ;;  %v6248_v35 = vpack.c.bf16 %v4467_v50, %v4464_v55  ;;  %v4312_v2 = vpack.c.bf16 %v4243_v12, %v4242_v56  ;;  %8402 = vrcp.f32 %v3866_v60 }
 0x314   : > { %v8393_v41 = vpop.eup %8392  ;;  %v4249_v30 = vmul.f32 %v8391_v34, %v9928_v36  ;;  %v6243_v40 = vpack.c.bf16 %v4459_v17, %v4456_v0 }
 0x315   : > { %v3867_v37 = vadd.f32 1.0, %v8393_v41  ;;  %6544 = vst [vmem:[%s9977_s6 + $0x28] sm:$0xff] %v6248_v35   ;;  %7455 = vmatprep.mubr.bf16.mxu1 %v4312_v2  ;;  %v8395_v22 = vpop.eup %8394 }
 0x316   : > { %6543 = vst [vmem:[%s9977_s6 + $0x20] sm:$0xff] %v6243_v40   ;;  %v7353_v49 = vpop.f32.mrb[140].mxu1  ;;  %v4315_v29 = vpack.c.bf16 %v4249_v30, %v4248_v32  ;;  %v4246_v54 = vmul.f32 %v8395_v22, %v9923_v11 }
 0x317   : > { %8404 = vrcp.f32 %v3867_v37  ;;  %7456 = vmatmul.mubr.bf16.gmra.mrb[244].mxu1 %v4313_v51  ;;  %v4471_v20 = vpop.f32.mrb[141].mxu1  ;;  %v4480_v9 = vadd.f32 %v7353_v49, %v9948_v10 }
 0x318   : > { %v7354_v4 = vpop.f32.mrb[142].mxu1  ;;  %v4472_v15 = vadd.f32 %v9948_v10, %v4471_v20 }
 0x319   : > { %v8397_v48 = vpop.eup %8396  ;;  %v4483_v36 = vadd.f32 %v7354_v4, %v9948_v10  ;;  %v4474_v63 = vpop.f32.mrb[143].mxu1 }
 0x31a   : > { %v8399_v23 = vpop.eup %8398  ;;  %v4247_v19 = vmul.f32 %v8397_v48, %v9933_v62  ;;  %v4475_v8 = vadd.f32 %v9948_v10, %v4474_v63 }
 0x31b   : > { %v6258_v27 = vpack.c.bf16 %v4483_v36, %v4480_v9  ;;  %v4252_v61 = vmul.f32 %v8399_v23, %v9951_v24 }
 0x31c   : > { %v8401_v33 = vpop.eup %8400  ;;  %v6253_v46 = vpack.c.bf16 %v4475_v8, %v4472_v15  ;;  %v4314_v26 = vpack.c.bf16 %v4247_v19, %v4246_v54 }
 0x31d   : > { %v4253_v7 = vmul.f32 %v8401_v33, %v9959_v44  ;;  %6546 = vst [vmem:[%s9977_s6 + $0x38] sm:$0xff] %v6258_v27   ;;  %v8403_v18 = vpop.eup %8402 }
 0x31e   : > { %6545 = vst [vmem:[%s9977_s6 + $0x30] sm:$0xff] %v6253_v46   ;;  %7459 = vmatprep.mubr.bf16.mxu1 %v4314_v26  ;;  %v7357_v13 = vpop.f32.mrb[144].mxu1  ;;  %v4250_v24 = vmul.f32 %v8403_v18, %v9956_v25 }
 0x31f   : > { %7460 = vmatmul.mubr.bf16.gmra.mrb[248].mxu1 %v4315_v29  ;;  %v4487_v11 = vpop.f32.mrb[145].mxu1  ;;  %v4317_v62 = vpack.c.bf16 %v4253_v7, %v4252_v61  ;;  %v4496_v3 = vadd.f32 %v7357_v13, %v9948_v10 }
 0x320   : > { %v7358_v38 = vpop.f32.mrb[146].mxu1  ;;  %v4488_v21 = vadd.f32 %v9948_v10, %v4487_v11 }
 0x321   : > { %v8405_v53 = vpop.eup %8404  ;;  %v4499_v59 = vadd.f32 %v7358_v38, %v9948_v10  ;;  %v4490_v39 = vpop.f32.mrb[147].mxu1 }
 0x322   : > { %v4251_v44 = vmul.f32 %v8405_v53, %v9972_v47  ;;  %v4491_v45 = vadd.f32 %v9948_v10, %v4490_v39 }
 0x323   : > { %v6268_v1 = vpack.c.bf16 %v4499_v59, %v4496_v3 }
 0x324   : > { %v6263_v14 = vpack.c.bf16 %v4491_v45, %v4488_v21  ;;  %v4316_v58 = vpack.c.bf16 %v4251_v44, %v4250_v24 }
 0x325   : > { %6548 = vst [vmem:[%s9977_s6 + $0x48] sm:$0xff] %v6268_v1  }
 0x326   : > { %6547 = vst [vmem:[%s9977_s6 + $0x40] sm:$0xff] %v6263_v14   ;;  %7463 = vmatprep.mubr.bf16.mxu1 %v4316_v58  ;;  %v7361_v57 = vpop.f32.mrb[148].mxu1 }
 0x327   : > { %7464 = vmatmul.mubr.bf16.gmra.mrb[252].mxu1 %v4317_v62  ;;  %v4503_v28 = vpop.f32.mrb[149].mxu1  ;;  %v4512_v25 = vadd.f32 %v7361_v57, %v9948_v10 }
 0x328   : > { %v7362_v51 = vpop.f32.mrb[150].mxu1  ;;  %v4504_v6 = vadd.f32 %v9948_v10, %v4503_v28 }
 0x329   : > { %v4515_v47 = vadd.f32 %v7362_v51, %v9948_v10  ;;  %v4506_v43 = vpop.f32.mrb[151].mxu1 }
 0x32a   : > { %v4507_v5 = vadd.f32 %v9948_v10, %v4506_v43 }
 0x32b   : > { %v6278_v56 = vpack.c.bf16 %v4515_v47, %v4512_v25 }
 0x32c   : > { %v6273_v52 = vpack.c.bf16 %v4507_v5, %v4504_v6 }
 0x32d   : > { %6550 = vst [vmem:[%s9977_s6 + $0x58] sm:$0xff] %v6278_v56  }
 0x32e   : > { %6549 = vst [vmem:[%s9977_s6 + $0x50] sm:$0xff] %v6273_v52   ;;  %v7365_v31 = vpop.f32.mrb[152].mxu1 }
 0x32f   : > { %v4519_v42 = vpop.f32.mrb[153].mxu1  ;;  %v4528_v60 = vadd.f32 %v7365_v31, %v9948_v10 }
 0x330   : > { %v7366_v12 = vpop.f32.mrb[154].mxu1  ;;  %v4520_v16 = vadd.f32 %v9948_v10, %v4519_v42 }
 0x331   : > { %v4531_v55 = vadd.f32 %v7366_v12, %v9948_v10  ;;  %v4522_v50 = vpop.f32.mrb[155].mxu1 }
 0x332   : > { %v4523_v0 = vadd.f32 %v9948_v10, %v4522_v50 }
 0x333   : > { %v6288_v17 = vpack.c.bf16 %v4531_v55, %v4528_v60 }
 0x334   : > { %v6283_v34 = vpack.c.bf16 %v4523_v0, %v4520_v16 }
 0x335   : > { %6552 = vst [vmem:[%s9977_s6 + $0x68] sm:$0xff] %v6288_v17  }
 0x336   : > { %6551 = vst [vmem:[%s9977_s6 + $0x60] sm:$0xff] %v6283_v34   ;;  %v7369_v35 = vpop.f32.mrb[156].mxu1 }
 0x337   : > { %v4535_v2 = vpop.f32.mrb[157].mxu1  ;;  %v4544_v32 = vadd.f32 %v7369_v35, %v9948_v10 }
 0x338   : > { %v7370_v41 = vpop.f32.mrb[158].mxu1  ;;  %v4536_v37 = vadd.f32 %v9948_v10, %v4535_v2 }
 0x339   : > { %v4547_v30 = vadd.f32 %v7370_v41, %v9948_v10  ;;  %v4538_v40 = vpop.f32.mrb[159].mxu1 }
 0x33a   : > { %v4539_v49 = vadd.f32 %v9948_v10, %v4538_v40 }
 0x33b   : > { %v6298_v29 = vpack.c.bf16 %v4547_v30, %v4544_v32 }
 0x33c   : > { %v6293_v22 = vpack.c.bf16 %v4539_v49, %v4536_v37 }
 0x33d   : > { %6554 = vst [vmem:[%s9977_s6 + $0x78] sm:$0xff] %v6298_v29  }
 0x33e   : > { %6553 = vst [vmem:[%s9977_s6 + $0x70] sm:$0xff] %v6293_v22  }
 0x33f   : > { %v7373_v20 = vpop.f32.mrb[160].mxu1 }
 0x340   : > { %v4551_v4 = vpop.f32.mrb[161].mxu1  ;;  %v4560_v9 = vadd.f32 %v7373_v20, %v9948_v10 }
 0x341   : > { %v7374_v48 = vpop.f32.mrb[162].mxu1  ;;  %v4552_v23 = vadd.f32 %v9948_v10, %v4551_v4 }
 0x342   : > { %v4563_v36 = vadd.f32 %v7374_v48, %v9948_v10  ;;  %v4554_v63 = vpop.f32.mrb[163].mxu1 }
 0x343   : > { %v4555_v54 = vadd.f32 %v9948_v10, %v4554_v63 }
 0x344   : > { %v6308_v19 = vpack.c.bf16 %v4563_v36, %v4560_v9 }
 0x345   : > { %v6303_v15 = vpack.c.bf16 %v4555_v54, %v4552_v23 }
 0x346   : > { %6556 = vst [vmem:[%s9977_s6 + $0x88] sm:$0xff] %v6308_v19  }
 0x347   : > { %6555 = vst [vmem:[%s9977_s6 + $0x80] sm:$0xff] %v6303_v15   ;;  %v7377_v8 = vpop.f32.mrb[164].mxu1 }
 0x348   : > { %v4567_v27 = vpop.f32.mrb[165].mxu1  ;;  %v4576_v46 = vadd.f32 %v7377_v8, %v9948_v10 }
 0x349   : > { %v7378_v33 = vpop.f32.mrb[166].mxu1  ;;  %v4568_v7 = vadd.f32 %v9948_v10, %v4567_v27 }
 0x34a   : > { %v4579_v26 = vadd.f32 %v7378_v33, %v9948_v10  ;;  %v4570_v61 = vpop.f32.mrb[167].mxu1 }
 0x34b   : > { %v4571_v13 = vadd.f32 %v9948_v10, %v4570_v61 }
 0x34c   : > { %v6318_v18 = vpack.c.bf16 %v4579_v26, %v4576_v46 }
 0x34d   : > { %v6313_v11 = vpack.c.bf16 %v4571_v13, %v4568_v7 }
 0x34e   : > { %6558 = vst [vmem:[%s9977_s6 + $0x98] sm:$0xff] %v6318_v18  }
 0x34f   : > { %6557 = vst [vmem:[%s9977_s6 + $0x90] sm:$0xff] %v6313_v11   ;;  %v7381_v62 = vpop.f32.mrb[168].mxu1 }
 0x350   : > { %v4583_v38 = vpop.f32.mrb[169].mxu1  ;;  %v4592_v3 = vadd.f32 %v7381_v62, %v9948_v10 }
 0x351   : > { %v7382_v53 = vpop.f32.mrb[170].mxu1  ;;  %v4584_v24 = vadd.f32 %v9948_v10, %v4583_v38 }
 0x352   : > { %v4595_v59 = vadd.f32 %v7382_v53, %v9948_v10  ;;  %v4586_v39 = vpop.f32.mrb[171].mxu1 }
 0x353   : > { %v4587_v44 = vadd.f32 %v9948_v10, %v4586_v39 }
 0x354   : > { %v6328_v21 = vpack.c.bf16 %v4595_v59, %v4592_v3 }
 0x355   : > { %v6323_v45 = vpack.c.bf16 %v4587_v44, %v4584_v24 }
 0x356   : > { %6560 = vst [vmem:[%s9977_s6 + $0xa8] sm:$0xff] %v6328_v21  }
 0x357   : > { %6559 = vst [vmem:[%s9977_s6 + $0xa0] sm:$0xff] %v6323_v45  }
 0x358   : > { %v7385_v1 = vpop.f32.mrb[172].mxu1 }
 0x359   : > { %v4599_v14 = vpop.f32.mrb[173].mxu1  ;;  %v4608_v57 = vadd.f32 %v7385_v1, %v9948_v10 }
 0x35a   : > { %v7386_v58 = vpop.f32.mrb[174].mxu1  ;;  %v4600_v25 = vadd.f32 %v9948_v10, %v4599_v14 }
 0x35b   : > { %v4611_v28 = vadd.f32 %v7386_v58, %v9948_v10  ;;  %v4602_v51 = vpop.f32.mrb[175].mxu1 }
 0x35c   : > { %v4603_v47 = vadd.f32 %v9948_v10, %v4602_v51 }
 0x35d   : > { %v6338_v43 = vpack.c.bf16 %v4611_v28, %v4608_v57 }
 0x35e   : > { %v6333_v6 = vpack.c.bf16 %v4603_v47, %v4600_v25 }
 0x35f   : > { %6562 = vst [vmem:[%s9977_s6 + $0xb8] sm:$0xff] %v6338_v43  }
 0x360   : > { %6561 = vst [vmem:[%s9977_s6 + $0xb0] sm:$0xff] %v6333_v6   ;;  %v7389_v5 = vpop.f32.mrb[176].mxu1 }
 0x361   : > { %v4615_v56 = vpop.f32.mrb[177].mxu1  ;;  %v4624_v31 = vadd.f32 %v7389_v5, %v9948_v10 }
 0x362   : > { %v7390_v52 = vpop.f32.mrb[178].mxu1  ;;  %v4616_v60 = vadd.f32 %v9948_v10, %v4615_v56 }
 0x363   : > { %v4627_v42 = vadd.f32 %v7390_v52, %v9948_v10  ;;  %v4618_v12 = vpop.f32.mrb[179].mxu1 }
 0x364   : > { %v4619_v55 = vadd.f32 %v9948_v10, %v4618_v12 }
 0x365   : > { %v6348_v50 = vpack.c.bf16 %v4627_v42, %v4624_v31 }
 0x366   : > { %v6343_v16 = vpack.c.bf16 %v4619_v55, %v4616_v60 }
 0x367   : > { %6564 = vst [vmem:[%s9977_s6 + $0xc8] sm:$0xff] %v6348_v50  }
 0x368   : > { %6563 = vst [vmem:[%s9977_s6 + $0xc0] sm:$0xff] %v6343_v16   ;;  %v7393_v0 = vpop.f32.mrb[180].mxu1 }
 0x369   : > { %v4631_v17 = vpop.f32.mrb[181].mxu1  ;;  %v4640_v35 = vadd.f32 %v7393_v0, %v9948_v10 }
 0x36a   : > { %v7394_v34 = vpop.f32.mrb[182].mxu1  ;;  %v4632_v32 = vadd.f32 %v9948_v10, %v4631_v17 }
 0x36b   : > { %v4643_v2 = vadd.f32 %v7394_v34, %v9948_v10  ;;  %v4634_v41 = vpop.f32.mrb[183].mxu1 }
 0x36c   : > { %v4635_v30 = vadd.f32 %v9948_v10, %v4634_v41 }
 0x36d   : > { %v6358_v40 = vpack.c.bf16 %v4643_v2, %v4640_v35 }
 0x36e   : > { %v6353_v37 = vpack.c.bf16 %v4635_v30, %v4632_v32 }
 0x36f   : > { %6566 = vst [vmem:[%s9977_s6 + $0xd8] sm:$0xff] %v6358_v40  }
 0x370   : > { %6565 = vst [vmem:[%s9977_s6 + $0xd0] sm:$0xff] %v6353_v37  }
 0x371   : > { %v7397_v49 = vpop.f32.mrb[184].mxu1 }
 0x372   : > { %v4647_v29 = vpop.f32.mrb[185].mxu1  ;;  %v4656_v20 = vadd.f32 %v7397_v49, %v9948_v10 }
 0x373   : > { %v7398_v22 = vpop.f32.mrb[186].mxu1  ;;  %v4648_v9 = vadd.f32 %v9948_v10, %v4647_v29 }
 0x374   : > { %v4659_v4 = vadd.f32 %v7398_v22, %v9948_v10  ;;  %v4650_v48 = vpop.f32.mrb[187].mxu1 }
 0x375   : > { %v4651_v36 = vadd.f32 %v9948_v10, %v4650_v48 }
 0x376   : > { %v6368_v63 = vpack.c.bf16 %v4659_v4, %v4656_v20 }
 0x377   : > { %v6363_v23 = vpack.c.bf16 %v4651_v36, %v4648_v9 }
 0x378   : > { %6568 = vst [vmem:[%s9977_s6 + $0xe8] sm:$0xff] %v6368_v63  }
 0x379   : > { %6567 = vst [vmem:[%s9977_s6 + $0xe0] sm:$0xff] %v6363_v23   ;;  %v7401_v54 = vpop.f32.mrb[188].mxu1 }
 0x37a   : > { %v4663_v19 = vpop.f32.mrb[189].mxu1  ;;  %v4672_v8 = vadd.f32 %v7401_v54, %v9948_v10 }
 0x37b   : > { %v7402_v15 = vpop.f32.mrb[190].mxu1  ;;  %v4664_v46 = vadd.f32 %v9948_v10, %v4663_v19 }
 0x37c   : > { %v4675_v27 = vadd.f32 %v7402_v15, %v9948_v10  ;;  %v4666_v33 = vpop.f32.mrb[191].mxu1 }
 0x37d   : > { %v4667_v26 = vadd.f32 %v9948_v10, %v4666_v33 }
 0x37e   : > { %v6378_v61 = vpack.c.bf16 %v4675_v27, %v4672_v8 }
 0x37f   : > { %v6373_v7 = vpack.c.bf16 %v4667_v26, %v4664_v46 }
 0x380   : > { %6570 = vst [vmem:[%s9977_s6 + $0xf8] sm:$0xff] %v6378_v61  }
 0x381   : > { %6569 = vst [vmem:[%s9977_s6 + $0xf0] sm:$0xff] %v6373_v7   ;;  %v7405_v13 = vpop.f32.mrb[192].mxu1 }
 0x382   : > { %v4679_v18 = vpop.f32.mrb[193].mxu1  ;;  %v4688_v62 = vadd.f32 %v7405_v13, %v9948_v10 }
 0x383   : > { %v7406_v11 = vpop.f32.mrb[194].mxu1  ;;  %v4680_v3 = vadd.f32 %v9948_v10, %v4679_v18 }
 0x384   : > { %v4691_v38 = vadd.f32 %v7406_v11, %v9948_v10  ;;  %v4682_v53 = vpop.f32.mrb[195].mxu1 }
 0x385   : > { %v4683_v59 = vadd.f32 %v9948_v10, %v4682_v53 }
 0x386   : > { %v6388_v39 = vpack.c.bf16 %v4691_v38, %v4688_v62 }
 0x387   : > { %v6383_v24 = vpack.c.bf16 %v4683_v59, %v4680_v3 }
 0x388   : > { %6572 = vst [vmem:[%s9977_s6 + $0x108] sm:$0xff] %v6388_v39  }
 0x389   : > { %6571 = vst [vmem:[%s9977_s6 + $0x100] sm:$0xff] %v6383_v24  }
 0x38a   : > { %v7409_v44 = vpop.f32.mrb[196].mxu1 }
 0x38b   : > { %v4695_v21 = vpop.f32.mrb[197].mxu1  ;;  %v4704_v1 = vadd.f32 %v7409_v44, %v9948_v10 }
 0x38c   : > { %v7410_v45 = vpop.f32.mrb[198].mxu1  ;;  %v4696_v57 = vadd.f32 %v9948_v10, %v4695_v21 }
 0x38d   : > { %v4707_v14 = vadd.f32 %v7410_v45, %v9948_v10  ;;  %v4698_v58 = vpop.f32.mrb[199].mxu1 }
 0x38e   : > { %v4699_v28 = vadd.f32 %v9948_v10, %v4698_v58 }
 0x38f   : > { %v6398_v51 = vpack.c.bf16 %v4707_v14, %v4704_v1 }
 0x390   : > { %v6393_v25 = vpack.c.bf16 %v4699_v28, %v4696_v57 }
 0x391   : > { %6574 = vst [vmem:[%s9977_s6 + $0x118] sm:$0xff] %v6398_v51  }
 0x392   : > { %6573 = vst [vmem:[%s9977_s6 + $0x110] sm:$0xff] %v6393_v25   ;;  %v7413_v47 = vpop.f32.mrb[200].mxu1 }
 0x393   : > { %v4711_v43 = vpop.f32.mrb[201].mxu1  ;;  %v4720_v5 = vadd.f32 %v7413_v47, %v9948_v10 }
 0x394   : > { %v7414_v6 = vpop.f32.mrb[202].mxu1  ;;  %v4712_v31 = vadd.f32 %v9948_v10, %v4711_v43 }
 0x395   : > { %v4723_v56 = vadd.f32 %v7414_v6, %v9948_v10  ;;  %v4714_v52 = vpop.f32.mrb[203].mxu1 }
 0x396   : > { %v4715_v42 = vadd.f32 %v9948_v10, %v4714_v52 }
 0x397   : > { %v6408_v12 = vpack.c.bf16 %v4723_v56, %v4720_v5 }
 0x398   : > { %v6403_v60 = vpack.c.bf16 %v4715_v42, %v4712_v31 }
 0x399   : > { %6576 = vst [vmem:[%s9977_s6 + $0x128] sm:$0xff] %v6408_v12  }
 0x39a   : > { %6575 = vst [vmem:[%s9977_s6 + $0x120] sm:$0xff] %v6403_v60   ;;  %v7417_v55 = vpop.f32.mrb[204].mxu1 }
 0x39b   : > { %v4727_v50 = vpop.f32.mrb[205].mxu1  ;;  %v4736_v0 = vadd.f32 %v7417_v55, %v9948_v10 }
 0x39c   : > { %v7418_v16 = vpop.f32.mrb[206].mxu1  ;;  %v4728_v35 = vadd.f32 %v9948_v10, %v4727_v50 }
 0x39d   : > { %v4739_v17 = vadd.f32 %v7418_v16, %v9948_v10  ;;  %v4730_v34 = vpop.f32.mrb[207].mxu1 }
 0x39e   : > { %v4731_v2 = vadd.f32 %v9948_v10, %v4730_v34 }
 0x39f   : > { %v6418_v41 = vpack.c.bf16 %v4739_v17, %v4736_v0 }
 0x3a0   : > { %v6413_v32 = vpack.c.bf16 %v4731_v2, %v4728_v35 }
 0x3a1   : > { %6578 = vst [vmem:[%s9977_s6 + $0x138] sm:$0xff] %v6418_v41  }
 0x3a2   : > { %6577 = vst [vmem:[%s9977_s6 + $0x130] sm:$0xff] %v6413_v32   ;;  %v7421_v30 = vpop.f32.mrb[208].mxu1 }
 0x3a3   : > { %v4743_v40 = vpop.f32.mrb[209].mxu1  ;;  %v4752_v49 = vadd.f32 %v7421_v30, %v9948_v10 }
 0x3a4   : > { %v7422_v37 = vpop.f32.mrb[210].mxu1  ;;  %v4744_v20 = vadd.f32 %v9948_v10, %v4743_v40 }
 0x3a5   : > { %v4755_v29 = vadd.f32 %v7422_v37, %v9948_v10  ;;  %v4746_v22 = vpop.f32.mrb[211].mxu1 }
 0x3a6   : > { %v4747_v4 = vadd.f32 %v9948_v10, %v4746_v22 }
 0x3a7   : > { %v6428_v48 = vpack.c.bf16 %v4755_v29, %v4752_v49 }
 0x3a8   : > { %v6423_v9 = vpack.c.bf16 %v4747_v4, %v4744_v20 }
 0x3a9   : > { %6580 = vst [vmem:[%s9977_s6 + $0x148] sm:$0xff] %v6428_v48  }
 0x3aa   : > { %6579 = vst [vmem:[%s9977_s6 + $0x140] sm:$0xff] %v6423_v9   ;;  %v7425_v36 = vpop.f32.mrb[212].mxu1 }
 0x3ab   : > { %v4759_v63 = vpop.f32.mrb[213].mxu1  ;;  %v4768_v54 = vadd.f32 %v7425_v36, %v9948_v10 }
 0x3ac   : > { %v7426_v23 = vpop.f32.mrb[214].mxu1  ;;  %v4760_v8 = vadd.f32 %v9948_v10, %v4759_v63 }
 0x3ad   : > { %v4771_v19 = vadd.f32 %v7426_v23, %v9948_v10  ;;  %v4762_v15 = vpop.f32.mrb[215].mxu1 }
 0x3ae   : > { %v4763_v27 = vadd.f32 %v9948_v10, %v4762_v15 }
 0x3af   : > { %v6438_v33 = vpack.c.bf16 %v4771_v19, %v4768_v54 }
 0x3b0   : > { %v6433_v46 = vpack.c.bf16 %v4763_v27, %v4760_v8 }
 0x3b1   : > { %6582 = vst [vmem:[%s9977_s6 + $0x158] sm:$0xff] %v6438_v33  }
 0x3b2   : > { %6581 = vst [vmem:[%s9977_s6 + $0x150] sm:$0xff] %v6433_v46   ;;  %v7429_v26 = vpop.f32.mrb[216].mxu1 }
 0x3b3   : > { %v4775_v61 = vpop.f32.mrb[217].mxu1  ;;  %v4784_v13 = vadd.f32 %v7429_v26, %v9948_v10 }
 0x3b4   : > { %v7430_v7 = vpop.f32.mrb[218].mxu1  ;;  %v4776_v62 = vadd.f32 %v9948_v10, %v4775_v61 }
 0x3b5   : > { %v4787_v18 = vadd.f32 %v7430_v7, %v9948_v10  ;;  %v4778_v11 = vpop.f32.mrb[219].mxu1 }
 0x3b6   : > { %v4779_v38 = vadd.f32 %v9948_v10, %v4778_v11 }
 0x3b7   : > { %v6448_v53 = vpack.c.bf16 %v4787_v18, %v4784_v13 }
 0x3b8   : > { %v6443_v3 = vpack.c.bf16 %v4779_v38, %v4776_v62 }
 0x3b9   : > { %6584 = vst [vmem:[%s9977_s6 + $0x168] sm:$0xff] %v6448_v53  }
 0x3ba   : > { %6583 = vst [vmem:[%s9977_s6 + $0x160] sm:$0xff] %v6443_v3   ;;  %v7433_v59 = vpop.f32.mrb[220].mxu1 }
 0x3bb   : > { %v4791_v39 = vpop.f32.mrb[221].mxu1  ;;  %v4800_v44 = vadd.f32 %v7433_v59, %v9948_v10 }
 0x3bc   : > { %v7434_v24 = vpop.f32.mrb[222].mxu1  ;;  %v4792_v1 = vadd.f32 %v9948_v10, %v4791_v39 }
 0x3bd   : > { %v4803_v21 = vadd.f32 %v7434_v24, %v9948_v10  ;;  %v4794_v45 = vpop.f32.mrb[223].mxu1 }
 0x3be   : > { %v4795_v14 = vadd.f32 %v9948_v10, %v4794_v45 }
 0x3bf   : > { %v6458_v58 = vpack.c.bf16 %v4803_v21, %v4800_v44 }
 0x3c0   : > { %v6453_v57 = vpack.c.bf16 %v4795_v14, %v4792_v1 }
 0x3c1   : > { %6586 = vst [vmem:[%s9977_s6 + $0x178] sm:$0xff] %v6458_v58  }
 0x3c2   : > { %6585 = vst [vmem:[%s9977_s6 + $0x170] sm:$0xff] %v6453_v57   ;;  %v7437_v28 = vpop.f32.mrb[224].mxu1 }
 0x3c3   : > { %v4807_v51 = vpop.f32.mrb[225].mxu1  ;;  %v4816_v47 = vadd.f32 %v7437_v28, %v9948_v10 }
 0x3c4   : > { %v7438_v25 = vpop.f32.mrb[226].mxu1  ;;  %v4808_v5 = vadd.f32 %v9948_v10, %v4807_v51 }
 0x3c5   : > { %v4819_v43 = vadd.f32 %v7438_v25, %v9948_v10  ;;  %v4810_v6 = vpop.f32.mrb[227].mxu1 }
 0x3c6   : > { %v4811_v56 = vadd.f32 %v9948_v10, %v4810_v6 }
 0x3c7   : > { %v6468_v52 = vpack.c.bf16 %v4819_v43, %v4816_v47 }
 0x3c8   : > { %v6463_v31 = vpack.c.bf16 %v4811_v56, %v4808_v5 }
 0x3c9   : > { %6588 = vst [vmem:[%s9977_s6 + $0x188] sm:$0xff] %v6468_v52  }
 0x3ca   : > { %6587 = vst [vmem:[%s9977_s6 + $0x180] sm:$0xff] %v6463_v31   ;;  %v7441_v42 = vpop.f32.mrb[228].mxu1 }
 0x3cb   : > { %v4823_v12 = vpop.f32.mrb[229].mxu1  ;;  %v4832_v55 = vadd.f32 %v7441_v42, %v9948_v10 }
 0x3cc   : > { %v7442_v60 = vpop.f32.mrb[230].mxu1  ;;  %v4824_v0 = vadd.f32 %v9948_v10, %v4823_v12 }
 0x3cd   : > { %v4835_v50 = vadd.f32 %v7442_v60, %v9948_v10  ;;  %v4826_v16 = vpop.f32.mrb[231].mxu1 }
 0x3ce   : > { %v4827_v17 = vadd.f32 %v9948_v10, %v4826_v16 }
 0x3cf   : > { %v6478_v34 = vpack.c.bf16 %v4835_v50, %v4832_v55 }
 0x3d0   : > { %v6473_v35 = vpack.c.bf16 %v4827_v17, %v4824_v0 }
 0x3d1   : > { %6590 = vst [vmem:[%s9977_s6 + $0x198] sm:$0xff] %v6478_v34  }
 0x3d2   : > { %6589 = vst [vmem:[%s9977_s6 + $0x190] sm:$0xff] %v6473_v35   ;;  %v7445_v2 = vpop.f32.mrb[232].mxu1 }
 0x3d3   : > { %v4839_v41 = vpop.f32.mrb[233].mxu1  ;;  %v4848_v30 = vadd.f32 %v7445_v2, %v9948_v10 }
 0x3d4   : > { %v7446_v32 = vpop.f32.mrb[234].mxu1  ;;  %v4840_v49 = vadd.f32 %v9948_v10, %v4839_v41 }
 0x3d5   : > { %v4851_v40 = vadd.f32 %v7446_v32, %v9948_v10  ;;  %v4842_v37 = vpop.f32.mrb[235].mxu1 }
 0x3d6   : > { %v4843_v29 = vadd.f32 %v9948_v10, %v4842_v37 }
 0x3d7   : > { %v6488_v22 = vpack.c.bf16 %v4851_v40, %v4848_v30 }
 0x3d8   : > { %v6483_v20 = vpack.c.bf16 %v4843_v29, %v4840_v49 }
 0x3d9   : > { %6592 = vst [vmem:[%s9977_s6 + $0x1a8] sm:$0xff] %v6488_v22  }
 0x3da   : > { %6591 = vst [vmem:[%s9977_s6 + $0x1a0] sm:$0xff] %v6483_v20   ;;  %v7449_v4 = vpop.f32.mrb[236].mxu1 }
 0x3db   : > { %v4855_v48 = vpop.f32.mrb[237].mxu1  ;;  %v4864_v36 = vadd.f32 %v7449_v4, %v9948_v10 }
 0x3dc   : > { %v7450_v9 = vpop.f32.mrb[238].mxu1  ;;  %v4856_v54 = vadd.f32 %v9948_v10, %v4855_v48 }
 0x3dd   : > { %v4867_v63 = vadd.f32 %v7450_v9, %v9948_v10  ;;  %v4858_v23 = vpop.f32.mrb[239].mxu1 }
 0x3de   : > { %v4859_v19 = vadd.f32 %v9948_v10, %v4858_v23 }
 0x3df   : > { %v6498_v15 = vpack.c.bf16 %v4867_v63, %v4864_v36 }
 0x3e0   : > { %v6493_v8 = vpack.c.bf16 %v4859_v19, %v4856_v54 }
 0x3e1   : > { %6594 = vst [vmem:[%s9977_s6 + $0x1b8] sm:$0xff] %v6498_v15  }
 0x3e2   : > { %6593 = vst [vmem:[%s9977_s6 + $0x1b0] sm:$0xff] %v6493_v8   ;;  %v7453_v27 = vpop.f32.mrb[240].mxu1 }
 0x3e3   : > { %v4871_v33 = vpop.f32.mrb[241].mxu1  ;;  %v4880_v26 = vadd.f32 %v7453_v27, %v9948_v10 }
 0x3e4   : > { %v7454_v46 = vpop.f32.mrb[242].mxu1  ;;  %v4872_v13 = vadd.f32 %v9948_v10, %v4871_v33 }
 0x3e5   : > { %v4883_v61 = vadd.f32 %v7454_v46, %v9948_v10  ;;  %v4874_v7 = vpop.f32.mrb[243].mxu1 }
 0x3e6   : > { %v4875_v18 = vadd.f32 %v9948_v10, %v4874_v7 }
 0x3e7   : > { %v6508_v11 = vpack.c.bf16 %v4883_v61, %v4880_v26 }
 0x3e8   : > { %v6503_v62 = vpack.c.bf16 %v4875_v18, %v4872_v13 }
 0x3e9   : > { %6596 = vst [vmem:[%s9977_s6 + $0x1c8] sm:$0xff] %v6508_v11  }
 0x3ea   : > { %6595 = vst [vmem:[%s9977_s6 + $0x1c0] sm:$0xff] %v6503_v62   ;;  %v7457_v38 = vpop.f32.mrb[244].mxu1 }
 0x3eb   : > { %v4887_v53 = vpop.f32.mrb[245].mxu1  ;;  %v4896_v59 = vadd.f32 %v7457_v38, %v9948_v10 }
 0x3ec   : > { %v7458_v3 = vpop.f32.mrb[246].mxu1  ;;  %v4888_v44 = vadd.f32 %v9948_v10, %v4887_v53 }
 0x3ed   : > { %v4899_v39 = vadd.f32 %v7458_v3, %v9948_v10  ;;  %v4890_v24 = vpop.f32.mrb[247].mxu1 }
 0x3ee   : > { %v4891_v21 = vadd.f32 %v9948_v10, %v4890_v24 }
 0x3ef   : > { %v6518_v45 = vpack.c.bf16 %v4899_v39, %v4896_v59 }
 0x3f0   : > { %v6513_v1 = vpack.c.bf16 %v4891_v21, %v4888_v44 }
 0x3f1   : > { %6598 = vst [vmem:[%s9977_s6 + $0x1d8] sm:$0xff] %v6518_v45  }
 0x3f2   : > { %6597 = vst [vmem:[%s9977_s6 + $0x1d0] sm:$0xff] %v6513_v1   ;;  %v7461_v14 = vpop.f32.mrb[248].mxu1 }
 0x3f3   : > { %v4903_v58 = vpop.f32.mrb[249].mxu1  ;;  %v4912_v28 = vadd.f32 %v7461_v14, %v9948_v10 }
 0x3f4   : > { %v7462_v57 = vpop.f32.mrb[250].mxu1  ;;  %v4904_v47 = vadd.f32 %v9948_v10, %v4903_v58 }
 0x3f5   : > { %v4915_v51 = vadd.f32 %v7462_v57, %v9948_v10  ;;  %v4906_v25 = vpop.f32.mrb[251].mxu1 }
 0x3f6   : > { %v4907_v43 = vadd.f32 %v9948_v10, %v4906_v25 }
 0x3f7   : > { %v6528_v6 = vpack.c.bf16 %v4915_v51, %v4912_v28 }
 0x3f8   : > { %v6523_v5 = vpack.c.bf16 %v4907_v43, %v4904_v47 }
 0x3f9   : > { %6600 = vst [vmem:[%s9977_s6 + $0x1e8] sm:$0xff] %v6528_v6  }
 0x3fa   : > { %6599 = vst [vmem:[%s9977_s6 + $0x1e0] sm:$0xff] %v6523_v5   ;;  %v7465_v56 = vpop.f32.mrb[252].mxu1 }
 0x3fb   : > { %v4919_v52 = vpop.f32.mrb[253].mxu1  ;;  %v4928_v42 = vadd.f32 %v7465_v56, %v9948_v10 }
 0x3fc   : > { %v7466_v31 = vpop.f32.mrb[254].mxu1  ;;  %v4920_v55 = vadd.f32 %v9948_v10, %v4919_v52 }
 0x3fd   : > { %v4931_v12 = vadd.f32 %v7466_v31, %v9948_v10  ;;  %v4922_v60 = vpop.f32.mrb[255].mxu1 }
 0x3fe   : > { %v4923_v50 = vadd.f32 %v9948_v10, %v4922_v60 }
 0x3ff   : > { %v6538_v16 = vpack.c.bf16 %v4931_v12, %v4928_v42 }
 0x400   : > { %v6533_v0 = vpack.c.bf16 %v4923_v50, %v4920_v55 }
 0x401   : > { %6602 = vst [vmem:[%s9977_s6 + $0x1f8] sm:$0xff] %v6538_v16  }
 0x402   : > { %6601 = vst [vmem:[%s9977_s6 + $0x1f0] sm:$0xff] %v6533_v0  }
 0x403 PF: > { %s15_s18 = sadd.s32 1, %s8414_s18  }
 0x404   : > { %p12_p4 = scmp.ge.s32.totalorder %s15_s18, 4  }
 0x406   :  { %14 = sbr.rel (!%p12_p4) target bundleno = 1 (0x1), region = 72 }

// kernel: effv2s_deepsuper_forward.9
= control target key start
LH: loop header
LB: loop body
LE: loop exit
PB: predicated region body
PF: predicated region fallthrough
CT: control target
= control target key end

     0   :  { %s2968_s18 = smov 0   ;;  %s3427_s0 = inlined_call_operand.vmem [shape: bf16[2,272,256], index: 0, kind: input, shape index: {}]   ;;  %s3428_s1 = inlined_call_operand.vmem [shape: bf16[3,128,128], index: 1, kind: input, shape index: {}]   ;;  %s3429_s2 = inlined_call_operand.vmem [shape: f32[1,128], index: 2, kind: input, shape index: {}]   ;;  %s3430_s3 = inlined_call_operand.vmem [shape: bf16[128,128], index: 3, kind: input, shape index: {}]   ;;  %s3431_s4 = inlined_call_operand.vmem [shape: f32[1,128], index: 4, kind: input, shape index: {}]   ;;  %s3432_s5 = inlined_call_operand.vmem [shape: bf16[2,256,128], index: 5, kind: output, shape index: {}]  }
   0x1 LB: > { %s2045_s19 = sadd.s32 4294967295, %s2936_s18   ;;  %p2049_p0 = scmp.ge.s32.totalorder %s2936_s18, 1  ;;  %s2936_s18 = sphi %s2968_s18, %s15_s18  }
   0x2   : > { %p187_p1 = scmp.lt.s32.totalorder %s2936_s18, 3 }
   0x4   : > { %p188_p2 = pnand %p2049_p0, %p187_p1 }
   0x5   : > { %v2722_v0 = vld [vmem:[%s3428_s1] sm:$0xff] (!%p188_p2)   ;;  %p215_p3 = scmp.lt.s32.totalorder (!%p188_p2), %s2045_s19, 1  ;;  %v2723_v1 = vld [vmem:[%s3428_s1 + $0x8] sm:$0xff] (!%p188_p2)   ;;  %v2724_v2 = vld [vmem:[%s3428_s1 + $0x10] sm:$0xff] (!%p188_p2)  }
   0x6   : > { %191 = sbr.rel (%p188_p2) target bundleno = 631 (0x277), region = 40  ;;  %2505 = vmatprep.subr.bf16.mxu0 (!%p188_p2), %v2722_v0  ;;  %v2725_v3 = vld [vmem:[%s3428_s1 + $0x18] sm:$0xff] (!%p188_p2)   ;;  %v2726_v5 = vld [vmem:[%s3428_s1 + $0x20] sm:$0xff] (!%p188_p2)   ;;  %v2727_v6 = vld [vmem:[%s3428_s1 + $0x28] sm:$0xff] (!%p188_p2)  }
   0x7   : > { %2506 = vmatpush3.bf16.msra.mxu0 (!%p188_p2), %v2722_v0  ;;  %v2728_v7 = vld [vmem:[%s3428_s1 + $0x30] sm:$0xff] (!%p188_p2)   ;;  %v2742_v8 = vld [vmem:[%s3428_s1 + $0x40] sm:$0xff] (!%p188_p2)   ;;  %v2729_v9 = vld [vmem:[%s3428_s1 + $0x38] sm:$0xff] (!%p188_p2)  }
   0x8   : > { %2507 = vmatprep.subr.bf16.mxu0 (!%p188_p2), %v2723_v1  ;;  %2457 = vmatprep.subr.bf16.mxu1 (!%p188_p2), %v2742_v8  ;;  %v2746_v10 = vld [vmem:[%s3428_s1 + $0x48] sm:$0xff] (!%p188_p2)   ;;  %v2747_v11 = vld [vmem:[%s3428_s1 + $0x50] sm:$0xff] (!%p188_p2)   ;;  %v2732_v12 = vld [vmem:[%s3428_s1 + $0x80] sm:$0xff] (!%p188_p2)  }
   0x9   : > { %2458 = vmatpush3.bf16.msra.mxu1 (!%p188_p2), %v2742_v8  ;;  %v2751_v13 = vld [vmem:[%s3428_s1 + $0x58] sm:$0xff] (!%p188_p2)   ;;  %v2735_v16 = vld [vmem:[%s3428_s1 + $0x88] sm:$0xff] (!%p188_p2)   ;;  %v2752_v17 = vld [vmem:[%s3428_s1 + $0x60] sm:$0xff] (!%p188_p2)  }
   0xa   : > { %2459 = vmatprep.subr.bf16.mxu1 (!%p188_p2), %v2746_v10  ;;  %v2738_v19 = vld [vmem:[%s3428_s1 + $0x90] sm:$0xff] (!%p188_p2)   ;;  %v2756_v20 = vld [vmem:[%s3428_s1 + $0x68] sm:$0xff] (!%p188_p2)   ;;  %v2741_v22 = vld [vmem:[%s3428_s1 + $0x98] sm:$0xff] (!%p188_p2)  }
   0xb   : > { %2508 = vmatpush3.bf16.msra.mxu0 (!%p188_p2), %v2723_v1  ;;  %v2757_v24 = vld [vmem:[%s3428_s1 + $0x70] sm:$0xff] (!%p188_p2)   ;;  %v2745_v25 = vld [vmem:[%s3428_s1 + $0xa0] sm:$0xff] (!%p188_p2)   ;;  %v2761_v26 = vld [vmem:[%s3428_s1 + $0x78] sm:$0xff] (!%p188_p2)  }
   0xc   : > { %2509 = vmatprep.subr.bf16.mxu0 (!%p188_p2), %v2724_v2  ;;  %v2750_v29 = vld [vmem:[%s3428_s1 + $0xa8] sm:$0xff] (!%p188_p2)   ;;  %v2755_v30 = vld [vmem:[%s3428_s1 + $0xb0] sm:$0xff] (!%p188_p2)   ;;  %v2760_v35 = vld [vmem:[%s3428_s1 + $0xb8] sm:$0xff] (!%p188_p2)  }
   0xd   : > { %s3434_s19 = smov (!%p215_p3, %s2045_s19), 1  ;;  %2460 = vmatpush3.bf16.msra.mxu1 %v2746_v10  ;;  %v2794_v44 = vld [vmem:[%s3430_s3] sm:$0xff]   ;;  %v2795_v46 = vld [vmem:[%s3430_s3 + $0x8] sm:$0xff]   ;;  %v2796_v48 = vld [vmem:[%s3430_s3 + $0x10] sm:$0xff]  }
   0xe   : > { %s2713_s26 = smul.u32 272, %s3434_s19  ;;  %2461 = vmatprep.subr.bf16.mxu1 %v2747_v11  ;;  %v2797_v8 = vld [vmem:[%s3430_s3 + $0x18] sm:$0xff]   ;;  %s2233_s24 = sshll.u32 %s3434_s19, 7 }
   0xf   : > { %2510 = vmatpush3.bf16.msra.mxu0 %v2724_v2  ;;  %s3377_s27 = scalar_lea.vmem %s3432_s5, %s2233_s24 }
  0x10   : > { %s2991_s29 = scalar_lea.vmem %s3427_s0, %s2713_s26  ;;  %2511 = vmatprep.subr.bf16.mxu0 %v2725_v3 }
  0x11   : > { %v2730_v4 = vld [vmem:[%s2991_s29] ss:$8 sps:$4 sm:$0xff]   ;;  %v2731_v14 = vld [vmem:[%s2991_s29 + $0x10] ss:$8 sps:$4 sm:$0xff]   ;;  %2462 = vmatpush3.bf16.msra.mxu1 %v2747_v11  ;;  %v2762_v23 = vld [vmem:[%s2991_s29 + $0x4] ss:$8 sps:$4 sm:$0xff]  }
  0x12   : > { %2521 = vmatprep.mubr.bf16.mxu0 %v2730_v4  ;;  %v2733_v15 = vld [vmem:[%s2991_s29 + $0x20] ss:$8 sps:$4 sm:$0xff]   ;;  %2463 = vmatprep.subr.bf16.mxu1 %v2751_v13  ;;  %v2734_v18 = vld [vmem:[%s2991_s29 + $0x30] ss:$8 sps:$4 sm:$0xff]   ;;  %v2763_v31 = vld [vmem:[%s2991_s29 + $0x14] ss:$8 sps:$4 sm:$0xff]  }
  0x13   : > { %2512 = vmatpush3.bf16.msra.mxu0 %v2725_v3  ;;  %v2736_v21 = vld [vmem:[%s2991_s29 + $0x40] ss:$8 sps:$4 sm:$0xff]   ;;  %2473 = vmatprep.mubr.bf16.mxu1 %v2762_v23  ;;  %v2737_v27 = vld [vmem:[%s2991_s29 + $0x50] ss:$8 sps:$4 sm:$0xff]   ;;  %v2766_v32 = vld [vmem:[%s2991_s29 + $0x24] ss:$8 sps:$4 sm:$0xff]  }
  0x14   : > { %2513 = vmatprep.subr.bf16.mxu0 %v2726_v5  ;;  %v2739_v28 = vld [vmem:[%s2991_s29 + $0x60] ss:$8 sps:$4 sm:$0xff]   ;;  %v2740_v33 = vld [vmem:[%s2991_s29 + $0x70] ss:$8 sps:$4 sm:$0xff]   ;;  %v2767_v36 = vld [vmem:[%s2991_s29 + $0x34] ss:$8 sps:$4 sm:$0xff]  }
  0x15   : > { %2464 = vmatpush3.bf16.msra.mxu1 %v2751_v13  ;;  %v2743_v34 = vld [vmem:[%s2991_s29 + $0x80] ss:$8 sps:$4 sm:$0xff]   ;;  %v2770_v37 = vld [vmem:[%s2991_s29 + $0x44] ss:$8 sps:$4 sm:$0xff]   ;;  %v2744_v38 = vld [vmem:[%s2991_s29 + $0x90] ss:$8 sps:$4 sm:$0xff]  }
  0x16   : > { %2465 = vmatprep.subr.bf16.mxu1 %v2752_v17  ;;  %v2748_v39 = vld [vmem:[%s2991_s29 + $0xa0] ss:$8 sps:$4 sm:$0xff]   ;;  %v2771_v40 = vld [vmem:[%s2991_s29 + $0x54] ss:$8 sps:$4 sm:$0xff]   ;;  %v2774_v41 = vld [vmem:[%s2991_s29 + $0x64] ss:$8 sps:$4 sm:$0xff]  }
  0x17   : > { %2514 = vmatpush3.bf16.msra.mxu0 %v2726_v5  ;;  %v2749_v42 = vld [vmem:[%s2991_s29 + $0xb0] ss:$8 sps:$4 sm:$0xff]   ;;  %v2753_v43 = vld [vmem:[%s2991_s29 + $0xc0] ss:$8 sps:$4 sm:$0xff]   ;;  %v2775_v45 = vld [vmem:[%s2991_s29 + $0x74] ss:$8 sps:$4 sm:$0xff]  }
  0x18   : > { %2515 = vmatprep.subr.bf16.mxu0 %v2727_v6  ;;  %v2778_v47 = vld [vmem:[%s2991_s29 + $0x84] ss:$8 sps:$4 sm:$0xff]   ;;  %v2754_v49 = vld [vmem:[%s2991_s29 + $0xd0] ss:$8 sps:$4 sm:$0xff]   ;;  %v2758_v50 = vld [vmem:[%s2991_s29 + $0xe0] ss:$8 sps:$4 sm:$0xff]  }
  0x19   : > { %2466 = vmatpush3.bf16.msra.mxu1 %v2752_v17  ;;  %v2779_v51 = vld [vmem:[%s2991_s29 + $0x94] ss:$8 sps:$4 sm:$0xff]   ;;  %v2782_v52 = vld [vmem:[%s2991_s29 + $0xa4] ss:$8 sps:$4 sm:$0xff]   ;;  %v2759_v53 = vld [vmem:[%s2991_s29 + $0xf0] ss:$8 sps:$4 sm:$0xff]  }
  0x1a   : > { %2467 = vmatprep.subr.bf16.mxu1 %v2756_v20  ;;  %v2764_v54 = vld [vmem:[%s2991_s29 + $0x10] ss:$8 sps:$4 sm:$0xff]   ;;  %v2783_v55 = vld [vmem:[%s2991_s29 + $0xb4] ss:$8 sps:$4 sm:$0xff]   ;;  %v2786_v56 = vld [vmem:[%s2991_s29 + $0xc4] ss:$8 sps:$4 sm:$0xff]  }
  0x1b   : > { %2516 = vmatpush3.bf16.msra.mxu0 %v2727_v6  ;;  %v2765_v57 = vld [vmem:[%s2991_s29 + $0x20] ss:$8 sps:$4 sm:$0xff]   ;;  %v2768_v58 = vld [vmem:[%s2991_s29 + $0x30] ss:$8 sps:$4 sm:$0xff]   ;;  %v2787_v59 = vld [vmem:[%s2991_s29 + $0xd4] ss:$8 sps:$4 sm:$0xff]  }
  0x1c   : > { %2517 = vmatprep.subr.bf16.mxu0 %v2728_v7  ;;  %v2790_v60 = vld [vmem:[%s2991_s29 + $0xe4] ss:$8 sps:$4 sm:$0xff]   ;;  %v2769_v61 = vld [vmem:[%s2991_s29 + $0x40] ss:$8 sps:$4 sm:$0xff]   ;;  %v2772_v62 = vld [vmem:[%s2991_s29 + $0x50] ss:$8 sps:$4 sm:$0xff]  }
  0x1d   : > { %2468 = vmatpush3.bf16.msra.mxu1 %v2756_v20  ;;  %v2791_v63 = vld [vmem:[%s2991_s29 + $0xf4] ss:$8 sps:$4 sm:$0xff]   ;;  %v2773_v0 = vld [vmem:[%s2991_s29 + $0x60] ss:$8 sps:$4 sm:$0xff]   ;;  %v2776_v1 = vld [vmem:[%s2991_s29 + $0x70] ss:$8 sps:$4 sm:$0xff]  }
  0x1e   : > { %2469 = vmatprep.subr.bf16.mxu1 %v2757_v24  ;;  %v2777_v2 = vld [vmem:[%s2991_s29 + $0x80] ss:$8 sps:$4 sm:$0xff]   ;;  %v2780_v3 = vld [vmem:[%s2991_s29 + $0x90] ss:$8 sps:$4 sm:$0xff]  }
  0x1f   : > { %2518 = vmatpush3.bf16.msra.mxu0 %v2728_v7  ;;  %v2781_v4 = vld [vmem:[%s2991_s29 + $0xa0] ss:$8 sps:$4 sm:$0xff]   ;;  %v2784_v5 = vld [vmem:[%s2991_s29 + $0xb0] ss:$8 sps:$4 sm:$0xff]  }
  0x20   : > { %2519 = vmatprep.subr.bf16.mxu0 %v2729_v9  ;;  %v2785_v6 = vld [vmem:[%s2991_s29 + $0xc0] ss:$8 sps:$4 sm:$0xff]   ;;  %v2788_v7 = vld [vmem:[%s2991_s29 + $0xd0] ss:$8 sps:$4 sm:$0xff]  }
  0x21   : > { %2470 = vmatpush3.bf16.msra.mxu1 %v2757_v24  ;;  %v2792_v10 = vld [vmem:[%s2991_s29 + $0xf0] ss:$8 sps:$4 sm:$0xff]   ;;  %v2793_v11 = vld [vmem:[%s2991_s29 + $0x100] ss:$8 sps:$4 sm:$0xff]  }
  0x22   : > { %2471 = vmatprep.subr.bf16.mxu1 %v2761_v26  ;;  %v2799_v13 = vld [vmem:[%s3430_s3 + $0x28] sm:$0xff]  }
  0x23   : > { %2520 = vmatpush3.bf16.msra.mxu0 %v2729_v9  ;;  %v2789_v9 = vld [vmem:[%s2991_s29 + $0xe0] ss:$8 sps:$4 sm:$0xff]  }
  0x24   : > { %2553 = vmatprep.subr.bf16.mxu0 %v2732_v12 }
  0x25   : > { %2472 = vmatpush3.bf16.msra.mxu1 %v2761_v26 }
  0x26   : > { %2522 = vmatmul.mubr.bf16.vlgmr.msra.gmra.mrb[0].mxu0 %v2731_v14  ;;  %2601 = vmatprep.subr.bf16.mxu1 %v2794_v44  ;;  %v2800_v14 = vld [vmem:[%s3430_s3 + $0x30] sm:$0xff]  }
  0x27   : > { %2554 = vmatpush3.bf16.msra.mxu0 %v2732_v12  ;;  %2525 = vmatprep.mubr.bf16.mxu0 %v2733_v15  ;;  %v2798_v12 = vld [vmem:[%s3430_s3 + $0x20] sm:$0xff]   ;;  %v2801_v15 = vld [vmem:[%s3430_s3 + $0x38] sm:$0xff]  }
  0x28   : > { %2555 = vmatprep.subr.bf16.mxu0 %v2735_v16  ;;  %2474 = vmatmul.mubr.bf16.vlgmr.msra.gmra.mrb[0].mxu1 %v2763_v31 }
  0x29   : > { %2477 = vmatprep.mubr.bf16.mxu1 %v2766_v32  ;;  %2602 = vmatpush3.bf16.msra.mxu1 %v2794_v44 }
  0x2a   : > { %2603 = vmatprep.subr.bf16.mxu1 %v2795_v46 }
  0x2b   : > { %2556 = vmatpush3.bf16.msra.mxu0 %v2735_v16 }
  0x2c   : > { %2557 = vmatprep.subr.bf16.mxu0 %v2738_v19 }
  0x2d   : > { %2604 = vmatpush3.bf16.msra.mxu1 %v2795_v46 }
  0x2e   : > { %2526 = vmatmul.mubr.bf16.gmra.mrb[4].mxu0 %v2734_v18  ;;  %2605 = vmatprep.subr.bf16.mxu1 %v2796_v48 }
  0x2f   : > { %2529 = vmatprep.mubr.bf16.mxu0 %v2736_v21  ;;  %2558 = vmatpush3.bf16.msra.mxu0 %v2738_v19 }
  0x30   : > { %2559 = vmatprep.subr.bf16.mxu0 %v2741_v22  ;;  %2478 = vmatmul.mubr.bf16.gmra.mrb[4].mxu1 %v2767_v36 }
  0x31   : > { %2481 = vmatprep.mubr.bf16.mxu1 %v2770_v37  ;;  %2606 = vmatpush3.bf16.msra.mxu1 %v2796_v48 }
  0x32   : > { %2607 = vmatprep.subr.bf16.mxu1 %v2797_v8 }
  0x33   : > { %2560 = vmatpush3.bf16.msra.mxu0 %v2741_v22 }
  0x34   : > { %2561 = vmatprep.subr.bf16.mxu0 %v2745_v25 }
  0x35   : > { %2608 = vmatpush3.bf16.msra.mxu1 %v2797_v8 }
  0x36   : > { %2530 = vmatmul.mubr.bf16.gmra.mrb[8].mxu0 %v2737_v27  ;;  %2609 = vmatprep.subr.bf16.mxu1 %v2798_v12 }
  0x37   : > { %2533 = vmatprep.mubr.bf16.mxu0 %v2739_v28  ;;  %2562 = vmatpush3.bf16.msra.mxu0 %v2745_v25 }
  0x38   : > { %2563 = vmatprep.subr.bf16.mxu0 %v2750_v29  ;;  %2482 = vmatmul.mubr.bf16.gmra.mrb[8].mxu1 %v2771_v40  ;;  %v3161_v40 = vld [vmem:[%s3429_s2] ss:$0 sm:$0xff] }
  0x39   : > { %2485 = vmatprep.mubr.bf16.mxu1 %v2774_v41  ;;  %2610 = vmatpush3.bf16.msra.mxu1 %v2798_v12 }
  0x3a   : > { %2611 = vmatprep.subr.bf16.mxu1 %v2799_v13 }
  0x3b   : > { %2564 = vmatpush3.bf16.msra.mxu0 %v2750_v29 }
  0x3c   : > { %2565 = vmatprep.subr.bf16.mxu0 %v2755_v30 }
  0x3d   : > { %2612 = vmatpush3.bf16.msra.mxu1 %v2799_v13 }
  0x3e   : > { %2534 = vmatmul.mubr.bf16.gmra.mrb[12].mxu0 %v2740_v33  ;;  %2613 = vmatprep.subr.bf16.mxu1 %v2800_v14 }
  0x3f   : > { %2537 = vmatprep.mubr.bf16.mxu0 %v2743_v34  ;;  %2566 = vmatpush3.bf16.msra.mxu0 %v2755_v30 }
  0x40   : > { %2567 = vmatprep.subr.bf16.mxu0 %v2760_v35  ;;  %2486 = vmatmul.mubr.bf16.gmra.mrb[12].mxu1 %v2775_v45 }
  0x41   : > { %2489 = vmatprep.mubr.bf16.mxu1 %v2778_v47  ;;  %2614 = vmatpush3.bf16.msra.mxu1 %v2800_v14 }
  0x42   : > { %2615 = vmatprep.subr.bf16.mxu1 %v2801_v15 }
  0x43   : > { %2568 = vmatpush3.bf16.msra.mxu0 %v2760_v35 }
  0x45   : > { %2616 = vmatpush3.bf16.msra.mxu1 %v2801_v15 }
  0x46   : > { %2538 = vmatmul.mubr.bf16.gmra.mrb[16].mxu0 %v2744_v38 }
  0x47   : > { %2541 = vmatprep.mubr.bf16.mxu0 %v2748_v39 }
  0x48   : > { %2490 = vmatmul.mubr.bf16.gmra.mrb[16].mxu1 %v2779_v51 }
  0x49   : > { %2493 = vmatprep.mubr.bf16.mxu1 %v2782_v52 }
  0x4e   : > { %2542 = vmatmul.mubr.bf16.gmra.mrb[20].mxu0 %v2749_v42 }
  0x4f   : > { %2545 = vmatprep.mubr.bf16.mxu0 %v2753_v43 }
  0x50   : > { %2494 = vmatmul.mubr.bf16.gmra.mrb[20].mxu1 %v2783_v55 }
  0x51   : > { %2497 = vmatprep.mubr.bf16.mxu1 %v2786_v56 }
  0x56   : > { %2546 = vmatmul.mubr.bf16.gmra.mrb[24].mxu0 %v2754_v49 }
  0x57   : > { %2549 = vmatprep.mubr.bf16.mxu0 %v2758_v50 }
  0x58   : > { %2498 = vmatmul.mubr.bf16.gmra.mrb[24].mxu1 %v2787_v59 }
  0x59   : > { %2501 = vmatprep.mubr.bf16.mxu1 %v2790_v60 }
  0x5e   : > { %2550 = vmatmul.mubr.bf16.gmra.mrb[28].mxu0 %v2759_v53 }
  0x5f   : > { %2569 = vmatprep.mubr.bf16.mxu0 %v2764_v54 }
  0x60   : > { %2502 = vmatmul.mubr.bf16.gmra.mrb[28].mxu1 %v2791_v63 }
  0x66   : > { %2570 = vmatmul.mubr.bf16.vlgmr.msra.gmra.mrb[0].mxu0 %v2765_v57 }
  0x67   : > { %2573 = vmatprep.mubr.bf16.mxu0 %v2768_v58 }
  0x6e   : > { %2574 = vmatmul.mubr.bf16.gmra.mrb[4].mxu0 %v2769_v61 }
  0x6f   : > { %2577 = vmatprep.mubr.bf16.mxu0 %v2772_v62 }
  0x76   : > { %2578 = vmatmul.mubr.bf16.gmra.mrb[8].mxu0 %v2773_v0 }
  0x77   : > { %2581 = vmatprep.mubr.bf16.mxu0 %v2776_v1 }
  0x7e   : > { %2582 = vmatmul.mubr.bf16.gmra.mrb[12].mxu0 %v2777_v2 }
  0x7f   : > { %2585 = vmatprep.mubr.bf16.mxu0 %v2780_v3 }
  0x86   : > { %2586 = vmatmul.mubr.bf16.gmra.mrb[16].mxu0 %v2781_v4 }
  0x87   : > { %2589 = vmatprep.mubr.bf16.mxu0 %v2784_v5 }
  0x8e   : > { %2590 = vmatmul.mubr.bf16.gmra.mrb[20].mxu0 %v2785_v6 }
  0x8f   : > { %2593 = vmatprep.mubr.bf16.mxu0 %v2788_v7 }
  0x96   : > { %2594 = vmatmul.mubr.bf16.gmra.mrb[24].mxu0 %v2789_v9 }
  0x97   : > { %2597 = vmatprep.mubr.bf16.mxu0 %v2792_v10 }
  0x9e   : > { %2598 = vmatmul.mubr.bf16.gmra.mrb[28].mxu0 %v2793_v11 }
  0xfb   : > { %v2475_v16 = vpop.f32.mrb[0].mxu1 }
  0xfc   : > { %v501_v17 = vpop.f32.mrb[1].mxu1 }
  0xfd   : > { %v2476_v18 = vpop.f32.mrb[2].mxu1 }
  0xfe   : > { %v504_v19 = vpop.f32.mrb[3].mxu1 }
 0x103   : > { %v2479_v20 = vpop.f32.mrb[4].mxu1 }
 0x104   : > { %v517_v21 = vpop.f32.mrb[5].mxu1 }
 0x105   : > { %v2480_v22 = vpop.f32.mrb[6].mxu1 }
 0x106   : > { %v520_v23 = vpop.f32.mrb[7].mxu1 }
 0x10b   : > { %v3128_v24 = vpop.f32.mrb[8].mxu1 }
 0x10c   : > { %v3130_v25 = vpop.f32.mrb[9].mxu1 }
 0x10d   : > { %v3132_v26 = vpop.f32.mrb[10].mxu1 }
 0x10e   : > { %v3134_v27 = vpop.f32.mrb[11].mxu1 }
 0x113   : > { %v3136_v28 = vpop.f32.mrb[12].mxu1 }
 0x114   : > { %v3138_v29 = vpop.f32.mrb[13].mxu1 }
 0x115   : > { %v3140_v30 = vpop.f32.mrb[14].mxu1 }
 0x116   : > { %v3142_v31 = vpop.f32.mrb[15].mxu1 }
 0x11b   : > { %v3144_v32 = vpop.f32.mrb[16].mxu1 }
 0x11c   : > { %v3146_v33 = vpop.f32.mrb[17].mxu1 }
 0x11d   : > { %v3148_v34 = vpop.f32.mrb[18].mxu1 }
 0x11e   : > { %v3150_v35 = vpop.f32.mrb[19].mxu1 }
 0x123   : > { %v3152_v36 = vpop.f32.mrb[20].mxu1 }
 0x124   : > { %v3154_v37 = vpop.f32.mrb[21].mxu1 }
 0x125   : > { %v3156_v38 = vpop.f32.mrb[22].mxu1 }
 0x126   : > { %v3163_v41 = vpop.f32.mrb[23].mxu1 }
 0x12b   : > { %v3175_v53 = vpop.f32.mrb[24].mxu1 }
 0x12c   : > { %v3181_v56 = vpop.f32.mrb[25].mxu1 }
 0x12d   : > { %v3184_v58 = vpop.f32.mrb[26].mxu1 }
 0x12e   : > { %v3187_v61 = vpop.f32.mrb[27].mxu1 }
 0x133   : > { %v3199_v9 = vpop.f32.mrb[28].mxu1 }
 0x134   : > { %v3205_v12 = vpop.f32.mrb[29].mxu1 }
 0x135   : > { %v3208_v14 = vpop.f32.mrb[30].mxu1 }
 0x139   : > { %v2571_v39 = vpop.f32.mrb[0].mxu0 }
 0x13a   : > { %v2649_v42 = vadd.f32 %v2571_v39, %v2475_v16  ;;  %v1160_v43 = vpop.f32.mrb[1].mxu0 }
 0x13b   : > { %v2650_v44 = vadd.f32 %v1160_v43, %v501_v17  ;;  %v2572_v45 = vpop.f32.mrb[2].mxu0  ;;  %v3211_v17 = vpop.f32.mrb[31].mxu1 }
 0x13c   : > { %v3166_v46 = vadd.f32 %v2649_v42, %v3161_v40  ;;  %v2651_v47 = vadd.f32 %v2572_v45, %v2476_v18  ;;  %v1163_v48 = vpop.f32.mrb[3].mxu0 }
 0x13d   : > { %v3169_v49 = vadd.f32 %v2650_v44, %v3161_v40  ;;  %v2652_v50 = vadd.f32 %v1163_v48, %v504_v19 }
 0x13e   : > { %v2160_v51 = vmul.f32 -1.442695, %v3166_v46  ;;  %v3173_v52 = vadd.f32 %v2651_v47, %v3161_v40 }
 0x13f   : > { %v2158_v54 = vmul.f32 -1.442695, %v3169_v49  ;;  %v3179_v55 = vadd.f32 %v2652_v50, %v3161_v40 }
 0x140   : > { %2802 = vpow2.f32 %v2160_v51  ;;  %v2161_v57 = vmul.f32 -1.442695, %v3173_v52 }
 0x141   : > { %2804 = vpow2.f32 %v2158_v54  ;;  %v2159_v59 = vmul.f32 -1.442695, %v3179_v55  ;;  %v2575_v60 = vpop.f32.mrb[4].mxu0 }
 0x142   : > { %2806 = vpow2.f32 %v2161_v57  ;;  %v2653_v62 = vadd.f32 %v2575_v60, %v2479_v20  ;;  %v1176_v63 = vpop.f32.mrb[5].mxu0 }
 0x143   : > { %2808 = vpow2.f32 %v2159_v59  ;;  %v2654_v0 = vadd.f32 %v1176_v63, %v517_v21  ;;  %v2576_v1 = vpop.f32.mrb[6].mxu0 }
 0x144   : > { %v3190_v2 = vadd.f32 %v2653_v62, %v3161_v40  ;;  %v2655_v3 = vadd.f32 %v2576_v1, %v2480_v22  ;;  %v1179_v4 = vpop.f32.mrb[7].mxu0 }
 0x145   : > { %v3193_v5 = vadd.f32 %v2654_v0, %v3161_v40  ;;  %v2656_v6 = vadd.f32 %v1179_v4, %v520_v23 }
 0x146   : > { %v2164_v7 = vmul.f32 -1.442695, %v3190_v2  ;;  %v3197_v8 = vadd.f32 %v2655_v3, %v3161_v40 }
 0x147   : > { %v2162_v10 = vmul.f32 -1.442695, %v3193_v5  ;;  %v3203_v11 = vadd.f32 %v2656_v6, %v3161_v40 }
 0x148   : > { %2810 = vpow2.f32 %v2164_v7  ;;  %v2165_v13 = vmul.f32 -1.442695, %v3197_v8 }
 0x149   : > { %2812 = vpow2.f32 %v2162_v10  ;;  %v2163_v15 = vmul.f32 -1.442695, %v3203_v11  ;;  %v2579_v16 = vpop.f32.mrb[8].mxu0 }
 0x14a   : > { %v2803_v18 = vpop.eup %2802  ;;  %2814 = vpow2.f32 %v2165_v13  ;;  %v2657_v19 = vadd.f32 %v2579_v16, %v3128_v24  ;;  %v1192_v20 = vpop.f32.mrb[9].mxu0 }
 0x14b   : > { %v2805_v21 = vpop.eup %2804  ;;  %v1456_v22 = vadd.f32 1.0, %v2803_v18  ;;  %2816 = vpow2.f32 %v2163_v15  ;;  %v2658_v23 = vadd.f32 %v1192_v20, %v3130_v25  ;;  %v2580_v39 = vpop.f32.mrb[10].mxu0 }
 0x14c   : > { %v2807_v42 = vpop.eup %2806  ;;  %v1454_v43 = vadd.f32 1.0, %v2805_v21  ;;  %v3216_v44 = vadd.f32 %v2657_v19, %v3161_v40  ;;  %v2659_v45 = vadd.f32 %v2580_v39, %v3132_v26  ;;  %v1195_v47 = vpop.f32.mrb[11].mxu0 }
 0x14d   : > { %v2809_v48 = vpop.eup %2808  ;;  %2818 = vrcp.f32 %v1456_v22  ;;  %v1457_v50 = vadd.f32 1.0, %v2807_v42  ;;  %v3220_v24 = vadd.f32 %v2658_v23, %v3161_v40  ;;  %v2660_v51 = vadd.f32 %v1195_v47, %v3134_v27 }
 0x14e   : > { %2820 = vrcp.f32 %v1454_v43  ;;  %v1455_v54 = vadd.f32 1.0, %v2809_v48  ;;  %v2168_v25 = vmul.f32 -1.442695, %v3216_v44  ;;  %v3225_v57 = vadd.f32 %v2659_v45, %v3161_v40 }
 0x14f   : > { %2822 = vrcp.f32 %v1457_v50  ;;  %v2166_v59 = vmul.f32 -1.442695, %v3220_v24  ;;  %v3229_v26 = vadd.f32 %v2660_v51, %v3161_v40 }
 0x150   : > { %2824 = vrcp.f32 %v1455_v54  ;;  %v2169_v60 = vmul.f32 -1.442695, %v3225_v57 }
 0x151   : > { %2826 = vpow2.f32 %v2168_v25  ;;  %v2167_v62 = vmul.f32 -1.442695, %v3229_v26  ;;  %v2583_v27 = vpop.f32.mrb[12].mxu0 }
 0x152   : > { %v2811_v63 = vpop.eup %2810  ;;  %2828 = vpow2.f32 %v2166_v59  ;;  %v2661_v0 = vadd.f32 %v2583_v27, %v3136_v28  ;;  %v1208_v1 = vpop.f32.mrb[13].mxu0 }
 0x153   : > { %v2813_v3 = vpop.eup %2812  ;;  %v1460_v4 = vadd.f32 1.0, %v2811_v63  ;;  %2830 = vpow2.f32 %v2169_v60  ;;  %v2662_v6 = vadd.f32 %v1208_v1, %v3138_v29  ;;  %v2584_v7 = vpop.f32.mrb[14].mxu0 }
 0x154   : > { %v2815_v10 = vpop.eup %2814  ;;  %v1458_v13 = vadd.f32 1.0, %v2813_v3  ;;  %2832 = vpow2.f32 %v2167_v62  ;;  %v3236_v15 = vadd.f32 %v2661_v0, %v3161_v40  ;;  %v2663_v16 = vadd.f32 %v2584_v7, %v3140_v30  ;;  %v1211_v18 = vpop.f32.mrb[15].mxu0 }
 0x155   : > { %v2817_v19 = vpop.eup %2816  ;;  %2834 = vrcp.f32 %v1460_v4  ;;  %v1461_v20 = vadd.f32 1.0, %v2815_v10  ;;  %v3240_v28 = vadd.f32 %v2662_v6, %v3161_v40  ;;  %v2664_v21 = vadd.f32 %v1211_v18, %v3142_v31 }
 0x156   : > { %2836 = vrcp.f32 %v1458_v13  ;;  %v1459_v29 = vadd.f32 1.0, %v2817_v19  ;;  %v2172_v22 = vmul.f32 -1.442695, %v3236_v15  ;;  %v3245_v23 = vadd.f32 %v2663_v16, %v3161_v40 }
 0x157   : > { %v2819_v39 = vpop.eup %2818  ;;  %2838 = vrcp.f32 %v1461_v20  ;;  %v2170_v30 = vmul.f32 -1.442695, %v3240_v28  ;;  %v3249_v42 = vadd.f32 %v2664_v21, %v3161_v40 }
 0x158   : > { %v2821_v43 = vpop.eup %2820  ;;  %2840 = vrcp.f32 %v1459_v29  ;;  %v2173_v45 = vmul.f32 -1.442695, %v3245_v23  ;;  %v1552_v51 = vmul.f32 %v2819_v39, %v3166_v46 }
 0x159   : > { %v2823_v47 = vpop.eup %2822  ;;  %2842 = vpow2.f32 %v2172_v22  ;;  %v2171_v31 = vmul.f32 -1.442695, %v3249_v42  ;;  %v2587_v48 = vpop.f32.mrb[16].mxu0  ;;  %v1550_v62 = vmul.f32 %v2821_v43, %v3169_v49 }
 0x15a   : > { %v2825_v50 = vpop.eup %2824  ;;  %v1553_v54 = vmul.f32 %v2823_v47, %v3173_v52  ;;  %2844 = vpow2.f32 %v2170_v30  ;;  %v2665_v25 = vadd.f32 %v2587_v48, %v3144_v32  ;;  %v1224_v59 = vpop.f32.mrb[17].mxu0 }
 0x15b   : > { %v2827_v60 = vpop.eup %2826  ;;  %v1551_v27 = vmul.f32 %v2825_v50, %v3179_v55  ;;  %2846 = vpow2.f32 %v2173_v45  ;;  %v2666_v63 = vadd.f32 %v1224_v59, %v3146_v33  ;;  %v2588_v0 = vpop.f32.mrb[18].mxu0 }
 0x15c   : > { %v2829_v1 = vpop.eup %2828  ;;  %v1583_v3 = vpack.c.bf16 %v1553_v54, %v1552_v51  ;;  %v1464_v4 = vadd.f32 1.0, %v2827_v60  ;;  %2848 = vpow2.f32 %v2171_v31  ;;  %v3260_v46 = vadd.f32 %v2665_v25, %v3161_v40  ;;  %v1227_v52 = vpop.f32.mrb[19].mxu0 }
 0x15d   : > { %v2831_v6 = vpop.eup %2830  ;;  %v1462_v32 = vadd.f32 1.0, %v2829_v1  ;;  %v3263_v7 = vadd.f32 %v2666_v63, %v3161_v40  ;;  %v2667_v49 = vadd.f32 %v2588_v0, %v3148_v34  ;;  %v2668_v55 = vadd.f32 %v1227_v52, %v3150_v35 }
 0x15e   : > { %v2833_v10 = vpop.eup %2832  ;;  %2850 = vrcp.f32 %v1464_v4  ;;  %v1465_v33 = vadd.f32 1.0, %v2831_v6  ;;  %v2176_v13 = vmul.f32 -1.442695, %v3260_v46  ;;  %v1582_v16 = vpack.c.bf16 %v1551_v27, %v1550_v62 }
 0x15f   : > { %v2835_v18 = vpop.eup %2834  ;;  %2852 = vrcp.f32 %v1462_v32  ;;  %v1463_v19 = vadd.f32 1.0, %v2833_v10  ;;  %v2174_v20 = vmul.f32 -1.442695, %v3263_v7  ;;  %v3270_v21 = vadd.f32 %v2667_v49, %v3161_v40 }
 0x160   : > { %v2837_v29 = vpop.eup %2836  ;;  %2854 = vrcp.f32 %v1465_v33  ;;  %v3273_v34 = vadd.f32 %v2668_v55, %v3161_v40  ;;  %2617 = vmatprep.mubr.bf16.mxu1 %v1582_v16  ;;  %v1556_v22 = vmul.f32 %v2835_v18, %v3190_v2 }
 0x161   : > { %v2839_v35 = vpop.eup %2838  ;;  %2856 = vrcp.f32 %v1463_v19  ;;  %v2177_v39 = vmul.f32 -1.442695, %v3270_v21  ;;  %2618 = vmatmul.mubr.bf16.vlgmr.msra.gmra.mrb[32].mxu1 %v1583_v3  ;;  %v2591_v30 = vpop.f32.mrb[20].mxu0  ;;  %v1554_v45 = vmul.f32 %v2837_v29, %v3193_v5 }
 0x162   : > { %v2841_v43 = vpop.eup %2840  ;;  %2858 = vpow2.f32 %v2176_v13  ;;  %v2175_v47 = vmul.f32 -1.442695, %v3273_v34  ;;  %v2669_v31 = vadd.f32 %v2591_v30, %v3152_v36  ;;  %v1240_v48 = vpop.f32.mrb[21].mxu0  ;;  %v1557_v51 = vmul.f32 %v2839_v35, %v3197_v8 }
 0x163   : > { %v2843_v50 = vpop.eup %2842  ;;  %v1555_v54 = vmul.f32 %v2841_v43, %v3203_v11  ;;  %2860 = vpow2.f32 %v2174_v20  ;;  %v2670_v2 = vadd.f32 %v1240_v48, %v3154_v37  ;;  %v2592_v25 = vpop.f32.mrb[22].mxu0 }
 0x164   : > { %v2845_v59 = vpop.eup %2844  ;;  %v1468_v60 = vadd.f32 1.0, %v2843_v50  ;;  %2862 = vpow2.f32 %v2177_v39  ;;  %v3284_v5 = vadd.f32 %v2669_v31, %v3161_v40  ;;  %v2671_v62 = vadd.f32 %v2592_v25, %v3156_v38  ;;  %v1243_v27 = vpop.f32.mrb[23].mxu0 }
 0x165   : > { %v2847_v36 = vpop.eup %2846  ;;  %v1466_v63 = vadd.f32 1.0, %v2845_v59  ;;  %2864 = vpow2.f32 %v2175_v47  ;;  %v3288_v8 = vadd.f32 %v2670_v2, %v3161_v40  ;;  %v2672_v11 = vadd.f32 %v1243_v27, %v3163_v41 }
 0x166   : > { %v2849_v0 = vpop.eup %2848  ;;  %2866 = vrcp.f32 %v1468_v60  ;;  %v1469_v37 = vadd.f32 1.0, %v2847_v36  ;;  %v2180_v1 = vmul.f32 -1.442695, %v3284_v5  ;;  %v3293_v3 = vadd.f32 %v2671_v62, %v3161_v40 }
 0x167   : > { %2868 = vrcp.f32 %v1466_v63  ;;  %v1467_v4 = vadd.f32 1.0, %v2849_v0  ;;  %v2178_v38 = vmul.f32 -1.442695, %v3288_v8  ;;  %v3297_v52 = vadd.f32 %v2672_v11, %v3161_v40 }
 0x168   : > { %v2851_v6 = vpop.eup %2850  ;;  %2870 = vrcp.f32 %v1469_v37  ;;  %v2181_v32 = vmul.f32 -1.442695, %v3293_v3  ;;  %v1584_v41 = vpack.c.bf16 %v1555_v54, %v1554_v45  ;;  %v1585_v49 = vpack.c.bf16 %v1557_v51, %v1556_v22 }
 0x169   : > { %v2853_v55 = vpop.eup %2852  ;;  %2872 = vrcp.f32 %v1467_v4  ;;  %v2179_v10 = vmul.f32 -1.442695, %v3297_v52  ;;  %v2595_v33 = vpop.f32.mrb[24].mxu0  ;;  %v1560_v48 = vmul.f32 %v2851_v6, %v3216_v44 }
 0x16a   : > { %v2855_v13 = vpop.eup %2854  ;;  %2874 = vpow2.f32 %v2180_v1  ;;  %2621 = vmatprep.mubr.bf16.mxu1 %v1584_v41  ;;  %v2673_v16 = vadd.f32 %v2595_v33, %v3175_v53  ;;  %v1256_v18 = vpop.f32.mrb[25].mxu0  ;;  %v1558_v20 = vmul.f32 %v2853_v55, %v3220_v24 }
 0x16b   : > { %v2857_v19 = vpop.eup %2856  ;;  %v1561_v29 = vmul.f32 %v2855_v13, %v3225_v57  ;;  %2876 = vpow2.f32 %v2178_v38  ;;  %2622 = vmatmul.mubr.bf16.gmra.mrb[36].mxu1 %v1585_v49  ;;  %v2674_v35 = vadd.f32 %v1256_v18, %v3181_v56  ;;  %v2596_v22 = vpop.f32.mrb[26].mxu0 }
 0x16c   : > { %v2859_v39 = vpop.eup %2858  ;;  %v1559_v30 = vmul.f32 %v2857_v19, %v3229_v26  ;;  %2878 = vpow2.f32 %v2181_v32  ;;  %v3307_v43 = vadd.f32 %v2673_v16, %v3161_v40  ;;  %v2675_v53 = vadd.f32 %v2596_v22, %v3184_v58  ;;  %v1259_v45 = vpop.f32.mrb[27].mxu0 }
 0x16d   : > { %v2861_v47 = vpop.eup %2860  ;;  %v1472_v31 = vadd.f32 1.0, %v2859_v39  ;;  %2880 = vpow2.f32 %v2179_v10  ;;  %v3311_v24 = vadd.f32 %v2674_v35, %v3161_v40  ;;  %v2676_v57 = vadd.f32 %v1259_v45, %v3187_v61 }
 0x16e   : > { %v2863_v56 = vpop.eup %2862  ;;  %v1470_v50 = vadd.f32 1.0, %v2861_v47  ;;  %v3316_v26 = vadd.f32 %v2675_v53, %v3161_v40  ;;  %v1586_v51 = vpack.c.bf16 %v1559_v30, %v1558_v20  ;;  %v2184_v2 = vmul.f32 -1.442695, %v3307_v43 }
 0x16f   : > { %v2865_v54 = vpop.eup %2864  ;;  %2882 = vrcp.f32 %v1472_v31  ;;  %v1473_v58 = vadd.f32 1.0, %v2863_v56  ;;  %v3320_v25 = vadd.f32 %v2676_v57, %v3161_v40  ;;  %v2182_v61 = vmul.f32 -1.442695, %v3311_v24 }
 0x170   : > { %v2867_v59 = vpop.eup %2866  ;;  %2884 = vrcp.f32 %v1470_v50  ;;  %v1471_v60 = vadd.f32 1.0, %v2865_v54  ;;  %2625 = vmatprep.mubr.bf16.mxu1 %v1586_v51  ;;  %v1587_v44 = vpack.c.bf16 %v1561_v29, %v1560_v48  ;;  %v2185_v27 = vmul.f32 -1.442695, %v3316_v26 }
 0x171   : > { %v2869_v62 = vpop.eup %2868  ;;  %2886 = vrcp.f32 %v1473_v58  ;;  %v2599_v36 = vpop.f32.mrb[28].mxu0  ;;  %v2183_v11 = vmul.f32 -1.442695, %v3320_v25  ;;  %v1564_v4 = vmul.f32 %v2867_v59, %v3236_v15 }
 0x172   : > { %v2871_v63 = vpop.eup %2870  ;;  %2888 = vrcp.f32 %v1471_v60  ;;  %v2677_v0 = vadd.f32 %v2599_v36, %v3199_v9  ;;  %v1272_v37 = vpop.f32.mrb[29].mxu0  ;;  %v1562_v16 = vmul.f32 %v2869_v62, %v3240_v28 }
 0x173   : > { %v2873_v1 = vpop.eup %2872  ;;  %v1565_v38 = vmul.f32 %v2871_v63, %v3245_v23  ;;  %2890 = vpow2.f32 %v2184_v2  ;;  %2626 = vmatmul.mubr.bf16.gmra.mrb[40].mxu1 %v1587_v44  ;;  %v2678_v6 = vadd.f32 %v1272_v37, %v3205_v12  ;;  %v2600_v32 = vpop.f32.mrb[30].mxu0 }
 0x174   : > { %v2875_v41 = vpop.eup %2874  ;;  %v1563_v49 = vmul.f32 %v2873_v1, %v3249_v42  ;;  %2892 = vpow2.f32 %v2182_v61  ;;  %v3331_v55 = vadd.f32 %v2677_v0, %v3161_v40  ;;  %v2679_v9 = vadd.f32 %v2600_v32, %v3208_v14  ;;  %v1275_v10 = vpop.f32.mrb[31].mxu0 }
 0x175   : > { %v2877_v33 = vpop.eup %2876  ;;  %v1476_v13 = vadd.f32 1.0, %v2875_v41  ;;  %2894 = vpow2.f32 %v2185_v27  ;;  %v3335_v15 = vadd.f32 %v2678_v6, %v3161_v40  ;;  %v2680_v23 = vadd.f32 %v1275_v10, %v3211_v17 }
 0x176   : > { %v2879_v12 = vpop.eup %2878  ;;  %v1474_v18 = vadd.f32 1.0, %v2877_v33  ;;  %2896 = vpow2.f32 %v2183_v11  ;;  %v3340_v42 = vadd.f32 %v2679_v9, %v3161_v40  ;;  %v2188_v20 = vmul.f32 -1.442695, %v3331_v55 }
 0x177   : > { %v2881_v19 = vpop.eup %2880  ;;  %2898 = vrcp.f32 %v1476_v13  ;;  %v1477_v14 = vadd.f32 1.0, %v2879_v12  ;;  %v3344_v29 = vadd.f32 %v2680_v23, %v3161_v40  ;;  %v2186_v17 = vmul.f32 -1.442695, %v3335_v15 }
 0x178   : > { %2900 = vrcp.f32 %v1474_v18  ;;  %v1475_v35 = vadd.f32 1.0, %v2881_v19  ;;  %v1588_v22 = vpack.c.bf16 %v1563_v49, %v1562_v16  ;;  %v2189_v28 = vmul.f32 -1.442695, %v3340_v42 }
 0x179   : > { %v2883_v39 = vpop.eup %2882  ;;  %2902 = vrcp.f32 %v1477_v14  ;;  %v1589_v30 = vpack.c.bf16 %v1565_v38, %v1564_v4  ;;  %v2187_v45 = vmul.f32 -1.442695, %v3344_v29 }
 0x17a   : > { %v2885_v53 = vpop.eup %2884  ;;  %2904 = vrcp.f32 %v1475_v35  ;;  %2629 = vmatprep.mubr.bf16.mxu1 %v1588_v22  ;;  %v1568_v31 = vmul.f32 %v2883_v39, %v3260_v46  ;;  %v3368_v39 = vld [vmem:[%s3431_s4] ss:$0 sm:$0xff] }
 0x17b   : > { %v2887_v47 = vpop.eup %2886  ;;  %2906 = vpow2.f32 %v2188_v20  ;;  %2630 = vmatmul.mubr.bf16.gmra.mrb[44].mxu1 %v1589_v30  ;;  %v1566_v48 = vmul.f32 %v2885_v53, %v3263_v7 }
 0x17c   : > { %v2889_v40 = vpop.eup %2888  ;;  %v1569_v57 = vmul.f32 %v2887_v47, %v3270_v21  ;;  %2908 = vpow2.f32 %v2186_v17 }
 0x17d   : > { %v2891_v56 = vpop.eup %2890  ;;  %v1567_v50 = vmul.f32 %v2889_v40, %v3273_v34  ;;  %2910 = vpow2.f32 %v2189_v28 }
 0x17e   : > { %v2893_v51 = vpop.eup %2892  ;;  %v1480_v54 = vadd.f32 1.0, %v2891_v56  ;;  %2912 = vpow2.f32 %v2187_v45  ;;  %v1591_v58 = vpack.c.bf16 %v1569_v57, %v1568_v31 }
 0x17f   : > { %v2895_v2 = vpop.eup %2894  ;;  %v1478_v59 = vadd.f32 1.0, %v2893_v51  ;;  %v1590_v60 = vpack.c.bf16 %v1567_v50, %v1566_v48 }
 0x180   : > { %v2897_v61 = vpop.eup %2896  ;;  %2914 = vrcp.f32 %v1480_v54  ;;  %v1481_v44 = vadd.f32 1.0, %v2895_v2 }
 0x181   : > { %v2899_v46 = vpop.eup %2898  ;;  %2916 = vrcp.f32 %v1478_v59  ;;  %v1479_v21 = vadd.f32 1.0, %v2897_v61  ;;  %2633 = vmatprep.mubr.bf16.mxu1 %v1590_v60 }
 0x182   : > { %v2901_v62 = vpop.eup %2900  ;;  %2918 = vrcp.f32 %v1481_v44  ;;  %v1572_v27 = vmul.f32 %v2899_v46, %v3284_v5 }
 0x183   : > { %v2903_v7 = vpop.eup %2902  ;;  %2920 = vrcp.f32 %v1479_v21  ;;  %2634 = vmatmul.mubr.bf16.gmra.mrb[48].mxu1 %v1591_v58  ;;  %v1570_v11 = vmul.f32 %v2901_v62, %v3288_v8 }
 0x184   : > { %v2905_v34 = vpop.eup %2904  ;;  %v1573_v36 = vmul.f32 %v2903_v7, %v3293_v3 }
 0x185   : > { %v2907_v63 = vpop.eup %2906  ;;  %v1571_v0 = vmul.f32 %v2905_v34, %v3297_v52 }
 0x186   : > { %v2909_v37 = vpop.eup %2908  ;;  %v1484_v1 = vadd.f32 1.0, %v2907_v63  ;;  %v1593_v4 = vpack.c.bf16 %v1573_v36, %v1572_v27 }
 0x187   : > { %v2911_v38 = vpop.eup %2910  ;;  %v1482_v6 = vadd.f32 1.0, %v2909_v37  ;;  %v1592_v32 = vpack.c.bf16 %v1571_v0, %v1570_v11 }
 0x188   : > { %v2913_v41 = vpop.eup %2912  ;;  %2922 = vrcp.f32 %v1484_v1  ;;  %v1485_v49 = vadd.f32 1.0, %v2911_v38 }
 0x189   : > { %2924 = vrcp.f32 %v1482_v6  ;;  %v1483_v9 = vadd.f32 1.0, %v2913_v41  ;;  %2637 = vmatprep.mubr.bf16.mxu1 %v1592_v32 }
 0x18a   : > { %v2915_v5 = vpop.eup %2914  ;;  %2926 = vrcp.f32 %v1485_v49 }
 0x18b   : > { %v2917_v3 = vpop.eup %2916  ;;  %2928 = vrcp.f32 %v1483_v9  ;;  %2638 = vmatmul.mubr.bf16.gmra.mrb[52].mxu1 %v1593_v4  ;;  %v1576_v52 = vmul.f32 %v2915_v5, %v3307_v43 }
 0x18c   : > { %v2919_v8 = vpop.eup %2918  ;;  %v1574_v13 = vmul.f32 %v2917_v3, %v3311_v24 }
 0x18d   : > { %v2921_v10 = vpop.eup %2920  ;;  %v1577_v33 = vmul.f32 %v2919_v8, %v3316_v26 }
 0x18e   : > { %v1575_v23 = vmul.f32 %v2921_v10, %v3320_v25 }
 0x18f   : > { %v1595_v12 = vpack.c.bf16 %v1577_v33, %v1576_v52 }
 0x190   : > { %v1594_v16 = vpack.c.bf16 %v1575_v23, %v1574_v13 }
 0x192   : > { %v2923_v18 = vpop.eup %2922  ;;  %2641 = vmatprep.mubr.bf16.mxu1 %v1594_v16 }
 0x193   : > { %v2925_v19 = vpop.eup %2924  ;;  %2642 = vmatmul.mubr.bf16.gmra.mrb[56].mxu1 %v1595_v12  ;;  %v1580_v35 = vmul.f32 %v2923_v18, %v3331_v55 }
 0x194   : > { %v2927_v14 = vpop.eup %2926  ;;  %v1578_v43 = vmul.f32 %v2925_v19, %v3335_v15 }
 0x195   : > { %v2929_v20 = vpop.eup %2928  ;;  %v1581_v17 = vmul.f32 %v2927_v14, %v3340_v42 }
 0x196   : > { %v1579_v26 = vmul.f32 %v2929_v20, %v3344_v29 }
 0x197   : > { %v1597_v24 = vpack.c.bf16 %v1581_v17, %v1580_v35 }
 0x198   : > { %v1596_v22 = vpack.c.bf16 %v1579_v26, %v1578_v43 }
 0x19a   : > { %2645 = vmatprep.mubr.bf16.mxu1 %v1596_v22 }
 0x19b   : > { %2646 = vmatmul.mubr.bf16.gmra.mrb[60].mxu1 %v1597_v24 }
 0x234   : > { %v2619_v25 = vpop.f32.mrb[32].mxu1 }
 0x235   : > { %v1703_v28 = vpop.f32.mrb[33].mxu1  ;;  %v1712_v55 = vadd.f32 %v2619_v25, %v3368_v39 }
 0x236   : > { %v2620_v30 = vpop.f32.mrb[34].mxu1  ;;  %v1704_v29 = vadd.f32 %v3368_v39, %v1703_v28 }
 0x237   : > { %v1715_v42 = vadd.f32 %v2620_v30, %v3368_v39  ;;  %v1706_v15 = vpop.f32.mrb[35].mxu1 }
 0x238   : > { %v1707_v53 = vadd.f32 %v3368_v39, %v1706_v15 }
 0x239   : > { %v2274_v45 = vpack.c.bf16 %v1715_v42, %v1712_v55 }
 0x23a   : > { %v2269_v47 = vpack.c.bf16 %v1707_v53, %v1704_v29 }
 0x23b   : > { %2346 = vst [vmem:[%s3377_s27 + $0x8] sm:$0xff] %v2274_v45  }
 0x23c   : > { %2270 = vst [vmem:[%s3377_s27] sm:$0xff] %v2269_v47  }
 0x23e   : > { %v2623_v40 = vpop.f32.mrb[36].mxu1 }
 0x23f   : > { %v1719_v31 = vpop.f32.mrb[37].mxu1  ;;  %v1728_v56 = vadd.f32 %v2623_v40, %v3368_v39 }
 0x240   : > { %v2624_v57 = vpop.f32.mrb[38].mxu1  ;;  %v1720_v51 = vadd.f32 %v3368_v39, %v1719_v31 }
 0x241   : > { %v1731_v48 = vadd.f32 %v2624_v57, %v3368_v39  ;;  %v1722_v50 = vpop.f32.mrb[39].mxu1 }
 0x242   : > { %v1723_v54 = vadd.f32 %v3368_v39, %v1722_v50 }
 0x243   : > { %v2284_v58 = vpack.c.bf16 %v1731_v48, %v1728_v56 }
 0x244   : > { %v2279_v2 = vpack.c.bf16 %v1723_v54, %v1720_v51 }
 0x245   : > { %2348 = vst [vmem:[%s3377_s27 + $0x18] sm:$0xff] %v2284_v58  }
 0x246   : > { %2347 = vst [vmem:[%s3377_s27 + $0x10] sm:$0xff] %v2279_v2   ;;  %v2627_v59 = vpop.f32.mrb[40].mxu1 }
 0x247   : > { %v1735_v60 = vpop.f32.mrb[41].mxu1  ;;  %v1744_v44 = vadd.f32 %v2627_v59, %v3368_v39 }
 0x248   : > { %v2628_v61 = vpop.f32.mrb[42].mxu1  ;;  %v1736_v62 = vadd.f32 %v3368_v39, %v1735_v60 }
 0x249   : > { %v1747_v46 = vadd.f32 %v2628_v61, %v3368_v39  ;;  %v1738_v21 = vpop.f32.mrb[43].mxu1 }
 0x24a   : > { %v1739_v7 = vadd.f32 %v3368_v39, %v1738_v21 }
 0x24b   : > { %v2294_v34 = vpack.c.bf16 %v1747_v46, %v1744_v44 }
 0x24c   : > { %v2289_v27 = vpack.c.bf16 %v1739_v7, %v1736_v62 }
 0x24d   : > { %2350 = vst [vmem:[%s3377_s27 + $0x28] sm:$0xff] %v2294_v34  }
 0x24e   : > { %2349 = vst [vmem:[%s3377_s27 + $0x20] sm:$0xff] %v2289_v27   ;;  %v2631_v36 = vpop.f32.mrb[44].mxu1 }
 0x24f   : > { %v1751_v63 = vpop.f32.mrb[45].mxu1  ;;  %v1760_v0 = vadd.f32 %v2631_v36, %v3368_v39 }
 0x250   : > { %v2632_v11 = vpop.f32.mrb[46].mxu1  ;;  %v1752_v4 = vadd.f32 %v3368_v39, %v1751_v63 }
 0x251   : > { %v1763_v37 = vadd.f32 %v2632_v11, %v3368_v39  ;;  %v1754_v1 = vpop.f32.mrb[47].mxu1 }
 0x252   : > { %v1755_v38 = vadd.f32 %v3368_v39, %v1754_v1 }
 0x253   : > { %v2304_v6 = vpack.c.bf16 %v1763_v37, %v1760_v0 }
 0x254   : > { %v2299_v32 = vpack.c.bf16 %v1755_v38, %v1752_v4 }
 0x255   : > { %2352 = vst [vmem:[%s3377_s27 + $0x38] sm:$0xff] %v2304_v6  }
 0x256   : > { %2351 = vst [vmem:[%s3377_s27 + $0x30] sm:$0xff] %v2299_v32   ;;  %v2635_v41 = vpop.f32.mrb[48].mxu1 }
 0x257   : > { %v1767_v49 = vpop.f32.mrb[49].mxu1  ;;  %v1776_v5 = vadd.f32 %v2635_v41, %v3368_v39 }
 0x258   : > { %v2636_v9 = vpop.f32.mrb[50].mxu1  ;;  %v1768_v10 = vadd.f32 %v3368_v39, %v1767_v49 }
 0x259   : > { %v1779_v3 = vadd.f32 %v2636_v9, %v3368_v39  ;;  %v1770_v8 = vpop.f32.mrb[51].mxu1 }
 0x25a   : > { %v1771_v52 = vadd.f32 %v3368_v39, %v1770_v8 }
 0x25b   : > { %v2314_v33 = vpack.c.bf16 %v1779_v3, %v1776_v5 }
 0x25c   : > { %v2309_v13 = vpack.c.bf16 %v1771_v52, %v1768_v10 }
 0x25d   : > { %2354 = vst [vmem:[%s3377_s27 + $0x48] sm:$0xff] %v2314_v33  }
 0x25e   : > { %2353 = vst [vmem:[%s3377_s27 + $0x40] sm:$0xff] %v2309_v13   ;;  %v2639_v23 = vpop.f32.mrb[52].mxu1 }
 0x25f   : > { %v1783_v12 = vpop.f32.mrb[53].mxu1  ;;  %v1792_v18 = vadd.f32 %v2639_v23, %v3368_v39 }
 0x260   : > { %v2640_v16 = vpop.f32.mrb[54].mxu1  ;;  %v1784_v20 = vadd.f32 %v3368_v39, %v1783_v12 }
 0x261   : > { %v1795_v19 = vadd.f32 %v2640_v16, %v3368_v39  ;;  %v1786_v14 = vpop.f32.mrb[55].mxu1 }
 0x262   : > { %v1787_v35 = vadd.f32 %v3368_v39, %v1786_v14 }
 0x263   : > { %v2324_v17 = vpack.c.bf16 %v1795_v19, %v1792_v18 }
 0x264   : > { %v2319_v43 = vpack.c.bf16 %v1787_v35, %v1784_v20 }
 0x265   : > { %2356 = vst [vmem:[%s3377_s27 + $0x58] sm:$0xff] %v2324_v17  }
 0x266   : > { %2355 = vst [vmem:[%s3377_s27 + $0x50] sm:$0xff] %v2319_v43   ;;  %v2643_v26 = vpop.f32.mrb[56].mxu1 }
 0x267   : > { %v1799_v24 = vpop.f32.mrb[57].mxu1  ;;  %v1808_v25 = vadd.f32 %v2643_v26, %v3368_v39 }
 0x268   : > { %v2644_v22 = vpop.f32.mrb[58].mxu1  ;;  %v1800_v55 = vadd.f32 %v3368_v39, %v1799_v24 }
 0x269   : > { %v1811_v28 = vadd.f32 %v2644_v22, %v3368_v39  ;;  %v1802_v30 = vpop.f32.mrb[59].mxu1 }
 0x26a   : > { %v1803_v42 = vadd.f32 %v3368_v39, %v1802_v30 }
 0x26b   : > { %v2334_v15 = vpack.c.bf16 %v1811_v28, %v1808_v25 }
 0x26c   : > { %v2329_v29 = vpack.c.bf16 %v1803_v42, %v1800_v55 }
 0x26d   : > { %2358 = vst [vmem:[%s3377_s27 + $0x68] sm:$0xff] %v2334_v15  }
 0x26e   : > { %2357 = vst [vmem:[%s3377_s27 + $0x60] sm:$0xff] %v2329_v29   ;;  %v2647_v53 = vpop.f32.mrb[60].mxu1 }
 0x26f   : > { %v1815_v45 = vpop.f32.mrb[61].mxu1  ;;  %v1824_v40 = vadd.f32 %v2647_v53, %v3368_v39 }
 0x270   : > { %v2648_v47 = vpop.f32.mrb[62].mxu1  ;;  %v1816_v56 = vadd.f32 %v3368_v39, %v1815_v45 }
 0x271   : > { %v1827_v31 = vadd.f32 %v2648_v47, %v3368_v39  ;;  %v1818_v57 = vpop.f32.mrb[63].mxu1 }
 0x272   : > { %v1819_v48 = vadd.f32 %v3368_v39, %v1818_v57 }
 0x273   : > { %v2344_v50 = vpack.c.bf16 %v1827_v31, %v1824_v40 }
 0x274   : > { %v2339_v51 = vpack.c.bf16 %v1819_v48, %v1816_v56 }
 0x275   : > { %2360 = vst [vmem:[%s3377_s27 + $0x78] sm:$0xff] %v2344_v50  }
 0x276   : > { %2359 = vst [vmem:[%s3377_s27 + $0x70] sm:$0xff] %v2339_v51  }
 0x277 PF: > { %s15_s18 = sadd.s32 1, %s2936_s18  }
 0x278   : > { %p12_p4 = scmp.ge.s32.totalorder %s15_s18, 4  }
 0x27a   :  { %14 = sbr.rel (!%p12_p4) target bundleno = 1 (0x1), region = 72 }

// kernel: effv2s_deepsuper_forward.10
= control target key start
LH: loop header
LB: loop body
LE: loop exit
PB: predicated region body
PF: predicated region fallthrough
CT: control target
= control target key end

     0   :  { %s1444_s18 = smov 0   ;;  %s1585_s0 = inlined_call_operand.vmem [shape: bf16[2,72,256], index: 0, kind: input, shape index: {}]   ;;  %s1586_s1 = inlined_call_operand.vmem [shape: bf16[3,128,128], index: 1, kind: input, shape index: {}]   ;;  %s1587_s2 = inlined_call_operand.vmem [shape: f32[1,128], index: 2, kind: input, shape index: {}]   ;;  %s1588_s3 = inlined_call_operand.vmem [shape: bf16[128,128], index: 3, kind: input, shape index: {}]   ;;  %s1589_s4 = inlined_call_operand.vmem [shape: f32[1,128], index: 4, kind: input, shape index: {}]   ;;  %s1590_s5 = inlined_call_operand.vmem [shape: bf16[2,64,128], index: 5, kind: output, shape index: {}]  }
   0x1 LB: > { %s1025_s19 = sadd.s32 4294967295, %s1412_s18   ;;  %p1029_p0 = scmp.ge.s32.totalorder %s1412_s18, 1  ;;  %s1412_s18 = sphi %s1444_s18, %s15_s18  }
   0x2   : > { %p187_p1 = scmp.lt.s32.totalorder %s1412_s18, 3 }
   0x4   : > { %p188_p2 = pnand %p1029_p0, %p187_p1 }
   0x5   : > { %v1330_v0 = vld [vmem:[%s1586_s1] sm:$0xff] (!%p188_p2)   ;;  %p215_p3 = scmp.lt.s32.totalorder (!%p188_p2), %s1025_s19, 1  ;;  %v1331_v1 = vld [vmem:[%s1586_s1 + $0x8] sm:$0xff] (!%p188_p2)   ;;  %v1332_v2 = vld [vmem:[%s1586_s1 + $0x10] sm:$0xff] (!%p188_p2)  }
   0x6   : > { %191 = sbr.rel (%p188_p2) target bundleno = 548 (0x224), region = 40  ;;  %1233 = vmatprep.subr.bf16.mxu0 (!%p188_p2), %v1330_v0  ;;  %v1333_v3 = vld [vmem:[%s1586_s1 + $0x18] sm:$0xff] (!%p188_p2)   ;;  %v1338_v4 = vld [vmem:[%s1586_s1 + $0x40] sm:$0xff] (!%p188_p2)   ;;  %v1341_v6 = vld [vmem:[%s1586_s1 + $0x48] sm:$0xff] (!%p188_p2)  }
   0x7   : > { %1234 = vmatpush3.bf16.msra.mxu0 (!%p188_p2), %v1330_v0  ;;  %1209 = vmatprep.subr.bf16.mxu1 (!%p188_p2), %v1338_v4  ;;  %v1334_v7 = vld [vmem:[%s1586_s1 + $0x20] sm:$0xff] (!%p188_p2)   ;;  %v1344_v8 = vld [vmem:[%s1586_s1 + $0x50] sm:$0xff] (!%p188_p2)   ;;  %v1335_v9 = vld [vmem:[%s1586_s1 + $0x28] sm:$0xff] (!%p188_p2)  }
   0x8   : > { %1235 = vmatprep.subr.bf16.mxu0 (!%p188_p2), %v1331_v1  ;;  %1210 = vmatpush3.bf16.msra.mxu1 (!%p188_p2), %v1338_v4  ;;  %v1346_v10 = vld [vmem:[%s1586_s1 + $0x58] sm:$0xff] (!%p188_p2)   ;;  %v1336_v11 = vld [vmem:[%s1586_s1 + $0x30] sm:$0xff] (!%p188_p2)   ;;  %v1348_v12 = vld [vmem:[%s1586_s1 + $0x60] sm:$0xff] (!%p188_p2)  }
   0x9   : > { %1211 = vmatprep.subr.bf16.mxu1 (!%p188_p2), %v1341_v6  ;;  %v1337_v13 = vld [vmem:[%s1586_s1 + $0x38] sm:$0xff] (!%p188_p2)   ;;  %v1350_v14 = vld [vmem:[%s1586_s1 + $0x68] sm:$0xff] (!%p188_p2)   ;;  %v1340_v15 = vld [vmem:[%s1586_s1 + $0x80] sm:$0xff] (!%p188_p2)  }
   0xa   : > { %v1352_v17 = vld [vmem:[%s1586_s1 + $0x70] sm:$0xff] (!%p188_p2)   ;;  %v1343_v19 = vld [vmem:[%s1586_s1 + $0x88] sm:$0xff] (!%p188_p2)   ;;  %v1356_v21 = vld [vmem:[%s1586_s1 + $0x78] sm:$0xff] (!%p188_p2)  }
   0xb   : > { %1236 = vmatpush3.bf16.msra.mxu0 (!%p188_p2), %v1331_v1  ;;  %v1345_v22 = vld [vmem:[%s1586_s1 + $0x90] sm:$0xff] (!%p188_p2)   ;;  %v1347_v26 = vld [vmem:[%s1586_s1 + $0x98] sm:$0xff] (!%p188_p2)   ;;  %v1349_v28 = vld [vmem:[%s1586_s1 + $0xa0] sm:$0xff] (!%p188_p2)  }
   0xc   : > { %1237 = vmatprep.subr.bf16.mxu0 (!%p188_p2), %v1332_v2  ;;  %1212 = vmatpush3.bf16.msra.mxu1 (!%p188_p2), %v1341_v6  ;;  %v1351_v30 = vld [vmem:[%s1586_s1 + $0xa8] sm:$0xff] (!%p188_p2)   ;;  %v1355_v31 = vld [vmem:[%s1586_s1 + $0xb0] sm:$0xff] (!%p188_p2)   ;;  %v1358_v32 = vld [vmem:[%s1586_s1 + $0xb8] sm:$0xff] (!%p188_p2)  }
   0xd   : > { %s1592_s19 = smov (!%p215_p3, %s1025_s19), 1  ;;  %1213 = vmatprep.subr.bf16.mxu1 %v1344_v8  ;;  %v1366_v36 = vld [vmem:[%s1588_s3] sm:$0xff]   ;;  %v1367_v37 = vld [vmem:[%s1588_s3 + $0x8] sm:$0xff]   ;;  %v1368_v38 = vld [vmem:[%s1588_s3 + $0x10] sm:$0xff]  }
   0xe   : > { %s1321_s26 = smul.u32 72, %s1592_s19  ;;  %v1369_v39 = vld [vmem:[%s1588_s3 + $0x18] sm:$0xff]   ;;  %v1370_v40 = vld [vmem:[%s1588_s3 + $0x20] sm:$0xff]   ;;  %v1371_v41 = vld [vmem:[%s1588_s3 + $0x28] sm:$0xff]   ;;  %s1129_s24 = sshll.u32 %s1592_s19, 5 }
   0xf   : > { %1238 = vmatpush3.bf16.msra.mxu0 %v1332_v2  ;;  %v1372_v42 = vld [vmem:[%s1588_s3 + $0x30] sm:$0xff]   ;;  %v1373_v43 = vld [vmem:[%s1588_s3 + $0x38] sm:$0xff]   ;;  %v1101_v53 = vld [vmem:[%s1587_s2] ss:$0 sm:$0xff]  ;;  %s224_s27 = scalar_lea.vmem %s1590_s5, %s1129_s24 }
  0x10   : > { %s1467_s29 = scalar_lea.vmem %s1585_s0, %s1321_s26  ;;  %1239 = vmatprep.subr.bf16.mxu0 %v1333_v3  ;;  %1214 = vmatpush3.bf16.msra.mxu1 %v1344_v8 }
  0x11   : > { %v1339_v5 = vld [vmem:[%s1467_s29] ss:$8 sps:$4 sm:$0xff]   ;;  %1215 = vmatprep.subr.bf16.mxu1 %v1346_v10  ;;  %v1357_v16 = vld [vmem:[%s1467_s29 + $0x4] ss:$8 sps:$4 sm:$0xff]   ;;  %v1342_v18 = vld [vmem:[%s1467_s29 + $0x10] ss:$8 sps:$4 sm:$0xff]  }
  0x12   : > { %1249 = vmatprep.mubr.bf16.mxu0 %v1339_v5  ;;  %1225 = vmatprep.mubr.bf16.mxu1 %v1357_v16  ;;  %v1353_v20 = vld [vmem:[%s1467_s29 + $0x20] ss:$8 sps:$4 sm:$0xff]   ;;  %v1354_v23 = vld [vmem:[%s1467_s29 + $0x30] ss:$8 sps:$4 sm:$0xff]   ;;  %v1359_v24 = vld [vmem:[%s1467_s29 + $0x14] ss:$8 sps:$4 sm:$0xff]  }
  0x13   : > { %1240 = vmatpush3.bf16.msra.mxu0 %v1333_v3  ;;  %v1360_v25 = vld [vmem:[%s1467_s29 + $0x8] ss:$8 sps:$4 sm:$0xff]   ;;  %v1362_v27 = vld [vmem:[%s1467_s29 + $0x24] ss:$8 sps:$4 sm:$0xff]   ;;  %v1363_v29 = vld [vmem:[%s1467_s29 + $0x34] ss:$8 sps:$4 sm:$0xff]  }
  0x14   : > { %1241 = vmatprep.subr.bf16.mxu0 %v1334_v7  ;;  %1216 = vmatpush3.bf16.msra.mxu1 %v1346_v10  ;;  %v1361_v33 = vld [vmem:[%s1467_s29 + $0x18] ss:$8 sps:$4 sm:$0xff]   ;;  %v1364_v34 = vld [vmem:[%s1467_s29 + $0x28] ss:$8 sps:$4 sm:$0xff]  }
  0x15   : > { %1217 = vmatprep.subr.bf16.mxu1 %v1348_v12  ;;  %v1365_v35 = vld [vmem:[%s1467_s29 + $0x38] ss:$8 sps:$4 sm:$0xff]  }
  0x17   : > { %1242 = vmatpush3.bf16.msra.mxu0 %v1334_v7 }
  0x18   : > { %1243 = vmatprep.subr.bf16.mxu0 %v1335_v9  ;;  %1218 = vmatpush3.bf16.msra.mxu1 %v1348_v12 }
  0x19   : > { %1219 = vmatprep.subr.bf16.mxu1 %v1350_v14 }
  0x1b   : > { %1244 = vmatpush3.bf16.msra.mxu0 %v1335_v9 }
  0x1c   : > { %1245 = vmatprep.subr.bf16.mxu0 %v1336_v11  ;;  %1220 = vmatpush3.bf16.msra.mxu1 %v1350_v14 }
  0x1d   : > { %1221 = vmatprep.subr.bf16.mxu1 %v1352_v17 }
  0x1f   : > { %1246 = vmatpush3.bf16.msra.mxu0 %v1336_v11 }
  0x20   : > { %1247 = vmatprep.subr.bf16.mxu0 %v1337_v13  ;;  %1222 = vmatpush3.bf16.msra.mxu1 %v1352_v17 }
  0x21   : > { %1223 = vmatprep.subr.bf16.mxu1 %v1356_v21 }
  0x23   : > { %1248 = vmatpush3.bf16.msra.mxu0 %v1337_v13 }
  0x24   : > { %1257 = vmatprep.subr.bf16.mxu0 %v1340_v15  ;;  %1224 = vmatpush3.bf16.msra.mxu1 %v1356_v21 }
  0x25   : > { %1281 = vmatprep.subr.bf16.mxu1 %v1366_v36 }
  0x26   : > { %1250 = vmatmul.mubr.bf16.vlgmr.msra.gmra.mrb[0].mxu0 %v1342_v18 }
  0x27   : > { %1258 = vmatpush3.bf16.msra.mxu0 %v1340_v15  ;;  %1253 = vmatprep.mubr.bf16.mxu0 %v1353_v20 }
  0x28   : > { %1259 = vmatprep.subr.bf16.mxu0 %v1343_v19  ;;  %1226 = vmatmul.mubr.bf16.vlgmr.msra.gmra.mrb[0].mxu1 %v1359_v24 }
  0x29   : > { %1229 = vmatprep.mubr.bf16.mxu1 %v1362_v27  ;;  %1282 = vmatpush3.bf16.msra.mxu1 %v1366_v36 }
  0x2a   : > { %1283 = vmatprep.subr.bf16.mxu1 %v1367_v37 }
  0x2b   : > { %1260 = vmatpush3.bf16.msra.mxu0 %v1343_v19 }
  0x2c   : > { %1261 = vmatprep.subr.bf16.mxu0 %v1345_v22 }
  0x2d   : > { %1284 = vmatpush3.bf16.msra.mxu1 %v1367_v37 }
  0x2e   : > { %1254 = vmatmul.mubr.bf16.gmra.mrb[4].mxu0 %v1354_v23  ;;  %1285 = vmatprep.subr.bf16.mxu1 %v1368_v38 }
  0x2f   : > { %1262 = vmatpush3.bf16.msra.mxu0 %v1345_v22  ;;  %1273 = vmatprep.mubr.bf16.mxu0 %v1360_v25 }
  0x30   : > { %1263 = vmatprep.subr.bf16.mxu0 %v1347_v26  ;;  %1230 = vmatmul.mubr.bf16.gmra.mrb[4].mxu1 %v1363_v29 }
  0x31   : > { %1286 = vmatpush3.bf16.msra.mxu1 %v1368_v38 }
  0x32   : > { %1287 = vmatprep.subr.bf16.mxu1 %v1369_v39 }
  0x33   : > { %1264 = vmatpush3.bf16.msra.mxu0 %v1347_v26 }
  0x34   : > { %1265 = vmatprep.subr.bf16.mxu0 %v1349_v28 }
  0x35   : > { %1288 = vmatpush3.bf16.msra.mxu1 %v1369_v39 }
  0x36   : > { %1289 = vmatprep.subr.bf16.mxu1 %v1370_v40 }
  0x37   : > { %1266 = vmatpush3.bf16.msra.mxu0 %v1349_v28 }
  0x38   : > { %1267 = vmatprep.subr.bf16.mxu0 %v1351_v30 }
  0x39   : > { %1290 = vmatpush3.bf16.msra.mxu1 %v1370_v40 }
  0x3a   : > { %1291 = vmatprep.subr.bf16.mxu1 %v1371_v41 }
  0x3b   : > { %1268 = vmatpush3.bf16.msra.mxu0 %v1351_v30 }
  0x3c   : > { %1269 = vmatprep.subr.bf16.mxu0 %v1355_v31 }
  0x3d   : > { %1292 = vmatpush3.bf16.msra.mxu1 %v1371_v41 }
  0x3e   : > { %1293 = vmatprep.subr.bf16.mxu1 %v1372_v42 }
  0x3f   : > { %1270 = vmatpush3.bf16.msra.mxu0 %v1355_v31 }
  0x40   : > { %1271 = vmatprep.subr.bf16.mxu0 %v1358_v32 }
  0x41   : > { %1294 = vmatpush3.bf16.msra.mxu1 %v1372_v42 }
  0x42   : > { %1295 = vmatprep.subr.bf16.mxu1 %v1373_v43 }
  0x43   : > { %1272 = vmatpush3.bf16.msra.mxu0 %v1358_v32 }
  0x45   : > { %1296 = vmatpush3.bf16.msra.mxu1 %v1373_v43 }
  0x46   : > { %1274 = vmatmul.mubr.bf16.vlgmr.msra.gmra.mrb[0].mxu0 %v1361_v33 }
  0x47   : > { %1277 = vmatprep.mubr.bf16.mxu0 %v1364_v34 }
  0x4e   : > { %1278 = vmatmul.mubr.bf16.gmra.mrb[4].mxu0 %v1365_v35 }
  0xfb   : > { %v1227_v44 = vpop.f32.mrb[0].mxu1 }
  0xfc   : > { %v381_v45 = vpop.f32.mrb[1].mxu1 }
  0xfd   : > { %v1228_v46 = vpop.f32.mrb[2].mxu1 }
  0xfe   : > { %v384_v47 = vpop.f32.mrb[3].mxu1 }
 0x103   : > { %v1231_v48 = vpop.f32.mrb[4].mxu1 }
 0x104   : > { %v397_v49 = vpop.f32.mrb[5].mxu1 }
 0x105   : > { %v1232_v50 = vpop.f32.mrb[6].mxu1 }
 0x106   : > { %v400_v51 = vpop.f32.mrb[7].mxu1 }
 0x119   : > { %v1275_v52 = vpop.f32.mrb[0].mxu0 }
 0x11a   : > { %v1305_v54 = vadd.f32 %v1275_v52, %v1227_v44  ;;  %v680_v55 = vpop.f32.mrb[1].mxu0 }
 0x11b   : > { %v1306_v56 = vadd.f32 %v680_v55, %v381_v45  ;;  %v1276_v57 = vpop.f32.mrb[2].mxu0 }
 0x11c   : > { %v1571_v58 = vadd.f32 %v1305_v54, %v1101_v53  ;;  %v1307_v59 = vadd.f32 %v1276_v57, %v1228_v46  ;;  %v683_v60 = vpop.f32.mrb[3].mxu0 }
 0x11d   : > { %v726_v61 = vadd.f32 %v1306_v56, %v1101_v53  ;;  %v1308_v62 = vadd.f32 %v683_v60, %v384_v47 }
 0x11e   : > { %v1104_v63 = vmul.f32 -1.442695, %v1571_v58  ;;  %v729_v0 = vadd.f32 %v1307_v59, %v1101_v53 }
 0x11f   : > { %v1102_v1 = vmul.f32 -1.442695, %v726_v61  ;;  %v727_v2 = vadd.f32 %v1308_v62, %v1101_v53 }
 0x120   : > { %1374 = vpow2.f32 %v1104_v63  ;;  %v1105_v3 = vmul.f32 -1.442695, %v729_v0 }
 0x121   : > { %1376 = vpow2.f32 %v1102_v1  ;;  %v1103_v4 = vmul.f32 -1.442695, %v727_v2  ;;  %v1279_v5 = vpop.f32.mrb[4].mxu0 }
 0x122   : > { %1378 = vpow2.f32 %v1105_v3  ;;  %v1309_v6 = vadd.f32 %v1279_v5, %v1231_v48  ;;  %v696_v7 = vpop.f32.mrb[5].mxu0 }
 0x123   : > { %1380 = vpow2.f32 %v1103_v4  ;;  %v1310_v8 = vadd.f32 %v696_v7, %v397_v49  ;;  %v1280_v9 = vpop.f32.mrb[6].mxu0 }
 0x124   : > { %v732_v10 = vadd.f32 %v1309_v6, %v1101_v53  ;;  %v1311_v11 = vadd.f32 %v1280_v9, %v1232_v50  ;;  %v699_v12 = vpop.f32.mrb[7].mxu0 }
 0x125   : > { %v730_v13 = vadd.f32 %v1310_v8, %v1101_v53  ;;  %v1312_v14 = vadd.f32 %v699_v12, %v400_v51 }
 0x126   : > { %v1108_v15 = vmul.f32 -1.442695, %v732_v10  ;;  %v733_v16 = vadd.f32 %v1311_v11, %v1101_v53 }
 0x127   : > { %v1106_v17 = vmul.f32 -1.442695, %v730_v13  ;;  %v731_v18 = vadd.f32 %v1312_v14, %v1101_v53 }
 0x128   : > { %1382 = vpow2.f32 %v1108_v15  ;;  %v1109_v19 = vmul.f32 -1.442695, %v733_v16 }
 0x129   : > { %1384 = vpow2.f32 %v1106_v17  ;;  %v1107_v20 = vmul.f32 -1.442695, %v731_v18 }
 0x12a   : > { %v1375_v21 = vpop.eup %1374  ;;  %1386 = vpow2.f32 %v1109_v19 }
 0x12b   : > { %v1377_v22 = vpop.eup %1376  ;;  %v760_v23 = vadd.f32 1.0, %v1375_v21  ;;  %1388 = vpow2.f32 %v1107_v20 }
 0x12c   : > { %v1379_v24 = vpop.eup %1378  ;;  %v758_v25 = vadd.f32 1.0, %v1377_v22 }
 0x12d   : > { %v1381_v26 = vpop.eup %1380  ;;  %1390 = vrcp.f32 %v760_v23  ;;  %v761_v27 = vadd.f32 1.0, %v1379_v24 }
 0x12e   : > { %1392 = vrcp.f32 %v758_v25  ;;  %v759_v28 = vadd.f32 1.0, %v1381_v26 }
 0x12f   : > { %1394 = vrcp.f32 %v761_v27 }
 0x130   : > { %1396 = vrcp.f32 %v759_v28 }
 0x132   : > { %v1383_v29 = vpop.eup %1382 }
 0x133   : > { %v1385_v30 = vpop.eup %1384  ;;  %v764_v31 = vadd.f32 1.0, %v1383_v29 }
 0x134   : > { %v1387_v32 = vpop.eup %1386  ;;  %v762_v33 = vadd.f32 1.0, %v1385_v30 }
 0x135   : > { %v1389_v34 = vpop.eup %1388  ;;  %1398 = vrcp.f32 %v764_v31  ;;  %v765_v35 = vadd.f32 1.0, %v1387_v32 }
 0x136   : > { %1400 = vrcp.f32 %v762_v33  ;;  %v763_v36 = vadd.f32 1.0, %v1389_v34 }
 0x137   : > { %v1391_v37 = vpop.eup %1390  ;;  %1402 = vrcp.f32 %v765_v35 }
 0x138   : > { %v1393_v38 = vpop.eup %1392  ;;  %1404 = vrcp.f32 %v763_v36  ;;  %v784_v41 = vmul.f32 %v1391_v37, %v1571_v58  ;;  %v1110_v58 = vld [vmem:[%s1589_s4] ss:$0 sm:$0xff] }
 0x139   : > { %v1395_v39 = vpop.eup %1394  ;;  %v782_v43 = vmul.f32 %v1393_v38, %v726_v61 }
 0x13a   : > { %v1397_v40 = vpop.eup %1396  ;;  %v785_v42 = vmul.f32 %v1395_v39, %v729_v0 }
 0x13b   : > { %v783_v44 = vmul.f32 %v1397_v40, %v727_v2 }
 0x13c   : > { %v791_v45 = vpack.c.bf16 %v785_v42, %v784_v41 }
 0x13d   : > { %v790_v46 = vpack.c.bf16 %v783_v44, %v782_v43 }
 0x13f   : > { %v1399_v47 = vpop.eup %1398  ;;  %1297 = vmatprep.mubr.bf16.mxu1 %v790_v46 }
 0x140   : > { %v1401_v48 = vpop.eup %1400  ;;  %1298 = vmatmul.mubr.bf16.vlgmr.msra.gmra.mrb[8].mxu1 %v791_v45  ;;  %v788_v51 = vmul.f32 %v1399_v47, %v732_v10 }
 0x141   : > { %v1403_v49 = vpop.eup %1402  ;;  %v786_v53 = vmul.f32 %v1401_v48, %v730_v13 }
 0x142   : > { %v1405_v50 = vpop.eup %1404  ;;  %v789_v52 = vmul.f32 %v1403_v49, %v733_v16 }
 0x143   : > { %v787_v54 = vmul.f32 %v1405_v50, %v731_v18 }
 0x144   : > { %v793_v55 = vpack.c.bf16 %v789_v52, %v788_v51 }
 0x145   : > { %v792_v56 = vpack.c.bf16 %v787_v54, %v786_v53 }
 0x147   : > { %1301 = vmatprep.mubr.bf16.mxu1 %v792_v56 }
 0x148   : > { %1302 = vmatmul.mubr.bf16.gmra.mrb[12].mxu1 %v793_v55 }
 0x213   : > { %v1299_v57 = vpop.f32.mrb[8].mxu1 }
 0x214   : > { %v899_v59 = vpop.f32.mrb[9].mxu1  ;;  %v908_v61 = vadd.f32 %v1299_v57, %v1110_v58 }
 0x215   : > { %v1300_v60 = vpop.f32.mrb[10].mxu1  ;;  %v900_v0 = vadd.f32 %v1110_v58, %v899_v59 }
 0x216   : > { %v911_v62 = vadd.f32 %v1300_v60, %v1110_v58  ;;  %v902_v63 = vpop.f32.mrb[11].mxu1 }
 0x217   : > { %v903_v1 = vadd.f32 %v1110_v58, %v902_v63 }
 0x218   : > { %v1146_v2 = vpack.c.bf16 %v911_v62, %v908_v61 }
 0x219   : > { %v1141_v3 = vpack.c.bf16 %v903_v1, %v900_v0 }
 0x21a   : > { %1158 = vst [vmem:[%s224_s27 + $0x8] sm:$0xff] %v1146_v2  }
 0x21b   : > { %1142 = vst [vmem:[%s224_s27] sm:$0xff] %v1141_v3   ;;  %v1303_v4 = vpop.f32.mrb[12].mxu1 }
 0x21c   : > { %v915_v5 = vpop.f32.mrb[13].mxu1  ;;  %v924_v7 = vadd.f32 %v1303_v4, %v1110_v58 }
 0x21d   : > { %v1304_v6 = vpop.f32.mrb[14].mxu1  ;;  %v916_v10 = vadd.f32 %v1110_v58, %v915_v5 }
 0x21e   : > { %v927_v8 = vadd.f32 %v1304_v6, %v1110_v58  ;;  %v918_v9 = vpop.f32.mrb[15].mxu1 }
 0x21f   : > { %v919_v11 = vadd.f32 %v1110_v58, %v918_v9 }
 0x220   : > { %v1156_v12 = vpack.c.bf16 %v927_v8, %v924_v7 }
 0x221   : > { %v1151_v13 = vpack.c.bf16 %v919_v11, %v916_v10 }
 0x222   : > { %1160 = vst [vmem:[%s224_s27 + $0x18] sm:$0xff] %v1156_v12  }
 0x223   : > { %1159 = vst [vmem:[%s224_s27 + $0x10] sm:$0xff] %v1151_v13  }
 0x224 PF: > { %s15_s18 = sadd.s32 1, %s1412_s18  }
 0x225   : > { %p12_p4 = scmp.ge.s32.totalorder %s15_s18, 4  }
 0x227   :  { %14 = sbr.rel (!%p12_p4) target bundleno = 1 (0x1), region = 72 }

// kernel: effv2s_deepsuper_forward.11
= control target key start
LH: loop header
LB: loop body
LE: loop exit
PB: predicated region body
PF: predicated region fallthrough
CT: control target
= control target key end

     0   :  { %vm295_vm0 = vcmask 1045504   ;;  %s1070_s1 = inlined_call_operand.vmem [shape: bf16[3,128,128], index: 1, kind: input, shape index: {}]   ;;  %s1071_s0 = inlined_call_operand.vmem [shape: bf16[2,20,256], index: 0, kind: input, shape index: {}]   ;;  %s1072_s3 = inlined_call_operand.vmem [shape: bf16[128,128], index: 3, kind: input, shape index: {}]   ;;  %s1073_s2 = inlined_call_operand.vmem [shape: f32[1,128], index: 2, kind: input, shape index: {}]   ;;  %s1074_s4 = inlined_call_operand.vmem [shape: f32[1,128], index: 4, kind: input, shape index: {}]   ;;  %s1075_s5 = inlined_call_operand.vmem [shape: bf16[2,16,128], index: 5, kind: output, shape index: {}]  }
   0x1   :  { %v850_v0 = vld [vmem:[%s1070_s1] sm:$0xff]   ;;  %v851_v1 = vld [vmem:[%s1070_s1 + $0x8] sm:$0xff]   ;;  %v852_v2 = vld [vmem:[%s1070_s1 + $0x10] sm:$0xff]  }
   0x2   :  { %782 = vmatprep.subr.bf16.mxu0 %v850_v0  ;;  %v853_v3 = vld [vmem:[%s1070_s1 + $0x18] sm:$0xff]   ;;  %v858_v4 = vld [vmem:[%s1070_s1 + $0x40] sm:$0xff]   ;;  %v861_v6 = vld [vmem:[%s1070_s1 + $0x48] sm:$0xff]  }
   0x3   :  { %783 = vmatpush3.bf16.msra.mxu0 %v850_v0  ;;  %v859_v5 = vld [vmem:[%s1071_s0] ss:$8 sps:$4 sm:$0xff]   ;;  %762 = vmatprep.subr.bf16.mxu1 %v858_v4  ;;  %v864_v8 = vld [vmem:[%s1070_s1 + $0x50] sm:$0xff]   ;;  %v866_v10 = vld [vmem:[%s1070_s1 + $0x58] sm:$0xff]  }
   0x4   :  { %784 = vmatprep.subr.bf16.mxu0 %v851_v1  ;;  %763 = vmatpush3.bf16.msra.mxu1 %v858_v4  ;;  %v854_v7 = vld [vmem:[%s1070_s1 + $0x20] sm:$0xff]   ;;  %v855_v9 = vld [vmem:[%s1070_s1 + $0x28] sm:$0xff]   ;;  %v856_v11 = vld [vmem:[%s1070_s1 + $0x30] sm:$0xff]  }
   0x5   :  { %798 = vmatprep.mubr.bf16.mxu0 %v859_v5  ;;  %764 = vmatprep.subr.bf16.mxu1 %v861_v6  ;;  %v868_v12 = vld [vmem:[%s1070_s1 + $0x60] sm:$0xff]   ;;  %v857_v13 = vld [vmem:[%s1070_s1 + $0x38] sm:$0xff]   ;;  %v870_v14 = vld [vmem:[%s1070_s1 + $0x68] sm:$0xff]  }
   0x6   :  { %v875_v15 = vld [vmem:[%s1071_s0 + $0x4] ss:$8 sps:$4 sm:$0xff]   ;;  %v872_v17 = vld [vmem:[%s1070_s1 + $0x70] sm:$0xff]   ;;  %v862_v18 = vld [vmem:[%s1071_s0 + $0x18] ss:$8 sps:$4 sm:$0xff]  }
   0x7   :  { %785 = vmatpush3.bf16.msra.mxu0 %v851_v1  ;;  %v860_v16 = vld [vmem:[%s1070_s1 + $0x80] sm:$0xff]   ;;  %778 = vmatprep.mubr.bf16.mxu1 %v875_v15  ;;  %v879_v20 = vld [vmem:[%s1071_s0 + $0x10] ss:$0 sps:$4 sm:$0x33]   ;;  %v863_v23 = vld [vmem:[%s1070_s1 + $0x88] sm:$0xff]  }
   0x8   :  { %786 = vmatprep.subr.bf16.mxu0 %v852_v2  ;;  %765 = vmatpush3.bf16.msra.mxu1 %v861_v6  ;;  %v878_v19 = vld [vmem:[%s1071_s0] ss:$8 sps:$4 sm:$0xfc]   ;;  %v297_v22 = vrot.slane %v879_v20, 2  ;;  %v874_v24 = vld [vmem:[%s1070_s1 + $0x78] sm:$0xff]   ;;  %v865_v26 = vld [vmem:[%s1070_s1 + $0x90] sm:$0xff]  }
   0x9   :  { %766 = vmatprep.subr.bf16.mxu1 %v864_v8  ;;  %v296_v21 = vrot.slane %v878_v19, 2  ;;  %v877_v27 = vld [vmem:[%s1071_s0 + $0x1c] ss:$8 sps:$4 sm:$0xff]   ;;  %v871_v30 = vld [vmem:[%s1070_s1 + $0xa8] sm:$0xff]   ;;  %v873_v31 = vld [vmem:[%s1070_s1 + $0xb0] sm:$0xff]  }
   0xa   :  { %v867_v28 = vld [vmem:[%s1070_s1 + $0x98] sm:$0xff]   ;;  %v869_v29 = vld [vmem:[%s1070_s1 + $0xa0] sm:$0xff]   ;;  %v881_v33 = vld [vmem:[%s1071_s0 + $0x28] ss:$0 sps:$4 sm:$0x33]  }
   0xb   :  { %787 = vmatpush3.bf16.msra.mxu0 %v852_v2  ;;  %v298_v25 = vsel %vm295_vm0, %v296_v21, %v297_v22  ;;  %v880_v32 = vld [vmem:[%s1071_s0 + $0x18] ss:$8 sps:$4 sm:$0xfc]   ;;  %v309_v36 = vrot.slane %v881_v33, 2  ;;  %v883_v39 = vld [vmem:[%s1072_s3 + $0x8] sm:$0xff]   ;;  %v884_v40 = vld [vmem:[%s1072_s3 + $0x10] sm:$0xff]  }
   0xc   :  { %788 = vmatprep.subr.bf16.mxu0 %v853_v3  ;;  %767 = vmatpush3.bf16.msra.mxu1 %v864_v8  ;;  %v876_v34 = vld [vmem:[%s1070_s1 + $0xb8] sm:$0xff]   ;;  %v308_v35 = vrot.slane %v880_v32, 2  ;;  %v882_v38 = vld [vmem:[%s1072_s3] sm:$0xff]   ;;  %v887_v43 = vld [vmem:[%s1072_s3 + $0x28] sm:$0xff]  }
   0xd   :  { %768 = vmatprep.subr.bf16.mxu1 %v866_v10  ;;  %v885_v41 = vld [vmem:[%s1072_s3 + $0x18] sm:$0xff]   ;;  %v886_v42 = vld [vmem:[%s1072_s3 + $0x20] sm:$0xff]   ;;  %v888_v44 = vld [vmem:[%s1072_s3 + $0x30] sm:$0xff]  }
   0xe   :  { %v310_v37 = vsel %vm295_vm0, %v308_v35, %v309_v36  ;;  %v889_v45 = vld [vmem:[%s1072_s3 + $0x38] sm:$0xff]   ;;  %v687_v51 = vld [vmem:[%s1073_s2] ss:$0 sm:$0xff] }
   0xf   :  { %789 = vmatpush3.bf16.msra.mxu0 %v853_v3  ;;  %v692_v22 = vld [vmem:[%s1074_s4] ss:$0 sm:$0xff] }
  0x10   :  { %790 = vmatprep.subr.bf16.mxu0 %v854_v7  ;;  %769 = vmatpush3.bf16.msra.mxu1 %v866_v10 }
  0x11   :  { %770 = vmatprep.subr.bf16.mxu1 %v868_v12 }
  0x13   :  { %791 = vmatpush3.bf16.msra.mxu0 %v854_v7 }
  0x14   :  { %792 = vmatprep.subr.bf16.mxu0 %v855_v9  ;;  %771 = vmatpush3.bf16.msra.mxu1 %v868_v12 }
  0x15   :  { %772 = vmatprep.subr.bf16.mxu1 %v870_v14 }
  0x17   :  { %793 = vmatpush3.bf16.msra.mxu0 %v855_v9 }
  0x18   :  { %794 = vmatprep.subr.bf16.mxu0 %v856_v11  ;;  %773 = vmatpush3.bf16.msra.mxu1 %v870_v14 }
  0x19   :  { %774 = vmatprep.subr.bf16.mxu1 %v872_v17 }
  0x1b   :  { %795 = vmatpush3.bf16.msra.mxu0 %v856_v11 }
  0x1c   :  { %796 = vmatprep.subr.bf16.mxu0 %v857_v13  ;;  %775 = vmatpush3.bf16.msra.mxu1 %v872_v17 }
  0x1d   :  { %776 = vmatprep.subr.bf16.mxu1 %v874_v24 }
  0x1f   :  { %797 = vmatpush3.bf16.msra.mxu0 %v857_v13 }
  0x20   :  { %802 = vmatprep.subr.bf16.mxu0 %v860_v16  ;;  %777 = vmatpush3.bf16.msra.mxu1 %v874_v24 }
  0x21   :  { %822 = vmatprep.subr.bf16.mxu1 %v882_v38 }
  0x22   :  { %799 = vmatmul.mubr.bf16.vlgmr.msra.gmra.mrb[0].mxu0 %v862_v18 }
  0x23   :  { %803 = vmatpush3.bf16.msra.mxu0 %v860_v16  ;;  %818 = vmatprep.mubr.bf16.mxu0 %v298_v25 }
  0x24   :  { %804 = vmatprep.subr.bf16.mxu0 %v863_v23  ;;  %779 = vmatmul.mubr.bf16.vlgmr.msra.gmra.mrb[0].mxu1 %v877_v27 }
  0x25   :  { %823 = vmatpush3.bf16.msra.mxu1 %v882_v38 }
  0x26   :  { %824 = vmatprep.subr.bf16.mxu1 %v883_v39 }
  0x27   :  { %805 = vmatpush3.bf16.msra.mxu0 %v863_v23 }
  0x28   :  { %806 = vmatprep.subr.bf16.mxu0 %v865_v26 }
  0x29   :  { %825 = vmatpush3.bf16.msra.mxu1 %v883_v39 }
  0x2a   :  { %826 = vmatprep.subr.bf16.mxu1 %v884_v40 }
  0x2b   :  { %807 = vmatpush3.bf16.msra.mxu0 %v865_v26 }
  0x2c   :  { %808 = vmatprep.subr.bf16.mxu0 %v867_v28 }
  0x2d   :  { %827 = vmatpush3.bf16.msra.mxu1 %v884_v40 }
  0x2e   :  { %828 = vmatprep.subr.bf16.mxu1 %v885_v41 }
  0x2f   :  { %809 = vmatpush3.bf16.msra.mxu0 %v867_v28 }
  0x30   :  { %810 = vmatprep.subr.bf16.mxu0 %v869_v29 }
  0x31   :  { %829 = vmatpush3.bf16.msra.mxu1 %v885_v41 }
  0x32   :  { %830 = vmatprep.subr.bf16.mxu1 %v886_v42 }
  0x33   :  { %811 = vmatpush3.bf16.msra.mxu0 %v869_v29 }
  0x34   :  { %812 = vmatprep.subr.bf16.mxu0 %v871_v30 }
  0x35   :  { %831 = vmatpush3.bf16.msra.mxu1 %v886_v42 }
  0x36   :  { %832 = vmatprep.subr.bf16.mxu1 %v887_v43 }
  0x37   :  { %813 = vmatpush3.bf16.msra.mxu0 %v871_v30 }
  0x38   :  { %814 = vmatprep.subr.bf16.mxu0 %v873_v31 }
  0x39   :  { %833 = vmatpush3.bf16.msra.mxu1 %v887_v43 }
  0x3a   :  { %834 = vmatprep.subr.bf16.mxu1 %v888_v44 }
  0x3b   :  { %815 = vmatpush3.bf16.msra.mxu0 %v873_v31 }
  0x3c   :  { %816 = vmatprep.subr.bf16.mxu0 %v876_v34 }
  0x3d   :  { %835 = vmatpush3.bf16.msra.mxu1 %v888_v44 }
  0x3e   :  { %836 = vmatprep.subr.bf16.mxu1 %v889_v45 }
  0x3f   :  { %817 = vmatpush3.bf16.msra.mxu0 %v876_v34 }
  0x41   :  { %837 = vmatpush3.bf16.msra.mxu1 %v889_v45 }
  0x42   :  { %819 = vmatmul.mubr.bf16.vlgmr.msra.gmra.mrb[0].mxu0 %v310_v37 }
  0xf7   :  { %v780_v46 = vpop.f32.mrb[0].mxu1 }
  0xf8   :  { %v169_v47 = vpop.f32.mrb[1].mxu1 }
  0xf9   :  { %v781_v48 = vpop.f32.mrb[2].mxu1 }
  0xfa   :  { %v172_v49 = vpop.f32.mrb[3].mxu1 }
 0x115   :  { %v820_v50 = vpop.f32.mrb[0].mxu0 }
 0x116   :  { %v842_v52 = vadd.f32 %v820_v50, %v780_v46  ;;  %v411_v53 = vpop.f32.mrb[1].mxu0 }
 0x117   :  { %v843_v54 = vadd.f32 %v411_v53, %v169_v47  ;;  %v821_v55 = vpop.f32.mrb[2].mxu0 }
 0x118   :  { %v439_v56 = vadd.f32 %v842_v52, %v687_v51  ;;  %v844_v57 = vadd.f32 %v821_v55, %v781_v48  ;;  %v414_v58 = vpop.f32.mrb[3].mxu0 }
 0x119   :  { %v437_v59 = vadd.f32 %v843_v54, %v687_v51  ;;  %v845_v60 = vadd.f32 %v414_v58, %v172_v49 }
 0x11a   :  { %v690_v61 = vmul.f32 -1.442695, %v439_v56  ;;  %v440_v62 = vadd.f32 %v844_v57, %v687_v51 }
 0x11b   :  { %v688_v63 = vmul.f32 -1.442695, %v437_v59  ;;  %v438_v0 = vadd.f32 %v845_v60, %v687_v51 }
 0x11c   :  { %890 = vpow2.f32 %v690_v61  ;;  %v691_v1 = vmul.f32 -1.442695, %v440_v62 }
 0x11d   :  { %892 = vpow2.f32 %v688_v63  ;;  %v689_v2 = vmul.f32 -1.442695, %v438_v0 }
 0x11e   :  { %894 = vpow2.f32 %v691_v1 }
 0x11f   :  { %896 = vpow2.f32 %v689_v2 }
 0x126   :  { %v891_v3 = vpop.eup %890 }
 0x127   :  { %v893_v4 = vpop.eup %892  ;;  %v455_v5 = vadd.f32 1.0, %v891_v3 }
 0x128   :  { %v895_v6 = vpop.eup %894  ;;  %v453_v7 = vadd.f32 1.0, %v893_v4 }
 0x129   :  { %v897_v8 = vpop.eup %896  ;;  %898 = vrcp.f32 %v455_v5  ;;  %v456_v9 = vadd.f32 1.0, %v895_v6 }
 0x12a   :  { %900 = vrcp.f32 %v453_v7  ;;  %v454_v10 = vadd.f32 1.0, %v897_v8 }
 0x12b   :  { %902 = vrcp.f32 %v456_v9 }
 0x12c   :  { %904 = vrcp.f32 %v454_v10 }
 0x133   :  { %v899_v11 = vpop.eup %898 }
 0x134   :  { %v901_v12 = vpop.eup %900  ;;  %v467_v15 = vmul.f32 %v899_v11, %v439_v56 }
 0x135   :  { %v903_v13 = vpop.eup %902  ;;  %v465_v17 = vmul.f32 %v901_v12, %v437_v59 }
 0x136   :  { %v905_v14 = vpop.eup %904  ;;  %v468_v16 = vmul.f32 %v903_v13, %v440_v62 }
 0x137   :  { %v466_v18 = vmul.f32 %v905_v14, %v438_v0 }
 0x138   :  { %v470_v19 = vpack.c.bf16 %v468_v16, %v467_v15 }
 0x139   :  { %v469_v20 = vpack.c.bf16 %v466_v18, %v465_v17 }
 0x13b   :  { %838 = vmatprep.mubr.bf16.mxu1 %v469_v20 }
 0x13c   :  { %839 = vmatmul.mubr.bf16.vlgmr.msra.gmra.mrb[4].mxu1 %v470_v19 }
 0x20f   :  { %v840_v21 = vpop.f32.mrb[4].mxu1 }
 0x210   :  { %v576_v23 = vpop.f32.mrb[5].mxu1  ;;  %v585_v25 = vadd.f32 %v840_v21, %v692_v22 }
 0x211   :  { %v841_v24 = vpop.f32.mrb[6].mxu1  ;;  %v577_v28 = vadd.f32 %v692_v22, %v576_v23 }
 0x212   :  { %v588_v26 = vadd.f32 %v841_v24, %v692_v22  ;;  %v579_v27 = vpop.f32.mrb[7].mxu1 }
 0x213   :  { %v580_v29 = vadd.f32 %v692_v22, %v579_v27 }
 0x214   :  { %v719_v30 = vpack.c.bf16 %v588_v26, %v585_v25 }
 0x215   :  { %v714_v31 = vpack.c.bf16 %v580_v29, %v577_v28 }
 0x216   :  { %721 = vst [vmem:[%s1075_s5 + $0x8] sm:$0xff] %v719_v30  }
 0x217   :  { %715 = vst [vmem:[%s1075_s5] sm:$0xff] %v714_v31  }

// kernel: effv2s_deepsuper_forward.12
= control target key start
LH: loop header
LB: loop body
LE: loop exit
PB: predicated region body
PF: predicated region fallthrough
CT: control target
= control target key end

     0   :  { %vm92_vm0 = vcmask 1045504   ;;  %s1448_s1 = inlined_call_operand.vmem [shape: bf16[3,256,128], index: 1, kind: input, shape index: {}]   ;;  %s1449_s0 = inlined_call_operand.vmem [shape: bf16[2,24,256], index: 0, kind: input, shape index: {}]   ;;  %s1450_s3 = inlined_call_operand.vmem [shape: bf16[128,128], index: 3, kind: input, shape index: {}]   ;;  %s1451_s2 = inlined_call_operand.vmem [shape: f32[1,128], index: 2, kind: input, shape index: {}]   ;;  %s1452_s4 = inlined_call_operand.vmem [shape: f32[1,128], index: 4, kind: input, shape index: {}]   ;;  %s1453_s5 = inlined_call_operand.vmem [shape: bf16[2,16,128], index: 5, kind: output, shape index: {}]  }
   0x1   :  { %v1108_v0 = vld [vmem:[%s1448_s1 + $0xc0] sm:$0xff]   ;;  %v1112_v4 = vld [vmem:[%s1448_s1 + $0xc8] sm:$0xff]   ;;  %v1116_v8 = vld [vmem:[%s1448_s1 + $0xd0] sm:$0xff]  }
   0x2   :  { %v1109_v1 = vld [vmem:[%s1448_s1 + $0x40] sm:$0xff]   ;;  %994 = vmatprep.subr.bf16.mxu0 %v1108_v0  ;;  %v1113_v5 = vld [vmem:[%s1448_s1 + $0x48] sm:$0xff]   ;;  %v1117_v9 = vld [vmem:[%s1448_s1 + $0x50] sm:$0xff]  }
   0x3   :  { %v1110_v2 = vld [vmem:[%s1448_s1 + $0x80] sm:$0xff]   ;;  %1022 = vmatprep.subr.bf16.mxu1 %v1109_v1  ;;  %v1114_v6 = vld [vmem:[%s1448_s1 + $0x88] sm:$0xff]   ;;  %v1118_v10 = vld [vmem:[%s1448_s1 + $0x90] sm:$0xff]  }
   0x4   :  { %v1111_v3 = vld [vmem:[%s1448_s1] sm:$0xff]   ;;  %995 = vmatpush3.bf16.msra.mxu0 %v1110_v2  ;;  %v1115_v7 = vld [vmem:[%s1448_s1 + $0x8] sm:$0xff]   ;;  %v1119_v11 = vld [vmem:[%s1448_s1 + $0x10] sm:$0xff]  }
   0x5   :  { %1023 = vmatpush3.bf16.msra.mxu1 %v1111_v3  ;;  %996 = vmatprep.subr.bf16.mxu0 %v1112_v4  ;;  %v1120_v12 = vld [vmem:[%s1448_s1 + $0xd8] sm:$0xff]   ;;  %v1124_v16 = vld [vmem:[%s1448_s1 + $0xe0] sm:$0xff]   ;;  %v1128_v20 = vld [vmem:[%s1448_s1 + $0xe8] sm:$0xff]  }
   0x6   :  { %1024 = vmatprep.subr.bf16.mxu1 %v1113_v5  ;;  %v1121_v13 = vld [vmem:[%s1448_s1 + $0x58] sm:$0xff]   ;;  %v1125_v17 = vld [vmem:[%s1448_s1 + $0x60] sm:$0xff]   ;;  %v1129_v21 = vld [vmem:[%s1448_s1 + $0x68] sm:$0xff]  }
   0x7   :  { %v1122_v14 = vld [vmem:[%s1448_s1 + $0x98] sm:$0xff]   ;;  %v1126_v18 = vld [vmem:[%s1448_s1 + $0xa0] sm:$0xff]   ;;  %v1130_v22 = vld [vmem:[%s1448_s1 + $0xa8] sm:$0xff]  }
   0x8   :  { %997 = vmatpush3.bf16.msra.mxu0 %v1114_v6  ;;  %v1123_v15 = vld [vmem:[%s1448_s1 + $0x18] sm:$0xff]   ;;  %v1127_v19 = vld [vmem:[%s1448_s1 + $0x20] sm:$0xff]   ;;  %v1131_v23 = vld [vmem:[%s1448_s1 + $0x28] sm:$0xff]  }
   0x9   :  { %1025 = vmatpush3.bf16.msra.mxu1 %v1115_v7  ;;  %998 = vmatprep.subr.bf16.mxu0 %v1116_v8  ;;  %v1132_v24 = vld [vmem:[%s1448_s1 + $0xf0] sm:$0xff]   ;;  %v1136_v28 = vld [vmem:[%s1448_s1 + $0xf8] sm:$0xff]   ;;  %v1325_v32 = vld [vmem:[%s1449_s0 + $0x8] sm:$0xff] }
   0xa   :  { %1026 = vmatprep.subr.bf16.mxu1 %v1117_v9  ;;  %v1133_v25 = vld [vmem:[%s1448_s1 + $0x70] sm:$0xff]   ;;  %v1137_v29 = vld [vmem:[%s1448_s1 + $0x78] sm:$0xff]   ;;  %v78_v33 = vld [vmem:[%s1449_s0] sm:$0xcc] }
   0xb   :  { %v1134_v26 = vld [vmem:[%s1448_s1 + $0xb0] sm:$0xff]   ;;  %v1138_v30 = vld [vmem:[%s1448_s1 + $0xb8] sm:$0xff]   ;;  %v835_v35 = vcombine.high %v78_v33, %v1325_v32  ;;  %v21_v37 = vld [vmem:[%s1449_s0] sm:$0xff]  ;;  %v834_v38 = vcombine.low %v78_v33, %v1325_v32 }
   0xc   :  { %999 = vmatpush3.bf16.msra.mxu0 %v1118_v10  ;;  %v1135_v27 = vld [vmem:[%s1448_s1 + $0x30] sm:$0xff]   ;;  %v1139_v31 = vld [vmem:[%s1448_s1 + $0x38] sm:$0xff]   ;;  %v828_v40 = vcombine.low %v21_v37, %v1325_v32  ;;  %v829_v41 = vcombine.high %v21_v37, %v1325_v32  ;;  %v1146_v42 = vld [vmem:[%s1448_s1 + $0x140] sm:$0xff]  }
   0xd   :  { %1027 = vmatpush3.bf16.msra.mxu1 %v1119_v11  ;;  %1000 = vmatprep.subr.bf16.mxu0 %v1120_v12  ;;  %v79_v34 = vld [vmem:[%s1449_s0 + $0x10] sm:$0x33]  ;;  %v96_v43 = vrot.slane %v835_v35, 2  ;;  %v93_v45 = vrot.slane %v834_v38, 2  ;;  %v1147_v47 = vld [vmem:[%s1448_s1 + $0x100] sm:$0xff]   ;;  %v1148_v50 = vld [vmem:[%s1448_s1 + $0x148] sm:$0xff]  }
   0xe   :  { %1028 = vmatprep.subr.bf16.mxu1 %v1121_v13  ;;  %v837_v36 = vcombine.high %v79_v34, %v79_v34  ;;  %v836_v39 = vcombine.low %v79_v34, %v79_v34  ;;  %425 = vmatprep.mubr.bf16.mxu1 %v829_v41  ;;  %v1149_v51 = vld [vmem:[%s1448_s1 + $0x108] sm:$0xff]   ;;  %v1150_v52 = vld [vmem:[%s1448_s1 + $0x150] sm:$0xff]   ;;  %v827_v54 = vld [vmem:[%s1449_s0 + $0x20] sm:$0xff] }
   0xf   :  { %v1151_v53 = vld [vmem:[%s1448_s1 + $0x110] sm:$0xff]   ;;  %v832_v55 = vld [vmem:[%s1449_s0 + $0x18] sm:$0xcc]  ;;  %v833_v56 = vld [vmem:[%s1449_s0 + $0x28] sm:$0x33] }
  0x10   :  { %1001 = vmatpush3.bf16.msra.mxu0 %v1122_v14  ;;  %v97_v44 = vrot.slane %v837_v36, 2  ;;  %v94_v46 = vrot.slane %v836_v39, 2  ;;  %v826_v57 = vld [vmem:[%s1449_s0 + $0x18] sm:$0xff]  ;;  %v839_v59 = vcombine.high %v832_v55, %v827_v54  ;;  %v841_v60 = vcombine.high %v833_v56, %v833_v56  ;;  %v1154_v5 = vld [vmem:[%s1448_s1 + $0x160] sm:$0xff]   ;;  %v442_v9 = vld [vmem:[%s1449_s0 + $0x10] sm:$0xff] }
  0x11   :  { %1029 = vmatpush3.bf16.msra.mxu1 %v1123_v15  ;;  %1002 = vmatprep.subr.bf16.mxu0 %v1124_v16  ;;  %v1152_v58 = vld [vmem:[%s1448_s1 + $0x158] sm:$0xff]   ;;  %v831_v61 = vcombine.high %v826_v57, %v827_v54  ;;  %v838_v62 = vcombine.low %v832_v55, %v827_v54  ;;  %v840_v63 = vcombine.low %v833_v56, %v833_v56  ;;  %v1155_v10 = vld [vmem:[%s1448_s1 + $0x120] sm:$0xff]   ;;  %v1159_v12 = vld [vmem:[%s1448_s1 + $0x168] sm:$0xff]  }
  0x12   :  { %1030 = vmatprep.subr.bf16.mxu1 %v1125_v17  ;;  %v98_v48 = vsel %vm92_vm0, %v96_v43, %v97_v44  ;;  %v95_v49 = vsel %vm92_vm0, %v93_v45, %v94_v46  ;;  %v830_v0 = vcombine.low %v826_v57, %v827_v54  ;;  %v1153_v1 = vld [vmem:[%s1448_s1 + $0x118] sm:$0xff]   ;;  %v114_v2 = vrot.slane %v839_v59, 2  ;;  %v1163_v13 = vld [vmem:[%s1448_s1 + $0x128] sm:$0xff]   ;;  %v1164_v14 = vld [vmem:[%s1448_s1 + $0x170] sm:$0xff]  }
  0x13   :  { %280 = vmatprep.mubr.bf16.mxu0 %v98_v48  ;;  %v115_v3 = vrot.slane %v841_v60, 2  ;;  %v111_v4 = vrot.slane %v838_v62, 2  ;;  %v112_v6 = vrot.slane %v840_v63, 2  ;;  %v908_v11 = vcombine.high %v1325_v32, %v442_v9  ;;  %v1165_v15 = vld [vmem:[%s1448_s1 + $0x130] sm:$0xff]   ;;  %v1166_v16 = vld [vmem:[%s1448_s1 + $0x178] sm:$0xff]  }
  0x14   :  { %1003 = vmatpush3.bf16.msra.mxu0 %v1126_v18  ;;  %v1167_v17 = vld [vmem:[%s1448_s1 + $0x138] sm:$0xff]   ;;  %v906_v18 = vld [vmem:[%s1449_s0 + $0x28] sm:$0xff]  ;;  %v959_v62 = vld [vmem:[%s1451_s2] ss:$0 sm:$0xff] }
  0x15   :  { %1031 = vmatpush3.bf16.msra.mxu1 %v1127_v19  ;;  %1004 = vmatprep.subr.bf16.mxu0 %v1128_v20  ;;  %v116_v7 = vsel %vm92_vm0, %v114_v2, %v115_v3  ;;  %v113_v8 = vsel %vm92_vm0, %v111_v4, %v112_v6  ;;  %v907_v19 = vcombine.low %v1325_v32, %v442_v9 }
  0x16   :  { %1032 = vmatprep.subr.bf16.mxu1 %v1129_v21  ;;  %v910_v20 = vcombine.high %v827_v54, %v906_v18  ;;  %v909_v21 = vcombine.low %v827_v54, %v906_v18 }
  0x18   :  { %1005 = vmatpush3.bf16.msra.mxu0 %v1130_v22  ;;  %v1172_v22 = vld [vmem:[%s1450_s3] sm:$0xff]  }
  0x19   :  { %1033 = vmatpush3.bf16.msra.mxu1 %v1131_v23  ;;  %1006 = vmatprep.subr.bf16.mxu0 %v1132_v24  ;;  %v1173_v23 = vld [vmem:[%s1450_s3 + $0x8] sm:$0xff]   ;;  %v1174_v24 = vld [vmem:[%s1450_s3 + $0x10] sm:$0xff]  }
  0x1a   :  { %1034 = vmatprep.subr.bf16.mxu1 %v1133_v25  ;;  %v1175_v25 = vld [vmem:[%s1450_s3 + $0x18] sm:$0xff]  }
  0x1c   :  { %1007 = vmatpush3.bf16.msra.mxu0 %v1134_v26  ;;  %v1176_v26 = vld [vmem:[%s1450_s3 + $0x20] sm:$0xff]  }
  0x1d   :  { %1035 = vmatpush3.bf16.msra.mxu1 %v1135_v27  ;;  %1008 = vmatprep.subr.bf16.mxu0 %v1136_v28  ;;  %v1177_v27 = vld [vmem:[%s1450_s3 + $0x28] sm:$0xff]   ;;  %v1178_v28 = vld [vmem:[%s1450_s3 + $0x30] sm:$0xff]  }
  0x1e   :  { %1036 = vmatprep.subr.bf16.mxu1 %v1137_v29  ;;  %v1179_v29 = vld [vmem:[%s1450_s3 + $0x38] sm:$0xff]  }
  0x20   :  { %1009 = vmatpush3.bf16.msra.mxu0 %v1138_v30 }
  0x21   :  { %1037 = vmatpush3.bf16.msra.mxu1 %v1139_v31  ;;  %1050 = vmatprep.subr.bf16.mxu0 %v1146_v42 }
  0x22   :  { %1088 = vmatprep.subr.bf16.mxu1 %v1172_v22 }
  0x23   :  { %281 = vmatmul.mubr.bf16.vlgmr.msra.gmra.mrb[0].mxu0 %v95_v49 }
  0x24   :  { %426 = vmatmul.mubr.bf16.vlgmr.msra.gmra.mrb[0].mxu1 %v828_v40  ;;  %1051 = vmatpush3.bf16.msra.mxu0 %v1147_v47 }
  0x25   :  { %1052 = vmatprep.subr.bf16.mxu0 %v1148_v50  ;;  %433 = vmatprep.mubr.bf16.mxu1 %v831_v61 }
  0x26   :  { %288 = vmatprep.mubr.bf16.mxu0 %v116_v7  ;;  %1089 = vmatpush3.bf16.msra.mxu1 %v1172_v22 }
  0x27   :  { %1090 = vmatprep.subr.bf16.mxu1 %v1173_v23 }
  0x28   :  { %1053 = vmatpush3.bf16.msra.mxu0 %v1149_v51 }
  0x29   :  { %1054 = vmatprep.subr.bf16.mxu0 %v1150_v52 }
  0x2a   :  { %1091 = vmatpush3.bf16.msra.mxu1 %v1173_v23 }
  0x2b   :  { %289 = vmatmul.mubr.bf16.gmra.mrb[4].mxu0 %v113_v8  ;;  %1092 = vmatprep.subr.bf16.mxu1 %v1174_v24 }
  0x2c   :  { %1055 = vmatpush3.bf16.msra.mxu0 %v1151_v53  ;;  %434 = vmatmul.mubr.bf16.gmra.mrb[4].mxu1 %v830_v0 }
  0x2d   :  { %1056 = vmatprep.subr.bf16.mxu0 %v1152_v58  ;;  %619 = vmatprep.mubr.bf16.mxu0 %v908_v11 }
  0x2e   :  { %1093 = vmatpush3.bf16.msra.mxu1 %v1174_v24 }
  0x2f   :  { %1094 = vmatprep.subr.bf16.mxu1 %v1175_v25 }
  0x30   :  { %1057 = vmatpush3.bf16.msra.mxu0 %v1153_v1 }
  0x31   :  { %1058 = vmatprep.subr.bf16.mxu0 %v1154_v5 }
  0x32   :  { %1095 = vmatpush3.bf16.msra.mxu1 %v1175_v25 }
  0x33   :  { %1096 = vmatprep.subr.bf16.mxu1 %v1176_v26 }
  0x34   :  { %1059 = vmatpush3.bf16.msra.mxu0 %v1155_v10 }
  0x35   :  { %1060 = vmatprep.subr.bf16.mxu0 %v1159_v12 }
  0x36   :  { %1097 = vmatpush3.bf16.msra.mxu1 %v1176_v26 }
  0x37   :  { %1098 = vmatprep.subr.bf16.mxu1 %v1177_v27 }
  0x38   :  { %1061 = vmatpush3.bf16.msra.mxu0 %v1163_v13 }
  0x39   :  { %1062 = vmatprep.subr.bf16.mxu0 %v1164_v14 }
  0x3a   :  { %1099 = vmatpush3.bf16.msra.mxu1 %v1177_v27 }
  0x3b   :  { %1100 = vmatprep.subr.bf16.mxu1 %v1178_v28 }
  0x3c   :  { %1063 = vmatpush3.bf16.msra.mxu0 %v1165_v15 }
  0x3d   :  { %1064 = vmatprep.subr.bf16.mxu0 %v1166_v16 }
  0x3e   :  { %1101 = vmatpush3.bf16.msra.mxu1 %v1178_v28 }
  0x3f   :  { %1102 = vmatprep.subr.bf16.mxu1 %v1179_v29 }
  0x40   :  { %1065 = vmatpush3.bf16.msra.mxu0 %v1167_v17 }
  0x42   :  { %1103 = vmatpush3.bf16.msra.mxu1 %v1179_v29 }
  0x43   :  { %620 = vmatmul.mubr.bf16.vlgmr.msra.gmra.mrb[8].mxu0 %v907_v19 }
  0x44   :  { %627 = vmatprep.mubr.bf16.mxu0 %v910_v20 }
  0x4b   :  { %628 = vmatmul.mubr.bf16.gmra.mrb[12].mxu0 %v909_v21 }
  0xf6   :  { %v1010_v32 = vpop.f32.mrb[0].mxu0 }
  0xf7   :  { %v1038_v30 = vpop.f32.mrb[0].mxu1  ;;  %v1011_v35 = vpop.f32.mrb[1].mxu0 }
  0xf8   :  { %v1039_v31 = vpop.f32.mrb[1].mxu1  ;;  %v1012_v37 = vadd.f32 %v1011_v35, %v1010_v32  ;;  %v1013_v38 = vpop.f32.mrb[2].mxu0 }
  0xf9   :  { %v1040_v33 = vadd.f32 %v1039_v31, %v1038_v30  ;;  %v1041_v34 = vpop.f32.mrb[2].mxu1  ;;  %v1014_v40 = vpop.f32.mrb[3].mxu0 }
  0xfa   :  { %v1042_v36 = vpop.f32.mrb[3].mxu1  ;;  %v1015_v42 = vadd.f32 %v1014_v40, %v1013_v38  ;;  %v964_v38 = vld [vmem:[%s1452_s4] ss:$0 sm:$0xff] }
  0xfb   :  { %v1043_v39 = vadd.f32 %v1042_v36, %v1041_v34  ;;  %v428_v41 = vadd.f32 %v1040_v33, %v1012_v37 }
  0xfd   :  { %v431_v43 = vadd.f32 %v1043_v39, %v1015_v42 }
  0xfe   :  { %v1016_v48 = vpop.f32.mrb[4].mxu0 }
  0xff   :  { %v1044_v44 = vpop.f32.mrb[4].mxu1  ;;  %v1017_v50 = vpop.f32.mrb[5].mxu0 }
 0x100   :  { %v1045_v45 = vpop.f32.mrb[5].mxu1  ;;  %v1018_v52 = vadd.f32 %v1017_v50, %v1016_v48  ;;  %v1019_v53 = vpop.f32.mrb[6].mxu0 }
 0x101   :  { %v1046_v46 = vadd.f32 %v1045_v45, %v1044_v44  ;;  %v1047_v47 = vpop.f32.mrb[6].mxu1  ;;  %v1020_v54 = vpop.f32.mrb[7].mxu0 }
 0x102   :  { %v1048_v49 = vpop.f32.mrb[7].mxu1  ;;  %v1021_v56 = vadd.f32 %v1020_v54, %v1019_v53 }
 0x103   :  { %v1049_v51 = vadd.f32 %v1048_v49, %v1047_v47  ;;  %v436_v55 = vadd.f32 %v1046_v46, %v1018_v52 }
 0x105   :  { %v439_v57 = vadd.f32 %v1049_v51, %v1021_v56 }
 0x116   :  { %v1066_v58 = vpop.f32.mrb[8].mxu0 }
 0x117   :  { %v1067_v59 = vpop.f32.mrb[9].mxu0 }
 0x118   :  { %v1068_v60 = vadd.f32 %v1067_v59, %v1066_v58  ;;  %v1069_v61 = vpop.f32.mrb[10].mxu0 }
 0x119   :  { %v1070_v63 = vpop.f32.mrb[11].mxu0 }
 0x11a   :  { %v636_v0 = vadd.f32 %v1068_v60, %v428_v41  ;;  %v1071_v1 = vadd.f32 %v1070_v63, %v1069_v61 }
 0x11c   :  { %v647_v2 = vadd.f32 %v959_v62, %v636_v0  ;;  %v637_v3 = vadd.f32 %v1071_v1, %v431_v43 }
 0x11e   :  { %v960_v4 = vmul.f32 -1.442695, %v647_v2  ;;  %v648_v5 = vadd.f32 %v959_v62, %v637_v3  ;;  %v1072_v6 = vpop.f32.mrb[12].mxu0 }
 0x11f   :  { %v1073_v7 = vpop.f32.mrb[13].mxu0 }
 0x120   :  { %1180 = vpow2.f32 %v960_v4  ;;  %v961_v8 = vmul.f32 -1.442695, %v648_v5  ;;  %v1074_v9 = vadd.f32 %v1073_v7, %v1072_v6  ;;  %v1075_v10 = vpop.f32.mrb[14].mxu0 }
 0x121   :  { %v1076_v11 = vpop.f32.mrb[15].mxu0 }
 0x122   :  { %1182 = vpow2.f32 %v961_v8  ;;  %v638_v12 = vadd.f32 %v1074_v9, %v436_v55  ;;  %v1077_v13 = vadd.f32 %v1076_v11, %v1075_v10 }
 0x124   :  { %v649_v14 = vadd.f32 %v959_v62, %v638_v12  ;;  %v639_v15 = vadd.f32 %v1077_v13, %v439_v57 }
 0x126   :  { %v962_v16 = vmul.f32 -1.442695, %v649_v14  ;;  %v650_v17 = vadd.f32 %v959_v62, %v639_v15 }
 0x128   :  { %1184 = vpow2.f32 %v962_v16  ;;  %v963_v18 = vmul.f32 -1.442695, %v650_v17 }
 0x12a   :  { %v1181_v19 = vpop.eup %1180  ;;  %1186 = vpow2.f32 %v963_v18 }
 0x12b   :  { %v663_v20 = vadd.f32 1.0, %v1181_v19 }
 0x12c   :  { %v1183_v21 = vpop.eup %1182 }
 0x12d   :  { %1188 = vrcp.f32 %v663_v20  ;;  %v664_v22 = vadd.f32 1.0, %v1183_v21 }
 0x12f   :  { %1190 = vrcp.f32 %v664_v22 }
 0x132   :  { %v1185_v23 = vpop.eup %1184 }
 0x133   :  { %v665_v24 = vadd.f32 1.0, %v1185_v23 }
 0x134   :  { %v1187_v25 = vpop.eup %1186 }
 0x135   :  { %1192 = vrcp.f32 %v665_v24  ;;  %v666_v26 = vadd.f32 1.0, %v1187_v25 }
 0x137   :  { %v1189_v27 = vpop.eup %1188  ;;  %1194 = vrcp.f32 %v666_v26 }
 0x138   :  { %v675_v29 = vmul.f32 %v1189_v27, %v647_v2 }
 0x139   :  { %v1191_v28 = vpop.eup %1190 }
 0x13a   :  { %v676_v30 = vmul.f32 %v1191_v28, %v648_v5 }
 0x13c   :  { %v679_v31 = vpack.c.bf16 %v676_v30, %v675_v29 }
 0x13e   :  { %1104 = vmatprep.mubr.bf16.mxu1 %v679_v31 }
 0x13f   :  { %v1193_v32 = vpop.eup %1192 }
 0x140   :  { %v677_v34 = vmul.f32 %v1193_v32, %v649_v14 }
 0x141   :  { %v1195_v33 = vpop.eup %1194 }
 0x142   :  { %v678_v35 = vmul.f32 %v1195_v33, %v650_v17 }
 0x144   :  { %v680_v36 = vpack.c.bf16 %v678_v35, %v677_v34 }
 0x146   :  { %1105 = vmatmul.mubr.bf16.vlgmr.msra.gmra.mrb[8].mxu1 %v680_v36 }
 0x219   :  { %v1106_v37 = vpop.f32.mrb[8].mxu1 }
 0x21a   :  { %v786_v39 = vpop.f32.mrb[9].mxu1  ;;  %v795_v41 = vadd.f32 %v1106_v37, %v964_v38 }
 0x21b   :  { %v1107_v40 = vpop.f32.mrb[10].mxu1  ;;  %v787_v44 = vadd.f32 %v964_v38, %v786_v39 }
 0x21c   :  { %v798_v42 = vadd.f32 %v1107_v40, %v964_v38  ;;  %v789_v43 = vpop.f32.mrb[11].mxu1 }
 0x21d   :  { %v790_v45 = vadd.f32 %v964_v38, %v789_v43 }
 0x21e   :  { %v991_v46 = vpack.c.bf16 %v798_v42, %v795_v41 }
 0x21f   :  { %v986_v47 = vpack.c.bf16 %v790_v45, %v787_v44 }
 0x220   :  { %993 = vst [vmem:[%s1453_s5 + $0x8] sm:$0xff] %v991_v46  }
 0x221   :  { %987 = vst [vmem:[%s1453_s5] sm:$0xff] %v986_v47  }

// kernel: effv2s_deepsuper_forward.13
= control target key start
LH: loop header
LB: loop body
LE: loop exit
PB: predicated region body
PF: predicated region fallthrough
CT: control target
= control target key end

     0   :  { %s1941_s21 = smov 0   ;;  %s2236_s0 = inlined_call_operand.vmem [shape: bf16[2,6,512], index: 0, kind: input, shape index: {}]   ;;  %s2237_s1 = inlined_call_operand.vmem [shape: bf16[3,256,128], index: 1, kind: input, shape index: {}]   ;;  %s2238_s2 = inlined_call_operand.vmem [shape: f32[1,128], index: 2, kind: input, shape index: {}]   ;;  %s2239_s3 = inlined_call_operand.vmem [shape: bf16[128,128], index: 3, kind: input, shape index: {}]   ;;  %s2240_s4 = inlined_call_operand.vmem [shape: f32[1,128], index: 4, kind: input, shape index: {}]   ;;  %s2241_s5 = inlined_call_operand.vmem [shape: bf16[2,64,128], index: 5, kind: input, shape index: {}]   ;;  %s2242_s6 = inlined_call_operand.vmem [shape: bf16[2,16,128], index: 6, kind: input, shape index: {}]   ;;  %s2243_s7 = inlined_call_operand.vmem [shape: bf16[2,16,128], index: 7, kind: input, shape index: {}]   ;;  %s2244_s8 = inlined_call_operand.vmem [shape: f32[3,128], index: 8, kind: input, shape index: {}]   ;;  %s2245_s9 = inlined_call_operand.vmem [shape: f32[3,128], index: 9, kind: input, shape index: {}]   ;;  %s2246_s10 = inlined_call_operand.vmem [shape: f32[4,128], index: 10, kind: input, shape index: {}]   ;;  %s2247_s11 = inlined_call_operand.vmem [shape: f32[4,1], index: 11, kind: input, shape index: {}]   ;;  %s2248_s12 = inlined_call_operand.vmem [shape: f32[2,4,1], index: 12, kind: output, shape index: {}]  }
   0x1 LB: > { %s1448_s22 = sadd.s32 4294967295, %s1872_s21   ;;  %p1452_p0 = scmp.ge.s32.totalorder %s1872_s21, 1  ;;  %s1872_s21 = sphi %s1941_s21, %s22_s21  }
   0x2   : > { %p392_p1 = scmp.lt.s32.totalorder %s1872_s21, 3 }
   0x4   : > { %p393_p2 = pnand %p1452_p0, %p392_p1 }
   0x5   : > { %v1748_v0 = vld [vmem:[%s2237_s1 + $0xc0] sm:$0xff] (!%p393_p2)   ;;  %v1752_v4 = vld [vmem:[%s2237_s1 + $0xc8] sm:$0xff] (!%p393_p2)   ;;  %v1756_v8 = vld [vmem:[%s2237_s1 + $0xd0] sm:$0xff] (!%p393_p2)   ;;  %p448_p3 = scmp.lt.s32.totalorder (!%p393_p2), %s1448_s22, 1  ;;  %v1874_v60 = vmov (!%p393_p2), 0.0   ;;  %vm1875_vm0 = vmmov (!%p393_p2), 0  }
   0x6   : > { %396 = sbr.rel (%p393_p2) target bundleno = 728 (0x2d8), region = 68  ;;  %v1749_v1 = vld [vmem:[%s2237_s1 + $0x40] sm:$0xff] (!%p393_p2)   ;;  %1643 = vmatprep.subr.bf16.mxu0 (!%p393_p2), %v1748_v0  ;;  %v1753_v5 = vld [vmem:[%s2237_s1 + $0x48] sm:$0xff] (!%p393_p2)   ;;  %v1757_v9 = vld [vmem:[%s2237_s1 + $0x50] sm:$0xff] (!%p393_p2)   ;;  %vm1140_vm1 = vcmask (!%p393_p2), 1043456   ;;  %vm1344_vm2 = vcmask (!%p393_p2), 1040384  }
   0x7   : > { %v1750_v2 = vld [vmem:[%s2237_s1 + $0x80] sm:$0xff] (!%p393_p2)   ;;  %1665 = vmatprep.subr.bf16.mxu1 (!%p393_p2), %v1749_v1  ;;  %v1754_v6 = vld [vmem:[%s2237_s1 + $0x88] sm:$0xff] (!%p393_p2)   ;;  %v1758_v10 = vld [vmem:[%s2237_s1 + $0x90] sm:$0xff] (!%p393_p2)   ;;  %vm1346_vm3 = vcmask (!%p393_p2), 1041408   ;;  %vm1348_vm4 = vcmask (!%p393_p2), 1042432   ;;  %vm1357_vm5 = vcmask (!%p393_p2), 3072  }
   0x8   : > { %v1751_v3 = vld [vmem:[%s2237_s1] sm:$0xff] (!%p393_p2)   ;;  %1644 = vmatpush3.bf16.msra.mxu0 (!%p393_p2), %v1750_v2  ;;  %v1755_v7 = vld [vmem:[%s2237_s1 + $0x8] sm:$0xff] (!%p393_p2)   ;;  %v1759_v11 = vld [vmem:[%s2237_s1 + $0x10] sm:$0xff] (!%p393_p2)  }
   0x9   : > { %1666 = vmatpush3.bf16.msra.mxu1 (!%p393_p2), %v1751_v3  ;;  %1645 = vmatprep.subr.bf16.mxu0 (!%p393_p2), %v1752_v4  ;;  %v1760_v12 = vld [vmem:[%s2237_s1 + $0xd8] sm:$0xff] (!%p393_p2)   ;;  %v1764_v16 = vld [vmem:[%s2237_s1 + $0xe0] sm:$0xff] (!%p393_p2)   ;;  %v1768_v20 = vld [vmem:[%s2237_s1 + $0xe8] sm:$0xff] (!%p393_p2)  }
   0xa   : > { %1667 = vmatprep.subr.bf16.mxu1 (!%p393_p2), %v1753_v5  ;;  %v1761_v13 = vld [vmem:[%s2237_s1 + $0x58] sm:$0xff] (!%p393_p2)   ;;  %v1765_v17 = vld [vmem:[%s2237_s1 + $0x60] sm:$0xff] (!%p393_p2)   ;;  %v1769_v21 = vld [vmem:[%s2237_s1 + $0x68] sm:$0xff] (!%p393_p2)  }
   0xb   : > { %v1762_v14 = vld [vmem:[%s2237_s1 + $0x98] sm:$0xff] (!%p393_p2)   ;;  %v1766_v18 = vld [vmem:[%s2237_s1 + $0xa0] sm:$0xff] (!%p393_p2)   ;;  %v1770_v22 = vld [vmem:[%s2237_s1 + $0xa8] sm:$0xff] (!%p393_p2)  }
   0xc   : > { %1646 = vmatpush3.bf16.msra.mxu0 (!%p393_p2), %v1754_v6  ;;  %v1763_v15 = vld [vmem:[%s2237_s1 + $0x18] sm:$0xff] (!%p393_p2)   ;;  %v1767_v19 = vld [vmem:[%s2237_s1 + $0x20] sm:$0xff] (!%p393_p2)   ;;  %v1771_v23 = vld [vmem:[%s2237_s1 + $0x28] sm:$0xff] (!%p393_p2)  }
   0xd   : > { %1668 = vmatpush3.bf16.msra.mxu1 %v1755_v7  ;;  %1647 = vmatprep.subr.bf16.mxu0 %v1756_v8  ;;  %s2250_s22 = smov (!%p448_p3, %s1448_s22), 1  ;;  %v1772_v24 = vld [vmem:[%s2237_s1 + $0xf0] sm:$0xff]   ;;  %v1776_v28 = vld [vmem:[%s2237_s1 + $0xf8] sm:$0xff]   ;;  %v1784_v36 = vld [vmem:[%s2237_s1 + $0x140] sm:$0xff]  }
   0xe   : > { %1669 = vmatprep.subr.bf16.mxu1 %v1757_v9  ;;  %v1773_v25 = vld [vmem:[%s2237_s1 + $0x70] sm:$0xff]   ;;  %s1612_s29 = sshll.u32 %s2250_s22, 4  ;;  %v1777_v29 = vld [vmem:[%s2237_s1 + $0x78] sm:$0xff]   ;;  %v1785_v37 = vld [vmem:[%s2237_s1 + $0x100] sm:$0xff]   ;;  %s1613_s30 = sshll.u32 %s2250_s22, 5 }
   0xf   : > { %v1774_v26 = vld [vmem:[%s2237_s1 + $0xb0] sm:$0xff]   ;;  %s2049_s20 = scalar_lea.vmem %s2236_s0, %s1612_s29  ;;  %v1778_v30 = vld [vmem:[%s2237_s1 + $0xb8] sm:$0xff]   ;;  %v1786_v40 = vld [vmem:[%s2237_s1 + $0x148] sm:$0xff]   ;;  %s2139_s15 = scalar_lea.vmem %s2241_s5, %s1613_s30 }
  0x10   : > { %1648 = vmatpush3.bf16.msra.mxu0 %v1758_v10  ;;  %v1775_v27 = vld [vmem:[%s2237_s1 + $0x30] sm:$0xff]   ;;  %v1779_v31 = vld [vmem:[%s2237_s1 + $0x38] sm:$0xff]   ;;  %v506_v32 = vld [vmem:[%s2049_s20 + $0x8] sm:$0x33]  ;;  %s1614_s23 = sshll.u32 %s2250_s22, 3 }
  0x11   : > { %1670 = vmatpush3.bf16.msra.mxu1 %v1759_v11  ;;  %1649 = vmatprep.subr.bf16.mxu0 %v1760_v12  ;;  %v1494_v33 = vcombine.low %v506_v32, %v506_v32  ;;  %v1495_v34 = vcombine.high %v506_v32, %v506_v32  ;;  %v473_v35 = vld [vmem:[%s2049_s20] sm:$0x33]  ;;  %v1787_v41 = vld [vmem:[%s2237_s1 + $0x108] sm:$0xff]   ;;  %v1788_v42 = vld [vmem:[%s2237_s1 + $0x150] sm:$0xff]   ;;  %s462_s25 = scalar_lea.vmem %s2242_s6, %s1614_s23  ;;  %s467_s28 = scalar_lea.vmem %s2243_s7, %s1614_s23 }
  0x12   : > { %1671 = vmatprep.subr.bf16.mxu1 %v1761_v13  ;;  %v1512_v38 = vcombine.low %v473_v35, %v473_v35  ;;  %v1513_v39 = vcombine.high %v473_v35, %v473_v35  ;;  %v1789_v43 = vld [vmem:[%s2237_s1 + $0x110] sm:$0xff]   ;;  %v1790_v44 = vld [vmem:[%s2237_s1 + $0x158] sm:$0xff]   ;;  %v1792_v46 = vld [vmem:[%s2237_s1 + $0x160] sm:$0xff]  }
  0x13   : > { %675 = vmatprep.mubr.bf16.mxu0 %v1495_v34  ;;  %v1791_v45 = vld [vmem:[%s2237_s1 + $0x118] sm:$0xff]   ;;  %v1793_v47 = vld [vmem:[%s2237_s1 + $0x120] sm:$0xff]   ;;  %v1794_v48 = vld [vmem:[%s2237_s1 + $0x168] sm:$0xff]  }
  0x14   : > { %1650 = vmatpush3.bf16.msra.mxu0 %v1762_v14  ;;  %818 = vmatprep.mubr.bf16.mxu1 %v1513_v39  ;;  %v826_v49 = vld [vmem:[%s2049_s20] sm:$0x66]  ;;  %v1795_v51 = vld [vmem:[%s2237_s1 + $0x128] sm:$0xff]   ;;  %v1796_v52 = vld [vmem:[%s2237_s1 + $0x170] sm:$0xff]  }
  0x15   : > { %1672 = vmatpush3.bf16.msra.mxu1 %v1763_v15  ;;  %1651 = vmatprep.subr.bf16.mxu0 %v1764_v16  ;;  %v1563_v50 = vcombine.high %v826_v49, %v826_v49  ;;  %v1797_v54 = vld [vmem:[%s2237_s1 + $0x130] sm:$0xff]   ;;  %v1798_v55 = vld [vmem:[%s2237_s1 + $0x178] sm:$0xff]   ;;  %v1562_v56 = vcombine.low %v826_v49, %v826_v49  ;;  %v1802_v59 = vld [vmem:[%s2239_s3] sm:$0xff]  }
  0x16   : > { %1673 = vmatprep.subr.bf16.mxu1 %v1765_v17  ;;  %v1799_v57 = vld [vmem:[%s2237_s1 + $0x138] sm:$0xff]   ;;  %v1803_v61 = vld [vmem:[%s2239_s3 + $0x8] sm:$0xff]   ;;  %v1804_v62 = vld [vmem:[%s2239_s3 + $0x10] sm:$0xff]  }
  0x17   : > { %v866_v53 = vrot.slane %v1563_v50, 1  ;;  %v865_v58 = vrot.slane %v1562_v56, 1  ;;  %v1805_v63 = vld [vmem:[%s2239_s3 + $0x18] sm:$0xff]   ;;  %v1806_v0 = vld [vmem:[%s2239_s3 + $0x20] sm:$0xff]   ;;  %v1807_v1 = vld [vmem:[%s2239_s3 + $0x28] sm:$0xff]  }
  0x18   : > { %1652 = vmatpush3.bf16.msra.mxu0 %v1766_v18  ;;  %v1808_v2 = vld [vmem:[%s2239_s3 + $0x30] sm:$0xff]   ;;  %v1809_v3 = vld [vmem:[%s2239_s3 + $0x38] sm:$0xff]   ;;  %v1592_v32 = vld [vmem:[%s2244_s8] ss:$0 sm:$0xff] }
  0x19   : > { %1674 = vmatpush3.bf16.msra.mxu1 %v1767_v19  ;;  %1653 = vmatprep.subr.bf16.mxu0 %v1768_v20  ;;  %v1580_v19 = vld [vmem:[%s2238_s2] ss:$0 sm:$0xff] }
  0x1a   : > { %1675 = vmatprep.subr.bf16.mxu1 %v1769_v21  ;;  %v1633_v56 = vld [vmem:[%s462_s25] sm:$0xff]   ;;  %s1461_s25 = sshll.u32 %s2250_s22, 2 }
  0x1b   : > { %s471_s30 = scalar_lea.vmem %s2248_s12, %s1461_s25 }
  0x1c   : > { %1654 = vmatpush3.bf16.msra.mxu0 %v1770_v22 }
  0x1d   : > { %1676 = vmatpush3.bf16.msra.mxu1 %v1771_v23  ;;  %1655 = vmatprep.subr.bf16.mxu0 %v1772_v24 }
  0x1e   : > { %1677 = vmatprep.subr.bf16.mxu1 %v1773_v25 }
  0x20   : > { %1656 = vmatpush3.bf16.msra.mxu0 %v1774_v26 }
  0x21   : > { %1678 = vmatpush3.bf16.msra.mxu1 %v1775_v27  ;;  %1657 = vmatprep.subr.bf16.mxu0 %v1776_v28 }
  0x22   : > { %1679 = vmatprep.subr.bf16.mxu1 %v1777_v29  ;;  %v1617_v29 = vld [vmem:[%s2139_s15] sm:$0xff]  }
  0x24   : > { %1658 = vmatpush3.bf16.msra.mxu0 %v1778_v30  ;;  %v1618_v30 = vunpack.c.l.bf16 %v1617_v29 }
  0x25   : > { %1680 = vmatpush3.bf16.msra.mxu1 %v1779_v31  ;;  %1687 = vmatprep.subr.bf16.mxu0 %v1784_v36  ;;  %v1640_v31 = vld [vmem:[%s2139_s15 + $0x8] sm:$0xff]   ;;  %v1593_v36 = vld [vmem:[%s2245_s9] ss:$0 sm:$0xff] }
  0x26   : > { %1718 = vmatprep.subr.bf16.mxu1 %v1874_v60  ;;  %v1622_v34 = vunpack.c.l.bf16 %v1640_v31  ;;  %v1171_v35 = vmul.f32 %v1618_v30, %v1592_v32 }
  0x27   : > { %676 = vmatmul.mubr.bf16.vlgmr.msra.gmra.mrb[0].mxu0 %v1494_v33  ;;  %v1619_v33 = vunpack.c.h.bf16 %v1617_v29 }
  0x28   : > { %1688 = vmatpush3.bf16.msra.mxu0 %v1785_v37  ;;  %819 = vmatmul.mubr.bf16.vlgmr.msra.gmra.mrb[0].mxu1 %v1512_v38  ;;  %v1623_v37 = vunpack.c.h.bf16 %v1640_v31  ;;  %v1173_v39 = vmul.f32 %v1622_v34, %v1592_v32 }
  0x29   : > { %1689 = vmatprep.subr.bf16.mxu0 %v1786_v40  ;;  %997 = vmatprep.mubr.bf16.mxu0 %v866_v53  ;;  %v1172_v38 = vmul.f32 %v1619_v33, %v1592_v32  ;;  %v2149_v40 = vadd.f32 %v1593_v36, %v1171_v35  ;;  %v1642_v53 = vld [vmem:[%s2139_s15 + $0x18] sm:$0xff]  }
  0x2a   : > { %1719 = vmatpush3.bf16.msra.mxu1 %v1802_v59  ;;  %1734 = vmatprep.mubr.msk.bf16.mxu1 %vm1875_vm0, %v1874_v60  ;;  %v1637_v59 = vld [vmem:[%s467_s28] sm:$0xff]  }
  0x2b   : > { %1720 = vmatprep.subr.bf16.mxu1 %v1874_v60 }
  0x2c   : > { %1690 = vmatpush3.bf16.msra.mxu0 %v1787_v41  ;;  %v1174_v41 = vmul.f32 %v1623_v37, %v1592_v32 }
  0x2d   : > { %1691 = vmatprep.subr.bf16.mxu0 %v1788_v42  ;;  %v2151_v42 = vadd.f32 %v1593_v36, %v1172_v38 }
  0x2e   : > { %1721 = vmatpush3.bf16.msra.mxu1 %v1803_v61 }
  0x2f   : > { %1722 = vmatprep.subr.bf16.mxu1 %v1874_v60 }
  0x30   : > { %1692 = vmatpush3.bf16.msra.mxu0 %v1789_v43  ;;  %v1641_v43 = vld [vmem:[%s2139_s15 + $0x10] sm:$0xff]  }
  0x31   : > { %1693 = vmatprep.subr.bf16.mxu0 %v1790_v44  ;;  %v2154_v44 = vadd.f32 %v1593_v36, %v1173_v39  ;;  %v1627_v50 = vunpack.c.h.bf16 %v1641_v43 }
  0x32   : > { %1723 = vmatpush3.bf16.msra.mxu1 %v1804_v62  ;;  %v1635_v62 = vunpack.c.h.bf16 %v1633_v56 }
  0x33   : > { %1724 = vmatprep.subr.bf16.mxu1 %v1874_v60  ;;  %v1596_v49 = vmul.f32 -1.442695, %v2154_v44 }
  0x34   : > { %1694 = vmatpush3.bf16.msra.mxu0 %v1791_v45  ;;  %v1594_v45 = vmul.f32 -1.442695, %v2149_v40 }
  0x35   : > { %1695 = vmatprep.subr.bf16.mxu0 %v1792_v46  ;;  %v1626_v46 = vunpack.c.l.bf16 %v1641_v43 }
  0x36   : > { %1725 = vmatpush3.bf16.msra.mxu1 %v1805_v63 }
  0x37   : > { %1726 = vmatprep.subr.bf16.mxu1 %v1874_v60 }
  0x38   : > { %1696 = vmatpush3.bf16.msra.mxu0 %v1793_v47  ;;  %v2157_v47 = vadd.f32 %v1593_v36, %v1174_v41 }
  0x39   : > { %1697 = vmatprep.subr.bf16.mxu0 %v1794_v48  ;;  %v1595_v48 = vmul.f32 -1.442695, %v2151_v42 }
  0x3a   : > { %1727 = vmatpush3.bf16.msra.mxu1 %v1806_v0 }
  0x3b   : > { %1728 = vmatprep.subr.bf16.mxu1 %v1874_v60 }
  0x3c   : > { %1698 = vmatpush3.bf16.msra.mxu0 %v1795_v51  ;;  %v1175_v51 = vmul.f32 %v1626_v46, %v1592_v32 }
  0x3d   : > { %1699 = vmatprep.subr.bf16.mxu0 %v1796_v52  ;;  %v1597_v52 = vmul.f32 -1.442695, %v2157_v47 }
  0x3e   : > { %1729 = vmatpush3.bf16.msra.mxu1 %v1807_v1 }
  0x3f   : > { %1730 = vmatprep.subr.bf16.mxu1 %v1874_v60 }
  0x40   : > { %1700 = vmatpush3.bf16.msra.mxu0 %v1797_v54  ;;  %v1630_v54 = vunpack.c.l.bf16 %v1642_v53 }
  0x41   : > { %1701 = vmatprep.subr.bf16.mxu0 %v1798_v55  ;;  %v1176_v55 = vmul.f32 %v1627_v50, %v1592_v32 }
  0x42   : > { %1731 = vmatpush3.bf16.msra.mxu1 %v1808_v2  ;;  %v1177_v63 = vmul.f32 %v1630_v54, %v1592_v32  ;;  %v1602_v2 = vld [vmem:[%s2244_s8 + $0x1] ss:$0 sm:$0xff] }
  0x43   : > { %1732 = vmatprep.subr.bf16.mxu1 %v1874_v60  ;;  %v1634_v60 = vunpack.c.l.bf16 %v1633_v56  ;;  %v2172_v0 = vadd.f32 %v1593_v36, %v1176_v55 }
  0x44   : > { %1702 = vmatpush3.bf16.msra.mxu0 %v1799_v57  ;;  %v2170_v57 = vadd.f32 %v1593_v36, %v1175_v51 }
  0x46   : > { %1733 = vmatpush3.bf16.msra.mxu1 %v1809_v3  ;;  %v1598_v1 = vmul.f32 -1.442695, %v2170_v57  ;;  %v1638_v3 = vunpack.c.l.bf16 %v1637_v59 }
  0x47   : > { %998 = vmatmul.mubr.bf16.vlgmr.msra.gmra.mrb[4].mxu0 %v865_v58  ;;  %v1631_v58 = vunpack.c.h.bf16 %v1642_v53 }
  0xfa   : > { %v1659_v4 = vpop.f32.mrb[0].mxu0 }
  0xfb   : > { %v1660_v5 = vpop.f32.mrb[1].mxu0  ;;  %v1681_v9 = vpop.f32.mrb[0].mxu1 }
  0xfc   : > { %v1661_v6 = vadd.f32 %v1660_v5, %v1659_v4  ;;  %v1662_v7 = vpop.f32.mrb[2].mxu0  ;;  %v1682_v10 = vpop.f32.mrb[1].mxu1  ;;  %v1178_v5 = vmul.f32 %v1631_v58, %v1592_v32 }
  0xfd   : > { %v1663_v8 = vpop.f32.mrb[3].mxu0  ;;  %v1683_v11 = vadd.f32 %v1682_v10, %v1681_v9  ;;  %v1684_v12 = vpop.f32.mrb[2].mxu1  ;;  %v1606_v7 = vld [vmem:[%s2244_s8 + $0x2] ss:$0 sm:$0xff]  ;;  %v1272_v9 = vmul.f32 %v1634_v60, %v1602_v2 }
  0xfe   : > { %v1685_v13 = vpop.f32.mrb[3].mxu1  ;;  %v1599_v12 = vmul.f32 -1.442695, %v2172_v0 }
  0xff   : > { %v821_v14 = vadd.f32 %v1683_v11, %v1661_v6  ;;  %v1639_v6 = vunpack.c.h.bf16 %v1637_v59  ;;  %v2181_v11 = vadd.f32 %v1593_v36, %v1177_v63  ;;  %v1273_v13 = vmul.f32 %v1635_v62, %v1602_v2 }
 0x11a   : > { %v1703_v15 = vpop.f32.mrb[4].mxu0 }
 0x11b   : > { %v1704_v16 = vpop.f32.mrb[5].mxu0 }
 0x11c   : > { %v1705_v17 = vadd.f32 %v1704_v16, %v1703_v15  ;;  %v1706_v18 = vpop.f32.mrb[6].mxu0  ;;  %v1313_v16 = vmul.f32 %v1638_v3, %v1606_v7 }
 0x11d   : > { %v1707_v20 = vpop.f32.mrb[7].mxu0  ;;  %v2187_v18 = vadd.f32 %v1593_v36, %v1178_v5 }
 0x11e   : > { %v1005_v21 = vadd.f32 %v1705_v17, %v821_v14  ;;  %v1603_v14 = vld [vmem:[%s2245_s9 + $0x1] ss:$0 sm:$0xff]  ;;  %v1607_v20 = vld [vmem:[%s2245_s9 + $0x2] ss:$0 sm:$0xff] }
 0x120   : > { %v1013_v22 = vadd.f32 %v1580_v19, %v1005_v21  ;;  %v1314_v19 = vmul.f32 %v1639_v6, %v1606_v7 }
 0x122   : > { %v1581_v23 = vmul.f32 -1.442695, %v1013_v22 }
 0x124   : > { %1810 = vpow2.f32 %v1581_v23  ;;  %v1600_v23 = vmul.f32 -1.442695, %v2181_v11 }
 0x12e   : > { %v1811_v24 = vpop.eup %1810 }
 0x12f   : > { %v1017_v25 = vadd.f32 1.0, %v1811_v24  ;;  %v2195_v24 = vadd.f32 %v1603_v14, %v1273_v13 }
 0x131   : > { %1812 = vrcp.f32 %v1017_v25  ;;  %v1605_v30 = vmul.f32 -1.442695, %v2195_v24 }
 0x132   : > { %1814 = vpow2.f32 %v1594_v45 }
 0x133   : > { %1816 = vpow2.f32 %v1595_v48 }
 0x134   : > { %1818 = vpow2.f32 %v1596_v49 }
 0x135   : > { %1820 = vpow2.f32 %v1597_v52 }
 0x136   : > { %1822 = vpow2.f32 %v1598_v1 }
 0x13b   : > { %v1813_v26 = vpop.eup %1812 }
 0x13c   : > { %v1020_v27 = vmul.f32 %v1813_v26, %v1013_v22  ;;  %v1815_v61 = vpop.eup %1814  ;;  %v2192_v22 = vadd.f32 %v1603_v14, %v1272_v9  ;;  %v2197_v26 = vadd.f32 %v1607_v20, %v1313_v16 }
 0x13d   : > { %v1817_v4 = vpop.eup %1816  ;;  %v1216_v8 = vadd.f32 1.0, %v1815_v61 }
 0x13e   : > { %v1021_v28 = vpack.c.bf16 %v1020_v27, %v1020_v27  ;;  %v1819_v10 = vpop.eup %1818  ;;  %v1217_v15 = vadd.f32 1.0, %v1817_v4  ;;  %v1601_v27 = vmul.f32 -1.442695, %v2187_v18  ;;  %v1604_v29 = vmul.f32 -1.442695, %v2192_v22 }
 0x13f   : > { %v1821_v17 = vpop.eup %1820  ;;  %v1218_v21 = vadd.f32 1.0, %v1819_v10  ;;  %1824 = vrcp.f32 %v1216_v8  ;;  %v1608_v31 = vmul.f32 -1.442695, %v2197_v26 }
 0x140   : > { %1735 = vmatmul.mubr.bf16.vlgmr.msra.gmra.mrb[4].mxu1 %v1021_v28  ;;  %1826 = vpow2.f32 %v1599_v12  ;;  %v1219_v25 = vadd.f32 1.0, %v1821_v17  ;;  %v2200_v28 = vadd.f32 %v1607_v20, %v1314_v19  ;;  %v1823_v32 = vpop.eup %1822 }
 0x141   : > { %1828 = vrcp.f32 %v1217_v15  ;;  %v1220_v35 = vadd.f32 1.0, %v1823_v32 }
 0x142   : > { %1830 = vrcp.f32 %v1218_v21  ;;  %v1609_v33 = vmul.f32 -1.442695, %v2200_v28 }
 0x143   : > { %1832 = vpow2.f32 %v1600_v23 }
 0x144   : > { %1834 = vrcp.f32 %v1219_v25 }
 0x145   : > { %1836 = vpow2.f32 %v1601_v27 }
 0x146   : > { %1838 = vpow2.f32 %v1604_v29 }
 0x147   : > { %1840 = vpow2.f32 %v1605_v30 }
 0x148   : > { %1842 = vpow2.f32 %v1608_v31 }
 0x149   : > { %v1825_v34 = vpop.eup %1824  ;;  %1844 = vpow2.f32 %v1609_v33 }
 0x14a   : > { %v1827_v36 = vpop.eup %1826  ;;  %1846 = vrcp.f32 %v1220_v35  ;;  %v1240_v43 = vmul.f32 %v1825_v34, %v2149_v40 }
 0x14b   : > { %v1829_v37 = vpop.eup %1828  ;;  %v1221_v39 = vadd.f32 1.0, %v1827_v36 }
 0x14c   : > { %v1831_v38 = vpop.eup %1830  ;;  %v1241_v45 = vmul.f32 %v1829_v37, %v2151_v42 }
 0x14d   : > { %v1833_v41 = vpop.eup %1832  ;;  %1848 = vrcp.f32 %v1221_v39  ;;  %v1242_v52 = vmul.f32 %v1831_v38, %v2154_v44  ;;  %v1582_v44 = vld [vmem:[%s2240_s4] ss:$0 sm:$0xff] }
 0x14e   : > { %v1835_v46 = vpop.eup %1834  ;;  %v1222_v50 = vadd.f32 1.0, %v1833_v41  ;;  %v1248_v53 = vadd.f32 %v1241_v45, %v1240_v43 }
 0x14f   : > { %v1837_v48 = vpop.eup %1836  ;;  %v1243_v60 = vmul.f32 %v1835_v46, %v2157_v47 }
 0x150   : > { %v1839_v49 = vpop.eup %1838  ;;  %v1223_v55 = vadd.f32 1.0, %v1837_v48  ;;  %1850 = vrcp.f32 %v1222_v50  ;;  %v1249_v40 = vadd.f32 %v1248_v53, %v1242_v52 }
 0x151   : > { %v1841_v51 = vpop.eup %1840  ;;  %v1287_v58 = vadd.f32 1.0, %v1839_v49 }
 0x152   : > { %v1843_v54 = vpop.eup %1842  ;;  %v1288_v59 = vadd.f32 1.0, %v1841_v51  ;;  %1852 = vrcp.f32 %v1223_v55  ;;  %v1250_v1 = vadd.f32 %v1249_v40, %v1243_v60 }
 0x153   : > { %v1845_v56 = vpop.eup %1844  ;;  %v1328_v61 = vadd.f32 1.0, %v1843_v54  ;;  %1854 = vrcp.f32 %v1287_v58 }
 0x154   : > { %v1847_v42 = vpop.eup %1846  ;;  %v1329_v62 = vadd.f32 1.0, %v1845_v56  ;;  %1856 = vrcp.f32 %v1288_v59 }
 0x155   : > { %v1244_v63 = vmul.f32 %v1847_v42, %v2170_v57  ;;  %1858 = vrcp.f32 %v1328_v61 }
 0x156   : > { %1860 = vrcp.f32 %v1329_v62  ;;  %v1350_v62 = vld [vmem:[%s2246_s10] sm:$0xf] }
 0x157   : > { %v1849_v2 = vpop.eup %1848  ;;  %v1251_v7 = vadd.f32 %v1250_v1, %v1244_v63 }
 0x158   : > { %v1245_v6 = vmul.f32 %v1849_v2, %v2172_v0 }
 0x15a   : > { %v1851_v8 = vpop.eup %1850  ;;  %v1252_v57 = vadd.f32 %v1251_v7, %v1245_v6 }
 0x15b   : > { %v1246_v14 = vmul.f32 %v1851_v8, %v2181_v11 }
 0x15c   : > { %v1853_v12 = vpop.eup %1852 }
 0x15d   : > { %v1855_v13 = vpop.eup %1854  ;;  %v1247_v19 = vmul.f32 %v1853_v12, %v2187_v18  ;;  %v1253_v20 = vadd.f32 %v1252_v57, %v1246_v14 }
 0x15e   : > { %v1857_v15 = vpop.eup %1856  ;;  %v1293_v21 = vmul.f32 %v1855_v13, %v2192_v22 }
 0x15f   : > { %v1859_v16 = vpop.eup %1858  ;;  %v1294_v0 = vmul.f32 %v1857_v15, %v2195_v24  ;;  %v1254_v27 = vadd.f32 %v1253_v20, %v1247_v19 }
 0x160   : > { %v1861_v17 = vpop.eup %1860  ;;  %v1334_v23 = vmul.f32 %v1859_v16, %v2197_v26 }
 0x161   : > { %v1335_v25 = vmul.f32 %v1861_v17, %v2200_v28  ;;  %v1295_v30 = vadd.f32 %v1294_v0, %v1293_v21  ;;  %v1255_v32 = vrot.slane %v1254_v27, 4 }
 0x163   : > { %v1336_v11 = vadd.f32 %v1335_v25, %v1334_v23  ;;  %v1296_v33 = vrot.slane %v1295_v30, 4  ;;  %v1256_v35 = vadd.f32 %v1255_v32, %v1254_v27 }
 0x165   : > { %v1337_v34 = vrot.slane %v1336_v11, 4  ;;  %v1297_v18 = vadd.f32 %v1296_v33, %v1295_v30  ;;  %v1257_v37 = vrot.slane %v1256_v35, 2 }
 0x167   : > { %v1338_v36 = vadd.f32 %v1337_v34, %v1336_v11  ;;  %v1298_v22 = vrot.slane %v1297_v18, 2  ;;  %v1258_v39 = vadd.f32 %v1257_v37, %v1256_v35 }
 0x169   : > { %v1339_v24 = vrot.slane %v1338_v36, 2  ;;  %v1299_v41 = vadd.f32 %v1298_v22, %v1297_v18  ;;  %v1259_v48 = vrot.slane %v1258_v39, 1 }
 0x16b   : > { %v1340_v45 = vadd.f32 %v1339_v24, %v1338_v36  ;;  %v1300_v49 = vrot.slane %v1299_v41, 1  ;;  %v1260_v53 = vadd.f32 %v1259_v48, %v1258_v39 }
 0x16d   : > { %v1341_v51 = vrot.slane %v1340_v45, 1  ;;  %v1301_v54 = vadd.f32 %v1300_v49, %v1299_v41  ;;  %v1262_v59 = vmul.f32 0.015625, %v1260_v53 }
 0x16f   : > { %v1342_v56 = vadd.f32 %v1341_v51, %v1340_v45  ;;  %v1303_v60 = vmul.f32 0.0625, %v1301_v54 }
 0x171   : > { %v1343_v61 = vmul.f32 0.0625, %v1342_v56 }
 0x213   : > { %v1127_v3 = vpop.f32.mrb[4].mxu1 }
 0x214   : > { %v1128_v4 = vadd.f32 %v1582_v44, %v1127_v3  ;;  %v1736_v47 = vpop.f32.mrb[5].mxu1  ;;  %v1355_v3 = vld [vmem:[%s2247_s11] sm:$0xf] }
 0x215   : > { %v1130_v5 = vpop.f32.mrb[6].mxu1 }
 0x216   : > { %v1591_v9 = vmul.f32 -1.442695, %v1128_v4  ;;  %v1737_v10 = vpop.f32.mrb[7].mxu1 }
 0x218   : > { %1862 = vpow2.f32 %v1591_v9 }
 0x222   : > { %v1863_v29 = vpop.eup %1862 }
 0x223   : > { %v1136_v31 = vadd.f32 1.0, %v1863_v29 }
 0x225   : > { %1864 = vrcp.f32 %v1136_v31 }
 0x22f   : > { %v1865_v38 = vpop.eup %1864 }
 0x230   : > { %v1139_v26 = vmul.f32 %v1865_v38, %v1128_v4 }
 0x232   : > { %v1141_v28 = vsel %vm1140_vm1, %v1139_v26, 0.0 }
 0x233   : > { %v1142_v43 = vrot.slane %v1141_v28, 4 }
 0x235   : > { %v1143_v46 = vadd.f32 %v1142_v43, %v1141_v28 }
 0x237   : > { %v1144_v50 = vrot.slane %v1143_v46, 2 }
 0x239   : > { %v1145_v52 = vadd.f32 %v1144_v50, %v1143_v46 }
 0x23b   : > { %v1146_v55 = vrot.slane %v1145_v52, 1 }
 0x23d   : > { %v1147_v58 = vadd.f32 %v1146_v55, %v1145_v52 }
 0x23f   : > { %v1149_v40 = vmul.f32 0.25, %v1147_v58 }
 0x241   : > { %v1345_v42 = vsel %vm1344_vm2, %v1149_v40, %v1262_v59 }
 0x242   : > { %v1347_v44 = vsel %vm1346_vm3, %v1345_v42, %v1303_v60 }
 0x243   : > { %v1349_v63 = vsel %vm1348_vm4, %v1347_v44, %v1343_v61 }
 0x244   : > { %v1351_v1 = vmul.f32 %v1350_v62, %v1349_v63 }
 0x246   : > { %v1352_v2 = vsel %vm1140_vm1, %v1351_v1, 0.0 }
 0x247   : > { %1353 = vadd.xlane.f32.xlu0 %v1352_v2 }
 0x2d4   : > { %v1354_v4 = vpop.xlane.xlu0 %1353 }
 0x2d5   : > { %v1356_v47 = vadd.f32 %v1355_v3, %v1354_v4 }
 0x2d7   : > { %1358 = vst.msk [vmem:[%s471_s30] sm:$0xf] %vm1357_vm5, %v1356_v47 }
 0x2d8 PF: > { %s22_s21 = sadd.s32 1, %s1872_s21  }
 0x2d9   : > { %p19_p4 = scmp.ge.s32.totalorder %s22_s21, 4  }
 0x2db   :  { %21 = sbr.rel (!%p19_p4) target bundleno = 1 (0x1), region = 109 }

</bundles_post_ra>
